<compile_context>
chip_gen: v7x
topology: tpu7x:2x2x1
jax: 0.10.0
libtpu: 0.0.40
codegen_flags: <defaults>
</compile_context>

<pallas_src>
import functools

import numpy as np
import jax
import jax.numpy as jnp
from jax import lax
from jax.experimental import pallas as pl
from jax.experimental.pallas import tpu as pltpu

_BN_EPS = 1e-5
_LANE = 128
_SLACK = 8          # zero slack rows at the front/back of the flat halo buffer


def _round_up(x, m):
    return (x + m - 1) // m * m


# ----------------------------- Pallas kernel --------------------------------

def _carb_fused_kernel(x_ref, mask_ref, w1_ref, t1_ref, w2_ref, t2_ref,
                       w3_ref, t3_ref, out_ref, y1p_ref, zp_ref, res_ref,
                       acc_ref, *, H, W, Wp):
    """One batch element per grid step, flat haloed layout.

    Flat haloed indexing: image pixel (i, j) lives at flat row
    _SLACK + (i+1)*Wp + (j+1)  (1-pixel zero halo, right-pad to Wp columns,
    _SLACK zero rows of slack front and back).

    x_ref   : (1, HP, CinP)  bf16  input, already in the flat haloed layout
    mask_ref: (HP, 1)        f32   1.0 at valid interior positions, else 0.0
    w1_ref  : (CinP, Cp)     bf16  1x1 conv weight, BN1 scale folded in
    t1_ref  : (1, Cp)        f32   BN1 shift (conv bias folded in)
    w2_ref  : (9, Cp, Cp)    bf16  3x3 conv #1 weight (ky*3+kx major), BN2 folded
    w3_ref  : (9, Cp, Cp)    bf16  3x3 conv #2 weight, BN3 folded
    out_ref : (1, H*Wp, Cp)  bf16  output, flat layout (rows 1..H, all cols)
    y1p_ref : (HP, Cp)       bf16  haloed y1 scratch
    zp_ref  : (HP, Cp)       bf16  haloed z scratch
    res_ref : (H*Wp, Cp)     f32   y1 residual at full precision
    acc_ref : (H*Wp, Cp)     f32   conv accumulator
    """
    HP = y1p_ref.shape[0]
    Cp = out_ref.shape[-1]
    L = H * Wp
    base = _SLACK + Wp                       # flat row of haloed (row=1, col=0)

    mask_full = mask_ref[...]                # (HP, 1)
    mask_win = mask_full[base:base + L, :]   # (L, 1)  same mask on the window

    # Re-zero only zp's small border slabs every step (its interior window is
    # fully overwritten below; y1p gets one full masked store, so no zeroing).
    zp_ref[pl.ds(0, base), :] = jnp.zeros((base, Cp), zp_ref.dtype)
    zp_ref[pl.ds(base + L, HP - base - L), :] = jnp.zeros(
        (HP - base - L, Cp), zp_ref.dtype)

    # ---- Stage 1: sideout 1x1 conv (+bias) + BN1 (scale folded into w1). ---
    y1 = jnp.dot(x_ref[0], w1_ref[...], preferred_element_type=jnp.float32)
    y1 = (y1 + t1_ref[...]) * mask_full          # halo/pad positions -> 0
    y1p_ref[...] = y1.astype(y1p_ref.dtype)      # one dense, full bf16 store
    res_ref[...] = y1[base:base + L, :]          # f32 residual for stage 3

    # ---- Flat-shift im2col 3x3 conv: 9 shifted windows, MXU matmuls, f32
    # ---- accumulation into a VMEM scratch. Zero halo makes the shift exact.
    def conv3x3(src_ref, w_ref):
        for k in range(9):
            ky, kx = divmod(k, 3)
            start = base + (ky - 1) * Wp + (kx - 1)        # static Python int
            patch = src_ref[pl.ds(start, L), :]            # (L, Cp) bf16
            d = jnp.dot(patch, w_ref[k], preferred_element_type=jnp.float32)
            if k == 0:
                acc_ref[...] = d
            else:
                acc_ref[...] += d
        return acc_ref[...]

    # ---- Stage 2: 3x3 conv + BN2 + ReLU (masked so zp's halo stays zero). --
    z = jnp.maximum(conv3x3(y1p_ref, w2_ref) + t2_ref[...], 0.0) * mask_win
    zp_ref[pl.ds(base, L), :] = z.astype(zp_ref.dtype)

    # ---- Stage 3: 3x3 conv + BN3 + identity shortcut (y1) + ReLU. ----------
    r = conv3x3(zp_ref, w3_ref) + t3_ref[...] + res_ref[...]
    out_ref[0] = jnp.maximum(r, 0.0).astype(out_ref.dtype)


# ------------------------------ JAX wrapper ----------------------------------

def _fold_bn(bn, bias=None):
    scale = bn["gamma"] / jnp.sqrt(bn["var"] + _BN_EPS)
    b = bias if bias is not None else 0.0
    shift = (b - bn["mean"]) * scale + bn["beta"]
    return scale, shift


def carb_block_forward(x_nchw, params):
    n, cin, h, w = x_nchw.shape
    cout = params["w1"].shape[0]
    cinp = _round_up(cin, _LANE)
    cp = _round_up(cout, _LANE)
    wp = _round_up(w + 2, 8)
    hp = (h + 2) * wp + 2 * _SLACK
    L = h * wp
    base = _SLACK + wp

    # NCHW -> NHWC -> flat haloed layout (N, HP, CinP): 1-pixel zero halo,
    # right-pad each padded row to Wp, channel-pad to the lane width, 8 zero
    # slack rows front/back, bf16.  This lets stage 1 write y1 with a single
    # dense store (no in-kernel scatter).
    x = jnp.transpose(x_nchw, (0, 2, 3, 1))
    x = jnp.pad(x, ((0, 0), (1, 1), (1, wp - w - 1), (0, cinp - cin)))
    x = x.reshape(n, (h + 2) * wp, cinp)
    x = jnp.pad(x, ((0, 0), (_SLACK, _SLACK), (0, 0))).astype(jnp.bfloat16)

    # Interior-validity mask over flat haloed rows (host-side constant so no
    # in-kernel integer div/mod is needed).
    pos = np.arange(hp)
    col = (pos - _SLACK) % wp
    valid = (pos >= base) & (pos < base + L) & (col >= 1) & (col <= w)
    mask = jnp.asarray(valid.astype(np.float32)[:, None])           # (HP, 1)

    # 1x1 conv weight: fold BN1 scale, pad channels, cast to bf16.
    s1, t1 = _fold_bn(params["bn1"], bias=params["b1"])
    w1 = params["w1"][:, :, 0, 0].T * s1[None, :]                   # (Cin, Cout)
    w1 = jnp.pad(w1, ((0, cinp - cin), (0, cp - cout))).astype(jnp.bfloat16)
    t1 = jnp.pad(t1, (0, cp - cout)).reshape(1, cp).astype(jnp.float32)

    # 3x3 conv weights: (Cout,Cin,3,3) -> (9, Cin, Cout) in (ky,kx)-major
    # order, fold BN scale, zero-pad channels, bf16.
    def prep3x3(w_oihw, bnp):
        s, t = _fold_bn(bnp)
        wf = jnp.transpose(w_oihw, (2, 3, 1, 0)).reshape(9, cout, cout)
        wf = wf * s[None, None, :]
        wf = jnp.pad(wf, ((0, 0), (0, cp - cout), (0, cp - cout)))
        tf = jnp.pad(t, (0, cp - cout)).reshape(1, cp)
        return wf.astype(jnp.bfloat16), tf.astype(jnp.float32)

    w2, t2 = prep3x3(params["w2"], params["bn2"])
    w3, t3 = prep3x3(params["w3"], params["bn3"])

    kern = functools.partial(_carb_fused_kernel, H=h, W=w, Wp=wp)

    flops = 2 * n * (hp * cinp * cp + 18 * L * cp * cp)
    bytes_accessed = (n * hp * cinp * 2 + hp * 4
                      + (cinp * cp + 18 * cp * cp) * 2 + 3 * cp * 4
                      + n * L * cp * 2)

    out = pl.pallas_call(
        kern,
        out_shape=jax.ShapeDtypeStruct((n, L, cp), jnp.bfloat16),
        grid_spec=pltpu.PrefetchScalarGridSpec(
            num_scalar_prefetch=0,
            grid=(n,),
            in_specs=[
                pl.BlockSpec((1, hp, cinp), lambda i: (i, 0, 0)),   # x
                pl.BlockSpec((hp, 1), lambda i: (0, 0)),            # mask
                pl.BlockSpec((cinp, cp), lambda i: (0, 0)),         # w1
                pl.BlockSpec((1, cp), lambda i: (0, 0)),            # t1
                pl.BlockSpec((9, cp, cp), lambda i: (0, 0, 0)),     # w2
                pl.BlockSpec((1, cp), lambda i: (0, 0)),            # t2
                pl.BlockSpec((9, cp, cp), lambda i: (0, 0, 0)),     # w3
                pl.BlockSpec((1, cp), lambda i: (0, 0)),            # t3
            ],
            out_specs=pl.BlockSpec((1, L, cp), lambda i: (i, 0, 0)),
            scratch_shapes=[
                pltpu.VMEM((hp, cp), jnp.bfloat16),   # y1 (haloed, flat)
                pltpu.VMEM((hp, cp), jnp.bfloat16),   # z  (haloed, flat)
                pltpu.VMEM((L, cp), jnp.float32),     # y1 residual (f32)
                pltpu.VMEM((L, cp), jnp.float32),     # conv accumulator
            ],
        ),
        compiler_params=pltpu.CompilerParams(
            dimension_semantics=("parallel",),
            vmem_limit_bytes=48 * 1024 * 1024),
        cost_estimate=pl.CostEstimate(
            flops=flops, transcendentals=0, bytes_accessed=bytes_accessed),
    )(x, mask, w1, t1, w2, t2, w3, t3)

    # Flat layout -> NCHW; drop halo/pad columns and padded channels.
    out = out.reshape(n, h, wp, cp)[:, :, 1:w + 1, :cout].astype(jnp.float32)
    return jnp.transpose(out, (0, 3, 1, 2))


# -------------------------- references (plain JAX) ---------------------------

def _conv_nchw(a, w_, pad):
    return lax.conv_general_dilated(
        a, w_, (1, 1), [(pad, pad), (pad, pad)],
        dimension_numbers=("NCHW", "OIHW", "NCHW"),
        precision=lax.Precision.HIGHEST)


def _ref_forward_f32(x, params):
    """Original-module semantics, full f32 (eval-mode BN)."""
    def bn_apply(y, bnp, bias=None):
        s, t = _fold_bn(bnp, bias)
        return y * s[None, :, None, None] + t[None, :, None, None]

    y1 = bn_apply(_conv_nchw(x, params["w1"], 0), params["bn1"], params["b1"])
    z = jnp.maximum(bn_apply(_conv_nchw(y1, params["w2"], 1), params["bn2"]), 0.0)
    r = bn_apply(_conv_nchw(z, params["w3"], 1), params["bn3"])
    return jnp.maximum(r + y1, 0.0)


def _ref_forward_matched(x, params):
    """Same math as the Pallas kernel: bf16 matmul inputs, f32 accumulation,
    BN scale folded into the weights, f32 residual."""
    bf = lambda a: a.astype(jnp.bfloat16).astype(jnp.float32)

    s1, t1 = _fold_bn(params["bn1"], bias=params["b1"])
    w1f = bf(params["w1"] * s1[:, None, None, None])
    y1 = _conv_nchw(bf(x), w1f, 0) + t1[None, :, None, None]

    s2, t2 = _fold_bn(params["bn2"])
    w2f = bf(params["w2"] * s2[:, None, None, None])
    z = jnp.maximum(_conv_nchw(bf(y1), w2f, 1) + t2[None, :, None, None], 0.0)

    s3, t3 = _fold_bn(params["bn3"])
    w3f = bf(params["w3"] * s3[:, None, None, None])
    r = _conv_nchw(bf(z), w3f, 1) + t3[None, :, None, None]
    return jnp.maximum(r + y1, 0.0)


# ------------------------------ param init -----------------------------------

def init_params(key, cin, cout):
    ks = jax.random.split(key, 7)

    def bn(k):
        k1, k2, k3, k4 = jax.random.split(k, 4)
        return dict(
            gamma=jax.random.uniform(k1, (cout,), minval=0.5, maxval=1.5),
            beta=0.1 * jax.random.normal(k2, (cout,)),
            mean=0.1 * jax.random.normal(k3, (cout,)),
            var=jax.random.uniform(k4, (cout,), minval=0.5, maxval=1.5),
        )

    return dict(
        w1=0.2 * jax.random.normal(ks[0], (cout, cin, 1, 1)),
        b1=0.1 * jax.random.normal(ks[1], (cout,)),
        bn1=bn(ks[2]),
        w2=0.1 * jax.random.normal(ks[3], (cout, cout, 3, 3)),
        bn2=bn(ks[4]),
        w3=0.1 * jax.random.normal(ks[5], (cout, cout, 3, 3)),
        bn3=bn(ks[6]),
    )


if __name__ == "__main__":
    key = jax.random.PRNGKey(0)
    k_x, k_p = jax.random.split(key)

    input_channels, output_channels = 4, 8
    x = jax.random.normal(k_x, (2, input_channels, 16, 16), dtype=jnp.float32)
    params = init_params(k_p, input_channels, output_channels)

    out = jax.block_until_ready(jax.jit(carb_block_forward)(x, params))
    assert out.shape == (2, output_channels, 16, 16)

    # Strict check against a precision-matched reference (bf16 matmul inputs,
    # f32 accumulation, bf16 final writeback), then a looser semantic check
    # against the pure-f32 original-module reference.
    ref_matched = jax.block_until_ready(_ref_forward_matched(x, params))
    ref_f32 = jax.block_until_ready(_ref_forward_f32(x, params))

    assert jnp.allclose(out, ref_matched, atol=2e-2, rtol=2e-2), \
        "mismatch vs precision-matched reference"
    assert jnp.allclose(out, ref_f32, atol=7e-2, rtol=7e-2), \
        "mismatch vs f32 reference"

    print("KERNEL_OK")
</pallas_src>

<mosaic_0001>
module attributes {stable_mosaic.version = 11 : i64} {
  func.func @_carb_fused_kernel(%arg0: i32, %arg1: memref<1x448x128xbf16, #tpu.memory_space<vmem>>, %arg2: memref<448x1xf32, #tpu.memory_space<vmem>>, %arg3: memref<128x128xbf16, #tpu.memory_space<vmem>>, %arg4: memref<1x128xf32, #tpu.memory_space<vmem>>, %arg5: memref<9x128x128xbf16, #tpu.memory_space<vmem>>, %arg6: memref<1x128xf32, #tpu.memory_space<vmem>>, %arg7: memref<9x128x128xbf16, #tpu.memory_space<vmem>>, %arg8: memref<1x128xf32, #tpu.memory_space<vmem>>, %arg9: memref<1x384x128xbf16, #tpu.memory_space<vmem>>, %arg10: memref<448x128xbf16, #tpu.memory_space<vmem>>, %arg11: memref<448x128xbf16, #tpu.memory_space<vmem>>, %arg12: memref<384x128xf32, #tpu.memory_space<vmem>>, %arg13: memref<384x128xf32, #tpu.memory_space<vmem>>) attributes {dimension_semantics = [#tpu.dimension_semantics<parallel>], iteration_bounds = array<i64: 2>, scalar_prefetch = 0 : i64, scratch_operands = 4 : i64, tpu.core_type = #tpu.core_type<tc>, window_params = [{transform_indices = @transform_0, window_bounds = array<i64: 1, 448, 128>}, {pipeline_mode = #tpu.pipeline_mode<synchronous>, transform_indices = @transform_1, window_bounds = array<i64: 448, 1>}, {pipeline_mode = #tpu.pipeline_mode<synchronous>, transform_indices = @transform_2, window_bounds = array<i64: 128, 128>}, {pipeline_mode = #tpu.pipeline_mode<synchronous>, transform_indices = @transform_3, window_bounds = array<i64: 1, 128>}, {pipeline_mode = #tpu.pipeline_mode<synchronous>, transform_indices = @transform_4, window_bounds = array<i64: 9, 128, 128>}, {pipeline_mode = #tpu.pipeline_mode<synchronous>, transform_indices = @transform_5, window_bounds = array<i64: 1, 128>}, {pipeline_mode = #tpu.pipeline_mode<synchronous>, transform_indices = @transform_6, window_bounds = array<i64: 9, 128, 128>}, {pipeline_mode = #tpu.pipeline_mode<synchronous>, transform_indices = @transform_7, window_bounds = array<i64: 1, 128>}, {transform_indices = @transform_8, window_bounds = array<i64: 1, 384, 128>}]} {
    %c0 = arith.constant 0 : index
    %c0_0 = arith.constant 0 : index
    %0 = vector.load %arg2[%c0, %c0_0] : memref<448x1xf32, #tpu.memory_space<vmem>>, vector<448x1xf32>
    %1 = vector.extract_strided_slice %0 {offsets = [32, 0], sizes = [384, 1], strides = [1, 1]} : vector<448x1xf32> to vector<384x1xf32>
    %cst = arith.constant 0.000000e+00 : bf16
    %2 = vector.broadcast %cst : bf16 to vector<32x128xbf16>
    %c0_1 = arith.constant 0 : index
    %c0_2 = arith.constant 0 : index
    %3 = vector.load %arg11[%c0_1, %c0_2] : memref<448x128xbf16, #tpu.memory_space<vmem>>, vector<32x128xbf16>
    tpu.vector_store %arg11[%c0_1, %c0_2], %2 {strides = array<i32>} : memref<448x128xbf16, #tpu.memory_space<vmem>>, vector<32x128xbf16>,
    %cst_3 = arith.constant 0.000000e+00 : bf16
    %4 = vector.broadcast %cst_3 : bf16 to vector<32x128xbf16>
    %c416 = arith.constant 416 : index
    %c0_4 = arith.constant 0 : index
    %5 = vector.load %arg11[%c416, %c0_4] : memref<448x128xbf16, #tpu.memory_space<vmem>>, vector<32x128xbf16>
    tpu.vector_store %arg11[%c416, %c0_4], %4 {strides = array<i32>} : memref<448x128xbf16, #tpu.memory_space<vmem>>, vector<32x128xbf16>,
    %c0_5 = arith.constant 0 : index
    %c0_6 = arith.constant 0 : index
    %c0_7 = arith.constant 0 : index
    %6 = vector.load %arg1[%c0_5, %c0_6, %c0_7] : memref<1x448x128xbf16, #tpu.memory_space<vmem>>, vector<1x448x128xbf16>
    %7 = vector.shape_cast %6 : vector<1x448x128xbf16> to vector<448x128xbf16>
    %c0_8 = arith.constant 0 : index
    %c0_9 = arith.constant 0 : index
    %8 = vector.load %arg3[%c0_8, %c0_9] : memref<128x128xbf16, #tpu.memory_space<vmem>>, vector<128x128xbf16>
    %cst_10 = arith.constant dense<0.000000e+00> : vector<448x128xf32>
    %9 = tpu.matmul %7, %8, %cst_10 {dimension_numbers = #tpu.dot_dimension_numbers<[1], [0], [0], [1], [0, 0, 1, 1], [], []>} : vector<448x128xbf16>, vector<128x128xbf16>, vector<448x128xf32> -> vector<448x128xf32>
    %c0_11 = arith.constant 0 : index
    %c0_12 = arith.constant 0 : index
    %10 = vector.load %arg4[%c0_11, %c0_12] : memref<1x128xf32, #tpu.memory_space<vmem>>, vector<1x128xf32>
    %11 = vector.broadcast %10 : vector<1x128xf32> to vector<448x128xf32>
    %12 = arith.addf %9, %11 : vector<448x128xf32>
    %13 = vector.broadcast %0 : vector<448x1xf32> to vector<448x128xf32>
    %14 = arith.mulf %12, %13 : vector<448x128xf32>
    %15 = arith.truncf %14 : vector<448x128xf32> to vector<448x128xbf16>
    %c0_13 = arith.constant 0 : index
    %c0_14 = arith.constant 0 : index
    %16 = vector.load %arg10[%c0_13, %c0_14] : memref<448x128xbf16, #tpu.memory_space<vmem>>, vector<448x128xbf16>
    tpu.vector_store %arg10[%c0_13, %c0_14], %15 {strides = array<i32>} : memref<448x128xbf16, #tpu.memory_space<vmem>>, vector<448x128xbf16>,
    %17 = vector.extract_strided_slice %14 {offsets = [32, 0], sizes = [384, 128], strides = [1, 1]} : vector<448x128xf32> to vector<384x128xf32>
    %c0_15 = arith.constant 0 : index
    %c0_16 = arith.constant 0 : index
    %18 = vector.load %arg12[%c0_15, %c0_16] : memref<384x128xf32, #tpu.memory_space<vmem>>, vector<384x128xf32>
    tpu.vector_store %arg12[%c0_15, %c0_16], %17 {strides = array<i32>} : memref<384x128xf32, #tpu.memory_space<vmem>>, vector<384x128xf32>,
    %c7 = arith.constant 7 : index
    %c0_17 = arith.constant 0 : index
    %19 = vector.load %arg10[%c7, %c0_17] : memref<448x128xbf16, #tpu.memory_space<vmem>>, vector<384x128xbf16>
    %c0_18 = arith.constant 0 : index
    %c0_19 = arith.constant 0 : index
    %c0_20 = arith.constant 0 : index
    %20 = vector.load %arg5[%c0_18, %c0_19, %c0_20] : memref<9x128x128xbf16, #tpu.memory_space<vmem>>, vector<1x128x128xbf16>
    %21 = vector.shape_cast %20 : vector<1x128x128xbf16> to vector<128x128xbf16>
    %cst_21 = arith.constant dense<0.000000e+00> : vector<384x128xf32>
    %22 = tpu.matmul %19, %21, %cst_21 {dimension_numbers = #tpu.dot_dimension_numbers<[1], [0], [0], [1], [0, 0, 1, 1], [], []>} : vector<384x128xbf16>, vector<128x128xbf16>, vector<384x128xf32> -> vector<384x128xf32>
    %c0_22 = arith.constant 0 : index
    %c0_23 = arith.constant 0 : index
    %23 = vector.load %arg13[%c0_22, %c0_23] : memref<384x128xf32, #tpu.memory_space<vmem>>, vector<384x128xf32>
    tpu.vector_store %arg13[%c0_22, %c0_23], %22 {strides = array<i32>} : memref<384x128xf32, #tpu.memory_space<vmem>>, vector<384x128xf32>,
    %c8 = arith.constant 8 : index
    %c0_24 = arith.constant 0 : index
    %24 = vector.load %arg10[%c8, %c0_24] : memref<448x128xbf16, #tpu.memory_space<vmem>>, vector<384x128xbf16>
    %c1 = arith.constant 1 : index
    %c0_25 = arith.constant 0 : index
    %c0_26 = arith.constant 0 : index
    %25 = vector.load %arg5[%c1, %c0_25, %c0_26] : memref<9x128x128xbf16, #tpu.memory_space<vmem>>, vector<1x128x128xbf16>
    %26 = vector.shape_cast %25 : vector<1x128x128xbf16> to vector<128x128xbf16>
    %cst_27 = arith.constant dense<0.000000e+00> : vector<384x128xf32>
    %27 = tpu.matmul %24, %26, %cst_27 {dimension_numbers = #tpu.dot_dimension_numbers<[1], [0], [0], [1], [0, 0, 1, 1], [], []>} : vector<384x128xbf16>, vector<128x128xbf16>, vector<384x128xf32> -> vector<384x128xf32>
    %c0_28 = arith.constant 0 : index
    %c0_29 = arith.constant 0 : index
    %28 = vector.load %arg13[%c0_28, %c0_29] : memref<384x128xf32, #tpu.memory_space<vmem>>, vector<384x128xf32>
    %29 = arith.addf %28, %27 : vector<384x128xf32>
    %c0_30 = arith.constant 0 : index
    %c0_31 = arith.constant 0 : index
    %30 = vector.load %arg13[%c0_30, %c0_31] : memref<384x128xf32, #tpu.memory_space<vmem>>, vector<384x128xf32>
    tpu.vector_store %arg13[%c0_30, %c0_31], %29 {strides = array<i32>} : memref<384x128xf32, #tpu.memory_space<vmem>>, vector<384x128xf32>,
    %c9 = arith.constant 9 : index
    %c0_32 = arith.constant 0 : index
    %31 = vector.load %arg10[%c9, %c0_32] : memref<448x128xbf16, #tpu.memory_space<vmem>>, vector<384x128xbf16>
    %c2 = arith.constant 2 : index
    %c0_33 = arith.constant 0 : index
    %c0_34 = arith.constant 0 : index
    %32 = vector.load %arg5[%c2, %c0_33, %c0_34] : memref<9x128x128xbf16, #tpu.memory_space<vmem>>, vector<1x128x128xbf16>
    %33 = vector.shape_cast %32 : vector<1x128x128xbf16> to vector<128x128xbf16>
    %cst_35 = arith.constant dense<0.000000e+00> : vector<384x128xf32>
    %34 = tpu.matmul %31, %33, %cst_35 {dimension_numbers = #tpu.dot_dimension_numbers<[1], [0], [0], [1], [0, 0, 1, 1], [], []>} : vector<384x128xbf16>, vector<128x128xbf16>, vector<384x128xf32> -> vector<384x128xf32>
    %c0_36 = arith.constant 0 : index
    %c0_37 = arith.constant 0 : index
    %35 = vector.load %arg13[%c0_36, %c0_37] : memref<384x128xf32, #tpu.memory_space<vmem>>, vector<384x128xf32>
    %36 = arith.addf %35, %34 : vector<384x128xf32>
    %c0_38 = arith.constant 0 : index
    %c0_39 = arith.constant 0 : index
    %37 = vector.load %arg13[%c0_38, %c0_39] : memref<384x128xf32, #tpu.memory_space<vmem>>, vector<384x128xf32>
    tpu.vector_store %arg13[%c0_38, %c0_39], %36 {strides = array<i32>} : memref<384x128xf32, #tpu.memory_space<vmem>>, vector<384x128xf32>,
    %c31 = arith.constant 31 : index
    %c0_40 = arith.constant 0 : index
    %38 = vector.load %arg10[%c31, %c0_40] : memref<448x128xbf16, #tpu.memory_space<vmem>>, vector<384x128xbf16>
    %c3 = arith.constant 3 : index
    %c0_41 = arith.constant 0 : index
    %c0_42 = arith.constant 0 : index
    %39 = vector.load %arg5[%c3, %c0_41, %c0_42] : memref<9x128x128xbf16, #tpu.memory_space<vmem>>, vector<1x128x128xbf16>
    %40 = vector.shape_cast %39 : vector<1x128x128xbf16> to vector<128x128xbf16>
    %cst_43 = arith.constant dense<0.000000e+00> : vector<384x128xf32>
    %41 = tpu.matmul %38, %40, %cst_43 {dimension_numbers = #tpu.dot_dimension_numbers<[1], [0], [0], [1], [0, 0, 1, 1], [], []>} : vector<384x128xbf16>, vector<128x128xbf16>, vector<384x128xf32> -> vector<384x128xf32>
    %c0_44 = arith.constant 0 : index
    %c0_45 = arith.constant 0 : index
    %42 = vector.load %arg13[%c0_44, %c0_45] : memref<384x128xf32, #tpu.memory_space<vmem>>, vector<384x128xf32>
    %43 = arith.addf %42, %41 : vector<384x128xf32>
    %c0_46 = arith.constant 0 : index
    %c0_47 = arith.constant 0 : index
    %44 = vector.load %arg13[%c0_46, %c0_47] : memref<384x128xf32, #tpu.memory_space<vmem>>, vector<384x128xf32>
    tpu.vector_store %arg13[%c0_46, %c0_47], %43 {strides = array<i32>} : memref<384x128xf32, #tpu.memory_space<vmem>>, vector<384x128xf32>,
    %c32 = arith.constant 32 : index
    %c0_48 = arith.constant 0 : index
    %45 = vector.load %arg10[%c32, %c0_48] : memref<448x128xbf16, #tpu.memory_space<vmem>>, vector<384x128xbf16>
    %c4 = arith.constant 4 : index
    %c0_49 = arith.constant 0 : index
    %c0_50 = arith.constant 0 : index
    %46 = vector.load %arg5[%c4, %c0_49, %c0_50] : memref<9x128x128xbf16, #tpu.memory_space<vmem>>, vector<1x128x128xbf16>
    %47 = vector.shape_cast %46 : vector<1x128x128xbf16> to vector<128x128xbf16>
    %cst_51 = arith.constant dense<0.000000e+00> : vector<384x128xf32>
    %48 = tpu.matmul %45, %47, %cst_51 {dimension_numbers = #tpu.dot_dimension_numbers<[1], [0], [0], [1], [0, 0, 1, 1], [], []>} : vector<384x128xbf16>, vector<128x128xbf16>, vector<384x128xf32> -> vector<384x128xf32>
    %c0_52 = arith.constant 0 : index
    %c0_53 = arith.constant 0 : index
    %49 = vector.load %arg13[%c0_52, %c0_53] : memref<384x128xf32, #tpu.memory_space<vmem>>, vector<384x128xf32>
    %50 = arith.addf %49, %48 : vector<384x128xf32>
    %c0_54 = arith.constant 0 : index
    %c0_55 = arith.constant 0 : index
    %51 = vector.load %arg13[%c0_54, %c0_55] : memref<384x128xf32, #tpu.memory_space<vmem>>, vector<384x128xf32>
    tpu.vector_store %arg13[%c0_54, %c0_55], %50 {strides = array<i32>} : memref<384x128xf32, #tpu.memory_space<vmem>>, vector<384x128xf32>,
    %c33 = arith.constant 33 : index
    %c0_56 = arith.constant 0 : index
    %52 = vector.load %arg10[%c33, %c0_56] : memref<448x128xbf16, #tpu.memory_space<vmem>>, vector<384x128xbf16>
    %c5 = arith.constant 5 : index
    %c0_57 = arith.constant 0 : index
    %c0_58 = arith.constant 0 : index
    %53 = vector.load %arg5[%c5, %c0_57, %c0_58] : memref<9x128x128xbf16, #tpu.memory_space<vmem>>, vector<1x128x128xbf16>
    %54 = vector.shape_cast %53 : vector<1x128x128xbf16> to vector<128x128xbf16>
    %cst_59 = arith.constant dense<0.000000e+00> : vector<384x128xf32>
    %55 = tpu.matmul %52, %54, %cst_59 {dimension_numbers = #tpu.dot_dimension_numbers<[1], [0], [0], [1], [0, 0, 1, 1], [], []>} : vector<384x128xbf16>, vector<128x128xbf16>, vector<384x128xf32> -> vector<384x128xf32>
    %c0_60 = arith.constant 0 : index
    %c0_61 = arith.constant 0 : index
    %56 = vector.load %arg13[%c0_60, %c0_61] : memref<384x128xf32, #tpu.memory_space<vmem>>, vector<384x128xf32>
    %57 = arith.addf %56, %55 : vector<384x128xf32>
    %c0_62 = arith.constant 0 : index
    %c0_63 = arith.constant 0 : index
    %58 = vector.load %arg13[%c0_62, %c0_63] : memref<384x128xf32, #tpu.memory_space<vmem>>, vector<384x128xf32>
    tpu.vector_store %arg13[%c0_62, %c0_63], %57 {strides = array<i32>} : memref<384x128xf32, #tpu.memory_space<vmem>>, vector<384x128xf32>,
    %c55 = arith.constant 55 : index
    %c0_64 = arith.constant 0 : index
    %59 = vector.load %arg10[%c55, %c0_64] : memref<448x128xbf16, #tpu.memory_space<vmem>>, vector<384x128xbf16>
    %c6 = arith.constant 6 : index
    %c0_65 = arith.constant 0 : index
    %c0_66 = arith.constant 0 : index
    %60 = vector.load %arg5[%c6, %c0_65, %c0_66] : memref<9x128x128xbf16, #tpu.memory_space<vmem>>, vector<1x128x128xbf16>
    %61 = vector.shape_cast %60 : vector<1x128x128xbf16> to vector<128x128xbf16>
    %cst_67 = arith.constant dense<0.000000e+00> : vector<384x128xf32>
    %62 = tpu.matmul %59, %61, %cst_67 {dimension_numbers = #tpu.dot_dimension_numbers<[1], [0], [0], [1], [0, 0, 1, 1], [], []>} : vector<384x128xbf16>, vector<128x128xbf16>, vector<384x128xf32> -> vector<384x128xf32>
    %c0_68 = arith.constant 0 : index
    %c0_69 = arith.constant 0 : index
    %63 = vector.load %arg13[%c0_68, %c0_69] : memref<384x128xf32, #tpu.memory_space<vmem>>, vector<384x128xf32>
    %64 = arith.addf %63, %62 : vector<384x128xf32>
    %c0_70 = arith.constant 0 : index
    %c0_71 = arith.constant 0 : index
    %65 = vector.load %arg13[%c0_70, %c0_71] : memref<384x128xf32, #tpu.memory_space<vmem>>, vector<384x128xf32>
    tpu.vector_store %arg13[%c0_70, %c0_71], %64 {strides = array<i32>} : memref<384x128xf32, #tpu.memory_space<vmem>>, vector<384x128xf32>,
    %c56 = arith.constant 56 : index
    %c0_72 = arith.constant 0 : index
    %66 = vector.load %arg10[%c56, %c0_72] : memref<448x128xbf16, #tpu.memory_space<vmem>>, vector<384x128xbf16>
    %c7_73 = arith.constant 7 : index
    %c0_74 = arith.constant 0 : index
    %c0_75 = arith.constant 0 : index
    %67 = vector.load %arg5[%c7_73, %c0_74, %c0_75] : memref<9x128x128xbf16, #tpu.memory_space<vmem>>, vector<1x128x128xbf16>
    %68 = vector.shape_cast %67 : vector<1x128x128xbf16> to vector<128x128xbf16>
    %cst_76 = arith.constant dense<0.000000e+00> : vector<384x128xf32>
    %69 = tpu.matmul %66, %68, %cst_76 {dimension_numbers = #tpu.dot_dimension_numbers<[1], [0], [0], [1], [0, 0, 1, 1], [], []>} : vector<384x128xbf16>, vector<128x128xbf16>, vector<384x128xf32> -> vector<384x128xf32>
    %c0_77 = arith.constant 0 : index
    %c0_78 = arith.constant 0 : index
    %70 = vector.load %arg13[%c0_77, %c0_78] : memref<384x128xf32, #tpu.memory_space<vmem>>, vector<384x128xf32>
    %71 = arith.addf %70, %69 : vector<384x128xf32>
    %c0_79 = arith.constant 0 : index
    %c0_80 = arith.constant 0 : index
    %72 = vector.load %arg13[%c0_79, %c0_80] : memref<384x128xf32, #tpu.memory_space<vmem>>, vector<384x128xf32>
    tpu.vector_store %arg13[%c0_79, %c0_80], %71 {strides = array<i32>} : memref<384x128xf32, #tpu.memory_space<vmem>>, vector<384x128xf32>,
    %c57 = arith.constant 57 : index
    %c0_81 = arith.constant 0 : index
    %73 = vector.load %arg10[%c57, %c0_81] : memref<448x128xbf16, #tpu.memory_space<vmem>>, vector<384x128xbf16>
    %c8_82 = arith.constant 8 : index
    %c0_83 = arith.constant 0 : index
    %c0_84 = arith.constant 0 : index
    %74 = vector.load %arg5[%c8_82, %c0_83, %c0_84] : memref<9x128x128xbf16, #tpu.memory_space<vmem>>, vector<1x128x128xbf16>
    %75 = vector.shape_cast %74 : vector<1x128x128xbf16> to vector<128x128xbf16>
    %cst_85 = arith.constant dense<0.000000e+00> : vector<384x128xf32>
    %76 = tpu.matmul %73, %75, %cst_85 {dimension_numbers = #tpu.dot_dimension_numbers<[1], [0], [0], [1], [0, 0, 1, 1], [], []>} : vector<384x128xbf16>, vector<128x128xbf16>, vector<384x128xf32> -> vector<384x128xf32>
    %c0_86 = arith.constant 0 : index
    %c0_87 = arith.constant 0 : index
    %77 = vector.load %arg13[%c0_86, %c0_87] : memref<384x128xf32, #tpu.memory_space<vmem>>, vector<384x128xf32>
    %78 = arith.addf %77, %76 : vector<384x128xf32>
    %c0_88 = arith.constant 0 : index
    %c0_89 = arith.constant 0 : index
    %79 = vector.load %arg13[%c0_88, %c0_89] : memref<384x128xf32, #tpu.memory_space<vmem>>, vector<384x128xf32>
    tpu.vector_store %arg13[%c0_88, %c0_89], %78 {strides = array<i32>} : memref<384x128xf32, #tpu.memory_space<vmem>>, vector<384x128xf32>,
    %c0_90 = arith.constant 0 : index
    %c0_91 = arith.constant 0 : index
    %80 = vector.load %arg13[%c0_90, %c0_91] : memref<384x128xf32, #tpu.memory_space<vmem>>, vector<384x128xf32>
    %c0_92 = arith.constant 0 : index
    %c0_93 = arith.constant 0 : index
    %81 = vector.load %arg6[%c0_92, %c0_93] : memref<1x128xf32, #tpu.memory_space<vmem>>, vector<1x128xf32>
    %82 = vector.broadcast %81 : vector<1x128xf32> to vector<384x128xf32>
    %83 = arith.addf %80, %82 : vector<384x128xf32>
    %cst_94 = arith.constant 0.000000e+00 : f32
    %84 = vector.broadcast %cst_94 : f32 to vector<384x128xf32>
    %85 = arith.maximumf %83, %84 : vector<384x128xf32>
    %86 = vector.broadcast %1 : vector<384x1xf32> to vector<384x128xf32>
    %87 = arith.mulf %85, %86 : vector<384x128xf32>
    %88 = arith.truncf %87 : vector<384x128xf32> to vector<384x128xbf16>
    %c32_95 = arith.constant 32 : index
    %c0_96 = arith.constant 0 : index
    %89 = vector.load %arg11[%c32_95, %c0_96] : memref<448x128xbf16, #tpu.memory_space<vmem>>, vector<384x128xbf16>
    tpu.vector_store %arg11[%c32_95, %c0_96], %88 {strides = array<i32>} : memref<448x128xbf16, #tpu.memory_space<vmem>>, vector<384x128xbf16>,
    %c7_97 = arith.constant 7 : index
    %c0_98 = arith.constant 0 : index
    %90 = vector.load %arg11[%c7_97, %c0_98] : memref<448x128xbf16, #tpu.memory_space<vmem>>, vector<384x128xbf16>
    %c0_99 = arith.constant 0 : index
    %c0_100 = arith.constant 0 : index
    %c0_101 = arith.constant 0 : index
    %91 = vector.load %arg7[%c0_99, %c0_100, %c0_101] : memref<9x128x128xbf16, #tpu.memory_space<vmem>>, vector<1x128x128xbf16>
    %92 = vector.shape_cast %91 : vector<1x128x128xbf16> to vector<128x128xbf16>
    %cst_102 = arith.constant dense<0.000000e+00> : vector<384x128xf32>
    %93 = tpu.matmul %90, %92, %cst_102 {dimension_numbers = #tpu.dot_dimension_numbers<[1], [0], [0], [1], [0, 0, 1, 1], [], []>} : vector<384x128xbf16>, vector<128x128xbf16>, vector<384x128xf32> -> vector<384x128xf32>
    %c0_103 = arith.constant 0 : index
    %c0_104 = arith.constant 0 : index
    %94 = vector.load %arg13[%c0_103, %c0_104] : memref<384x128xf32, #tpu.memory_space<vmem>>, vector<384x128xf32>
    tpu.vector_store %arg13[%c0_103, %c0_104], %93 {strides = array<i32>} : memref<384x128xf32, #tpu.memory_space<vmem>>, vector<384x128xf32>,
    %c8_105 = arith.constant 8 : index
    %c0_106 = arith.constant 0 : index
    %95 = vector.load %arg11[%c8_105, %c0_106] : memref<448x128xbf16, #tpu.memory_space<vmem>>, vector<384x128xbf16>
    %c1_107 = arith.constant 1 : index
    %c0_108 = arith.constant 0 : index
    %c0_109 = arith.constant 0 : index
    %96 = vector.load %arg7[%c1_107, %c0_108, %c0_109] : memref<9x128x128xbf16, #tpu.memory_space<vmem>>, vector<1x128x128xbf16>
    %97 = vector.shape_cast %96 : vector<1x128x128xbf16> to vector<128x128xbf16>
    %cst_110 = arith.constant dense<0.000000e+00> : vector<384x128xf32>
    %98 = tpu.matmul %95, %97, %cst_110 {dimension_numbers = #tpu.dot_dimension_numbers<[1], [0], [0], [1], [0, 0, 1, 1], [], []>} : vector<384x128xbf16>, vector<128x128xbf16>, vector<384x128xf32> -> vector<384x128xf32>
    %c0_111 = arith.constant 0 : index
    %c0_112 = arith.constant 0 : index
    %99 = vector.load %arg13[%c0_111, %c0_112] : memref<384x128xf32, #tpu.memory_space<vmem>>, vector<384x128xf32>
    %100 = arith.addf %99, %98 : vector<384x128xf32>
    %c0_113 = arith.constant 0 : index
    %c0_114 = arith.constant 0 : index
    %101 = vector.load %arg13[%c0_113, %c0_114] : memref<384x128xf32, #tpu.memory_space<vmem>>, vector<384x128xf32>
    tpu.vector_store %arg13[%c0_113, %c0_114], %100 {strides = array<i32>} : memref<384x128xf32, #tpu.memory_space<vmem>>, vector<384x128xf32>,
    %c9_115 = arith.constant 9 : index
    %c0_116 = arith.constant 0 : index
    %102 = vector.load %arg11[%c9_115, %c0_116] : memref<448x128xbf16, #tpu.memory_space<vmem>>, vector<384x128xbf16>
    %c2_117 = arith.constant 2 : index
    %c0_118 = arith.constant 0 : index
    %c0_119 = arith.constant 0 : index
    %103 = vector.load %arg7[%c2_117, %c0_118, %c0_119] : memref<9x128x128xbf16, #tpu.memory_space<vmem>>, vector<1x128x128xbf16>
    %104 = vector.shape_cast %103 : vector<1x128x128xbf16> to vector<128x128xbf16>
    %cst_120 = arith.constant dense<0.000000e+00> : vector<384x128xf32>
    %105 = tpu.matmul %102, %104, %cst_120 {dimension_numbers = #tpu.dot_dimension_numbers<[1], [0], [0], [1], [0, 0, 1, 1], [], []>} : vector<384x128xbf16>, vector<128x128xbf16>, vector<384x128xf32> -> vector<384x128xf32>
    %c0_121 = arith.constant 0 : index
    %c0_122 = arith.constant 0 : index
    %106 = vector.load %arg13[%c0_121, %c0_122] : memref<384x128xf32, #tpu.memory_space<vmem>>, vector<384x128xf32>
    %107 = arith.addf %106, %105 : vector<384x128xf32>
    %c0_123 = arith.constant 0 : index
    %c0_124 = arith.constant 0 : index
    %108 = vector.load %arg13[%c0_123, %c0_124] : memref<384x128xf32, #tpu.memory_space<vmem>>, vector<384x128xf32>
    tpu.vector_store %arg13[%c0_123, %c0_124], %107 {strides = array<i32>} : memref<384x128xf32, #tpu.memory_space<vmem>>, vector<384x128xf32>,
    %c31_125 = arith.constant 31 : index
    %c0_126 = arith.constant 0 : index
    %109 = vector.load %arg11[%c31_125, %c0_126] : memref<448x128xbf16, #tpu.memory_space<vmem>>, vector<384x128xbf16>
    %c3_127 = arith.constant 3 : index
    %c0_128 = arith.constant 0 : index
    %c0_129 = arith.constant 0 : index
    %110 = vector.load %arg7[%c3_127, %c0_128, %c0_129] : memref<9x128x128xbf16, #tpu.memory_space<vmem>>, vector<1x128x128xbf16>
    %111 = vector.shape_cast %110 : vector<1x128x128xbf16> to vector<128x128xbf16>
    %cst_130 = arith.constant dense<0.000000e+00> : vector<384x128xf32>
    %112 = tpu.matmul %109, %111, %cst_130 {dimension_numbers = #tpu.dot_dimension_numbers<[1], [0], [0], [1], [0, 0, 1, 1], [], []>} : vector<384x128xbf16>, vector<128x128xbf16>, vector<384x128xf32> -> vector<384x128xf32>
    %c0_131 = arith.constant 0 : index
    %c0_132 = arith.constant 0 : index
    %113 = vector.load %arg13[%c0_131, %c0_132] : memref<384x128xf32, #tpu.memory_space<vmem>>, vector<384x128xf32>
    %114 = arith.addf %113, %112 : vector<384x128xf32>
    %c0_133 = arith.constant 0 : index
    %c0_134 = arith.constant 0 : index
    %115 = vector.load %arg13[%c0_133, %c0_134] : memref<384x128xf32, #tpu.memory_space<vmem>>, vector<384x128xf32>
    tpu.vector_store %arg13[%c0_133, %c0_134], %114 {strides = array<i32>} : memref<384x128xf32, #tpu.memory_space<vmem>>, vector<384x128xf32>,
    %c32_135 = arith.constant 32 : index
    %c0_136 = arith.constant 0 : index
    %116 = vector.load %arg11[%c32_135, %c0_136] : memref<448x128xbf16, #tpu.memory_space<vmem>>, vector<384x128xbf16>
    %c4_137 = arith.constant 4 : index
    %c0_138 = arith.constant 0 : index
    %c0_139 = arith.constant 0 : index
    %117 = vector.load %arg7[%c4_137, %c0_138, %c0_139] : memref<9x128x128xbf16, #tpu.memory_space<vmem>>, vector<1x128x128xbf16>
    %118 = vector.shape_cast %117 : vector<1x128x128xbf16> to vector<128x128xbf16>
    %cst_140 = arith.constant dense<0.000000e+00> : vector<384x128xf32>
    %119 = tpu.matmul %116, %118, %cst_140 {dimension_numbers = #tpu.dot_dimension_numbers<[1], [0], [0], [1], [0, 0, 1, 1], [], []>} : vector<384x128xbf16>, vector<128x128xbf16>, vector<384x128xf32> -> vector<384x128xf32>
    %c0_141 = arith.constant 0 : index
    %c0_142 = arith.constant 0 : index
    %120 = vector.load %arg13[%c0_141, %c0_142] : memref<384x128xf32, #tpu.memory_space<vmem>>, vector<384x128xf32>
    %121 = arith.addf %120, %119 : vector<384x128xf32>
    %c0_143 = arith.constant 0 : index
    %c0_144 = arith.constant 0 : index
    %122 = vector.load %arg13[%c0_143, %c0_144] : memref<384x128xf32, #tpu.memory_space<vmem>>, vector<384x128xf32>
    tpu.vector_store %arg13[%c0_143, %c0_144], %121 {strides = array<i32>} : memref<384x128xf32, #tpu.memory_space<vmem>>, vector<384x128xf32>,
    %c33_145 = arith.constant 33 : index
    %c0_146 = arith.constant 0 : index
    %123 = vector.load %arg11[%c33_145, %c0_146] : memref<448x128xbf16, #tpu.memory_space<vmem>>, vector<384x128xbf16>
    %c5_147 = arith.constant 5 : index
    %c0_148 = arith.constant 0 : index
    %c0_149 = arith.constant 0 : index
    %124 = vector.load %arg7[%c5_147, %c0_148, %c0_149] : memref<9x128x128xbf16, #tpu.memory_space<vmem>>, vector<1x128x128xbf16>
    %125 = vector.shape_cast %124 : vector<1x128x128xbf16> to vector<128x128xbf16>
    %cst_150 = arith.constant dense<0.000000e+00> : vector<384x128xf32>
    %126 = tpu.matmul %123, %125, %cst_150 {dimension_numbers = #tpu.dot_dimension_numbers<[1], [0], [0], [1], [0, 0, 1, 1], [], []>} : vector<384x128xbf16>, vector<128x128xbf16>, vector<384x128xf32> -> vector<384x128xf32>
    %c0_151 = arith.constant 0 : index
    %c0_152 = arith.constant 0 : index
    %127 = vector.load %arg13[%c0_151, %c0_152] : memref<384x128xf32, #tpu.memory_space<vmem>>, vector<384x128xf32>
    %128 = arith.addf %127, %126 : vector<384x128xf32>
    %c0_153 = arith.constant 0 : index
    %c0_154 = arith.constant 0 : index
    %129 = vector.load %arg13[%c0_153, %c0_154] : memref<384x128xf32, #tpu.memory_space<vmem>>, vector<384x128xf32>
    tpu.vector_store %arg13[%c0_153, %c0_154], %128 {strides = array<i32>} : memref<384x128xf32, #tpu.memory_space<vmem>>, vector<384x128xf32>,
    %c55_155 = arith.constant 55 : index
    %c0_156 = arith.constant 0 : index
    %130 = vector.load %arg11[%c55_155, %c0_156] : memref<448x128xbf16, #tpu.memory_space<vmem>>, vector<384x128xbf16>
    %c6_157 = arith.constant 6 : index
    %c0_158 = arith.constant 0 : index
    %c0_159 = arith.constant 0 : index
    %131 = vector.load %arg7[%c6_157, %c0_158, %c0_159] : memref<9x128x128xbf16, #tpu.memory_space<vmem>>, vector<1x128x128xbf16>
    %132 = vector.shape_cast %131 : vector<1x128x128xbf16> to vector<128x128xbf16>
    %cst_160 = arith.constant dense<0.000000e+00> : vector<384x128xf32>
    %133 = tpu.matmul %130, %132, %cst_160 {dimension_numbers = #tpu.dot_dimension_numbers<[1], [0], [0], [1], [0, 0, 1, 1], [], []>} : vector<384x128xbf16>, vector<128x128xbf16>, vector<384x128xf32> -> vector<384x128xf32>
    %c0_161 = arith.constant 0 : index
    %c0_162 = arith.constant 0 : index
    %134 = vector.load %arg13[%c0_161, %c0_162] : memref<384x128xf32, #tpu.memory_space<vmem>>, vector<384x128xf32>
    %135 = arith.addf %134, %133 : vector<384x128xf32>
    %c0_163 = arith.constant 0 : index
    %c0_164 = arith.constant 0 : index
    %136 = vector.load %arg13[%c0_163, %c0_164] : memref<384x128xf32, #tpu.memory_space<vmem>>, vector<384x128xf32>
    tpu.vector_store %arg13[%c0_163, %c0_164], %135 {strides = array<i32>} : memref<384x128xf32, #tpu.memory_space<vmem>>, vector<384x128xf32>,
    %c56_165 = arith.constant 56 : index
    %c0_166 = arith.constant 0 : index
    %137 = vector.load %arg11[%c56_165, %c0_166] : memref<448x128xbf16, #tpu.memory_space<vmem>>, vector<384x128xbf16>
    %c7_167 = arith.constant 7 : index
    %c0_168 = arith.constant 0 : index
    %c0_169 = arith.constant 0 : index
    %138 = vector.load %arg7[%c7_167, %c0_168, %c0_169] : memref<9x128x128xbf16, #tpu.memory_space<vmem>>, vector<1x128x128xbf16>
    %139 = vector.shape_cast %138 : vector<1x128x128xbf16> to vector<128x128xbf16>
    %cst_170 = arith.constant dense<0.000000e+00> : vector<384x128xf32>
    %140 = tpu.matmul %137, %139, %cst_170 {dimension_numbers = #tpu.dot_dimension_numbers<[1], [0], [0], [1], [0, 0, 1, 1], [], []>} : vector<384x128xbf16>, vector<128x128xbf16>, vector<384x128xf32> -> vector<384x128xf32>
    %c0_171 = arith.constant 0 : index
    %c0_172 = arith.constant 0 : index
    %141 = vector.load %arg13[%c0_171, %c0_172] : memref<384x128xf32, #tpu.memory_space<vmem>>, vector<384x128xf32>
    %142 = arith.addf %141, %140 : vector<384x128xf32>
    %c0_173 = arith.constant 0 : index
    %c0_174 = arith.constant 0 : index
    %143 = vector.load %arg13[%c0_173, %c0_174] : memref<384x128xf32, #tpu.memory_space<vmem>>, vector<384x128xf32>
    tpu.vector_store %arg13[%c0_173, %c0_174], %142 {strides = array<i32>} : memref<384x128xf32, #tpu.memory_space<vmem>>, vector<384x128xf32>,
    %c57_175 = arith.constant 57 : index
    %c0_176 = arith.constant 0 : index
    %144 = vector.load %arg11[%c57_175, %c0_176] : memref<448x128xbf16, #tpu.memory_space<vmem>>, vector<384x128xbf16>
    %c8_177 = arith.constant 8 : index
    %c0_178 = arith.constant 0 : index
    %c0_179 = arith.constant 0 : index
    %145 = vector.load %arg7[%c8_177, %c0_178, %c0_179] : memref<9x128x128xbf16, #tpu.memory_space<vmem>>, vector<1x128x128xbf16>
    %146 = vector.shape_cast %145 : vector<1x128x128xbf16> to vector<128x128xbf16>
    %cst_180 = arith.constant dense<0.000000e+00> : vector<384x128xf32>
    %147 = tpu.matmul %144, %146, %cst_180 {dimension_numbers = #tpu.dot_dimension_numbers<[1], [0], [0], [1], [0, 0, 1, 1], [], []>} : vector<384x128xbf16>, vector<128x128xbf16>, vector<384x128xf32> -> vector<384x128xf32>
    %c0_181 = arith.constant 0 : index
    %c0_182 = arith.constant 0 : index
    %148 = vector.load %arg13[%c0_181, %c0_182] : memref<384x128xf32, #tpu.memory_space<vmem>>, vector<384x128xf32>
    %149 = arith.addf %148, %147 : vector<384x128xf32>
    %c0_183 = arith.constant 0 : index
    %c0_184 = arith.constant 0 : index
    %150 = vector.load %arg13[%c0_183, %c0_184] : memref<384x128xf32, #tpu.memory_space<vmem>>, vector<384x128xf32>
    tpu.vector_store %arg13[%c0_183, %c0_184], %149 {strides = array<i32>} : memref<384x128xf32, #tpu.memory_space<vmem>>, vector<384x128xf32>,
    %c0_185 = arith.constant 0 : index
    %c0_186 = arith.constant 0 : index
    %151 = vector.load %arg13[%c0_185, %c0_186] : memref<384x128xf32, #tpu.memory_space<vmem>>, vector<384x128xf32>
    %c0_187 = arith.constant 0 : index
    %c0_188 = arith.constant 0 : index
    %152 = vector.load %arg8[%c0_187, %c0_188] : memref<1x128xf32, #tpu.memory_space<vmem>>, vector<1x128xf32>
    %153 = vector.broadcast %152 : vector<1x128xf32> to vector<384x128xf32>
    %154 = arith.addf %151, %153 : vector<384x128xf32>
    %c0_189 = arith.constant 0 : index
    %c0_190 = arith.constant 0 : index
    %155 = vector.load %arg12[%c0_189, %c0_190] : memref<384x128xf32, #tpu.memory_space<vmem>>, vector<384x128xf32>
    %156 = arith.addf %154, %155 : vector<384x128xf32>
    %cst_191 = arith.constant 0.000000e+00 : f32
    %157 = vector.broadcast %cst_191 : f32 to vector<384x128xf32>
    %158 = arith.maximumf %156, %157 : vector<384x128xf32>
    %159 = arith.truncf %158 : vector<384x128xf32> to vector<384x128xbf16>
    %c0_192 = arith.constant 0 : index
    %c0_193 = arith.constant 0 : index
    %c0_194 = arith.constant 0 : index
    %160 = vector.load %arg9[%c0_192, %c0_193, %c0_194] : memref<1x384x128xbf16, #tpu.memory_space<vmem>>, vector<1x384x128xbf16>
    %161 = vector.shape_cast %160 : vector<1x384x128xbf16> to vector<384x128xbf16>
    %162 = vector.shape_cast %159 : vector<384x128xbf16> to vector<1x384x128xbf16>
    tpu.vector_store %arg9[%c0_192, %c0_193, %c0_194], %162 {strides = array<i32>} : memref<1x384x128xbf16, #tpu.memory_space<vmem>>, vector<1x384x128xbf16>,
    return
  }
  func.func @transform_0(%arg0: i32) -> (i32, i32, i32) {
    %c0_i32 = arith.constant 0 : i32
    %c0_i32_0 = arith.constant 0 : i32
    %c0_i32_1 = arith.constant 0 : i32
    return %arg0, %c0_i32, %c0_i32_0 : i32, i32, i32
  }
  func.func @transform_1(%arg0: i32) -> (i32, i32) {
    %c0_i32 = arith.constant 0 : i32
    %c0_i32_0 = arith.constant 0 : i32
    %c0_i32_1 = arith.constant 0 : i32
    return %c0_i32, %c0_i32_0 : i32, i32
  }
  func.func @transform_2(%arg0: i32) -> (i32, i32) {
    %c0_i32 = arith.constant 0 : i32
    %c0_i32_0 = arith.constant 0 : i32
    %c0_i32_1 = arith.constant 0 : i32
    return %c0_i32, %c0_i32_0 : i32, i32
  }
  func.func @transform_3(%arg0: i32) -> (i32, i32) {
    %c0_i32 = arith.constant 0 : i32
    %c0_i32_0 = arith.constant 0 : i32
    %c0_i32_1 = arith.constant 0 : i32
    return %c0_i32, %c0_i32_0 : i32, i32
  }
  func.func @transform_4(%arg0: i32) -> (i32, i32, i32) {
    %c0_i32 = arith.constant 0 : i32
    %c0_i32_0 = arith.constant 0 : i32
    %c0_i32_1 = arith.constant 0 : i32
    %c0_i32_2 = arith.constant 0 : i32
    return %c0_i32, %c0_i32_0, %c0_i32_1 : i32, i32, i32
  }
  func.func @transform_5(%arg0: i32) -> (i32, i32) {
    %c0_i32 = arith.constant 0 : i32
    %c0_i32_0 = arith.constant 0 : i32
    %c0_i32_1 = arith.constant 0 : i32
    return %c0_i32, %c0_i32_0 : i32, i32
  }
  func.func @transform_6(%arg0: i32) -> (i32, i32, i32) {
    %c0_i32 = arith.constant 0 : i32
    %c0_i32_0 = arith.constant 0 : i32
    %c0_i32_1 = arith.constant 0 : i32
    %c0_i32_2 = arith.constant 0 : i32
    return %c0_i32, %c0_i32_0, %c0_i32_1 : i32, i32, i32
  }
  func.func @transform_7(%arg0: i32) -> (i32, i32) {
    %c0_i32 = arith.constant 0 : i32
    %c0_i32_0 = arith.constant 0 : i32
    %c0_i32_1 = arith.constant 0 : i32
    return %c0_i32, %c0_i32_0 : i32, i32
  }
  func.func @transform_8(%arg0: i32) -> (i32, i32, i32) {
    %c0_i32 = arith.constant 0 : i32
    %c0_i32_0 = arith.constant 0 : i32
    %c0_i32_1 = arith.constant 0 : i32
    return %arg0, %c0_i32, %c0_i32_0 : i32, i32, i32
  }
}

</mosaic_0001>

<bundles_post_ra>
// kernel: carb_block_forward.1
= control target key start
LH: loop header
LB: loop body
LE: loop exit
PB: predicated region body
PF: predicated region fallthrough
CT: control target
= control target key end

     0   :  { %s17087_s27 = smov 0   ;;  %s20916_s0 = inlined_call_operand.vmem [shape: bf16[2,448,128], index: 0, kind: input, shape index: {}]   ;;  %s20917_s1 = inlined_call_operand.vmem [shape: f32[448,1], index: 1, kind: input, shape index: {}]   ;;  %s20918_s2 = inlined_call_operand.vmem [shape: bf16[128,128], index: 2, kind: input, shape index: {}]   ;;  %s20919_s3 = inlined_call_operand.vmem [shape: f32[1,128], index: 3, kind: input, shape index: {}]   ;;  %s20920_s4 = inlined_call_operand.vmem [shape: bf16[9,128,128], index: 4, kind: input, shape index: {}]   ;;  %s20921_s5 = inlined_call_operand.vmem [shape: f32[1,128], index: 5, kind: input, shape index: {}]   ;;  %s20922_s6 = inlined_call_operand.vmem [shape: bf16[9,128,128], index: 6, kind: input, shape index: {}]   ;;  %s20923_s7 = inlined_call_operand.vmem [shape: f32[1,128], index: 7, kind: input, shape index: {}]   ;;  %s20924_s8 = inlined_call_operand.vmem [shape: bf16[2,384,128], index: 8, kind: output, shape index: {}]  }
   0x1 LB: > { %s13475_s28 = sadd.s32 4294967295, %s17039_s27   ;;  %p13479_p0 = scmp.ge.s32.totalorder %s17039_s27, 1  ;;  %s17039_s27 = sphi %s17087_s27, %s18_s27  }
   0x2   : > { %p262_p1 = scmp.lt.s32.totalorder %s17039_s27, 3 }
   0x4   : > { %p263_p2 = pnand %p13479_p0, %p262_p1 }
   0x6   : > { %266 = sbr.rel (%p263_p2) target bundleno = 2378 (0x94a), region = 52 }
   0xd   : > { %v16795_v0 = vld [vmem:[%s20918_s2] sm:$0xff]   ;;  %v16796_v1 = vld [vmem:[%s20918_s2 + $0x8] sm:$0xff]   ;;  %v17041_v2 = vmov 0   ;;  %p296_p3 = scmp.lt.s32.totalorder %s13475_s28, 1  ;;  %v16797_v3 = vld [vmem:[%s20918_s2 + $0x10] sm:$0xff]   ;;  %vm2037_vm1 = vcmask 1043456  }
   0xe   : > { %16794 = vset.pattern.permute.xlu1 %v17041_v2  ;;  %363 = vst [vmem:[#allocation3] sm:$0xff] %v17041_v2  ;;  %364 = vst [vmem:[#allocation3 + $0x8] sm:$0xff] %v17041_v2  ;;  %16793 = vset.pattern.permute.xlu0 %v17041_v2  ;;  %v309_v4 = vld [vmem:[%s20917_s1 + $0x10] sm:$0xff]  ;;  %v307_v5 = vld [vmem:[%s20917_s1] sm:$0xff]  ;;  %vm1400_vm0 = vsmask.f32 4352 }
   0xf   : > { %365 = vst [vmem:[#allocation3 + $0xd0] sm:$0xff] %v17041_v2  ;;  %366 = vst [vmem:[#allocation3 + $0xd8] sm:$0xff] %v17041_v2  ;;  %14774 = vmatprep.subr.bf16.mxu0 %v16795_v0  ;;  %15998 = vmatprep.subr.bf16.mxu1 %v16795_v0  ;;  %s21950_s28 = smov (!%p296_p3, %s13475_s28), 1  ;;  %v310_v6 = vld [vmem:[%s20917_s1 + $0x18] sm:$0xff]  ;;  %v308_v7 = vld [vmem:[%s20917_s1 + $0x8] sm:$0xff] }
  0x10   : > { %14775 = vmatpush3.bf16.msra.mxu0 %v16795_v0  ;;  %16006 = vmatpush3.bf16.msra.mxu1 %v16795_v0  ;;  %s16782_s19 = smul.u32 224, %s21950_s28  ;;  %v16798_v8 = vld [vmem:[%s20918_s2 + $0x18] sm:$0xff]   ;;  %v312_v9 = vld [vmem:[%s20917_s1 + $0x28] sm:$0xff]  ;;  %v311_v10 = vld [vmem:[%s20917_s1 + $0x20] sm:$0xff]  ;;  %vm2570_vm2 = vsmask.f32 3328 }
  0x11   : > { %14776 = vmatprep.subr.bf16.mxu0 %v16796_v1  ;;  %15999 = vmatprep.subr.bf16.mxu1 %v16796_v1  ;;  %v16799_v11 = vld [vmem:[%s20918_s2 + $0x20] sm:$0xff]   ;;  %v314_v12 = vld [vmem:[%s20917_s1 + $0x38] sm:$0xff]  ;;  %v313_v14 = vld [vmem:[%s20917_s1 + $0x30] sm:$0xff]  ;;  %vm3278_vm3 = vsmask.f32 256  ;;  %s16783_s16 = smul.u32 192, %s21950_s28 }
  0x12   : > { %931 = vperm.xlu1 %16794, %v309_v4   ;;  %921 = vperm.xlu0 %16793, %v307_v5   ;;  %s17125_s26 = scalar_lea.vmem %s20916_s0, %s16782_s19  ;;  %v16800_v16 = vld [vmem:[%s20918_s2 + $0x28] sm:$0xff]   ;;  %v315_v18 = vld [vmem:[%s20917_s1 + $0x40] sm:$0xff]  ;;  %v16801_v19 = vld [vmem:[%s20918_s2 + $0x30] sm:$0xff]   ;;  %vm4416_vm4 = vsmask.f32 7424 }
  0x13   : > { %v16803_v13 = vld [vmem:[%s17125_s26] sm:$0xff]   ;;  %v16804_v15 = vld [vmem:[%s17125_s26 + $0x70] sm:$0xff]   ;;  %v316_v17 = vld [vmem:[%s20917_s1 + $0x48] sm:$0xff]  ;;  %s20799_s19 = scalar_lea.vmem %s20924_s8, %s16783_s16 }
  0x14   : > { %14777 = vmatpush3.bf16.msra.mxu0 %v16796_v1  ;;  %16007 = vmatpush3.bf16.msra.mxu1 %v16796_v1  ;;  %v318_v20 = vld [vmem:[%s20917_s1 + $0x58] sm:$0xff]  ;;  %v317_v21 = vld [vmem:[%s20917_s1 + $0x50] sm:$0xff]  ;;  %v320_v23 = vld [vmem:[%s20917_s1 + $0x68] sm:$0xff] }
  0x15   : > { %14778 = vmatprep.subr.bf16.mxu0 %v16797_v3  ;;  %16000 = vmatprep.subr.bf16.mxu1 %v16797_v3  ;;  %v16802_v22 = vld [vmem:[%s20918_s2 + $0x38] sm:$0xff]   ;;  %v319_v24 = vld [vmem:[%s20917_s1 + $0x60] sm:$0xff]  ;;  %v16805_v25 = vld [vmem:[%s17125_s26 + $0x8] sm:$0xff]  }
  0x16   : > { %936 = vperm.xlu1 %16794, %v310_v6   ;;  %926 = vperm.xlu0 %16793, %v308_v7   ;;  %v16806_v26 = vld [vmem:[%s17125_s26 + $0x78] sm:$0xff]   ;;  %v321_v28 = vld [vmem:[%s20917_s1 + $0x70] sm:$0xff]  ;;  %v16808_v30 = vld [vmem:[%s17125_s26 + $0x80] sm:$0xff]  }
  0x17   : > { %14790 = vmatprep.mubr.bf16.mxu0 %v16803_v13  ;;  %14818 = vmatprep.mubr.bf16.mxu1 %v16804_v15  ;;  %v322_v27 = vld [vmem:[%s20917_s1 + $0x78] sm:$0xff]  ;;  %v16807_v29 = vld [vmem:[%s17125_s26 + $0x10] sm:$0xff]   ;;  %v324_v31 = vld [vmem:[%s20917_s1 + $0x88] sm:$0xff] }
  0x18   : > { %14779 = vmatpush3.bf16.msra.mxu0 %v16797_v3  ;;  %16008 = vmatpush3.bf16.msra.mxu1 %v16797_v3  ;;  %v323_v32 = vld [vmem:[%s20917_s1 + $0x80] sm:$0xff]  ;;  %v16809_v33 = vld [vmem:[%s17125_s26 + $0x18] sm:$0xff]   ;;  %v16810_v34 = vld [vmem:[%s17125_s26 + $0x88] sm:$0xff]  }
  0x19   : > { %14780 = vmatprep.subr.bf16.mxu0 %v16798_v8  ;;  %16001 = vmatprep.subr.bf16.mxu1 %v16798_v8  ;;  %v16811_v35 = vld [vmem:[%s17125_s26 + $0x20] sm:$0xff]   ;;  %v326_v36 = vld [vmem:[%s20917_s1 + $0x98] sm:$0xff]  ;;  %v325_v37 = vld [vmem:[%s20917_s1 + $0x90] sm:$0xff] }
  0x1a   : > { %946 = vperm.xlu1 %16794, %v312_v9   ;;  %941 = vperm.xlu0 %16793, %v311_v10   ;;  %v16812_v38 = vld [vmem:[%s17125_s26 + $0x90] sm:$0xff]   ;;  %v328_v39 = vld [vmem:[%s20917_s1 + $0xa8] sm:$0xff]  ;;  %v327_v40 = vld [vmem:[%s20917_s1 + $0xa0] sm:$0xff] }
  0x1b   : > { %v16813_v41 = vld [vmem:[%s17125_s26 + $0x28] sm:$0xff]   ;;  %v16814_v42 = vld [vmem:[%s17125_s26 + $0x98] sm:$0xff]   ;;  %v329_v44 = vld [vmem:[%s20917_s1 + $0xb0] sm:$0xff] }
  0x1c   : > { %14781 = vmatpush3.bf16.msra.mxu0 %v16798_v8  ;;  %16009 = vmatpush3.bf16.msra.mxu1 %v16798_v8  ;;  %v330_v43 = vld [vmem:[%s20917_s1 + $0xb8] sm:$0xff]  ;;  %v16815_v45 = vld [vmem:[%s17125_s26 + $0x30] sm:$0xff]   ;;  %v16816_v46 = vld [vmem:[%s17125_s26 + $0xa0] sm:$0xff]  }
  0x1d   : > { %14782 = vmatprep.subr.bf16.mxu0 %v16799_v11  ;;  %16002 = vmatprep.subr.bf16.mxu1 %v16799_v11  ;;  %v332_v47 = vld [vmem:[%s20917_s1 + $0xc8] sm:$0xff]  ;;  %v331_v48 = vld [vmem:[%s20917_s1 + $0xc0] sm:$0xff]  ;;  %v16817_v49 = vld [vmem:[%s17125_s26 + $0x38] sm:$0xff]  }
  0x1e   : > { %956 = vperm.xlu1 %16794, %v314_v12   ;;  %951 = vperm.xlu0 %16793, %v313_v14   ;;  %v16818_v50 = vld [vmem:[%s17125_s26 + $0xa8] sm:$0xff]   ;;  %v16819_v51 = vld [vmem:[%s17125_s26 + $0x40] sm:$0xff]   ;;  %v16820_v52 = vld [vmem:[%s17125_s26 + $0xb0] sm:$0xff]  }
  0x1f   : > { %v334_v53 = vld [vmem:[%s20917_s1 + $0xd8] sm:$0xff]  ;;  %v333_v54 = vld [vmem:[%s20917_s1 + $0xd0] sm:$0xff]  ;;  %v336_v55 = vld [vmem:[%s20917_s1 + $0xe8] sm:$0xff] }
  0x20   : > { %14783 = vmatpush3.bf16.msra.mxu0 %v16799_v11  ;;  %16010 = vmatpush3.bf16.msra.mxu1 %v16799_v11  ;;  %v335_v56 = vld [vmem:[%s20917_s1 + $0xe0] sm:$0xff]  ;;  %v16821_v57 = vld [vmem:[%s17125_s26 + $0x48] sm:$0xff]   ;;  %v16822_v58 = vld [vmem:[%s17125_s26 + $0xb8] sm:$0xff]  }
  0x21   : > { %14784 = vmatprep.subr.bf16.mxu0 %v16800_v16  ;;  %16003 = vmatprep.subr.bf16.mxu1 %v16800_v16  ;;  %v338_v59 = vld [vmem:[%s20917_s1 + $0xf8] sm:$0xff]  ;;  %v337_v60 = vld [vmem:[%s20917_s1 + $0xf0] sm:$0xff]  ;;  %v16824_v62 = vld [vmem:[%s17125_s26 + $0xc0] sm:$0xff]  }
  0x22   : > { %966 = vperm.xlu1 %16794, %v316_v17   ;;  %961 = vperm.xlu0 %16793, %v315_v18   ;;  %v16823_v61 = vld [vmem:[%s17125_s26 + $0x50] sm:$0xff]   ;;  %v340_v63 = vld [vmem:[%s20917_s1 + $0x108] sm:$0xff]  ;;  %v339_v0 = vld [vmem:[%s20917_s1 + $0x100] sm:$0xff] }
  0x23   : > { %v16825_v1 = vld [vmem:[%s17125_s26 + $0x58] sm:$0xff]   ;;  %v16826_v2 = vld [vmem:[%s17125_s26 + $0xc8] sm:$0xff]   ;;  %v341_v4 = vld [vmem:[%s20917_s1 + $0x110] sm:$0xff] }
  0x24   : > { %14785 = vmatpush3.bf16.msra.mxu0 %v16800_v16  ;;  %16011 = vmatpush3.bf16.msra.mxu1 %v16800_v16  ;;  %v342_v3 = vld [vmem:[%s20917_s1 + $0x118] sm:$0xff]  ;;  %v16827_v5 = vld [vmem:[%s17125_s26 + $0x60] sm:$0xff]   ;;  %v16828_v6 = vld [vmem:[%s17125_s26 + $0xd0] sm:$0xff]  }
  0x25   : > { %14786 = vmatprep.subr.bf16.mxu0 %v16801_v19  ;;  %16004 = vmatprep.subr.bf16.mxu1 %v16801_v19  ;;  %v344_v7 = vld [vmem:[%s20917_s1 + $0x128] sm:$0xff]  ;;  %v343_v8 = vld [vmem:[%s20917_s1 + $0x120] sm:$0xff]  ;;  %v16830_v10 = vld [vmem:[%s17125_s26 + $0xd8] sm:$0xff]  }
  0x26   : > { %976 = vperm.xlu1 %16794, %v318_v20   ;;  %971 = vperm.xlu0 %16793, %v317_v21   ;;  %v16829_v9 = vld [vmem:[%s17125_s26 + $0x68] sm:$0xff]   ;;  %v346_v11 = vld [vmem:[%s20917_s1 + $0x138] sm:$0xff]  ;;  %v345_v12 = vld [vmem:[%s20917_s1 + $0x130] sm:$0xff] }
  0x27   : > { %v348_v13 = vld [vmem:[%s20917_s1 + $0x148] sm:$0xff]  ;;  %v347_v14 = vld [vmem:[%s20917_s1 + $0x140] sm:$0xff]  ;;  %v350_v16 = vld [vmem:[%s20917_s1 + $0x158] sm:$0xff] }
  0x28   : > { %14787 = vmatpush3.bf16.msra.mxu0 %v16801_v19  ;;  %16012 = vmatpush3.bf16.msra.mxu1 %v16801_v19  ;;  %v16831_v15 = vld [vmem:[%s20920_s4] sm:$0xff]   ;;  %v349_v17 = vld [vmem:[%s20917_s1 + $0x150] sm:$0xff]  ;;  %v352_v18 = vld [vmem:[%s20917_s1 + $0x168] sm:$0xff] }
  0x29   : > { %14788 = vmatprep.subr.bf16.mxu0 %v16802_v22  ;;  %16005 = vmatprep.subr.bf16.mxu1 %v16802_v22  ;;  %v351_v19 = vld [vmem:[%s20917_s1 + $0x160] sm:$0xff]  ;;  %v16832_v20 = vld [vmem:[%s20920_s4 + $0x8] sm:$0xff]   ;;  %v354_v21 = vld [vmem:[%s20917_s1 + $0x178] sm:$0xff] }
  0x2a   : > { %986 = vperm.xlu1 %16794, %v320_v23   ;;  %981 = vperm.xlu0 %16793, %v319_v24   ;;  %v356_v23 = vld [vmem:[%s20917_s1 + $0x188] sm:$0xff]  ;;  %v355_v24 = vld [vmem:[%s20917_s1 + $0x180] sm:$0xff] }
  0x2c   : > { %14789 = vmatpush3.bf16.msra.mxu0 %v16802_v22  ;;  %16013 = vmatpush3.bf16.msra.mxu1 %v16802_v22  ;;  %v353_v22 = vld [vmem:[%s20917_s1 + $0x170] sm:$0xff] }
  0x2d   : > { %14846 = vmatprep.subr.bf16.mxu1 %v16831_v15 }
  0x2e   : > { %996 = vperm.xlu1 %16794, %v322_v27   ;;  %991 = vperm.xlu0 %16793, %v321_v28   ;;  %v357_v27 = vld [vmem:[%s20917_s1 + $0x190] sm:$0xff]  ;;  %v360_v28 = vld [vmem:[%s20917_s1 + $0x1a8] sm:$0xff] }
  0x2f   : > { %14791 = vmatmul.mubr.bf16.vlgmr.msra.gmra.mrb[0].mxu0 %v16805_v25  ;;  %14819 = vmatmul.mubr.bf16.vlgmr.msra.gmra.mrb[0].mxu1 %v16806_v26  ;;  %v16833_v25 = vld [vmem:[%s20920_s4 + $0x10] sm:$0xff]   ;;  %v358_v26 = vld [vmem:[%s20917_s1 + $0x198] sm:$0xff] }
  0x30   : > { %14794 = vmatprep.mubr.bf16.mxu0 %v16807_v29  ;;  %14822 = vmatprep.mubr.bf16.mxu1 %v16808_v30  ;;  %v359_v29 = vld [vmem:[%s20917_s1 + $0x1a0] sm:$0xff]  ;;  %v16834_v30 = vld [vmem:[%s20920_s4 + $0x18] sm:$0xff]  }
  0x31   : > { %14847 = vmatpush3.bf16.msra.mxu1 %v16831_v15  ;;  %v17438_v15 = vld [vmem:[%s20919_s3] ss:$0 sm:$0xff] }
  0x32   : > { %1006 = vperm.xlu1 %16794, %v324_v31   ;;  %1001 = vperm.xlu0 %16793, %v323_v32   ;;  %v362_v31 = vld [vmem:[%s20917_s1 + $0x1b8] sm:$0xff]  ;;  %v361_v32 = vld [vmem:[%s20917_s1 + $0x1b0] sm:$0xff] }
  0x33   : > { %14848 = vmatprep.subr.bf16.mxu1 %v16832_v20 }
  0x35   : > { %14849 = vmatpush3.bf16.msra.mxu1 %v16832_v20 }
  0x36   : > { %1016 = vperm.xlu1 %16794, %v326_v36   ;;  %1011 = vperm.xlu0 %16793, %v325_v37   ;;  %v16837_v37 = vld [vmem:[%s20920_s4 + $0x30] sm:$0xff]  }
  0x37   : > { %14795 = vmatmul.mubr.bf16.gmra.mrb[4].mxu0 %v16809_v33  ;;  %14823 = vmatmul.mubr.bf16.gmra.mrb[4].mxu1 %v16810_v34  ;;  %v16835_v33 = vld [vmem:[%s20920_s4 + $0x20] sm:$0xff]   ;;  %v16836_v34 = vld [vmem:[%s20920_s4 + $0x28] sm:$0xff]  }
  0x38   : > { %14798 = vmatprep.mubr.bf16.mxu0 %v16811_v35  ;;  %14826 = vmatprep.mubr.bf16.mxu1 %v16812_v38 }
  0x39   : > { %14850 = vmatprep.subr.bf16.mxu1 %v16833_v25 }
  0x3a   : > { %1026 = vperm.xlu1 %16794, %v328_v39   ;;  %1021 = vperm.xlu0 %16793, %v327_v40   ;;  %v16838_v40 = vld [vmem:[%s20920_s4 + $0x38] sm:$0xff]  }
  0x3b   : > { %14851 = vmatpush3.bf16.msra.mxu1 %v16833_v25 }
  0x3c   : > { %14852 = vmatprep.subr.bf16.mxu1 %v16834_v30 }
  0x3e   : > { %1036 = vperm.xlu1 %16794, %v330_v43   ;;  %1031 = vperm.xlu0 %16793, %v329_v44  }
  0x3f   : > { %14799 = vmatmul.mubr.bf16.gmra.mrb[8].mxu0 %v16813_v41  ;;  %14827 = vmatmul.mubr.bf16.gmra.mrb[8].mxu1 %v16814_v42 }
  0x40   : > { %14802 = vmatprep.mubr.bf16.mxu0 %v16815_v45  ;;  %14830 = vmatprep.mubr.bf16.mxu1 %v16816_v46 }
  0x41   : > { %14853 = vmatpush3.bf16.msra.mxu1 %v16834_v30 }
  0x42   : > { %1046 = vperm.xlu1 %16794, %v332_v47   ;;  %1041 = vperm.xlu0 %16793, %v331_v48   ;;  %v17372_v48 = vld [vmem:[%s20920_s4 + $0x40] sm:$0xff]  }
  0x43   : > { %14854 = vmatprep.subr.bf16.mxu1 %v16835_v33 }
  0x45   : > { %14855 = vmatpush3.bf16.msra.mxu1 %v16835_v33 }
  0x46   : > { %1056 = vperm.xlu1 %16794, %v334_v53   ;;  %1051 = vperm.xlu0 %16793, %v333_v54  }
  0x47   : > { %14803 = vmatmul.mubr.bf16.gmra.mrb[12].mxu0 %v16817_v49  ;;  %14831 = vmatmul.mubr.bf16.gmra.mrb[12].mxu1 %v16818_v50 }
  0x48   : > { %14806 = vmatprep.mubr.bf16.mxu0 %v16819_v51  ;;  %14834 = vmatprep.mubr.bf16.mxu1 %v16820_v52 }
  0x49   : > { %14856 = vmatprep.subr.bf16.mxu1 %v16836_v34 }
  0x4a   : > { %1066 = vperm.xlu1 %16794, %v336_v55   ;;  %1061 = vperm.xlu0 %16793, %v335_v56  }
  0x4b   : > { %14857 = vmatpush3.bf16.msra.mxu1 %v16836_v34 }
  0x4c   : > { %14858 = vmatprep.subr.bf16.mxu1 %v16837_v37 }
  0x4e   : > { %1076 = vperm.xlu1 %16794, %v338_v59   ;;  %1071 = vperm.xlu0 %16793, %v337_v60  }
  0x4f   : > { %14807 = vmatmul.mubr.bf16.gmra.mrb[16].mxu0 %v16821_v57  ;;  %14835 = vmatmul.mubr.bf16.gmra.mrb[16].mxu1 %v16822_v58 }
  0x50   : > { %14810 = vmatprep.mubr.bf16.mxu0 %v16823_v61  ;;  %14838 = vmatprep.mubr.bf16.mxu1 %v16824_v62 }
  0x51   : > { %14859 = vmatpush3.bf16.msra.mxu1 %v16837_v37 }
  0x52   : > { %1086 = vperm.xlu1 %16794, %v340_v63   ;;  %1081 = vperm.xlu0 %16793, %v339_v0  }
  0x53   : > { %14860 = vmatprep.subr.bf16.mxu1 %v16838_v40 }
  0x55   : > { %14861 = vmatpush3.bf16.msra.mxu1 %v16838_v40 }
  0x56   : > { %1096 = vperm.xlu1 %16794, %v342_v3   ;;  %1091 = vperm.xlu0 %16793, %v341_v4  }
  0x57   : > { %14811 = vmatmul.mubr.bf16.gmra.mrb[20].mxu0 %v16825_v1  ;;  %14839 = vmatmul.mubr.bf16.gmra.mrb[20].mxu1 %v16826_v2 }
  0x58   : > { %14814 = vmatprep.mubr.bf16.mxu0 %v16827_v5  ;;  %14842 = vmatprep.mubr.bf16.mxu1 %v16828_v6 }
  0x59   : > { %14910 = vmatprep.subr.bf16.mxu1 %v17372_v48 }
  0x5a   : > { %1106 = vperm.xlu1 %16794, %v344_v7   ;;  %1101 = vperm.xlu0 %16793, %v343_v8  }
  0x5e   : > { %1116 = vperm.xlu1 %16794, %v346_v11   ;;  %1111 = vperm.xlu0 %16793, %v345_v12  }
  0x5f   : > { %14815 = vmatmul.mubr.bf16.gmra.mrb[24].mxu0 %v16829_v9  ;;  %14843 = vmatmul.mubr.bf16.gmra.mrb[24].mxu1 %v16830_v10 }
  0x62   : > { %1126 = vperm.xlu1 %16794, %v348_v13   ;;  %1121 = vperm.xlu0 %16793, %v347_v14  }
  0x66   : > { %1136 = vperm.xlu1 %16794, %v350_v16   ;;  %1131 = vperm.xlu0 %16793, %v349_v17  }
  0x6a   : > { %1146 = vperm.xlu1 %16794, %v352_v18   ;;  %1141 = vperm.xlu0 %16793, %v351_v19  }
  0x6e   : > { %1156 = vperm.xlu1 %16794, %v354_v21   ;;  %1151 = vperm.xlu0 %16793, %v353_v22  }
  0x72   : > { %1166 = vperm.xlu1 %16794, %v356_v23   ;;  %1161 = vperm.xlu0 %16793, %v355_v24  }
  0x76   : > { %1176 = vperm.xlu1 %16794, %v358_v26   ;;  %1171 = vperm.xlu0 %16793, %v357_v27  }
  0x7a   : > { %1186 = vperm.xlu1 %16794, %v360_v28   ;;  %1181 = vperm.xlu0 %16793, %v359_v29  }
  0x7e   : > { %1196 = vperm.xlu1 %16794, %v362_v31   ;;  %1191 = vperm.xlu0 %16793, %v361_v32  }
  0x91   : > { %v17341_v35 = vpop.permute.xlu1 %931  ;;  %v17343_v36 = vpop.permute.xlu0 %921 }
  0x95   : > { %v17348_v38 = vpop.permute.xlu1 %936  ;;  %v17350_v39 = vpop.permute.xlu0 %926 }
  0x99   : > { %v17355_v41 = vpop.permute.xlu1 %946  ;;  %v17357_v42 = vpop.permute.xlu0 %941 }
  0x9a   : > { %21163 = vst [vmem:[#allocation6_spill] sm:$0xff] %v17355_v41  ;;  %21164 = vst [vmem:[#allocation7_spill] sm:$0xff] %v17357_v42 }
  0x9d   : > { %v17359_v43 = vpop.permute.xlu1 %956  ;;  %v17361_v44 = vpop.permute.xlu0 %951 }
  0x9e   : > { %21165 = vst [vmem:[#allocation8_spill] sm:$0xff] %v17359_v43  ;;  %21166 = vst [vmem:[#allocation9_spill] sm:$0xff] %v17361_v44 }
  0xa1   : > { %v17363_v45 = vpop.permute.xlu1 %966  ;;  %v17365_v46 = vpop.permute.xlu0 %961 }
  0xa2   : > { %21167 = vst [vmem:[#allocation10_spill] sm:$0xff] %v17363_v45  ;;  %21168 = vst [vmem:[#allocation11_spill] sm:$0xff] %v17365_v46 }
  0xa5   : > { %v17367_v47 = vpop.permute.xlu0 %971  ;;  %v17374_v49 = vpop.permute.xlu1 %976 }
  0xa6   : > { %21169 = vst [vmem:[#allocation12_spill] sm:$0xff] %v17367_v47  ;;  %21170 = vst [vmem:[#allocation13_spill] sm:$0xff] %v17374_v49 }
  0xa9   : > { %v17377_v50 = vpop.permute.xlu0 %981  ;;  %v17379_v51 = vpop.permute.xlu1 %986 }
  0xaa   : > { %21171 = vst [vmem:[#allocation14_spill] sm:$0xff] %v17377_v50  ;;  %21172 = vst [vmem:[#allocation15_spill] sm:$0xff] %v17379_v51 }
  0xad   : > { %v17381_v52 = vpop.permute.xlu0 %991  ;;  %v17383_v53 = vpop.permute.xlu1 %996 }
  0xae   : > { %21173 = vst [vmem:[#allocation16_spill] sm:$0xff] %v17381_v52  ;;  %21174 = vst [vmem:[#allocation17_spill] sm:$0xff] %v17383_v53 }
  0xb1   : > { %v17385_v54 = vpop.permute.xlu0 %1001  ;;  %v17387_v55 = vpop.permute.xlu1 %1006 }
  0xb2   : > { %21175 = vst [vmem:[#allocation18_spill] sm:$0xff] %v17385_v54  ;;  %21176 = vst [vmem:[#allocation19_spill] sm:$0xff] %v17387_v55 }
  0xb5   : > { %v17389_v56 = vpop.permute.xlu0 %1011  ;;  %v17391_v57 = vpop.permute.xlu1 %1016 }
  0xb6   : > { %21177 = vst [vmem:[#allocation20_spill] sm:$0xff] %v17389_v56  ;;  %21178 = vst [vmem:[#allocation21_spill] sm:$0xff] %v17391_v57 }
  0xb9   : > { %v17393_v58 = vpop.permute.xlu0 %1021  ;;  %v17395_v59 = vpop.permute.xlu1 %1026 }
  0xba   : > { %21179 = vst [vmem:[#allocation22_spill] sm:$0xff] %v17393_v58  ;;  %21180 = vst [vmem:[#allocation23_spill] sm:$0xff] %v17395_v59 }
  0xbd   : > { %v17397_v60 = vpop.permute.xlu0 %1031  ;;  %v17399_v61 = vpop.permute.xlu1 %1036 }
  0xbe   : > { %21181 = vst [vmem:[#allocation24_spill] sm:$0xff] %v17397_v60  ;;  %21182 = vst [vmem:[#allocation25_spill] sm:$0xff] %v17399_v61 }
  0xc1   : > { %v17401_v62 = vpop.permute.xlu0 %1041  ;;  %v17403_v63 = vpop.permute.xlu1 %1046 }
  0xc2   : > { %21183 = vst [vmem:[#allocation26_spill] sm:$0xff] %v17401_v62  ;;  %21184 = vst [vmem:[#allocation27_spill] sm:$0xff] %v17403_v63 }
  0xc5   : > { %v17405_v0 = vpop.permute.xlu0 %1051  ;;  %v17407_v1 = vpop.permute.xlu1 %1056 }
  0xc6   : > { %21185 = vst [vmem:[#allocation28_spill] sm:$0xff] %v17405_v0  ;;  %21186 = vst [vmem:[#allocation29_spill] sm:$0xff] %v17407_v1 }
  0xc9   : > { %v17409_v2 = vpop.permute.xlu0 %1061  ;;  %v17411_v3 = vpop.permute.xlu1 %1066 }
  0xca   : > { %21187 = vst [vmem:[#allocation30_spill] sm:$0xff] %v17409_v2  ;;  %21188 = vst [vmem:[#allocation31_spill] sm:$0xff] %v17411_v3 }
  0xcd   : > { %v17413_v4 = vpop.permute.xlu0 %1071  ;;  %v17415_v5 = vpop.permute.xlu1 %1076 }
  0xce   : > { %21189 = vst [vmem:[#allocation32_spill] sm:$0xff] %v17413_v4  ;;  %21190 = vst [vmem:[#allocation33_spill] sm:$0xff] %v17415_v5 }
  0xd1   : > { %v17417_v6 = vpop.permute.xlu0 %1081  ;;  %v17419_v7 = vpop.permute.xlu1 %1086 }
  0xd2   : > { %21191 = vst [vmem:[#allocation34_spill] sm:$0xff] %v17417_v6  ;;  %21192 = vst [vmem:[#allocation35_spill] sm:$0xff] %v17419_v7 }
  0xd5   : > { %v17421_v8 = vpop.permute.xlu0 %1091  ;;  %v17423_v9 = vpop.permute.xlu1 %1096 }
  0xd6   : > { %21193 = vst [vmem:[#allocation36_spill] sm:$0xff] %v17421_v8  ;;  %21194 = vst [vmem:[#allocation37_spill] sm:$0xff] %v17423_v9 }
  0xd9   : > { %v17425_v10 = vpop.permute.xlu0 %1101  ;;  %v17427_v11 = vpop.permute.xlu1 %1106 }
  0xda   : > { %21195 = vst [vmem:[#allocation38_spill] sm:$0xff] %v17425_v10  ;;  %21196 = vst [vmem:[#allocation39_spill] sm:$0xff] %v17427_v11 }
  0xdd   : > { %v17429_v12 = vpop.permute.xlu0 %1111  ;;  %v17431_v13 = vpop.permute.xlu1 %1116 }
  0xde   : > { %21197 = vst [vmem:[#allocation40_spill] sm:$0xff] %v17429_v12  ;;  %21198 = vst [vmem:[#allocation41_spill] sm:$0xff] %v17431_v13 }
  0xe1   : > { %v17433_v14 = vpop.permute.xlu0 %1121  ;;  %v17440_v16 = vpop.permute.xlu1 %1126 }
  0xe2   : > { %21199 = vst [vmem:[#allocation42_spill] sm:$0xff] %v17433_v14  ;;  %21200 = vst [vmem:[#allocation43_spill] sm:$0xff] %v17440_v16 }
  0xe5   : > { %v17442_v17 = vpop.permute.xlu0 %1131 }
  0xe6   : > { %21201 = vst [vmem:[#allocation44_spill] sm:$0xff] %v17442_v17 }
 0x102   : > { %v14792_v18 = vpop.f32.mrb[0].mxu0  ;;  %v14820_v19 = vpop.f32.mrb[0].mxu1 }
 0x103   : > { %v705_v20 = vadd.f32 %v14792_v18, %v17438_v15  ;;  %v817_v21 = vadd.f32 %v14820_v19, %v17438_v15  ;;  %v696_v22 = vpop.f32.mrb[1].mxu0  ;;  %v808_v23 = vpop.f32.mrb[1].mxu1 }
 0x104   : > { %v697_v24 = vadd.f32 %v17438_v15, %v696_v22  ;;  %v809_v25 = vadd.f32 %v17438_v15, %v808_v23  ;;  %v14793_v26 = vpop.f32.mrb[2].mxu0  ;;  %v14821_v27 = vpop.f32.mrb[2].mxu1 }
 0x105   : > { %v708_v28 = vadd.f32 %v14793_v26, %v17438_v15  ;;  %v820_v29 = vadd.f32 %v14821_v27, %v17438_v15  ;;  %v699_v30 = vpop.f32.mrb[3].mxu0  ;;  %v811_v31 = vpop.f32.mrb[3].mxu1  ;;  %v1201_v34 = vmul.f32 %v17341_v35, %v705_v20  ;;  %v17454_v37 = vmul.f32 %v17413_v4, %v817_v21 }
 0x106   : > { %v700_v32 = vadd.f32 %v17438_v15, %v699_v30  ;;  %v812_v33 = vadd.f32 %v17438_v15, %v811_v31  ;;  %v1199_v19 = vmul.f32 %v17343_v36, %v697_v24  ;;  %v17462_v22 = vmul.f32 %v17409_v2, %v809_v25  ;;  %v17468_v27 = vpop.permute.xlu1 %1136  ;;  %v17470_v35 = vpop.permute.xlu0 %1141 }
 0x107   : > { %21202 = vst [vmem:[#allocation45_spill] sm:$0xff] %v17454_v37  ;;  %v1202_v40 = vmul.f32 %v17348_v38, %v708_v28  ;;  %v17458_v18 = vmul.f32 %v17415_v5, %v820_v29  ;;  %21206 = vst [vmem:[#allocation49_spill] sm:$0xff] %v17468_v27 }
 0x108   : > { %21204 = vst [vmem:[#allocation47_spill] sm:$0xff] %v17462_v22  ;;  %v1200_v23 = vmul.f32 %v17350_v39, %v700_v32  ;;  %v17466_v26 = vmul.f32 %v17411_v3, %v812_v33  ;;  %21207 = vst [vmem:[#allocation50_spill] sm:$0xff] %v17470_v35 }
 0x109   : > { %21203 = vst [vmem:[#allocation46_spill] sm:$0xff] %v17458_v18  ;;  %v17472_v20 = vpack.c.bf16 %v1202_v40, %v1201_v34  ;;  %v17476_v38 = vpack.c.bf16 %v17458_v18, %v17454_v37 }
 0x10a   : > { %21205 = vst [vmem:[#allocation48_spill] sm:$0xff] %v17466_v26  ;;  %v1255_v21 = vpack.c.bf16 %v1200_v23, %v1199_v19  ;;  %v17480_v36 = vpack.c.bf16 %v17466_v26, %v17462_v22  ;;  %v14796_v24 = vpop.f32.mrb[4].mxu0  ;;  %v14824_v39 = vpop.f32.mrb[4].mxu1 }
 0x10b   : > { %1284 = vst [vmem:[#allocation2 + $0x8] sm:$0xff] %v17472_v20  ;;  %1298 = vst [vmem:[#allocation2 + $0x78] sm:$0xff] %v17476_v38  ;;  %v721_v25 = vadd.f32 %v14796_v24, %v17438_v15  ;;  %v833_v28 = vadd.f32 %v14824_v39, %v17438_v15  ;;  %v712_v29 = vpop.f32.mrb[5].mxu0  ;;  %v824_v30 = vpop.f32.mrb[5].mxu1  ;;  %v1410_v31 = vshrl.u32 %v17472_v20, 16  ;;  %v1413_v32 = vshll.u32 %v17472_v20, 16 }
 0x10c   : > { %1283 = vst [vmem:[#allocation2] sm:$0xff] %v1255_v21  ;;  %1297 = vst [vmem:[#allocation2 + $0x70] sm:$0xff] %v17480_v36  ;;  %v713_v33 = vadd.f32 %v17438_v15, %v712_v29  ;;  %v825_v34 = vadd.f32 %v17438_v15, %v824_v30  ;;  %v14797_v40 = vpop.f32.mrb[6].mxu0  ;;  %v14825_v19 = vpop.f32.mrb[6].mxu1 }
 0x10d   : > { %v724_v23 = vadd.f32 %v14797_v40, %v17438_v15  ;;  %v836_v24 = vadd.f32 %v14825_v19, %v17438_v15  ;;  %v715_v39 = vpop.f32.mrb[7].mxu0  ;;  %v827_v26 = vpop.f32.mrb[7].mxu1  ;;  %v17494_v18 = vmul.f32 %v17361_v44, %v721_v25  ;;  %v17497_v22 = vmul.f32 %v17421_v8, %v833_v28 }
 0x10e   : > { %v716_v21 = vadd.f32 %v17438_v15, %v715_v39  ;;  %v828_v29 = vadd.f32 %v17438_v15, %v827_v26  ;;  %v1412_v40 = vrot.slane %v1410_v31, 3  ;;  %v1415_v19 = vrot.slane %v1413_v32, 4  ;;  %v17519_v26 = vpop.permute.xlu1 %1146 }
 0x10f   : > { %21208 = vst [vmem:[#allocation51_spill] sm:$0xff] %v17494_v18  ;;  %21209 = vst [vmem:[#allocation52_spill] sm:$0xff] %v17497_v22  ;;  %v17502_v30 = vmul.f32 %v17359_v43, %v724_v23  ;;  %v17505_v37 = vmul.f32 %v17423_v9, %v836_v24  ;;  %v17508_v3 = vmul.f32 %v17357_v42, %v713_v33  ;;  %v17521_v23 = vpop.permute.xlu0 %1151 }
 0x110   : > { %v17511_v25 = vmul.f32 %v17417_v6, %v825_v34  ;;  %v17514_v28 = vmul.f32 %v17355_v41, %v716_v21  ;;  %v17517_v39 = vmul.f32 %v17419_v7, %v828_v29  ;;  %21216 = vst [vmem:[#allocation59_spill] sm:$0xff] %v17519_v26  ;;  %21217 = vst [vmem:[#allocation60_spill] sm:$0xff] %v17521_v23 }
 0x111   : > { %21210 = vst [vmem:[#allocation53_spill] sm:$0xff] %v17502_v30  ;;  %21211 = vst [vmem:[#allocation54_spill] sm:$0xff] %v17505_v37  ;;  %v17525_v31 = vpack.c.bf16 %v17502_v30, %v17494_v18  ;;  %v17529_v32 = vpack.c.bf16 %v17505_v37, %v17497_v22  ;;  %v17539_v29 = vor.u32 %v1415_v19, %v1412_v40 }
 0x112   : > { %21212 = vst [vmem:[#allocation55_spill] sm:$0xff] %v17508_v3  ;;  %21213 = vst [vmem:[#allocation56_spill] sm:$0xff] %v17511_v25  ;;  %v17533_v33 = vpack.c.bf16 %v17514_v28, %v17508_v3  ;;  %v17537_v34 = vpack.c.bf16 %v17517_v39, %v17511_v25  ;;  %v14800_v24 = vpop.f32.mrb[8].mxu0  ;;  %v14828_v21 = vpop.f32.mrb[8].mxu1 }
 0x113   : > { %21214 = vst [vmem:[#allocation57_spill] sm:$0xff] %v17514_v28  ;;  %21215 = vst [vmem:[#allocation58_spill] sm:$0xff] %v17517_v39  ;;  %v737_v37 = vadd.f32 %v14800_v24, %v17438_v15  ;;  %v849_v22 = vadd.f32 %v14828_v21, %v17438_v15  ;;  %v728_v30 = vpop.f32.mrb[9].mxu0  ;;  %v840_v28 = vpop.f32.mrb[9].mxu1  ;;  %v1359_v3 = vld [vmem:[#allocation2] sm:$0xf8] }
 0x114   : > { %1286 = vst [vmem:[#allocation2 + $0x18] sm:$0xff] %v17525_v31  ;;  %1300 = vst [vmem:[#allocation2 + $0x88] sm:$0xff] %v17529_v32  ;;  %v1428_v18 = vshrl.u32 %v17525_v31, 16  ;;  %v1431_v39 = vshll.u32 %v17525_v31, 16  ;;  %v729_v40 = vadd.f32 %v17438_v15, %v728_v30  ;;  %v841_v19 = vadd.f32 %v17438_v15, %v840_v28  ;;  %v14801_v25 = vpop.f32.mrb[10].mxu0  ;;  %v14829_v7 = vpop.f32.mrb[10].mxu1 }
 0x115   : > { %1285 = vst [vmem:[#allocation2 + $0x10] sm:$0xff] %v17533_v33  ;;  %1299 = vst [vmem:[#allocation2 + $0x80] sm:$0xff] %v17537_v34  ;;  %v1402_v24 = vshrl.u32 %v1359_v3, 16  ;;  %v1405_v6 = vshll.u32 %v1359_v3, 16  ;;  %v17552_v21 = vmul.f32 %v17367_v47, %v737_v37  ;;  %v17555_v9 = vmul.f32 %v17429_v12, %v849_v22  ;;  %v731_v5 = vpop.f32.mrb[11].mxu0  ;;  %v843_v4 = vpop.f32.mrb[11].mxu1 }
 0x116   : > { %v740_v8 = vadd.f32 %v14801_v25, %v17438_v15  ;;  %v852_v2 = vadd.f32 %v14829_v7, %v17438_v15  ;;  %v17560_v30 = vmul.f32 %v17365_v46, %v729_v40  ;;  %v17563_v28 = vmul.f32 %v17425_v10, %v841_v19  ;;  %v17581_v10 = vpop.permute.xlu1 %1156 }
 0x117   : > { %21218 = vst [vmem:[#allocation61_spill] sm:$0xff] %v17552_v21  ;;  %21219 = vst [vmem:[#allocation62_spill] sm:$0xff] %v17555_v9  ;;  %v732_v3 = vadd.f32 %v17438_v15, %v731_v5  ;;  %v844_v37 = vadd.f32 %v17438_v15, %v843_v4  ;;  %v1404_v25 = vrot.slane %v1402_v24, 3  ;;  %v1407_v7 = vrot.slane %v1405_v6, 4  ;;  %v17583_v4 = vpop.permute.xlu0 %1161 }
 0x118   : > { %21220 = vst [vmem:[#allocation63_spill] sm:$0xff] %v17560_v30  ;;  %21221 = vst [vmem:[#allocation64_spill] sm:$0xff] %v17563_v28  ;;  %v17568_v47 = vmul.f32 %v17374_v49, %v740_v8  ;;  %v17571_v22 = vmul.f32 %v17431_v13, %v852_v2  ;;  %v1419_v19 = vshrl.u32 %v17533_v33, 16  ;;  %v1422_v5 = vshll.u32 %v17533_v33, 16 }
 0x119   : > { %v17574_v12 = vmul.f32 %v17363_v45, %v732_v3  ;;  %v17577_v40 = vmul.f32 %v17427_v11, %v844_v37  ;;  %21226 = vst [vmem:[#allocation69_spill] sm:$0xff] %v17581_v10  ;;  %21227 = vst [vmem:[#allocation70_spill] sm:$0xff] %v17583_v4  ;;  %v1408_v8 = vor.u32 %v1407_v7, %v1404_v25  ;;  %v1430_v24 = vrot.slane %v1428_v18, 3 }
 0x11a   : > { %21222 = vst [vmem:[#allocation65_spill] sm:$0xff] %v17568_v47  ;;  %21223 = vst [vmem:[#allocation66_spill] sm:$0xff] %v17571_v22  ;;  %v17587_v2 = vpack.c.bf16 %v17568_v47, %v17552_v21  ;;  %v17591_v6 = vpack.c.bf16 %v17571_v22, %v17555_v9  ;;  %v14804_v11 = vpop.f32.mrb[12].mxu0  ;;  %v14832_v13 = vpop.f32.mrb[12].mxu1  ;;  %v1421_v45 = vrot.slane %v1419_v19, 3  ;;  %v1424_v46 = vrot.slane %v1422_v5, 4 }
 0x11b   : > { %21224 = vst [vmem:[#allocation67_spill] sm:$0xff] %v17574_v12  ;;  %21225 = vst [vmem:[#allocation68_spill] sm:$0xff] %v17577_v40  ;;  %v17595_v3 = vpack.c.bf16 %v17574_v12, %v17560_v30  ;;  %v17599_v37 = vpack.c.bf16 %v17577_v40, %v17563_v28  ;;  %v753_v22 = vadd.f32 %v14804_v11, %v17438_v15  ;;  %v744_v25 = vpop.f32.mrb[13].mxu0  ;;  %v856_v7 = vpop.f32.mrb[13].mxu1  ;;  %v1433_v12 = vrot.slane %v1431_v39, 4 }
 0x11c   : > { %1288 = vst [vmem:[#allocation2 + $0x28] sm:$0xff] %v17587_v2  ;;  %1302 = vst [vmem:[#allocation2 + $0x98] sm:$0xff] %v17591_v6  ;;  %v865_v18 = vadd.f32 %v14832_v13, %v17438_v15  ;;  %v1417_v9 = vsel %vm1400_vm0, %v1408_v8, %v17539_v29  ;;  %v745_v19 = vadd.f32 %v17438_v15, %v744_v25  ;;  %v14805_v40 = vpop.f32.mrb[14].mxu0  ;;  %v14833_v28 = vpop.f32.mrb[14].mxu1 }
 0x11d   : > { %1287 = vst [vmem:[#allocation2 + $0x20] sm:$0xff] %v17595_v3  ;;  %1301 = vst [vmem:[#allocation2 + $0x90] sm:$0xff] %v17599_v37  ;;  %v857_v5 = vadd.f32 %v17438_v15, %v856_v7  ;;  %14862 = vmatprep.mubr.bf16.mxu1 %v1417_v9  ;;  %v1425_v11 = vor.u32 %v1424_v46, %v1421_v45  ;;  %v1437_v13 = vshrl.u32 %v17595_v3, 16  ;;  %v747_v21 = vpop.f32.mrb[15].mxu0  ;;  %v859_v25 = vpop.f32.mrb[15].mxu1 }
 0x11e   : > { %v17613_v47 = vmul.f32 %v17381_v52, %v753_v22  ;;  %v17616_v8 = vmul.f32 %v17442_v17, %v865_v18  ;;  %v756_v39 = vadd.f32 %v14805_v40, %v17438_v15  ;;  %v868_v30 = vadd.f32 %v14833_v28, %v17438_v15  ;;  %v16840_v22 = vld [vmem:[%s20920_s4 + $0x48] sm:$0xff]   ;;  %v17646_v17 = vpop.permute.xlu1 %1166 }
 0x11f   : > { %v17621_v7 = vmul.f32 %v17377_v50, %v745_v19  ;;  %v17624_v9 = vmul.f32 %v17433_v14, %v857_v5  ;;  %v748_v45 = vadd.f32 %v17438_v15, %v747_v21  ;;  %v860_v46 = vadd.f32 %v17438_v15, %v859_v25  ;;  %21236 = vst [vmem:[#allocation79_spill] sm:$0xff] %v17646_v17 }
 0x120   : > { %21228 = vst [vmem:[#allocation71_spill] sm:$0xff] %v17613_v47  ;;  %21229 = vst [vmem:[#allocation72_spill] sm:$0xff] %v17616_v8  ;;  %v17632_v40 = vmul.f32 %v17383_v53, %v756_v39  ;;  %v17635_v28 = vmul.f32 %v17468_v27, %v868_v30  ;;  %v1426_v18 = vsel %vm1400_vm0, %v17539_v29, %v1425_v11  ;;  %v1439_v25 = vrot.slane %v1437_v13, 3  ;;  %v17648_v39 = vpop.permute.xlu0 %1171 }
 0x121   : > { %21230 = vst [vmem:[#allocation73_spill] sm:$0xff] %v17621_v7  ;;  %21231 = vst [vmem:[#allocation74_spill] sm:$0xff] %v17624_v9  ;;  %v1434_v19 = vor.u32 %v1433_v12, %v1430_v24  ;;  %v17640_v5 = vmul.f32 %v17379_v51, %v748_v45  ;;  %v17643_v21 = vmul.f32 %v17440_v16, %v860_v46  ;;  %14863 = vmatmul.mubr.bf16.vlgmr.msra.gmra.mrb[28].mxu1 %v1426_v18 }
 0x122   : > { %21232 = vst [vmem:[#allocation75_spill] sm:$0xff] %v17632_v40  ;;  %21233 = vst [vmem:[#allocation76_spill] sm:$0xff] %v17635_v28  ;;  %v1440_v14 = vshll.u32 %v17595_v3, 16  ;;  %v17652_v30 = vpack.c.bf16 %v17632_v40, %v17613_v47  ;;  %v17656_v12 = vpack.c.bf16 %v17635_v28, %v17616_v8  ;;  %14911 = vmatpush3.bf16.msra.mxu1 %v17372_v48  ;;  %v1446_v24 = vshrl.u32 %v17587_v2, 16  ;;  %v14808_v46 = vpop.f32.mrb[16].mxu0  ;;  %v14836_v18 = vpop.f32.mrb[16].mxu1 }
 0x123   : > { %21234 = vst [vmem:[#allocation77_spill] sm:$0xff] %v17640_v5  ;;  %21235 = vst [vmem:[#allocation78_spill] sm:$0xff] %v17643_v21  ;;  %v1435_v29 = vsel %vm1400_vm0, %v1425_v11, %v1434_v19  ;;  %v17663_v13 = vpack.c.bf16 %v17640_v5, %v17621_v7  ;;  %v17667_v45 = vpack.c.bf16 %v17643_v21, %v17624_v9  ;;  %v1449_v28 = vshll.u32 %v17587_v2, 16  ;;  %v16841_v48 = vld [vmem:[%s20920_s4 + $0x50] sm:$0xff]   ;;  %v760_v9 = vpop.f32.mrb[17].mxu0  ;;  %v872_v8 = vpop.f32.mrb[17].mxu1 }
 0x124   : > { %21237 = vst [vmem:[#allocation80_spill] sm:$0xff] %v17648_v39  ;;  %14866 = vmatprep.mubr.bf16.mxu1 %v1435_v29  ;;  %v1442_v40 = vrot.slane %v1440_v14, 4  ;;  %14912 = vmatprep.subr.bf16.mxu1 %v16840_v22  ;;  %1290 = vst [vmem:[#allocation2 + $0x38] sm:$0xff] %v17652_v30  ;;  %v769_v11 = vadd.f32 %v14808_v46, %v17438_v15  ;;  %v881_v21 = vadd.f32 %v14836_v18, %v17438_v15  ;;  %v14809_v47 = vpop.f32.mrb[18].mxu0  ;;  %v14837_v16 = vpop.f32.mrb[18].mxu1 }
 0x125   : > { %1304 = vst [vmem:[#allocation2 + $0xa8] sm:$0xff] %v17656_v12  ;;  %v1448_v5 = vrot.slane %v1446_v24, 3  ;;  %v1464_v14 = vshrl.u32 %v17652_v30, 16  ;;  %1289 = vst [vmem:[#allocation2 + $0x30] sm:$0xff] %v17663_v13  ;;  %v761_v29 = vadd.f32 %v17438_v15, %v760_v9  ;;  %v873_v7 = vadd.f32 %v17438_v15, %v872_v8  ;;  %v763_v53 = vpop.f32.mrb[19].mxu0  ;;  %v875_v52 = vpop.f32.mrb[19].mxu1 }
 0x126   : > { %1303 = vst [vmem:[#allocation2 + $0xa0] sm:$0xff] %v17667_v45  ;;  %v1443_v27 = vor.u32 %v1442_v40, %v1439_v25  ;;  %v1451_v51 = vrot.slane %v1449_v28, 4  ;;  %v17683_v46 = vmul.f32 %v17389_v56, %v769_v11  ;;  %v17686_v18 = vmul.f32 %v17521_v23, %v881_v21  ;;  %14913 = vmatpush3.bf16.msra.mxu1 %v16840_v22 }
 0x127   : > { %v772_v24 = vadd.f32 %v14809_v47, %v17438_v15  ;;  %v884_v50 = vadd.f32 %v14837_v16, %v17438_v15  ;;  %v17691_v9 = vmul.f32 %v17385_v54, %v761_v29  ;;  %v17694_v8 = vmul.f32 %v17470_v35, %v873_v7  ;;  %14914 = vmatprep.subr.bf16.mxu1 %v16841_v48  ;;  %v16842_v47 = vld [vmem:[%s20920_s4 + $0x58] sm:$0xff]   ;;  %v17716_v29 = vpop.permute.xlu1 %1176 }
 0x128   : > { %21238 = vst [vmem:[#allocation81_spill] sm:$0xff] %v17683_v46  ;;  %21239 = vst [vmem:[#allocation82_spill] sm:$0xff] %v17686_v18  ;;  %v764_v40 = vadd.f32 %v17438_v15, %v763_v53  ;;  %v876_v28 = vadd.f32 %v17438_v15, %v875_v52  ;;  %v1444_v21 = vsel %vm1400_vm0, %v1434_v19, %v1443_v27  ;;  %v1455_v52 = vshrl.u32 %v17663_v13, 16 }
 0x129   : > { %21240 = vst [vmem:[#allocation83_spill] sm:$0xff] %v17691_v9  ;;  %21241 = vst [vmem:[#allocation84_spill] sm:$0xff] %v17694_v8  ;;  %v17702_v16 = vmul.f32 %v17391_v57, %v772_v24  ;;  %v17705_v22 = vmul.f32 %v17581_v10, %v884_v50  ;;  %v1452_v25 = vor.u32 %v1451_v51, %v1448_v5  ;;  %14867 = vmatmul.mubr.bf16.gmra.mrb[32].mxu1 %v1444_v21  ;;  %v17718_v24 = vpop.permute.xlu0 %1181 }
 0x12a   : > { %v17709_v7 = vmul.f32 %v17387_v55, %v764_v40  ;;  %v17712_v53 = vmul.f32 %v17519_v26, %v876_v28  ;;  %v1458_v11 = vshll.u32 %v17663_v13, 16  ;;  %21246 = vst [vmem:[#allocation89_spill] sm:$0xff] %v17716_v29  ;;  %v1466_v5 = vrot.slane %v1464_v14, 3  ;;  %14915 = vmatpush3.bf16.msra.mxu1 %v16841_v48  ;;  %v14812_v21 = vpop.f32.mrb[20].mxu0  ;;  %v14840_v26 = vpop.f32.mrb[20].mxu1 }
 0x12b   : > { %21242 = vst [vmem:[#allocation85_spill] sm:$0xff] %v17702_v16  ;;  %21243 = vst [vmem:[#allocation86_spill] sm:$0xff] %v17705_v22  ;;  %v17722_v50 = vpack.c.bf16 %v17702_v16, %v17683_v46  ;;  %v17726_v51 = vpack.c.bf16 %v17705_v22, %v17686_v18  ;;  %v1453_v19 = vsel %vm1400_vm0, %v1443_v27, %v1452_v25  ;;  %v1457_v16 = vrot.slane %v1455_v52, 3  ;;  %v16843_v27 = vld [vmem:[%s20920_s4 + $0x60] sm:$0xff]   ;;  %v888_v22 = vpop.f32.mrb[21].mxu1 }
 0x12c   : > { %21244 = vst [vmem:[#allocation87_spill] sm:$0xff] %v17709_v7  ;;  %21245 = vst [vmem:[#allocation88_spill] sm:$0xff] %v17712_v53  ;;  %v17731_v40 = vpack.c.bf16 %v17709_v7, %v17691_v9  ;;  %v17735_v28 = vpack.c.bf16 %v17712_v53, %v17694_v8  ;;  %14870 = vmatprep.mubr.bf16.mxu1 %v1453_v19  ;;  %v1460_v46 = vrot.slane %v1458_v11, 4  ;;  %14916 = vmatprep.subr.bf16.mxu1 %v16842_v47  ;;  %v776_v53 = vpop.f32.mrb[21].mxu0  ;;  %v14841_v7 = vpop.f32.mrb[22].mxu1 }
 0x12d   : > { %1292 = vst [vmem:[#allocation2 + $0x48] sm:$0xff] %v17722_v50  ;;  %1306 = vst [vmem:[#allocation2 + $0xb8] sm:$0xff] %v17726_v51  ;;  %v785_v48 = vadd.f32 %v14812_v21, %v17438_v15  ;;  %v897_v14 = vadd.f32 %v14840_v26, %v17438_v15  ;;  %v1467_v8 = vshll.u32 %v17652_v30, 16  ;;  %v1482_v52 = vshrl.u32 %v17722_v50, 16  ;;  %v14813_v18 = vpop.f32.mrb[22].mxu0  ;;  %v891_v54 = vpop.f32.mrb[23].mxu1 }
 0x12e   : > { %1291 = vst [vmem:[#allocation2 + $0x40] sm:$0xff] %v17731_v40  ;;  %1305 = vst [vmem:[#allocation2 + $0xb0] sm:$0xff] %v17735_v28  ;;  %v777_v11 = vadd.f32 %v17438_v15, %v776_v53  ;;  %v889_v19 = vadd.f32 %v17438_v15, %v888_v22  ;;  %v1461_v9 = vor.u32 %v1460_v46, %v1457_v16  ;;  %v20991_v21 = vshrl.u32 %v17731_v40, 16  ;;  %v779_v55 = vpop.f32.mrb[23].mxu0 }
 0x12f   : > { %v17752_v26 = vmul.f32 %v17397_v60, %v785_v48  ;;  %v17755_v35 = vmul.f32 %v17648_v39, %v897_v14  ;;  %v788_v10 = vadd.f32 %v14813_v18, %v17438_v15  ;;  %v900_v23 = vadd.f32 %v14841_v7, %v17438_v15  ;;  %14917 = vmatpush3.bf16.msra.mxu1 %v16842_v47  ;;  %v16844_v18 = vld [vmem:[%s20920_s4 + $0x68] sm:$0xff]  }
 0x130   : > { %v17760_v22 = vmul.f32 %v17393_v58, %v777_v11  ;;  %v17763_v46 = vmul.f32 %v17583_v4, %v889_v19  ;;  %v780_v16 = vadd.f32 %v17438_v15, %v779_v55  ;;  %v892_v53 = vadd.f32 %v17438_v15, %v891_v54  ;;  %14918 = vmatprep.subr.bf16.mxu1 %v16843_v27  ;;  %v1187_v11 = vpop.permute.xlu1 %1186  ;;  %v1192_v4 = vpop.permute.xlu0 %1191 }
 0x131   : > { %21247 = vst [vmem:[#allocation90_spill] sm:$0xff] %v17752_v26  ;;  %21248 = vst [vmem:[#allocation91_spill] sm:$0xff] %v17755_v35  ;;  %v17771_v7 = vmul.f32 %v17399_v61, %v788_v10  ;;  %v17774_v47 = vmul.f32 %v17716_v29, %v900_v23  ;;  %v1462_v48 = vsel %vm1400_vm0, %v1452_v25, %v1461_v9  ;;  %v1469_v14 = vrot.slane %v1467_v8, 4 }
 0x132   : > { %21249 = vst [vmem:[#allocation92_spill] sm:$0xff] %v17760_v22  ;;  %21250 = vst [vmem:[#allocation93_spill] sm:$0xff] %v17763_v46  ;;  %v17778_v19 = vmul.f32 %v17395_v59, %v780_v16  ;;  %v17781_v54 = vmul.f32 %v17646_v17, %v892_v53  ;;  %14871 = vmatmul.mubr.bf16.gmra.mrb[36].mxu1 %v1462_v48  ;;  %v1475_v55 = vrot.slane %v20991_v21, 3  ;;  %v1484_v16 = vrot.slane %v1482_v52, 3  ;;  %v14816_v21 = vpop.f32.mrb[24].mxu0  ;;  %v14844_v10 = vpop.f32.mrb[24].mxu1 }
 0x133   : > { %21251 = vst [vmem:[#allocation94_spill] sm:$0xff] %v17771_v7  ;;  %21252 = vst [vmem:[#allocation95_spill] sm:$0xff] %v17774_v47  ;;  %v17788_v23 = vpack.c.bf16 %v17771_v7, %v17752_v26  ;;  %v1280_v8 = vpack.c.bf16 %v17774_v47, %v17755_v35  ;;  %v1470_v25 = vor.u32 %v1469_v14, %v1466_v5  ;;  %14919 = vmatpush3.bf16.msra.mxu1 %v16843_v27  ;;  %v16845_v5 = vld [vmem:[%s20920_s4 + $0x70] sm:$0xff]   ;;  %v792_v14 = vpop.f32.mrb[25].mxu0 }
 0x134   : > { %21253 = vst [vmem:[#allocation96_spill] sm:$0xff] %v17778_v19  ;;  %21254 = vst [vmem:[#allocation97_spill] sm:$0xff] %v17781_v54  ;;  %v17794_v53 = vpack.c.bf16 %v17778_v19, %v17760_v22  ;;  %v1279_v48 = vpack.c.bf16 %v17781_v54, %v17763_v46  ;;  %v21255_v17 = vshll.u32 %v17731_v40, 16  ;;  %v1485_v7 = vshll.u32 %v17722_v50, 16  ;;  %14920 = vmatprep.subr.bf16.mxu1 %v16844_v18  ;;  %v904_v54 = vpop.f32.mrb[25].mxu1  ;;  %v14817_v19 = vpop.f32.mrb[26].mxu0 }
 0x135   : > { %1294 = vst [vmem:[#allocation2 + $0x58] sm:$0xff] %v17788_v23  ;;  %1308 = vst [vmem:[#allocation2 + $0xc8] sm:$0xff] %v1280_v8  ;;  %v801_v27 = vadd.f32 %v14816_v21, %v17438_v15  ;;  %v913_v52 = vadd.f32 %v14844_v10, %v17438_v15  ;;  %v1471_v47 = vsel %vm1400_vm0, %v1461_v9, %v1470_v25  ;;  %v14845_v22 = vpop.f32.mrb[26].mxu1  ;;  %v795_v39 = vpop.f32.mrb[27].mxu0 }
 0x136   : > { %v1478_v29 = vrot.slane %v21255_v17, 4  ;;  %1293 = vst [vmem:[#allocation2 + $0x50] sm:$0xff] %v17794_v53  ;;  %1307 = vst [vmem:[#allocation2 + $0xc0] sm:$0xff] %v1279_v48  ;;  %v793_v46 = vadd.f32 %v17438_v15, %v792_v14  ;;  %v905_v35 = vadd.f32 %v17438_v15, %v904_v54  ;;  %14874 = vmatprep.mubr.bf16.mxu1 %v1471_v47  ;;  %v1487_v21 = vrot.slane %v1485_v7, 4  ;;  %v907_v59 = vpop.f32.mrb[27].mxu1  ;;  %v1197_v48 = vpop.permute.xlu1 %1196 }
 0x137   : > { %v17813_v10 = vmul.f32 %v17405_v0, %v801_v27  ;;  %v1253_v26 = vmul.f32 %v1192_v4, %v913_v52  ;;  %v804_v9 = vadd.f32 %v14817_v19, %v17438_v15  ;;  %v916_v17 = vadd.f32 %v14845_v22, %v17438_v15  ;;  %14921 = vmatpush3.bf16.msra.mxu1 %v16844_v18  ;;  %v16846_v4 = vld [vmem:[%s20920_s4 + $0x78] sm:$0xff]  }
 0x138   : > { %v1479_v8 = vor.u32 %v1478_v29, %v1475_v55  ;;  %v17818_v14 = vmul.f32 %v17401_v62, %v793_v46  ;;  %v1251_v54 = vmul.f32 %v17718_v24, %v905_v35  ;;  %v796_v29 = vadd.f32 %v17438_v15, %v795_v39  ;;  %14922 = vmatprep.subr.bf16.mxu1 %v16845_v5 }
 0x139   : > { %21256 = vst [vmem:[#allocation98_spill] sm:$0xff] %v17813_v10  ;;  %v908_v7 = vadd.f32 %v17438_v15, %v907_v59  ;;  %v17827_v22 = vmul.f32 %v17407_v1, %v804_v9  ;;  %v1254_v47 = vmul.f32 %v1197_v48, %v916_v17  ;;  %v1488_v19 = vor.u32 %v1487_v21, %v1484_v16 }
 0x13a   : > { %21257 = vst [vmem:[#allocation99_spill] sm:$0xff] %v17818_v14  ;;  %v1480_v18 = vsel %vm1400_vm0, %v1470_v25, %v1479_v8  ;;  %v17831_v46 = vmul.f32 %v17403_v63, %v796_v29  ;;  %v21013_v39 = vshrl.u32 %v17794_v53, 16  ;;  %v21012_v59 = vshll.u32 %v17794_v53, 16 }
 0x13b   : > { %21258 = vst [vmem:[#allocation100_spill] sm:$0xff] %v17827_v22  ;;  %v1252_v35 = vmul.f32 %v1187_v11, %v908_v7  ;;  %14875 = vmatmul.mubr.bf16.gmra.mrb[40].mxu1 %v1480_v18  ;;  %v17837_v15 = vpack.c.bf16 %v17827_v22, %v17813_v10  ;;  %v1282_v24 = vpack.c.bf16 %v1254_v47, %v1253_v26  ;;  %v17851_v26 = vld [vmem:[%s20920_s4 + $0x80] sm:$0xff]   ;;  %v21008_v17 = vshll.u32 %v17788_v23, 16 }
 0x13c   : > { %21259 = vst [vmem:[#allocation101_spill] sm:$0xff] %v17831_v46  ;;  %v1489_v55 = vsel %vm1400_vm0, %v1479_v8, %v1488_v19  ;;  %14923 = vmatpush3.bf16.msra.mxu1 %v16845_v5  ;;  %v17842_v25 = vpack.c.bf16 %v17831_v46, %v17818_v14  ;;  %v1493_v11 = vrot.slane %v21013_v39, 3  ;;  %v1496_v27 = vrot.slane %v21012_v59, 4 }
 0x13d   : > { %v1281_v16 = vpack.c.bf16 %v1252_v35, %v1251_v54  ;;  %14878 = vmatprep.mubr.bf16.mxu1 %v1489_v55  ;;  %14924 = vmatprep.subr.bf16.mxu1 %v16846_v4  ;;  %1296 = vst [vmem:[#allocation2 + $0x68] sm:$0xff] %v17837_v15  ;;  %1310 = vst [vmem:[#allocation2 + $0xd8] sm:$0xff] %v1282_v24  ;;  %v21260_v5 = vshrl.u32 %v17788_v23, 16  ;;  %v21004_v8 = vshrl.u32 %v17837_v15, 16  ;;  %v21007_v54 = vshll.u32 %v17837_v15, 16 }
 0x13e   : > { %1295 = vst [vmem:[#allocation2 + $0x60] sm:$0xff] %v17842_v25  ;;  %v1497_v21 = vor.u32 %v1496_v27, %v1493_v11  ;;  %v21006_v9 = vshrl.u32 %v17842_v25, 16  ;;  %v21005_v48 = vshll.u32 %v17842_v25, 16  ;;  %v1505_v29 = vrot.slane %v21008_v17, 4 }
 0x13f   : > { %v1502_v52 = vrot.slane %v21260_v5, 3  ;;  %1309 = vst [vmem:[#allocation2 + $0xd0] sm:$0xff] %v1281_v16  ;;  %v1520_v24 = vrot.slane %v21004_v8, 3  ;;  %v1523_v55 = vrot.slane %v21007_v54, 4  ;;  %v1536_v27 = vshrl.u32 %v17476_v38, 16 }
 0x140   : > { %14925 = vmatpush3.bf16.msra.mxu1 %v16846_v4  ;;  %v1498_v7 = vsel %vm1400_vm0, %v1488_v19, %v1497_v21  ;;  %v1511_v47 = vrot.slane %v21006_v9, 3  ;;  %v1514_v18 = vrot.slane %v21005_v48, 4  ;;  %v1527_v4 = vshrl.u32 %v17480_v36, 16 }
 0x141   : > { %14974 = vmatprep.subr.bf16.mxu1 %v17851_v26  ;;  %v1506_v35 = vor.u32 %v1505_v29, %v1502_v52  ;;  %v1530_v19 = vshll.u32 %v17480_v36, 16  ;;  %v1539_v5 = vshll.u32 %v17476_v38, 16  ;;  %v1524_v52 = vor.u32 %v1523_v55, %v1520_v24 }
 0x142   : > { %v1515_v11 = vor.u32 %v1514_v18, %v1511_v47  ;;  %v1529_v29 = vrot.slane %v1527_v4, 3  ;;  %v1538_v48 = vrot.slane %v1536_v27, 3  ;;  %v1545_v54 = vshrl.u32 %v17537_v34, 16 }
 0x143   : > { %14879 = vmatmul.mubr.bf16.gmra.mrb[44].mxu1 %v1498_v7  ;;  %v1507_v16 = vsel %vm1400_vm0, %v1497_v21, %v1506_v35  ;;  %v1532_v8 = vrot.slane %v1530_v19, 4  ;;  %v1541_v9 = vrot.slane %v1539_v5, 4  ;;  %v1548_v17 = vshll.u32 %v17537_v34, 16 }
 0x144   : > { %14882 = vmatprep.mubr.bf16.mxu1 %v1507_v16  ;;  %v1516_v7 = vsel %vm1400_vm0, %v1506_v35, %v1515_v11  ;;  %v1525_v36 = vsel %vm1400_vm0, %v1515_v11, %v1524_v52  ;;  %v1554_v38 = vshrl.u32 %v17529_v32, 16  ;;  %v1557_v18 = vshll.u32 %v17529_v32, 16 }
 0x145   : > { %v1533_v21 = vor.u32 %v1532_v8, %v1529_v29  ;;  %v1542_v47 = vor.u32 %v1541_v9, %v1538_v48  ;;  %v1547_v24 = vrot.slane %v1545_v54, 3  ;;  %v1550_v55 = vrot.slane %v1548_v17, 4 }
 0x146   : > { %v21009_v35 = vrot.slane %v17533_v33, 4  ;;  %v1556_v34 = vrot.slane %v1554_v38, 3  ;;  %v1559_v16 = vrot.slane %v1557_v18, 4  ;;  %v1563_v11 = vshrl.u32 %v17599_v37, 16 }
 0x147   : > { %v1534_v4 = vsel %vm1400_vm0, %v1524_v52, %v1533_v21  ;;  %v1543_v19 = vsel %vm1400_vm0, %v1533_v21, %v1542_v47  ;;  %v2043_v8 = vrot.slane %v17525_v31, 4  ;;  %v1551_v9 = vor.u32 %v1550_v55, %v1547_v24 }
 0x148   : > { %v1566_v48 = vshll.u32 %v17599_v37, 16  ;;  %v2045_v32 = vrot.slane %v17595_v3, 4  ;;  %v2047_v17 = vrot.slane %v17587_v2, 4  ;;  %v2049_v27 = vrot.slane %v17663_v13, 4 }
 0x149   : > { %v17896_v54 = vsel %vm2037_vm1, %v21009_v35, %v2043_v8  ;;  %v2051_v5 = vrot.slane %v17652_v30, 4  ;;  %v2053_v52 = vrot.slane %v17731_v40, 4  ;;  %v1572_v31 = vshrl.u32 %v17591_v6, 16 }
 0x14a   : > { %v17903_v29 = vsel %vm2037_vm1, %v2043_v8, %v2045_v32  ;;  %v17906_v2 = vsel %vm2037_vm1, %v2045_v32, %v2047_v17  ;;  %v2055_v3 = vrot.slane %v17722_v50, 4  ;;  %v2059_v38 = vrot.slane %v17788_v23, 4 }
 0x14b   : > { %14883 = vmatmul.mubr.bf16.gmra.mrb[48].mxu1 %v1516_v7  ;;  %v17910_v7 = vsel %vm2037_vm1, %v2047_v17, %v2049_v27  ;;  %v17913_v13 = vsel %vm2037_vm1, %v2049_v27, %v2051_v5  ;;  %v17916_v30 = vsel %vm2037_vm1, %v2051_v5, %v2053_v52  ;;  %v2061_v18 = vrot.slane %v17842_v25, 4 }
 0x14c   : > { %14886 = vmatprep.mubr.bf16.mxu1 %v1525_v36  ;;  %v2057_v36 = vrot.slane %v17794_v53, 4  ;;  %v17920_v21 = vsel %vm2037_vm1, %v2053_v52, %v2055_v3  ;;  %v21010_v50 = vrot.slane %v17837_v15, 4  ;;  %v1560_v24 = vor.u32 %v1559_v16, %v1556_v34 }
 0x14d   : > { %v1575_v55 = vshll.u32 %v17591_v6, 16  ;;  %v17933_v8 = vsel %vm2037_vm1, %v2059_v38, %v2061_v18  ;;  %v1552_v17 = vsel %vm1400_vm0, %v1542_v47, %v1551_v9  ;;  %v1565_v27 = vrot.slane %v1563_v11, 3 }
 0x14e   : > { %v17938_v32 = vsel %vm2037_vm1, %v2061_v18, %v21010_v50  ;;  %v1568_v34 = vrot.slane %v1566_v48, 4  ;;  %v21011_v16 = vrot.slane %v17599_v37, 4  ;;  %v1574_v5 = vrot.slane %v1572_v31, 3 }
 0x14f   : > { %v2075_v52 = vrot.slane %v17591_v6, 4  ;;  %v1577_v35 = vrot.slane %v1575_v55, 4  ;;  %v2081_v18 = vrot.slane %v17735_v28, 4  ;;  %v21016_v50 = vrot.slane %v17726_v51, 4 }
 0x150   : > { %v1581_v48 = vshrl.u32 %v17667_v45, 16  ;;  %v21271_v10 = vshrl.u32 %v17837_v15, 16 }
 0x151   : > { %v17951_v47 = vsel %vm2037_vm1, %v21011_v16, %v2075_v52  ;;  %v17967_v55 = vsel %vm2037_vm1, %v2081_v18, %v21016_v50  ;;  %v1593_v16 = vshll.u32 %v17656_v12, 16 }
 0x152   : > { %v2690_v63 = vrot.slane %v21271_v10, 4 }
 0x153   : > { %14887 = vmatmul.mubr.bf16.gmra.mrb[52].mxu1 %v1534_v4  ;;  %v17927_v4 = vsel %vm2037_vm1, %v2055_v3, %v2057_v36  ;;  %v2077_v3 = vrot.slane %v17667_v45, 4  ;;  %v1595_v46 = vrot.slane %v1593_v16, 4 }
 0x154   : > { %14890 = vmatprep.mubr.bf16.mxu1 %v1543_v19  ;;  %v17930_v19 = vsel %vm2037_vm1, %v2057_v36, %v2059_v38  ;;  %v2079_v36 = vrot.slane %v17656_v12, 4  ;;  %v1561_v38 = vsel %vm1400_vm0, %v1551_v9, %v1560_v24  ;;  %v1584_v9 = vshll.u32 %v17667_v45, 16 }
 0x155   : > { %v17954_v6 = vsel %vm2037_vm1, %v2075_v52, %v2077_v3  ;;  %v1590_v52 = vshrl.u32 %v17656_v12, 16 }
 0x156   : > { %v17957_v11 = vsel %vm2037_vm1, %v2077_v3, %v2079_v36  ;;  %v17962_v31 = vsel %vm2037_vm1, %v2079_v36, %v2081_v18  ;;  %v1583_v3 = vrot.slane %v1581_v48, 3  ;;  %v1586_v59 = vrot.slane %v1584_v9, 4 }
 0x157   : > { %v1592_v36 = vrot.slane %v1590_v52, 3  ;;  %v1599_v18 = vshrl.u32 %v17735_v28, 16 }
 0x158   : > { %v1587_v22 = vor.u32 %v1586_v59, %v1583_v3 }
 0x159   : > { %v1596_v12 = vor.u32 %v1595_v46, %v1592_v36  ;;  %v1601_v9 = vrot.slane %v1599_v18, 3  ;;  %v21265_v46 = vshll.u32 %v17794_v53, 16 }
 0x15b   : > { %14891 = vmatmul.mubr.bf16.gmra.mrb[56].mxu1 %v1552_v17  ;;  %v1569_v17 = vor.u32 %v1568_v34, %v1565_v27  ;;  %v1602_v27 = vshll.u32 %v17735_v28, 16  ;;  %v1611_v34 = vshll.u32 %v17726_v51, 16  ;;  %v2666_v36 = vrot.slane %v21265_v46, 5 }
 0x15c   : > { %14894 = vmatprep.mubr.bf16.mxu1 %v1561_v38  ;;  %v1578_v38 = vor.u32 %v1577_v35, %v1574_v5  ;;  %v1608_v35 = vshrl.u32 %v17726_v51, 16  ;;  %v21261_v5 = vshrl.u32 %v17731_v40, 16 }
 0x15d   : > { %v1570_v39 = vsel %vm1400_vm0, %v1560_v24, %v1569_v17  ;;  %v1604_v59 = vrot.slane %v1602_v27, 4  ;;  %v1613_v3 = vrot.slane %v1611_v34, 4  ;;  %v21267_v27 = vshll.u32 %v17788_v23, 16 }
 0x15e   : > { %v1579_v45 = vsel %vm1400_vm0, %v1569_v17, %v1578_v38  ;;  %v2645_v48 = vrot.slane %v21261_v5, 4  ;;  %v1588_v16 = vsel %vm1400_vm0, %v1578_v38, %v1587_v22  ;;  %v1383_v17 = vld [vmem:[#allocation2 + $0xc0] sm:$0xf]  ;;  %v1610_v28 = vrot.slane %v1608_v35, 3  ;;  %v17989_v5 = vld [vmem:[#allocation2 + $0x70] sm:$0xff] }
 0x15f   : > { %v21266_v38 = vshrl.u32 %v17788_v23, 16  ;;  %v2675_v35 = vrot.slane %v21267_v27, 5  ;;  %v21268_v34 = vshrl.u32 %v17842_v25, 16  ;;  %v1605_v46 = vor.u32 %v1604_v59, %v1601_v9 }
 0x160   : > { %v21024_v62 = vshrl.u32 %v17989_v5, 16  ;;  %v21294_v49 = vshrl.u32 %v17989_v5, 16 }
 0x161   : > { %v2672_v18 = vrot.slane %v21266_v38, 4  ;;  %v21272_v38 = vshll.u32 %v17837_v15, 16 }
 0x162   : > { %v2699_v10 = vrot.slane %v21024_v62, 4  ;;  %v3382_v42 = vrot.slane %v21294_v49, 7 }
 0x163   : > { %14895 = vmatmul.mubr.bf16.gmra.mrb[60].mxu1 %v1570_v39  ;;  %v21262_v39 = vshll.u32 %v17731_v40, 16  ;;  %v1597_v40 = vsel %vm1400_vm0, %v1587_v22, %v1596_v12  ;;  %v21270_v22 = vshll.u32 %v17842_v25, 16  ;;  %v2676_v14 = vor.u32 %v2675_v35, %v2672_v18 }
 0x164   : > { %14898 = vmatprep.mubr.bf16.mxu1 %v1579_v45  ;;  %v21264_v45 = vshrl.u32 %v17794_v53, 16  ;;  %v1620_v53 = vshll.u32 %v1383_v17, 16  ;;  %v2693_v23 = vrot.slane %v21272_v38, 5  ;;  %v1606_v35 = vsel %vm1400_vm0, %v1596_v12, %v1605_v46  ;;  %v18038_v12 = vld [vmem:[#allocation2 + $0x18] sm:$0xff] }
 0x165   : > { %v2648_v24 = vrot.slane %v21262_v39, 5  ;;  %v17991_v39 = vld [vmem:[#allocation2 + $0x78] sm:$0xff] }
 0x166   : > { %v2663_v50 = vrot.slane %v21264_v45, 4  ;;  %v2694_v9 = vor.u32 %v2693_v23, %v2690_v63  ;;  %v21295_v43 = vshrl.u32 %v17991_v39, 16 }
 0x167   : > { %v17982_v52 = vor.u32 %v2648_v24, %v2645_v48  ;;  %v2681_v48 = vrot.slane %v21268_v34, 4  ;;  %v1617_v24 = vshrl.u32 %v1383_v17, 16  ;;  %v21022_v17 = vshrl.u32 %v17991_v39, 16 }
 0x168   : > { %v17999_v45 = vor.u32 %v2666_v36, %v2663_v50  ;;  %v1614_v50 = vor.u32 %v1613_v3, %v1610_v28  ;;  %v21023_v3 = vshll.u32 %v17991_v39, 16  ;;  %v1622_v34 = vrot.slane %v1620_v53, 4 }
 0x169   : > { %21263 = vst [vmem:[#allocation102_spill] sm:$0xff] %v17982_v52  ;;  %v2708_v28 = vrot.slane %v21022_v17, 4  ;;  %v1619_v63 = vrot.slane %v1617_v24, 3  ;;  %v18036_v17 = vld [vmem:[#allocation2 + $0x10] sm:$0xff]  ;;  %v2039_v53 = vrot.slane %v17472_v20, 4  ;;  %v21031_v20 = vshll.u32 %v18038_v12, 16 }
 0x16a   : > { %21269 = vst [vmem:[#allocation103_spill] sm:$0xff] %v17999_v45  ;;  %v18012_v25 = vsel %vm2570_vm2, %v17999_v45, %v2676_v14  ;;  %v3390_v44 = vrot.slane %v21295_v43, 7  ;;  %v21299_v43 = vshll.u32 %v17989_v5, 16  ;;  %v18314_v52 = vld [vmem:[#allocation2 + $0x20] sm:$0xff] }
 0x16b   : > { %14899 = vmatmul.mubr.bf16.gmra.mrb[64].mxu1 %v1588_v16  ;;  %v2684_v16 = vrot.slane %v21270_v22, 5  ;;  %21273 = vst [vmem:[#allocation104_spill] sm:$0xff] %v18012_v25  ;;  %v2711_v22 = vrot.slane %v21023_v3, 5  ;;  %21328 = vst [vmem:[#allocation147_spill] sm:$0xff] %v18314_v52 }
 0x16c   : > { %14902 = vmatprep.mubr.bf16.mxu1 %v1597_v40  ;;  %v21021_v40 = vshll.u32 %v17989_v5, 16 }
 0x16d   : > { %v2685_v27 = vor.u32 %v2684_v16, %v2681_v48  ;;  %v1615_v48 = vsel %vm1400_vm0, %v1605_v46, %v1614_v50  ;;  %v1970_v16 = vld [vmem:[#allocation2] sm:$0xf0]  ;;  %v18034_v23 = vor.u32 %v2711_v22, %v2708_v28  ;;  %v18050_v28 = vld [vmem:[#allocation2 + $0x28] sm:$0xff] }
 0x16e   : > { %v2702_v36 = vrot.slane %v21021_v40, 5  ;;  %v2038_v40 = vrot.slane %v1970_v16, 4  ;;  %v2537_v22 = vld [vmem:[#allocation2 + $0x48] sm:$0xff]  ;;  %v21283_v62 = vshrl.u32 %v18050_v28, 16  ;;  %v21286_v60 = vshll.u32 %v18050_v28, 16 }
 0x16f   : > { %v18015_v59 = vsel %vm2570_vm2, %v2676_v14, %v2685_v27  ;;  %v18022_v18 = vsel %vm2570_vm2, %v2685_v27, %v2694_v9  ;;  %21277 = vst [vmem:[#allocation108_spill] sm:$0xff] %v18034_v23  ;;  %v1623_v27 = vor.u32 %v1622_v34, %v1619_v63  ;;  %v2534_v63 = vld [vmem:[#allocation2 + $0x30] sm:$0xff]  ;;  %v2535_v34 = vld [vmem:[#allocation2 + $0x38] sm:$0xff] }
 0x170   : > { %21274 = vst [vmem:[#allocation105_spill] sm:$0xff] %v18015_v59  ;;  %21275 = vst [vmem:[#allocation106_spill] sm:$0xff] %v18022_v18  ;;  %v2703_v14 = vor.u32 %v2702_v36, %v2699_v10  ;;  %v21027_v10 = vshrl.u32 %v18036_v17, 16  ;;  %v18048_v36 = vld [vmem:[#allocation2 + $0x20] sm:$0xff]  ;;  %v18057_v16 = vshrl.u32 %v2534_v63, 16  ;;  %v3310_v0 = vrot.slane %v21283_v62, 7 }
 0x171   : > { %v1624_v46 = vsel %vm1400_vm0, %v1614_v50, %v1623_v27  ;;  %v18059_v27 = vshrl.u32 %v2535_v34, 16  ;;  %v18069_v50 = vshrl.u32 %v2537_v22, 16  ;;  %v18087_v58 = vshll.u32 %v2535_v34, 16  ;;  %v18100_v62 = vld [vmem:[#allocation2 + $0x88] sm:$0xff] }
 0x172   : > { %v18032_v38 = vsel %vm2570_vm2, %v2694_v9, %v2703_v14  ;;  %v18042_v24 = vsel %vm2570_vm2, %v2703_v14, %v18034_v23  ;;  %v21026_v9 = vshrl.u32 %v18038_v12, 16  ;;  %v21030_v14 = vshll.u32 %v18036_v17, 16 }
 0x173   : > { %14903 = vmatmul.mubr.bf16.gmra.mrb[68].mxu1 %v1606_v35  ;;  %21276 = vst [vmem:[#allocation107_spill] sm:$0xff] %v18032_v38  ;;  %21278 = vst [vmem:[#allocation109_spill] sm:$0xff] %v18042_v24  ;;  %v2040_v35 = vsel %vm2037_vm1, %v2038_v40, %v2039_v53  ;;  %v21036_v61 = vrot.slane %v18059_v27, 7  ;;  %v3313_v57 = vor.u32 %v3310_v0, %v21286_v60  ;;  %v18102_v34 = vshll.u32 %v2537_v22, 16  ;;  %v16849_v60 = vld [vmem:[%s20920_s4 + $0x90] sm:$0xff]  }
 0x174   : > { %14906 = vmatprep.mubr.bf16.mxu1 %v1615_v48  ;;  %v3294_v40 = vrot.slane %v21026_v9, 7  ;;  %v16848_v9 = vld [vmem:[%s20920_s4 + $0x88] sm:$0xff]  }
 0x176   : > { %v3297_v1 = vor.u32 %v3294_v40, %v21031_v20  ;;  %v3318_v20 = vrot.slane %v18057_v16, 7 }
 0x17b   : > { %14907 = vmatmul.mubr.bf16.gmra.mrb[72].mxu1 %v1624_v46  ;;  %v3286_v46 = vrot.slane %v21027_v10, 7  ;;  %v18081_v10 = vshll.u32 %v2534_v63, 16 }
 0x17c   : > { %14926 = vmatprep.mubr.bf16.mxu1 %v2040_v35  ;;  %v21279_v35 = vrot.slane %v17533_v33, 4  ;;  %v21285_v33 = vshll.u32 %v18048_v36, 16 }
 0x17d   : > { %v18073_v48 = vor.u32 %v3286_v46, %v21030_v14  ;;  %21281 = vst [vmem:[#allocation111_spill] sm:$0xff] %v18081_v10  ;;  %v18090_v14 = vsel %vm3278_vm3, %v3286_v46, %v3297_v1  ;;  %v18104_v1 = vld [vmem:[#allocation2 + $0x80] sm:$0xff]  ;;  %v3321_v46 = vor.u32 %v3318_v20, %v18081_v10 }
 0x17e   : > { %v2042_v3 = vsel %vm2037_vm1, %v2039_v53, %v21279_v35  ;;  %v21282_v53 = vshrl.u32 %v18048_v36, 16  ;;  %21284 = vst [vmem:[#allocation112_spill] sm:$0xff] %v18090_v14  ;;  %21287 = vst [vmem:[#allocation113_spill] sm:$0xff] %v18104_v1 }
 0x17f   : > { %21280 = vst [vmem:[#allocation110_spill] sm:$0xff] %v18073_v48  ;;  %v21302_v48 = vshll.u32 %v18100_v62, 16 }
 0x180   : > { %v3302_v35 = vrot.slane %v21282_v53, 7  ;;  %v18121_v53 = vsel %vm3278_vm3, %v3310_v0, %v3321_v46  ;;  %v16850_v0 = vld [vmem:[%s20920_s4 + $0x98] sm:$0xff]   ;;  %v2549_v46 = vld [vmem:[#allocation2 + $0xa8] sm:$0xff] }
 0x181   : > { %21290 = vst [vmem:[#allocation116_spill] sm:$0xff] %v18121_v53 }
 0x182   : > { %v3305_v63 = vor.u32 %v3302_v35, %v21285_v33  ;;  %v21039_v33 = vrot.slane %v18069_v50, 7  ;;  %v18118_v22 = vsel %vm3278_vm3, %v3302_v35, %v3313_v57  ;;  %v2548_v57 = vld [vmem:[#allocation2 + $0xa0] sm:$0xff]  ;;  %v21296_v35 = vshrl.u32 %v18104_v1, 16 }
 0x183   : > { %14927 = vmatmul.mubr.bf16.vlgmr.msra.gmra.mrb[28].mxu1 %v2042_v3  ;;  %v3329_v3 = vor.u32 %v21036_v61, %v18087_v58  ;;  %21289 = vst [vmem:[#allocation115_spill] sm:$0xff] %v18118_v22  ;;  %v18179_v24 = vshll.u32 %v2548_v57, 16 }
 0x184   : > { %14975 = vmatpush3.bf16.msra.mxu1 %v17851_v26  ;;  %14930 = vmatprep.mubr.bf16.mxu1 %v17896_v54  ;;  %v2546_v26 = vld [vmem:[#allocation2 + $0x90] sm:$0xff]  ;;  %v18115_v54 = vsel %vm3278_vm3, %v3294_v40, %v3305_v63  ;;  %v18129_v61 = vor.u32 %v21039_v33, %v18102_v34  ;;  %v2547_v40 = vld [vmem:[#allocation2 + $0x98] sm:$0xff]  ;;  %v3398_v53 = vrot.slane %v21296_v35, 7  ;;  %v16851_v35 = vld [vmem:[%s20920_s4 + $0xa0] sm:$0xff]  }
 0x185   : > { %14976 = vmatprep.subr.bf16.mxu1 %v16848_v9  ;;  %21288 = vst [vmem:[#allocation114_spill] sm:$0xff] %v18115_v54  ;;  %v18124_v56 = vsel %vm3278_vm3, %v3318_v20, %v3329_v3  ;;  %v18133_v63 = vshrl.u32 %v2546_v26, 16  ;;  %v18139_v20 = vshll.u32 %v18104_v1, 16  ;;  %v2550_v3 = vld [vmem:[#allocation2 + $0xb0] sm:$0xff]  ;;  %v18142_v33 = vshll.u32 %v2546_v26, 16 }
 0x186   : > { %21291 = vst [vmem:[#allocation117_spill] sm:$0xff] %v18124_v56  ;;  %21292 = vst [vmem:[#allocation118_spill] sm:$0xff] %v18129_v61  ;;  %v18144_v41 = vshrl.u32 %v2547_v40, 16  ;;  %v18151_v61 = vshll.u32 %v2547_v40, 16  ;;  %v18153_v56 = vshrl.u32 %v2548_v57, 16  ;;  %v21297_v26 = vshrl.u32 %v18100_v62, 16 }
 0x187   : > { %21293 = vst [vmem:[#allocation119_spill] sm:$0xff] %v18139_v20  ;;  %v18160_v54 = vshrl.u32 %v2549_v46, 16  ;;  %v18162_v49 = vshrl.u32 %v2550_v3, 16  ;;  %v3414_v40 = vrot.slane %v18133_v63, 7 }
 0x188   : > { %14977 = vmatpush3.bf16.msra.mxu1 %v16848_v9  ;;  %v2551_v9 = vld [vmem:[#allocation2 + $0xb8] sm:$0xff]  ;;  %v3406_v22 = vrot.slane %v21297_v26, 7  ;;  %v3401_v26 = vor.u32 %v3398_v53, %v18139_v20  ;;  %v3422_v20 = vrot.slane %v18144_v41, 7  ;;  %v3430_v57 = vrot.slane %v18153_v56, 7 }
 0x189   : > { %14978 = vmatprep.subr.bf16.mxu1 %v16849_v60  ;;  %21298 = vst [vmem:[#allocation120_spill] sm:$0xff] %v18160_v54  ;;  %v18172_v14 = vshrl.u32 %v2551_v9, 16  ;;  %v3417_v38 = vor.u32 %v3414_v40, %v18142_v33 }
 0x18a   : > { %v3409_v23 = vor.u32 %v3406_v22, %v21302_v48  ;;  %v18190_v18 = vsel %vm3278_vm3, %v3390_v44, %v3401_v26  ;;  %v3243_v26 = vld [vmem:[#allocation2 + $0x40] sm:$0xff] }
 0x18b   : > { %14931 = vmatmul.mubr.bf16.gmra.mrb[32].mxu1 %v17903_v29  ;;  %v18166_v29 = vor.u32 %v3382_v42, %v21299_v43  ;;  %v18181_v43 = vshll.u32 %v2549_v46, 16  ;;  %21306 = vst [vmem:[#allocation125_spill] sm:$0xff] %v18190_v18  ;;  %v18197_v48 = vsel %vm3278_vm3, %v3406_v22, %v3417_v38  ;;  %v3438_v46 = vrot.slane %v18160_v54, 7 }
 0x18c   : > { %14934 = vmatprep.mubr.bf16.mxu1 %v17906_v2  ;;  %14979 = vmatpush3.bf16.msra.mxu1 %v16849_v60  ;;  %v21301_v2 = vshll.u32 %v17991_v39, 16  ;;  %21308 = vst [vmem:[#allocation127_spill] sm:$0xff] %v18197_v48  ;;  %v3433_v38 = vor.u32 %v3430_v57, %v18179_v24 }
 0x18d   : > { %21300 = vst [vmem:[#allocation121_spill] sm:$0xff] %v18166_v29  ;;  %14980 = vmatprep.subr.bf16.mxu1 %v16850_v0  ;;  %21303 = vst [vmem:[#allocation122_spill] sm:$0xff] %v18181_v43  ;;  %v18183_v29 = vshll.u32 %v2550_v3, 16  ;;  %v3446_v3 = vrot.slane %v18162_v49, 7  ;;  %v3441_v22 = vor.u32 %v3438_v46, %v18181_v43 }
 0x18e   : > { %v3393_v60 = vor.u32 %v3390_v44, %v21301_v2  ;;  %v18193_v2 = vsel %vm3278_vm3, %v3398_v53, %v3409_v23  ;;  %v18205_v44 = vshll.u32 %v2551_v9, 16  ;;  %v3425_v23 = vor.u32 %v3422_v20, %v18151_v61 }
 0x18f   : > { %21304 = vst [vmem:[#allocation123_spill] sm:$0xff] %v18183_v29  ;;  %21307 = vst [vmem:[#allocation126_spill] sm:$0xff] %v18193_v2  ;;  %v21047_v53 = vrot.slane %v18172_v14, 7  ;;  %v18221_v48 = vsel %vm3278_vm3, %v3422_v20, %v3433_v38  ;;  %v18224_v2 = vsel %vm3278_vm3, %v3430_v57, %v3441_v22  ;;  %v3247_v20 = vld [vmem:[#allocation2 + $0x60] sm:$0xff]  ;;  %v3248_v38 = vld [vmem:[#allocation2 + $0x68] sm:$0xff]  ;;  %v21048_v22 = vrot.slane %v18081_v10, 1 }
 0x190   : > { %v18187_v1 = vsel %vm3278_vm3, %v3382_v42, %v3393_v60  ;;  %14981 = vmatpush3.bf16.msra.mxu1 %v16850_v0  ;;  %v16852_v42 = vld [vmem:[%s20920_s4 + $0xa8] sm:$0xff]   ;;  %v3449_v0 = vor.u32 %v3446_v3, %v18183_v29  ;;  %v18214_v60 = vsel %vm3278_vm3, %v3414_v40, %v3425_v23  ;;  %21310 = vst [vmem:[#allocation129_spill] sm:$0xff] %v18221_v48  ;;  %21311 = vst [vmem:[#allocation130_spill] sm:$0xff] %v18224_v2  ;;  %v3246_v23 = vld [vmem:[#allocation2 + $0x58] sm:$0xff] }
 0x191   : > { %21305 = vst [vmem:[#allocation124_spill] sm:$0xff] %v18187_v1  ;;  %14982 = vmatprep.subr.bf16.mxu1 %v16851_v35  ;;  %21309 = vst [vmem:[#allocation128_spill] sm:$0xff] %v18214_v60  ;;  %v3457_v9 = vor.u32 %v21047_v53, %v18205_v44  ;;  %v16854_v57 = vld [vmem:[%s20920_s4 + $0xb8] sm:$0xff]   ;;  %v18251_v53 = vshll.u32 %v3248_v38, 16  ;;  %v18265_v48 = vld [vmem:[%s20920_s4 + $0xc0] sm:$0xff]   ;;  %v18267_v60 = vshrl.u32 %v3246_v23, 16 }
 0x192   : > { %v18227_v18 = vsel %vm3278_vm3, %v3438_v46, %v3449_v0  ;;  %v18240_v46 = vshrl.u32 %v3243_v26, 16  ;;  %v18280_v25 = vshrl.u32 %v3248_v38, 16 }
 0x193   : > { %14935 = vmatmul.mubr.bf16.gmra.mrb[36].mxu1 %v17910_v7  ;;  %21312 = vst [vmem:[#allocation131_spill] sm:$0xff] %v18227_v18  ;;  %v16853_v7 = vld [vmem:[%s20920_s4 + $0xb0] sm:$0xff]   ;;  %v18233_v40 = vsel %vm3278_vm3, %v3446_v3, %v3457_v9  ;;  %v18245_v3 = vshll.u32 %v3246_v23, 16  ;;  %v4459_v9 = vrot.slane %v18087_v58, 1  ;;  %21316 = vst [vmem:[#allocation135_spill] sm:$0xff] %v18251_v53 }
 0x194   : > { %14938 = vmatprep.mubr.bf16.mxu1 %v17913_v13  ;;  %14983 = vmatpush3.bf16.msra.mxu1 %v16851_v35  ;;  %21313 = vst [vmem:[#allocation132_spill] sm:$0xff] %v18233_v40  ;;  %v18235_v13 = vshll.u32 %v3243_v26, 16  ;;  %v3245_v35 = vld [vmem:[#allocation2 + $0x50] sm:$0xff]  ;;  %v4455_v40 = vor.u32 %v21048_v22, %v18057_v16  ;;  %v18269_v22 = vshrl.u32 %v3247_v20, 16  ;;  %21319 = vst [vmem:[#allocation138_spill] sm:$0xff] %v18280_v25 }
 0x195   : > { %14984 = vmatprep.subr.bf16.mxu1 %v16852_v42  ;;  %v18243_v0 = vshll.u32 %v3245_v35, 16  ;;  %21314 = vst [vmem:[#allocation133_spill] sm:$0xff] %v18245_v3  ;;  %v18258_v18 = vshrl.u32 %v3245_v35, 16  ;;  %v4463_v2 = vor.u32 %v4459_v9, %v18059_v27  ;;  %v4491_v59 = vrot.slane %v18245_v3, 1 }
 0x196   : > { %v4467_v26 = vrot.slane %v18235_v13, 1 }
 0x197   : > { %v4483_v1 = vrot.slane %v18243_v0, 1 }
 0x198   : > { %14985 = vmatpush3.bf16.msra.mxu1 %v16852_v42  ;;  %v18249_v42 = vshll.u32 %v3247_v20, 16  ;;  %v18276_v35 = vsel %vm4416_vm4, %v4463_v2, %v4467_v26  ;;  %v4507_v20 = vrot.slane %v18251_v53, 1  ;;  %v4495_v2 = vor.u32 %v4491_v59, %v18267_v60 }
 0x199   : > { %14986 = vmatprep.subr.bf16.mxu1 %v16853_v7  ;;  %21318 = vst [vmem:[#allocation137_spill] sm:$0xff] %v18276_v35  ;;  %v18307_v35 = vld [vmem:[#allocation2 + $0xc8] sm:$0xff] }
 0x19a   : > { %21315 = vst [vmem:[#allocation134_spill] sm:$0xff] %v18249_v42  ;;  %v4499_v23 = vrot.slane %v18249_v42, 1  ;;  %v18293_v38 = vor.u32 %v4507_v20, %v18280_v25  ;;  %21326 = vst [vmem:[#allocation145_spill] sm:$0xff] %v18307_v35 }
 0x19b   : > { %14939 = vmatmul.mubr.bf16.gmra.mrb[40].mxu1 %v17916_v30  ;;  %v4475_v30 = vrot.slane %v18102_v34, 1 }
 0x19c   : > { %14942 = vmatprep.mubr.bf16.mxu1 %v17920_v21  ;;  %14987 = vmatpush3.bf16.msra.mxu1 %v16853_v7  ;;  %v18272_v21 = vsel %vm4416_vm4, %v4455_v40, %v4459_v9  ;;  %v4471_v7 = vor.u32 %v4467_v26, %v18240_v46  ;;  %v4487_v9 = vor.u32 %v4483_v1, %v18258_v18 }
 0x19d   : > { %14988 = vmatprep.subr.bf16.mxu1 %v16854_v57  ;;  %21317 = vst [vmem:[#allocation136_spill] sm:$0xff] %v18272_v21  ;;  %v4479_v40 = vor.u32 %v4475_v30, %v18069_v50  ;;  %v4503_v26 = vor.u32 %v4499_v23, %v18269_v22  ;;  %21321 = vst [vmem:[#allocation140_spill] sm:$0xff] %v18293_v38  ;;  %v4579_v38 = vrot.slane %v18183_v29, 1 }
 0x19e   : > { %v18283_v45 = vsel %vm4416_vm4, %v4471_v7, %v4475_v30  ;;  %v18295_v7 = vld [vmem:[#allocation2 + $0xc0] sm:$0xff]  ;;  %v18304_v30 = vsel %vm4416_vm4, %v4495_v2, %v4499_v23  ;;  %v18323_v2 = vld [vmem:[#allocation2 + $0x28] sm:$0xff] }
 0x19f   : > { %21320 = vst [vmem:[#allocation139_spill] sm:$0xff] %v18283_v45  ;;  %21322 = vst [vmem:[#allocation141_spill] sm:$0xff] %v18295_v7  ;;  %v18298_v45 = vsel %vm4416_vm4, %v4479_v40, %v4483_v1  ;;  %v18310_v21 = vsel %vm4416_vm4, %v4503_v26, %v4507_v20  ;;  %v21051_v1 = vrot.slane %v18142_v33, 1 }
 0x1a0   : > { %14989 = vmatpush3.bf16.msra.mxu1 %v16854_v57  ;;  %21323 = vst [vmem:[#allocation142_spill] sm:$0xff] %v18298_v45  ;;  %v18301_v57 = vsel %vm4416_vm4, %v4487_v9, %v4491_v59  ;;  %21325 = vst [vmem:[#allocation144_spill] sm:$0xff] %v18304_v30  ;;  %v4555_v59 = vrot.slane %v18151_v61, 1  ;;  %v4571_v9 = vrot.slane %v18181_v43, 1  ;;  %v4587_v45 = vrot.slane %v18205_v44, 1 }
 0x1a1   : > { %15038 = vmatprep.subr.bf16.mxu1 %v18265_v48  ;;  %21324 = vst [vmem:[#allocation143_spill] sm:$0xff] %v18301_v57  ;;  %21327 = vst [vmem:[#allocation146_spill] sm:$0xff] %v18310_v21  ;;  %v21334_v43 = vshll.u32 %v18295_v7, 16 }
 0x1a2   : > { %21329 = vst [vmem:[#allocation148_spill] sm:$0xff] %v18323_v2  ;;  %v4559_v26 = vor.u32 %v4555_v59, %v18144_v41  ;;  %v4575_v30 = vor.u32 %v4571_v9, %v18160_v54 }
 0x1a3   : > { %14943 = vmatmul.mubr.bf16.gmra.mrb[44].mxu1 %v17927_v4  ;;  %v4563_v4 = vrot.slane %v18179_v24, 1  ;;  %v4595_v54 = vrot.slane %v21334_v43, 1 }
 0x1a4   : > { %14946 = vmatprep.mubr.bf16.mxu1 %v17930_v19  ;;  %v4551_v19 = vor.u32 %v21051_v1, %v18133_v63  ;;  %v4583_v1 = vor.u32 %v4579_v38, %v18162_v49  ;;  %v18347_v40 = vsel %vm4416_vm4, %v4575_v30, %v4579_v38  ;;  %v21338_v30 = vshrl.u32 %v18314_v52, 16 }
 0x1a5   : > { %v4567_v21 = vor.u32 %v4563_v4, %v18153_v56  ;;  %v18338_v57 = vsel %vm4416_vm4, %v4559_v26, %v4563_v4  ;;  %21333 = vst [vmem:[#allocation152_spill] sm:$0xff] %v18347_v40  ;;  %v21336_v26 = vshll.u32 %v18307_v35, 16 }
 0x1a6   : > { %v18335_v20 = vsel %vm4416_vm4, %v4551_v19, %v4555_v59  ;;  %21331 = vst [vmem:[#allocation150_spill] sm:$0xff] %v18338_v57  ;;  %v18354_v4 = vsel %vm4416_vm4, %v4583_v1, %v4587_v45  ;;  %v4591_v19 = vor.u32 %v4587_v45, %v18172_v14  ;;  %v5107_v43 = vrot.slane %v21338_v30, 3 }
 0x1a7   : > { %21330 = vst [vmem:[#allocation149_spill] sm:$0xff] %v18335_v20  ;;  %v18344_v23 = vsel %vm4416_vm4, %v4567_v21, %v4571_v9  ;;  %21335 = vst [vmem:[#allocation153_spill] sm:$0xff] %v18354_v4  ;;  %v4603_v29 = vrot.slane %v21336_v26, 1  ;;  %v21337_v21 = vshrl.u32 %v18295_v7, 16  ;;  %v21340_v9 = vshrl.u32 %v18307_v35, 16 }
 0x1a8   : > { %21332 = vst [vmem:[#allocation151_spill] sm:$0xff] %v18344_v23  ;;  %v21342_v45 = vshll.u32 %v18314_v52, 16  ;;  %v2067_v30 = vrot.slane %v17991_v39, 4  ;;  %v18394_v39 = vld [vmem:[#allocation2 + $0x78] sm:$0xff]  ;;  %v5191_v23 = vrot.slane %v18251_v53, 4 }
 0x1a9   : > { %v4599_v38 = vor.u32 %v4595_v54, %v21337_v21  ;;  %v18369_v1 = vor.u32 %v4603_v29, %v21340_v9  ;;  %v2065_v21 = vrot.slane %v17989_v5, 4  ;;  %v18384_v9 = vld [vmem:[#allocation2 + $0x70] sm:$0xff]  ;;  %21350 = vst [vmem:[#allocation160_spill] sm:$0xff] %v18394_v39  ;;  %v21359_v7 = vshll.u32 %v18394_v39, 16 }
 0x1aa   : > { %v5110_v59 = vrot.slane %v21342_v45, 4  ;;  %21347 = vst [vmem:[#allocation158_spill] sm:$0xff] %v18384_v9  ;;  %v5143_v45 = vrot.slane %v18240_v46, 3  ;;  %v21355_v57 = vshrl.u32 %v18384_v9, 16 }
 0x1ab   : > { %14947 = vmatmul.mubr.bf16.gmra.mrb[48].mxu1 %v17933_v8  ;;  %v18365_v8 = vsel %vm4416_vm4, %v4591_v19, %v4595_v54  ;;  %21341 = vst [vmem:[#allocation155_spill] sm:$0xff] %v18369_v1  ;;  %v18374_v26 = vsel %vm4416_vm4, %v4599_v38, %v4603_v29  ;;  %v21346_v54 = vshll.u32 %v18323_v2, 16  ;;  %v5146_v29 = vrot.slane %v18235_v13, 4 }
 0x1ac   : > { %14950 = vmatprep.mubr.bf16.mxu1 %v17938_v32  ;;  %21339 = vst [vmem:[#allocation154_spill] sm:$0xff] %v18365_v8  ;;  %21343 = vst [vmem:[#allocation156_spill] sm:$0xff] %v18374_v26  ;;  %v21344_v32 = vshrl.u32 %v18323_v2, 16  ;;  %v18380_v40 = vor.u32 %v5110_v59, %v5107_v43  ;;  %v21349_v38 = vrot.slane %v17837_v15, 4  ;;  %v2068_v5 = vsel %vm2037_vm1, %v2065_v21, %v2067_v30  ;;  %v18396_v59 = vld [vmem:[#allocation2 + $0x88] sm:$0xff] }
 0x1ad   : > { %v5119_v19 = vrot.slane %v21346_v54, 4  ;;  %21351 = vst [vmem:[#allocation161_spill] sm:$0xff] %v18396_v59  ;;  %v18403_v43 = vor.u32 %v5146_v29, %v5143_v45  ;;  %v2071_v26 = vrot.slane %v18100_v62, 4  ;;  %v5170_v8 = vrot.slane %v18267_v60, 3 }
 0x1ae   : > { %v5116_v4 = vrot.slane %v21344_v32, 3  ;;  %21345 = vst [vmem:[#allocation157_spill] sm:$0xff] %v18380_v40  ;;  %v2066_v32 = vsel %vm2037_vm1, %v21349_v38, %v2065_v21  ;;  %v5164_v21 = vrot.slane %v18243_v0, 4  ;;  %v16975_v38 = vld [vmem:[#allocation2 + $0x80] sm:$0xff]  ;;  %v5197_v45 = vrot.slane %v21355_v57, 3 }
 0x1af   : > { %21353 = vst [vmem:[#allocation163_spill] sm:$0xff] %v18403_v43  ;;  %v21356_v29 = vshll.u32 %v18384_v9, 16  ;;  %v21358_v15 = vshrl.u32 %v18394_v39, 16  ;;  %v5209_v53 = vrot.slane %v21359_v7, 4  ;;  %v21365_v7 = vshll.u32 %v18396_v59, 16 }
 0x1b0   : > { %v18386_v1 = vor.u32 %v5119_v19, %v5116_v4  ;;  %v5161_v19 = vrot.slane %v18258_v18, 3 }
 0x1b1   : > { %v5200_v20 = vrot.slane %v21356_v29, 4  ;;  %v5206_v35 = vrot.slane %v21358_v15, 3 }
 0x1b2   : > { %21348 = vst [vmem:[#allocation159_spill] sm:$0xff] %v18386_v1  ;;  %v18401_v4 = vsel %vm1400_vm0, %v18380_v40, %v18386_v1  ;;  %v5173_v1 = vrot.slane %v18245_v3, 4  ;;  %v18415_v54 = vor.u32 %v5164_v21, %v5161_v19  ;;  %v5188_v40 = vrot.slane %v18280_v25, 3  ;;  %v5775_v25 = vld [vmem:[#allocation2 + $0x88] sm:$0xff] }
 0x1b3   : > { %14951 = vmatmul.mubr.bf16.gmra.mrb[52].mxu1 %v2066_v32  ;;  %21352 = vst [vmem:[#allocation162_spill] sm:$0xff] %v18401_v4  ;;  %v2069_v32 = vrot.slane %v16975_v38, 4  ;;  %v5179_v4 = vrot.slane %v18269_v22, 3  ;;  %v5182_v38 = vrot.slane %v18249_v42, 4 }
 0x1b4   : > { %14954 = vmatprep.mubr.bf16.mxu1 %v2068_v5  ;;  %21354 = vst [vmem:[#allocation164_spill] sm:$0xff] %v18415_v54  ;;  %v5174_v43 = vor.u32 %v5173_v1, %v5170_v8  ;;  %v5192_v1 = vor.u32 %v5191_v23, %v5188_v40  ;;  %v5201_v5 = vor.u32 %v5200_v20, %v5197_v45  ;;  %v5227_v20 = vrot.slane %v21365_v7, 4  ;;  %v2529_v45 = vld [vmem:[#allocation2 + $0x8] sm:$0xff] }
 0x1b5   : > { %v2070_v19 = vsel %vm2037_vm1, %v2067_v30, %v2069_v32  ;;  %v5183_v8 = vor.u32 %v5182_v38, %v5179_v4  ;;  %v2072_v57 = vsel %vm2037_vm1, %v2069_v32, %v2071_v26  ;;  %v21361_v30 = vshrl.u32 %v18396_v59, 16  ;;  %v2528_v32 = vld [vmem:[#allocation2] sm:$0xf0] }
 0x1b6   : > { %v18429_v21 = vsel %vm1400_vm0, %v18415_v54, %v5174_v43  ;;  %v18445_v23 = vsel %vm1400_vm0, %v5192_v1, %v5201_v5  ;;  %v18447_v40 = vor.u32 %v5209_v53, %v5206_v35  ;;  %v21368_v38 = vrot.slane %v17599_v37, 4  ;;  %v5769_v54 = vld [vmem:[#allocation2 + $0x58] sm:$0xff] }
 0x1b7   : > { %21357 = vst [vmem:[#allocation165_spill] sm:$0xff] %v18429_v21  ;;  %v18437_v29 = vsel %vm1400_vm0, %v5174_v43, %v5183_v8  ;;  %v5224_v9 = vrot.slane %v21361_v30, 3  ;;  %v18442_v4 = vsel %vm1400_vm0, %v5183_v8, %v5192_v1  ;;  %21363 = vst [vmem:[#allocation168_spill] sm:$0xff] %v18445_v23  ;;  %v2572_v53 = vshrl.u32 %v2528_v32, 16 }
 0x1b8   : > { %21360 = vst [vmem:[#allocation166_spill] sm:$0xff] %v18437_v29  ;;  %21362 = vst [vmem:[#allocation167_spill] sm:$0xff] %v18442_v4  ;;  %v18453_v15 = vsel %vm1400_vm0, %v5201_v5, %v18447_v40  ;;  %v2575_v35 = vshll.u32 %v2528_v32, 16  ;;  %v2580_v8 = vshrl.u32 %v2529_v45, 16  ;;  %v2583_v1 = vshll.u32 %v2529_v45, 16 }
 0x1b9   : > { %21364 = vst [vmem:[#allocation169_spill] sm:$0xff] %v18447_v40  ;;  %21366 = vst [vmem:[#allocation170_spill] sm:$0xff] %v18453_v15  ;;  %v18455_v43 = vor.u32 %v5227_v20, %v5224_v9  ;;  %v1994_v40 = vld [vmem:[#allocation2 + $0xc0] sm:$0xf]  ;;  %v21369_v9 = vshrl.u32 %v18036_v17, 16  ;;  %v21373_v32 = vshrl.u32 %v18048_v36, 16 }
 0x1ba   : > { %v2577_v30 = vrot.slane %v2575_v35, 5  ;;  %v2582_v7 = vrot.slane %v2580_v8, 4  ;;  %v2585_v5 = vrot.slane %v2583_v1, 5  ;;  %v21375_v8 = vshrl.u32 %v18050_v28, 16 }
 0x1bb   : > { %14955 = vmatmul.mubr.bf16.gmra.mrb[56].mxu1 %v2070_v19  ;;  %21367 = vst [vmem:[#allocation171_spill] sm:$0xff] %v18455_v43  ;;  %v2074_v19 = vsel %vm2037_vm1, %v2071_v26, %v21368_v38  ;;  %v2591_v20 = vrot.slane %v21369_v9, 4  ;;  %v21370_v43 = vshll.u32 %v18036_v17, 16  ;;  %v21371_v26 = vshrl.u32 %v18038_v12, 16  ;;  %v18477_v17 = vld [vmem:[#allocation2 + $0x30] sm:$0xff] }
 0x1bc   : > { %14958 = vmatprep.mubr.bf16.mxu1 %v2072_v57  ;;  %v2574_v57 = vrot.slane %v2572_v53, 4  ;;  %v2609_v45 = vrot.slane %v21373_v32, 4  ;;  %v21374_v53 = vshll.u32 %v18048_v36, 16  ;;  %v2618_v1 = vrot.slane %v21375_v8, 4  ;;  %21377 = vst [vmem:[#allocation172_spill] sm:$0xff] %v18477_v17  ;;  %v18484_v36 = vld [vmem:[#allocation2 + $0x38] sm:$0xff] }
 0x1bd   : > { %v2594_v37 = vrot.slane %v21370_v43, 5  ;;  %v2600_v38 = vrot.slane %v21371_v26, 4  ;;  %v21376_v9 = vshll.u32 %v18050_v28, 16  ;;  %v2627_v43 = vrot.slane %v18057_v16, 4  ;;  %21378 = vst [vmem:[#allocation173_spill] sm:$0xff] %v18484_v36 }
 0x1be   : > { %v2612_v35 = vrot.slane %v21374_v53, 5  ;;  %v2636_v26 = vrot.slane %v18059_v27, 4  ;;  %v2085_v32 = vrot.slane %v1994_v40, 4  ;;  %v2578_v53 = vor.u32 %v2577_v30, %v2574_v57 }
 0x1bf   : > { %v2621_v15 = vrot.slane %v21376_v9, 5  ;;  %v21068_v28 = vrot.slane %v18314_v52, 4  ;;  %v5831_v8 = vrot.slane %v18323_v2, 4  ;;  %v2586_v9 = vor.u32 %v2585_v5, %v2582_v7  ;;  %v5770_v2 = vld [vmem:[#allocation2 + $0x60] sm:$0xff] }
 0x1c0   : > { %v5833_v16 = vrot.slane %v18477_v17, 4  ;;  %v2613_v4 = vor.u32 %v2612_v35, %v2609_v45  ;;  %v6441_v59 = vshrl.u32 %v5770_v2, 16  ;;  %v6444_v39 = vshll.u32 %v5770_v2, 16 }
 0x1c1   : > { %v2622_v29 = vor.u32 %v2621_v15, %v2618_v1  ;;  %v21382_v15 = vrot.slane %v17726_v51, 4 }
 0x1c2   : > { %v18499_v30 = vsel %vm2037_vm1, %v5831_v8, %v5833_v16 }
 0x1c3   : > { %14959 = vmatmul.mubr.bf16.gmra.mrb[60].mxu1 %v2074_v19  ;;  %21380 = vst [vmem:[#allocation175_spill] sm:$0xff] %v18499_v30  ;;  %v2086_v5 = vsel %vm2037_vm1, %v21382_v15, %v2085_v32  ;;  %v18524_v1 = vsel %vm2570_vm2, %v2613_v4, %v2622_v29 }
 0x1c4   : > { %14962 = vmatprep.mubr.bf16.mxu1 %v17951_v47  ;;  %v21372_v47 = vshll.u32 %v18038_v12, 16  ;;  %v2630_v12 = vrot.slane %v18081_v10, 5 }
 0x1c6   : > { %v2603_v19 = vrot.slane %v21372_v47, 5  ;;  %v2639_v47 = vrot.slane %v18087_v58, 5  ;;  %v18493_v58 = vsel %vm2037_vm1, %v21068_v28, %v5831_v8  ;;  %v2631_v40 = vor.u32 %v2630_v12, %v2627_v43  ;;  %v18527_v43 = vld [vmem:[#allocation2 + $0x48] sm:$0xff]  ;;  %v18529_v12 = vld [vmem:[#allocation2 + $0xa0] sm:$0xff]  ;;  %v18545_v8 = vld [vmem:[#allocation2 + $0xb8] sm:$0xff] }
 0x1c7   : > { %21379 = vst [vmem:[#allocation174_spill] sm:$0xff] %v18493_v58  ;;  %21383 = vst [vmem:[#allocation177_spill] sm:$0xff] %v18527_v43  ;;  %v18558_v28 = vld [vmem:[#allocation2 + $0x80] sm:$0xff]  ;;  %v5867_v15 = vrot.slane %v18545_v8, 4 }
 0x1c8   : > { %v2604_v23 = vor.u32 %v2603_v19, %v2600_v38  ;;  %v18496_v57 = vor.u32 %v2639_v47, %v2636_v26  ;;  %v18513_v38 = vld [vmem:[#allocation2 + $0x90] sm:$0xff]  ;;  %v18515_v19 = vld [vmem:[#allocation2 + $0x98] sm:$0xff]  ;;  %v18531_v26 = vld [vmem:[#allocation2 + $0xa8] sm:$0xff]  ;;  %v18535_v47 = vsel %vm2570_vm2, %v2622_v29, %v2631_v40 }
 0x1c9   : > { %v18550_v29 = vld [vmem:[#allocation2 + $0xc0] sm:$0xff]  ;;  %v5863_v51 = vrot.slane %v18531_v26, 4 }
 0x1ca   : > { %v18521_v35 = vsel %vm2570_vm2, %v2604_v23, %v2613_v4  ;;  %v18560_v4 = vld [vmem:[#allocation2 + $0xd0] sm:$0xff]  ;;  %v5869_v30 = vrot.slane %v18550_v29, 4 }
 0x1cb   : > { %14963 = vmatmul.mubr.bf16.gmra.mrb[64].mxu1 %v17954_v6  ;;  %v2595_v6 = vor.u32 %v2594_v37, %v2591_v20  ;;  %v2587_v20 = vsel %vm2570_vm2, %v2578_v53, %v2586_v9  ;;  %v18543_v53 = vld [vmem:[#allocation2 + $0xb0] sm:$0xff] }
 0x1cc   : > { %14966 = vmatprep.mubr.bf16.mxu1 %v17957_v11  ;;  %v21067_v11 = vrot.slane %v18484_v36, 4  ;;  %v5865_v32 = vrot.slane %v18543_v53, 4 }
 0x1cd   : > { %v18511_v37 = vsel %vm2570_vm2, %v2586_v9, %v2595_v6  ;;  %v18518_v45 = vsel %vm2570_vm2, %v2595_v6, %v2604_v23  ;;  %v18539_v23 = vsel %vm2570_vm2, %v2631_v40, %v18496_v57  ;;  %v18552_v6 = vld [vmem:[#allocation2 + $0xc8] sm:$0xff]  ;;  %v5859_v40 = vrot.slane %v18515_v19, 4 }
 0x1ce   : > { %v18504_v7 = vsel %vm2037_vm1, %v5833_v16, %v21067_v11  ;;  %v21069_v16 = vrot.slane %v18513_v38, 4  ;;  %v5871_v58 = vrot.slane %v18552_v6, 4  ;;  %v18582_v21 = vsel %vm2037_vm1, %v5863_v51, %v5865_v32 }
 0x1cf   : > { %21381 = vst [vmem:[#allocation176_spill] sm:$0xff] %v18504_v7  ;;  %21387 = vst [vmem:[#allocation181_spill] sm:$0xff] %v18582_v21  ;;  %v21396_v21 = vshll.u32 %v18484_v36, 16 }
 0x1d0   : > { %v18568_v9 = vsel %vm2037_vm1, %v21069_v16, %v5859_v40  ;;  %v18585_v16 = vsel %vm2037_vm1, %v5865_v32, %v5867_v15 }
 0x1d1   : > { %21384 = vst [vmem:[#allocation178_spill] sm:$0xff] %v18568_v9  ;;  %21388 = vst [vmem:[#allocation182_spill] sm:$0xff] %v18585_v16  ;;  %v21070_v9 = vrot.slane %v18560_v4, 4 }
 0x1d3   : > { %14967 = vmatmul.mubr.bf16.gmra.mrb[68].mxu1 %v17962_v31  ;;  %v18602_v32 = vsel %vm2037_vm1, %v5871_v58, %v21070_v9  ;;  %v21392_v31 = vshrl.u32 %v18477_v17, 16 }
 0x1d4   : > { %14970 = vmatprep.mubr.bf16.mxu1 %v17967_v55  ;;  %v5861_v55 = vrot.slane %v18529_v12, 4  ;;  %21391 = vst [vmem:[#allocation185_spill] sm:$0xff] %v18602_v32 }
 0x1d6   : > { %v18573_v11 = vsel %vm2037_vm1, %v5859_v40, %v5861_v55  ;;  %v18576_v7 = vsel %vm2037_vm1, %v5861_v55, %v5863_v51  ;;  %v18591_v55 = vsel %vm2037_vm1, %v5867_v15, %v5869_v30  ;;  %v21397_v15 = vshrl.u32 %v18527_v43, 16 }
 0x1d7   : > { %21385 = vst [vmem:[#allocation179_spill] sm:$0xff] %v18573_v11  ;;  %21386 = vst [vmem:[#allocation180_spill] sm:$0xff] %v18576_v7  ;;  %v18594_v7 = vsel %vm2037_vm1, %v5869_v30, %v5871_v58  ;;  %v21393_v58 = vshll.u32 %v18477_v17, 16  ;;  %v5768_v11 = vld [vmem:[#allocation2 + $0x50] sm:$0xff]  ;;  %v21394_v30 = vshrl.u32 %v18484_v36, 16  ;;  %v21398_v40 = vshll.u32 %v18527_v43, 16 }
 0x1d8   : > { %21389 = vst [vmem:[#allocation183_spill] sm:$0xff] %v18591_v55  ;;  %21390 = vst [vmem:[#allocation184_spill] sm:$0xff] %v18594_v7  ;;  %v5766_v7 = vld [vmem:[#allocation2 + $0x40] sm:$0xff]  ;;  %v6389_v55 = vrot.slane %v21392_v31, 4  ;;  %v6401_v31 = vrot.slane %v21396_v21, 5  ;;  %v6416_v17 = vrot.slane %v21397_v15, 4 }
 0x1d9   : > { %v6405_v16 = vshrl.u32 %v5766_v7, 16  ;;  %v6408_v9 = vshll.u32 %v5766_v7, 16  ;;  %v6419_v10 = vrot.slane %v21398_v40, 5  ;;  %v16856_v21 = vld [vmem:[%s20920_s4 + $0xc8] sm:$0xff]   ;;  %v6426_v43 = vshll.u32 %v5768_v11, 16  ;;  %v5772_v7 = vld [vmem:[#allocation2 + $0x70] sm:$0xff] }
 0x1da   : > { %v5771_v36 = vld [vmem:[#allocation2 + $0x68] sm:$0xff] }
 0x1db   : > { %14971 = vmatmul.mubr.bf16.gmra.mrb[72].mxu1 %v2086_v5  ;;  %v6392_v5 = vrot.slane %v21393_v58, 5  ;;  %v6410_v52 = vrot.slane %v6408_v9, 5  ;;  %v6420_v15 = vor.u32 %v6419_v10, %v6416_v17  ;;  %v5773_v9 = vld [vmem:[#allocation2 + $0x78] sm:$0xff]  ;;  %v6428_v10 = vrot.slane %v6426_v43, 5 }
 0x1dc   : > { %14990 = vmatprep.mubr.bf16.mxu1 %v2587_v20  ;;  %v6398_v20 = vrot.slane %v21394_v30, 4  ;;  %v6450_v58 = vshrl.u32 %v5771_v36, 16  ;;  %v6471_v3 = vshll.u32 %v5773_v9, 16 }
 0x1dd   : > { %v18620_v32 = vor.u32 %v6392_v5, %v6389_v55  ;;  %v6407_v55 = vrot.slane %v6405_v16, 4  ;;  %v6423_v5 = vshrl.u32 %v5768_v11, 16  ;;  %v16857_v11 = vld [vmem:[%s20920_s4 + $0xd0] sm:$0xff]  }
 0x1de   : > { %v6402_v51 = vor.u32 %v6401_v31, %v6398_v20  ;;  %v6432_v20 = vshrl.u32 %v5769_v54, 16  ;;  %v6435_v31 = vshll.u32 %v5769_v54, 16  ;;  %v6443_v54 = vrot.slane %v6441_v59, 4  ;;  %v16858_v59 = vld [vmem:[%s20920_s4 + $0xd8] sm:$0xff]  }
 0x1df   : > { %21395 = vst [vmem:[#allocation186_spill] sm:$0xff] %v18620_v32  ;;  %v6425_v30 = vrot.slane %v6423_v5, 4  ;;  %v6411_v16 = vor.u32 %v6410_v52, %v6407_v55  ;;  %v6452_v55 = vrot.slane %v6450_v58, 4 }
 0x1e0   : > { %v18637_v40 = vsel %vm2570_vm2, %v18620_v32, %v6402_v51  ;;  %v6434_v17 = vrot.slane %v6432_v20, 4  ;;  %v6453_v32 = vshll.u32 %v5771_v36, 16  ;;  %v6459_v20 = vshrl.u32 %v5772_v7, 16 }
 0x1e1   : > { %21399 = vst [vmem:[#allocation187_spill] sm:$0xff] %v18637_v40  ;;  %v18646_v52 = vsel %vm2570_vm2, %v6402_v51, %v6411_v16  ;;  %v18649_v2 = vsel %vm2570_vm2, %v6411_v16, %v6420_v15  ;;  %v6462_v36 = vshll.u32 %v5772_v7, 16  ;;  %v6468_v40 = vshrl.u32 %v5773_v9, 16 }
 0x1e2   : > { %21400 = vst [vmem:[#allocation188_spill] sm:$0xff] %v18646_v52  ;;  %v6455_v43 = vrot.slane %v6453_v32, 5  ;;  %v6461_v32 = vrot.slane %v6459_v20, 4  ;;  %v21401_v16 = vshrl.u32 %v18558_v28, 16 }
 0x1e3   : > { %14991 = vmatmul.mubr.bf16.vlgmr.msra.gmra.mrb[28].mxu1 %v18511_v37  ;;  %v6429_v37 = vor.u32 %v6428_v10, %v6425_v30  ;;  %v6464_v58 = vrot.slane %v6462_v36, 5  ;;  %v6470_v30 = vrot.slane %v6468_v40, 4  ;;  %v21402_v10 = vshll.u32 %v18558_v28, 16 }
 0x1e4   : > { %15039 = vmatpush3.bf16.msra.mxu1 %v18265_v48  ;;  %14994 = vmatprep.mubr.bf16.mxu1 %v18518_v45  ;;  %v6437_v48 = vrot.slane %v6435_v31, 5  ;;  %v6446_v45 = vrot.slane %v6444_v39, 5  ;;  %v6456_v52 = vor.u32 %v6455_v43, %v6452_v55  ;;  %v6479_v31 = vrot.slane %v21401_v16, 4 }
 0x1e5   : > { %15040 = vmatprep.subr.bf16.mxu1 %v16856_v21  ;;  %v18652_v42 = vsel %vm2570_vm2, %v6420_v15, %v6429_v37  ;;  %v6473_v15 = vrot.slane %v6471_v3, 5  ;;  %v6465_v9 = vor.u32 %v6464_v58, %v6461_v32  ;;  %v21404_v3 = vshll.u32 %v18513_v38, 16 }
 0x1e6   : > { %v6438_v5 = vor.u32 %v6437_v48, %v6434_v17  ;;  %v6447_v51 = vor.u32 %v6446_v45, %v6443_v54  ;;  %v6482_v17 = vrot.slane %v21402_v10, 5  ;;  %v6486_v48 = vshrl.u32 %v5775_v25, 16 }
 0x1e7   : > { %v6489_v54 = vshll.u32 %v5775_v25, 16  ;;  %v6474_v40 = vor.u32 %v6473_v15, %v6470_v30  ;;  %v6500_v55 = vrot.slane %v21404_v3, 5  ;;  %v21405_v43 = vshrl.u32 %v18515_v19, 16 }
 0x1e8   : > { %15041 = vmatpush3.bf16.msra.mxu1 %v16856_v21  ;;  %v18658_v39 = vsel %vm2570_vm2, %v6429_v37, %v6438_v5  ;;  %v18661_v21 = vsel %vm2570_vm2, %v6438_v5, %v6447_v51  ;;  %v18664_v7 = vsel %vm2570_vm2, %v6447_v51, %v6456_v52  ;;  %v21403_v37 = vshrl.u32 %v18513_v38, 16 }
 0x1e9   : > { %15042 = vmatprep.subr.bf16.mxu1 %v16857_v11  ;;  %v6506_v5 = vrot.slane %v21405_v43, 4  ;;  %v18682_v25 = vsel %vm2570_vm2, %v6456_v52, %v6465_v9  ;;  %v6491_v20 = vrot.slane %v6489_v54, 5  ;;  %v18685_v36 = vsel %vm2570_vm2, %v6465_v9, %v6474_v40 }
 0x1ea   : > { %v6497_v45 = vrot.slane %v21403_v37, 4  ;;  %v21406_v32 = vshll.u32 %v18515_v19, 16  ;;  %v21407_v30 = vshrl.u32 %v18529_v12, 16  ;;  %v21408_v52 = vshll.u32 %v18529_v12, 16 }
 0x1eb   : > { %14995 = vmatmul.mubr.bf16.gmra.mrb[32].mxu1 %v18521_v35  ;;  %v16859_v35 = vld [vmem:[%s20920_s4 + $0xe0] sm:$0xff]  }
 0x1ec   : > { %14998 = vmatprep.mubr.bf16.mxu1 %v18524_v1  ;;  %15043 = vmatpush3.bf16.msra.mxu1 %v16857_v11  ;;  %v6483_v1 = vor.u32 %v6482_v17, %v6479_v31  ;;  %v6488_v11 = vrot.slane %v6486_v48, 4  ;;  %v6501_v51 = vor.u32 %v6500_v55, %v6497_v45  ;;  %v6509_v58 = vrot.slane %v21406_v32, 5 }
 0x1ed   : > { %15044 = vmatprep.subr.bf16.mxu1 %v16858_v59  ;;  %v6515_v15 = vrot.slane %v21407_v30, 4  ;;  %v6518_v37 = vrot.slane %v21408_v52, 5  ;;  %v21409_v31 = vshrl.u32 %v18531_v26, 16  ;;  %v21410_v48 = vshll.u32 %v18531_v26, 16 }
 0x1ee   : > { %v18692_v16 = vsel %vm2570_vm2, %v6474_v40, %v6483_v1  ;;  %v6492_v10 = vor.u32 %v6491_v20, %v6488_v11  ;;  %v6510_v9 = vor.u32 %v6509_v58, %v6506_v5  ;;  %v21411_v45 = vshrl.u32 %v18543_v53, 16  ;;  %v16860_v40 = vld [vmem:[%s20920_s4 + $0xe8] sm:$0xff]  }
 0x1ef   : > { %v6524_v17 = vrot.slane %v21409_v31, 4  ;;  %v6527_v54 = vrot.slane %v21410_v48, 5  ;;  %v21412_v55 = vshll.u32 %v18543_v53, 16  ;;  %v6519_v5 = vor.u32 %v6518_v37, %v6515_v15 }
 0x1f0   : > { %15045 = vmatpush3.bf16.msra.mxu1 %v16858_v59  ;;  %v6533_v3 = vrot.slane %v21411_v45, 4  ;;  %v18708_v11 = vsel %vm2570_vm2, %v6483_v1, %v6492_v10  ;;  %v18711_v59 = vsel %vm2570_vm2, %v6492_v10, %v6501_v51  ;;  %v21413_v20 = vshrl.u32 %v18545_v8, 16 }
 0x1f1   : > { %v6536_v43 = vrot.slane %v21412_v55, 5  ;;  %15046 = vmatprep.subr.bf16.mxu1 %v16859_v35  ;;  %v18716_v58 = vsel %vm2570_vm2, %v6501_v51, %v6510_v9  ;;  %v6528_v30 = vor.u32 %v6527_v54, %v6524_v17  ;;  %v21414_v31 = vshll.u32 %v18545_v8, 16 }
 0x1f2   : > { %v6542_v32 = vrot.slane %v21413_v20, 4  ;;  %v18722_v1 = vsel %vm2570_vm2, %v6510_v9, %v6519_v5  ;;  %v21415_v10 = vshrl.u32 %v18550_v29, 16  ;;  %v21416_v15 = vshll.u32 %v18550_v29, 16 }
 0x1f3   : > { %v6537_v52 = vor.u32 %v6536_v43, %v6533_v3  ;;  %v6545_v48 = vrot.slane %v21414_v31, 5  ;;  %14999 = vmatmul.mubr.bf16.gmra.mrb[36].mxu1 %v18535_v47  ;;  %v21417_v55 = vshrl.u32 %v18552_v6, 16  ;;  %v18732_v17 = vsel %vm2570_vm2, %v6519_v5, %v6528_v30  ;;  %v16861_v43 = vld [vmem:[%s20920_s4 + $0xf0] sm:$0xff]  }
 0x1f4   : > { %v6551_v45 = vrot.slane %v21415_v10, 4  ;;  %v6554_v37 = vrot.slane %v21416_v15, 5  ;;  %15002 = vmatprep.mubr.bf16.mxu1 %v18539_v23  ;;  %15047 = vmatpush3.bf16.msra.mxu1 %v16859_v35  ;;  %v21418_v54 = vshll.u32 %v18552_v6, 16  ;;  %v21419_v31 = vshrl.u32 %v18560_v4, 16 }
 0x1f5   : > { %v6560_v51 = vrot.slane %v21417_v55, 4  ;;  %v18735_v47 = vsel %vm2570_vm2, %v6528_v30, %v6537_v52  ;;  %v6546_v9 = vor.u32 %v6545_v48, %v6542_v32  ;;  %15048 = vmatprep.subr.bf16.mxu1 %v16860_v40  ;;  %v21420_v35 = vshll.u32 %v18560_v4, 16 }
 0x1f6   : > { %v6563_v3 = vrot.slane %v21418_v54, 5  ;;  %v6555_v20 = vor.u32 %v6554_v37, %v6551_v45  ;;  %v6569_v23 = vrot.slane %v21419_v31, 4  ;;  %v21421_v32 = vrot.slane %v18069_v50, 4  ;;  %v21426_v31 = vld [vmem:[#allocation105_spill] sm:$0xff] }
 0x1f7   : > { %v6572_v5 = vrot.slane %v21420_v35, 5  ;;  %v18747_v10 = vsel %vm2570_vm2, %v6537_v52, %v6546_v9  ;;  %v21422_v48 = vrot.slane %v18102_v34, 5  ;;  %v16862_v52 = vld [vmem:[%s20920_s4 + $0xf8] sm:$0xff]   ;;  %v21423_v34 = vld [vmem:[#allocation102_spill] sm:$0xff] }
 0x1f8   : > { %v6564_v30 = vor.u32 %v6563_v3, %v6560_v51  ;;  %v18754_v55 = vsel %vm2570_vm2, %v6546_v9, %v6555_v20  ;;  %15049 = vmatpush3.bf16.msra.mxu1 %v16860_v40  ;;  %v2650_v51 = vsel %vm2570_vm2, %v18496_v57, %v21423_v34  ;;  %v18776_v9 = vld [vmem:[%s20920_s4 + $0x100] sm:$0xff]   ;;  %v21424_v3 = vld [vmem:[#allocation103_spill] sm:$0xff]  ;;  %v21425_v57 = vld [vmem:[#allocation104_spill] sm:$0xff] }
 0x1f9   : > { %v2658_v15 = vor.u32 %v21422_v48, %v21421_v32  ;;  %v18756_v54 = vor.u32 %v6572_v5, %v6569_v23  ;;  %15050 = vmatprep.subr.bf16.mxu1 %v16861_v43  ;;  %v21427_v23 = vld [vmem:[#allocation106_spill] sm:$0xff]  ;;  %v21431_v48 = vld [vmem:[#allocation107_spill] sm:$0xff] }
 0x1fa   : > { %v18759_v45 = vsel %vm2570_vm2, %v6555_v20, %v6564_v30 }
 0x1fb   : > { %v18766_v37 = vsel %vm2570_vm2, %v6564_v30, %v18756_v54  ;;  %15003 = vmatmul.mubr.bf16.gmra.mrb[40].mxu1 %v2650_v51  ;;  %v2659_v40 = vsel %vm2570_vm2, %v21423_v34, %v2658_v15  ;;  %v2668_v20 = vsel %vm2570_vm2, %v2658_v15, %v21424_v3  ;;  %v21430_v30 = vld [vmem:[#allocation119_spill] sm:$0xff]  ;;  %v21433_v51 = vshll.u32 %v18100_v62, 16 }
 0x1fc   : > { %15006 = vmatprep.mubr.bf16.mxu1 %v2659_v40  ;;  %15051 = vmatpush3.bf16.msra.mxu1 %v16861_v43  ;;  %v21428_v43 = vld [vmem:[#allocation113_spill] sm:$0xff]  ;;  %v2720_v32 = vrot.slane %v21430_v30, 5 }
 0x1fd   : > { %15052 = vmatprep.subr.bf16.mxu1 %v16862_v52  ;;  %v21429_v35 = vshrl.u32 %v21428_v43, 16  ;;  %v2729_v15 = vrot.slane %v21433_v51, 5  ;;  %v21434_v40 = vld [vmem:[#allocation109_spill] sm:$0xff]  ;;  %v2738_v43 = vrot.slane %v18142_v33, 5 }
 0x1ff   : > { %v2717_v5 = vrot.slane %v21429_v35, 4 }
 0x200   : > { %15053 = vmatpush3.bf16.msra.mxu1 %v16862_v52  ;;  %v21432_v52 = vshrl.u32 %v18100_v62, 16 }
 0x201   : > { %15102 = vmatprep.subr.bf16.mxu1 %v18776_v9  ;;  %v2721_v3 = vor.u32 %v2720_v32, %v2717_v5  ;;  %v2753_v32 = vrot.slane %v18153_v56, 4 }
 0x202   : > { %v2726_v34 = vrot.slane %v21432_v52, 4  ;;  %v2747_v52 = vrot.slane %v18151_v61, 5 }
 0x203   : > { %15007 = vmatmul.mubr.bf16.gmra.mrb[44].mxu1 %v2668_v20 }
 0x204   : > { %15010 = vmatprep.mubr.bf16.mxu1 %v21425_v57  ;;  %v2730_v20 = vor.u32 %v2729_v15, %v2726_v34  ;;  %v21435_v57 = vld [vmem:[#allocation108_spill] sm:$0xff]  ;;  %v2756_v34 = vrot.slane %v18179_v24, 5  ;;  %v2780_v24 = vrot.slane %v18172_v14, 4 }
 0x205   : > { %v21436_v15 = vld [vmem:[#allocation120_spill] sm:$0xff] }
 0x206   : > { %v2731_v35 = vsel %vm2570_vm2, %v2721_v3, %v2730_v20 }
 0x20b   : > { %15011 = vmatmul.mubr.bf16.gmra.mrb[48].mxu1 %v21426_v31  ;;  %v2722_v31 = vsel %vm2570_vm2, %v21435_v57, %v2721_v3  ;;  %v21437_v57 = vld [vmem:[#allocation122_spill] sm:$0xff] }
 0x20c   : > { %15014 = vmatprep.mubr.bf16.mxu1 %v21427_v23  ;;  %v2735_v23 = vrot.slane %v18133_v63, 4  ;;  %v2765_v3 = vrot.slane %v21437_v57, 5 }
 0x20e   : > { %v2739_v62 = vor.u32 %v2738_v43, %v2735_v23  ;;  %v2771_v23 = vrot.slane %v18162_v49, 4  ;;  %v21438_v43 = vld [vmem:[#allocation123_spill] sm:$0xff] }
 0x20f   : > { %v3236_v49 = vld [vmem:[#allocation2 + $0x8] sm:$0x80] }
 0x210   : > { %v2740_v5 = vsel %vm2570_vm2, %v2730_v20, %v2739_v62  ;;  %v2774_v20 = vrot.slane %v21438_v43, 5  ;;  %v21441_v43 = vld [vmem:[#allocation114_spill] sm:$0xff] }
 0x213   : > { %15015 = vmatmul.mubr.bf16.gmra.mrb[52].mxu1 %v21431_v48  ;;  %v2744_v48 = vrot.slane %v18144_v41, 4  ;;  %v2757_v41 = vor.u32 %v2756_v34, %v2753_v32 }
 0x214   : > { %15018 = vmatprep.mubr.bf16.mxu1 %v21434_v40  ;;  %v2762_v40 = vrot.slane %v21436_v15, 4 }
 0x215   : > { %v2748_v51 = vor.u32 %v2747_v52, %v2744_v48  ;;  %v2552_v48 = vld [vmem:[#allocation2 + $0xc0] sm:$0x1f]  ;;  %v2775_v52 = vor.u32 %v2774_v20, %v2771_v23  ;;  %v21440_v23 = vld [vmem:[#allocation112_spill] sm:$0xff] }
 0x216   : > { %v16865_v20 = vld [vmem:[%s20920_s4 + $0x110] sm:$0xff]  }
 0x217   : > { %v2749_v63 = vsel %vm2570_vm2, %v2739_v62, %v2748_v51  ;;  %v2758_v61 = vsel %vm2570_vm2, %v2748_v51, %v2757_v41  ;;  %v2787_v62 = vshrl.u32 %v2552_v48, 16 }
 0x219   : > { %v2789_v51 = vrot.slane %v2787_v62, 4  ;;  %v16868_v62 = vld [vmem:[%s20920_s4 + $0x128] sm:$0xff]  }
 0x21b   : > { %15019 = vmatmul.mubr.bf16.gmra.mrb[56].mxu1 %v2722_v31  ;;  %v2766_v31 = vor.u32 %v2765_v3, %v2762_v40  ;;  %v3280_v40 = vshrl.u32 %v3236_v49, 16 }
 0x21c   : > { %15022 = vmatprep.mubr.bf16.mxu1 %v2731_v35  ;;  %v2783_v35 = vrot.slane %v18205_v44, 5 }
 0x21d   : > { %v2767_v56 = vsel %vm2570_vm2, %v2757_v41, %v2766_v31  ;;  %v2776_v34 = vsel %vm2570_vm2, %v2766_v31, %v2775_v52  ;;  %v3282_v3 = vrot.slane %v3280_v40, 7  ;;  %v21439_v41 = vld [vmem:[#allocation110_spill] sm:$0xff]  ;;  %v16864_v31 = vld [vmem:[%s20920_s4 + $0x108] sm:$0xff]  }
 0x21e   : > { %v2784_v32 = vor.u32 %v2783_v35, %v2780_v24  ;;  %v21442_v24 = vld [vmem:[#allocation115_spill] sm:$0xff]  ;;  %v3334_v35 = vrot.slane %v18240_v46, 7  ;;  %v21445_v46 = vrot.slane %v18059_v27, 7  ;;  %v21446_v27 = vld [vmem:[#allocation118_spill] sm:$0xff] }
 0x220   : > { %v2785_v15 = vsel %vm2570_vm2, %v2775_v52, %v2784_v32  ;;  %v3337_v52 = vor.u32 %v18235_v13, %v3334_v35  ;;  %v16869_v13 = vld [vmem:[%s20920_s4 + $0x130] sm:$0xff]   ;;  %v3346_v49 = vsel %vm3278_vm3, %v3334_v35, %v21446_v27 }
 0x221   : > { %v21453_v35 = vld [vmem:[#allocation124_spill] sm:$0xff] }
 0x223   : > { %15023 = vmatmul.mubr.bf16.gmra.mrb[60].mxu1 %v2740_v5  ;;  %v2790_v5 = vshll.u32 %v2552_v48, 16  ;;  %v21443_v48 = vld [vmem:[#allocation116_spill] sm:$0xff] }
 0x224   : > { %15026 = vmatprep.mubr.bf16.mxu1 %v2749_v63 }
 0x225   : > { %v2792_v63 = vrot.slane %v2790_v5, 5  ;;  %v21444_v5 = vld [vmem:[#allocation117_spill] sm:$0xff] }
 0x227   : > { %v2793_v57 = vor.u32 %v2792_v63, %v2789_v51  ;;  %v16870_v63 = vld [vmem:[%s20920_s4 + $0x138] sm:$0xff]  }
 0x229   : > { %v2794_v44 = vsel %vm2570_vm2, %v2784_v32, %v2793_v57  ;;  %v3338_v32 = vsel %vm3278_vm3, %v21445_v46, %v3337_v52  ;;  %v3366_v57 = vrot.slane %v18269_v22, 7  ;;  %v21456_v52 = vld [vmem:[#allocation127_spill] sm:$0xff]  ;;  %v21459_v46 = vld [vmem:[#allocation130_spill] sm:$0xff] }
 0x22b   : > { %15027 = vmatmul.mubr.bf16.gmra.mrb[64].mxu1 %v2758_v61  ;;  %v3290_v61 = vsel %vm3278_vm3, %v3282_v3, %v21439_v41  ;;  %v21448_v3 = vld [vmem:[#allocation133_spill] sm:$0xff]  ;;  %v21449_v41 = vld [vmem:[#allocation134_spill] sm:$0xff] }
 0x22c   : > { %15030 = vmatprep.mubr.bf16.mxu1 %v2767_v56  ;;  %v16866_v56 = vld [vmem:[%s20920_s4 + $0x118] sm:$0xff]  }
 0x233   : > { %15031 = vmatmul.mubr.bf16.gmra.mrb[68].mxu1 %v2776_v34  ;;  %v3350_v34 = vrot.slane %v18258_v18, 7  ;;  %v3358_v18 = vrot.slane %v18267_v60, 7 }
 0x234   : > { %15034 = vmatprep.mubr.bf16.mxu1 %v2785_v15  ;;  %v21447_v15 = vrot.slane %v18069_v50, 7  ;;  %v21450_v50 = vld [vmem:[#allocation138_spill] sm:$0xff] }
 0x235   : > { %v3353_v51 = vor.u32 %v18243_v0, %v3350_v34  ;;  %v16871_v0 = vld [vmem:[%s20920_s4 + $0x140] sm:$0xff]  }
 0x237   : > { %v3354_v40 = vsel %vm3278_vm3, %v21447_v15, %v3353_v51  ;;  %v21462_v51 = vld [vmem:[#allocation131_spill] sm:$0xff] }
 0x23b   : > { %15035 = vmatmul.mubr.bf16.gmra.mrb[72].mxu1 %v2794_v44  ;;  %v3361_v44 = vor.u32 %v21448_v3, %v3358_v18 }
 0x23c   : > { %15054 = vmatprep.mubr.bf16.mxu1 %v3290_v61  ;;  %v3369_v61 = vor.u32 %v21449_v41, %v3366_v57 }
 0x23d   : > { %v3362_v60 = vsel %vm3278_vm3, %v3350_v34, %v3361_v44 }
 0x23e   : > { %v3370_v22 = vsel %vm3278_vm3, %v3358_v18, %v3369_v61 }
 0x243   : > { %15055 = vmatmul.mubr.bf16.vlgmr.msra.gmra.mrb[28].mxu1 %v21440_v23  ;;  %v21451_v23 = vld [vmem:[#allocation135_spill] sm:$0xff] }
 0x244   : > { %15103 = vmatpush3.bf16.msra.mxu1 %v18776_v9  ;;  %15058 = vmatprep.mubr.bf16.mxu1 %v21441_v43  ;;  %v16867_v9 = vld [vmem:[%s20920_s4 + $0x120] sm:$0xff]  }
 0x245   : > { %15104 = vmatprep.subr.bf16.mxu1 %v16864_v31 }
 0x248   : > { %15105 = vmatpush3.bf16.msra.mxu1 %v16864_v31  ;;  %v3374_v31 = vrot.slane %v21450_v50, 7  ;;  %v16872_v50 = vld [vmem:[%s20920_s4 + $0x148] sm:$0xff]  }
 0x249   : > { %15106 = vmatprep.subr.bf16.mxu1 %v16865_v20 }
 0x24a   : > { %v3377_v43 = vor.u32 %v21451_v23, %v3374_v31  ;;  %v16874_v23 = vld [vmem:[%s20920_s4 + $0x158] sm:$0xff]  }
 0x24b   : > { %15059 = vmatmul.mubr.bf16.gmra.mrb[32].mxu1 %v21442_v24 }
 0x24c   : > { %15062 = vmatprep.mubr.bf16.mxu1 %v21443_v48  ;;  %15107 = vmatpush3.bf16.msra.mxu1 %v16865_v20  ;;  %v3378_v20 = vsel %vm3278_vm3, %v3366_v57, %v3377_v43  ;;  %v21454_v48 = vld [vmem:[#allocation125_spill] sm:$0xff]  ;;  %v21467_v57 = vrot.slane %v18172_v14, 7  ;;  %v16978_v14 = vld [vmem:[#allocation2 + $0x20] sm:$0xff]  ;;  %v16979_v43 = vld [vmem:[#allocation2 + $0x28] sm:$0xff] }
 0x24d   : > { %15108 = vmatprep.subr.bf16.mxu1 %v16866_v56 }
 0x250   : > { %15109 = vmatpush3.bf16.msra.mxu1 %v16866_v56  ;;  %v21452_v56 = vld [vmem:[#allocation121_spill] sm:$0xff] }
 0x251   : > { %15110 = vmatprep.subr.bf16.mxu1 %v16867_v9  ;;  %v3386_v24 = vsel %vm3278_vm3, %v3374_v31, %v21452_v56  ;;  %v18894_v31 = vld [vmem:[#allocation2 + $0x18] sm:$0xff]  ;;  %v16876_v56 = vld [vmem:[%s20920_s4 + $0x168] sm:$0xff]  }
 0x253   : > { %15063 = vmatmul.mubr.bf16.gmra.mrb[36].mxu1 %v21444_v5  ;;  %v21458_v5 = vld [vmem:[#allocation129_spill] sm:$0xff] }
 0x254   : > { %15066 = vmatprep.mubr.bf16.mxu1 %v3338_v32  ;;  %15111 = vmatpush3.bf16.msra.mxu1 %v16867_v9  ;;  %v21455_v9 = vld [vmem:[#allocation126_spill] sm:$0xff]  ;;  %v21460_v32 = vld [vmem:[#allocation141_spill] sm:$0xff] }
 0x255   : > { %15112 = vmatprep.subr.bf16.mxu1 %v16868_v62  ;;  %v21461_v34 = vshrl.u32 %v21460_v32, 16 }
 0x258   : > { %15113 = vmatpush3.bf16.msra.mxu1 %v16868_v62  ;;  %v21457_v62 = vld [vmem:[#allocation128_spill] sm:$0xff] }
 0x259   : > { %15114 = vmatprep.subr.bf16.mxu1 %v16869_v13 }
 0x25b   : > { %15067 = vmatmul.mubr.bf16.gmra.mrb[40].mxu1 %v3346_v49  ;;  %v21464_v49 = vld [vmem:[#allocation145_spill] sm:$0xff] }
 0x25c   : > { %15070 = vmatprep.mubr.bf16.mxu1 %v3354_v40  ;;  %15115 = vmatpush3.bf16.msra.mxu1 %v16869_v13  ;;  %v3462_v13 = vrot.slane %v21461_v34, 7  ;;  %v21465_v18 = vshrl.u32 %v21464_v49, 16  ;;  %v21466_v40 = vld [vmem:[#allocation132_spill] sm:$0xff]  ;;  %v21468_v44 = vshll.u32 %v21464_v49, 16  ;;  %v16987_v34 = vld [vmem:[#allocation2 + $0x68] sm:$0xff] }
 0x25d   : > { %15116 = vmatprep.subr.bf16.mxu1 %v16870_v63  ;;  %v16989_v49 = vld [vmem:[#allocation2 + $0x90] sm:$0xff] }
 0x25e   : > { %v3470_v15 = vrot.slane %v21465_v18, 7  ;;  %v16990_v18 = vld [vmem:[#allocation2 + $0x98] sm:$0xff] }
 0x260   : > { %15117 = vmatpush3.bf16.msra.mxu1 %v16870_v63  ;;  %v21463_v63 = vshll.u32 %v21460_v32, 16  ;;  %v3473_v41 = vor.u32 %v21468_v44, %v3470_v15  ;;  %v16986_v32 = vld [vmem:[#allocation2 + $0x60] sm:$0xff] }
 0x261   : > { %15166 = vmatprep.subr.bf16.mxu1 %v16871_v0  ;;  %v16991_v15 = vld [vmem:[#allocation2 + $0xa0] sm:$0xff] }
 0x262   : > { %v3465_v27 = vor.u32 %v21463_v63, %v3462_v13  ;;  %v3474_v61 = vsel %vm3278_vm3, %v3462_v13, %v3473_v41  ;;  %v21469_v13 = vld [vmem:[#allocation158_spill] sm:$0xff]  ;;  %v16994_v41 = vld [vmem:[#allocation2 + $0xb8] sm:$0xff] }
 0x263   : > { %15071 = vmatmul.mubr.bf16.gmra.mrb[44].mxu1 %v3362_v60  ;;  %v16976_v60 = vld [vmem:[#allocation2 + $0x10] sm:$0xff]  ;;  %v18920_v63 = vld [vmem:[#allocation2 + $0x80] sm:$0xff] }
 0x264   : > { %15074 = vmatprep.mubr.bf16.mxu1 %v3370_v22  ;;  %v3466_v3 = vsel %vm3278_vm3, %v21467_v57, %v3465_v27  ;;  %v16873_v22 = vld [vmem:[%s20920_s4 + $0x150] sm:$0xff]   ;;  %v21471_v27 = vld [vmem:[#allocation161_spill] sm:$0xff] }
 0x265   : > { %v16993_v57 = vld [vmem:[#allocation2 + $0xb0] sm:$0xff] }
 0x26b   : > { %15075 = vmatmul.mubr.bf16.gmra.mrb[48].mxu1 %v3378_v20  ;;  %v16980_v20 = vld [vmem:[#allocation2 + $0x30] sm:$0xff] }
 0x26c   : > { %15078 = vmatprep.mubr.bf16.mxu1 %v3386_v24  ;;  %v16981_v24 = vld [vmem:[#allocation2 + $0x38] sm:$0xff] }
 0x273   : > { %15079 = vmatmul.mubr.bf16.gmra.mrb[52].mxu1 %v21453_v35  ;;  %v16982_v35 = vld [vmem:[#allocation2 + $0x40] sm:$0xff] }
 0x274   : > { %15082 = vmatprep.mubr.bf16.mxu1 %v21454_v48  ;;  %v16877_v48 = vld [vmem:[%s20920_s4 + $0x170] sm:$0xff]  }
 0x27b   : > { %15083 = vmatmul.mubr.bf16.gmra.mrb[56].mxu1 %v21455_v9  ;;  %v16878_v9 = vld [vmem:[%s20920_s4 + $0x178] sm:$0xff]  }
 0x27c   : > { %15086 = vmatprep.mubr.bf16.mxu1 %v21456_v52  ;;  %v16983_v52 = vld [vmem:[#allocation2 + $0x48] sm:$0xff] }
 0x283   : > { %15087 = vmatmul.mubr.bf16.gmra.mrb[60].mxu1 %v21457_v62  ;;  %v16984_v62 = vld [vmem:[#allocation2 + $0x50] sm:$0xff] }
 0x284   : > { %15090 = vmatprep.mubr.bf16.mxu1 %v21458_v5  ;;  %v16879_v5 = vld [vmem:[%s20920_s4 + $0x180] sm:$0xff]  }
 0x28b   : > { %15091 = vmatmul.mubr.bf16.gmra.mrb[64].mxu1 %v21459_v46  ;;  %v16985_v46 = vld [vmem:[#allocation2 + $0x58] sm:$0xff] }
 0x28c   : > { %15094 = vmatprep.mubr.bf16.mxu1 %v21462_v51  ;;  %v21470_v51 = vld [vmem:[#allocation160_spill] sm:$0xff] }
 0x293   : > { %15095 = vmatmul.mubr.bf16.gmra.mrb[68].mxu1 %v21466_v40  ;;  %v16992_v40 = vld [vmem:[#allocation2 + $0xa8] sm:$0xff] }
 0x294   : > { %15098 = vmatprep.mubr.bf16.mxu1 %v3466_v3  ;;  %v4374_v3 = vld [vmem:[#allocation2 + $0x10] sm:$0xff] }
 0x295   : > { %v4420_v44 = vshll.u32 %v4374_v3, 16 }
 0x29b   : > { %15099 = vmatmul.mubr.bf16.gmra.mrb[72].mxu1 %v3474_v61  ;;  %v4422_v61 = vrot.slane %v4420_v44, 1 }
 0x29c   : > { %15118 = vmatprep.mubr.bf16.mxu1 %v16976_v60  ;;  %v16995_v60 = vld [vmem:[#allocation2 + $0xc0] sm:$0xff] }
 0x2a3   : > { %15119 = vmatmul.mubr.bf16.vlgmr.msra.gmra.mrb[28].mxu1 %v18894_v31 }
 0x2a4   : > { %15167 = vmatpush3.bf16.msra.mxu1 %v16871_v0  ;;  %15122 = vmatprep.mubr.bf16.mxu1 %v16978_v14  ;;  %v16875_v0 = vld [vmem:[%s20920_s4 + $0x160] sm:$0xff]   ;;  %v4425_v14 = vshll.u32 %v18894_v31, 16 }
 0x2a5   : > { %15168 = vmatprep.subr.bf16.mxu1 %v16872_v50 }
 0x2a8   : > { %15169 = vmatpush3.bf16.msra.mxu1 %v16872_v50  ;;  %v4418_v50 = vshrl.u32 %v4374_v3, 16  ;;  %v21478_v3 = vld [vmem:[#allocation111_spill] sm:$0xff] }
 0x2a9   : > { %15170 = vmatprep.subr.bf16.mxu1 %v16873_v22  ;;  %v21479_v44 = vrot.slane %v21478_v3, 1 }
 0x2ab   : > { %15123 = vmatmul.mubr.bf16.gmra.mrb[32].mxu1 %v16979_v43  ;;  %v16996_v43 = vld [vmem:[#allocation2 + $0xc8] sm:$0xff] }
 0x2ac   : > { %15126 = vmatprep.mubr.bf16.mxu1 %v16980_v20  ;;  %15171 = vmatpush3.bf16.msra.mxu1 %v16873_v22  ;;  %v4423_v22 = vor.u32 %v4422_v61, %v4418_v50  ;;  %v16883_v61 = vld [vmem:[%s20920_s4 + $0x1a0] sm:$0xff]   ;;  %v21481_v50 = vld [vmem:[#allocation137_spill] sm:$0xff] }
 0x2ad   : > { %15172 = vmatprep.subr.bf16.mxu1 %v16874_v23 }
 0x2b0   : > { %15173 = vmatpush3.bf16.msra.mxu1 %v16874_v23  ;;  %v4427_v23 = vrot.slane %v4425_v14, 1  ;;  %v21482_v14 = vld [vmem:[#allocation139_spill] sm:$0xff] }
 0x2b1   : > { %15174 = vmatprep.subr.bf16.mxu1 %v16875_v0 }
 0x2b2   : > { %v4428_v20 = vsel %vm4416_vm4, %v4423_v22, %v4427_v23  ;;  %v16885_v22 = vld [vmem:[%s20920_s4 + $0x1b0] sm:$0xff]  }
 0x2b3   : > { %15127 = vmatmul.mubr.bf16.gmra.mrb[36].mxu1 %v16981_v24 }
 0x2b4   : > { %15130 = vmatprep.mubr.bf16.mxu1 %v16982_v35  ;;  %15175 = vmatpush3.bf16.msra.mxu1 %v16875_v0  ;;  %v21472_v0 = vld [vmem:[#allocation147_spill] sm:$0xff]  ;;  %v4429_v35 = vshrl.u32 %v18894_v31, 16  ;;  %v16881_v31 = vld [vmem:[%s20920_s4 + $0x190] sm:$0xff]  }
 0x2b5   : > { %15176 = vmatprep.subr.bf16.mxu1 %v16876_v56 }
 0x2b8   : > { %15177 = vmatpush3.bf16.msra.mxu1 %v16876_v56  ;;  %v21473_v56 = vshll.u32 %v21472_v0, 16 }
 0x2b9   : > { %15178 = vmatprep.subr.bf16.mxu1 %v16877_v48 }
 0x2ba   : > { %v4435_v24 = vrot.slane %v21473_v56, 1  ;;  %v16887_v56 = vld [vmem:[%s20920_s4 + $0x1c0] sm:$0xff]  }
 0x2bb   : > { %15131 = vmatmul.mubr.bf16.gmra.mrb[40].mxu1 %v16983_v52  ;;  %v4431_v52 = vor.u32 %v4429_v35, %v4427_v23  ;;  %v16886_v23 = vld [vmem:[%s20920_s4 + $0x1b8] sm:$0xff]   ;;  %v21486_v35 = vshll.u32 %v21469_v13, 16 }
 0x2bc   : > { %15134 = vmatprep.mubr.bf16.mxu1 %v16984_v62  ;;  %15179 = vmatpush3.bf16.msra.mxu1 %v16877_v48  ;;  %v21474_v48 = vshrl.u32 %v21472_v0, 16  ;;  %v21475_v62 = vld [vmem:[#allocation148_spill] sm:$0xff] }
 0x2bd   : > { %15180 = vmatprep.subr.bf16.mxu1 %v16878_v9 }
 0x2c0   : > { %15181 = vmatpush3.bf16.msra.mxu1 %v16878_v9  ;;  %v4439_v9 = vor.u32 %v21474_v48, %v4435_v24  ;;  %v4515_v48 = vrot.slane %v21486_v35, 1 }
 0x2c1   : > { %15230 = vmatprep.subr.bf16.mxu1 %v16879_v5 }
 0x2c3   : > { %15135 = vmatmul.mubr.bf16.gmra.mrb[44].mxu1 %v16985_v46  ;;  %v21476_v46 = vshll.u32 %v21475_v62, 16 }
 0x2c4   : > { %15138 = vmatprep.mubr.bf16.mxu1 %v16986_v32 }
 0x2c5   : > { %v4443_v32 = vrot.slane %v21476_v46, 1  ;;  %v21489_v46 = vshll.u32 %v21470_v51, 16 }
 0x2cb   : > { %15139 = vmatmul.mubr.bf16.gmra.mrb[48].mxu1 %v16987_v34  ;;  %v16880_v34 = vld [vmem:[%s20920_s4 + $0x188] sm:$0xff]  }
 0x2cc   : > { %15142 = vmatprep.mubr.bf16.mxu1 %v21469_v13 }
 0x2d3   : > { %15143 = vmatmul.mubr.bf16.gmra.mrb[52].mxu1 %v21470_v51 }
 0x2d4   : > { %15146 = vmatprep.mubr.bf16.mxu1 %v18920_v63 }
 0x2db   : > { %15147 = vmatmul.mubr.bf16.gmra.mrb[56].mxu1 %v21471_v27 }
 0x2dc   : > { %15150 = vmatprep.mubr.bf16.mxu1 %v16989_v49  ;;  %v4436_v49 = vsel %vm4416_vm4, %v4431_v52, %v4435_v24  ;;  %v21485_v24 = vld [vmem:[#allocation144_spill] sm:$0xff]  ;;  %v21488_v52 = vshrl.u32 %v21469_v13, 16  ;;  %v21492_v13 = vshll.u32 %v21471_v27, 16 }
 0x2e3   : > { %15151 = vmatmul.mubr.bf16.gmra.mrb[60].mxu1 %v16990_v18  ;;  %v4444_v18 = vsel %vm4416_vm4, %v4439_v9, %v4443_v32  ;;  %v21487_v9 = vld [vmem:[#allocation146_spill] sm:$0xff] }
 0x2e4   : > { %15154 = vmatprep.mubr.bf16.mxu1 %v16991_v15  ;;  %v21477_v15 = vshrl.u32 %v21475_v62, 16  ;;  %v4519_v62 = vor.u32 %v21488_v52, %v4515_v48 }
 0x2eb   : > { %15155 = vmatmul.mubr.bf16.gmra.mrb[64].mxu1 %v16992_v40  ;;  %v4447_v40 = vor.u32 %v21477_v15, %v4443_v32  ;;  %v4523_v32 = vrot.slane %v21489_v46, 1  ;;  %v4533_v15 = vshrl.u32 %v18920_v63, 16 }
 0x2ec   : > { %15158 = vmatprep.mubr.bf16.mxu1 %v16993_v57  ;;  %v16882_v57 = vld [vmem:[%s20920_s4 + $0x198] sm:$0xff]  }
 0x2f3   : > { %15159 = vmatmul.mubr.bf16.gmra.mrb[68].mxu1 %v16994_v41  ;;  %v4452_v41 = vsel %vm4416_vm4, %v4447_v40, %v21479_v44  ;;  %v4539_v44 = vrot.slane %v21492_v13, 1 }
 0x2f4   : > { %15162 = vmatprep.mubr.bf16.mxu1 %v16995_v60  ;;  %v16884_v60 = vld [vmem:[%s20920_s4 + $0x1a8] sm:$0xff]  }
 0x2fb   : > { %15163 = vmatmul.mubr.bf16.gmra.mrb[72].mxu1 %v16996_v43  ;;  %v21483_v43 = vld [vmem:[#allocation142_spill] sm:$0xff] }
 0x2fc   : > { %15182 = vmatprep.mubr.bf16.mxu1 %v4428_v20  ;;  %v21484_v20 = vld [vmem:[#allocation143_spill] sm:$0xff] }
 0x303   : > { %15183 = vmatmul.mubr.bf16.vlgmr.msra.gmra.mrb[28].mxu1 %v4436_v49 }
 0x304   : > { %15231 = vmatpush3.bf16.msra.mxu1 %v16879_v5  ;;  %15186 = vmatprep.mubr.bf16.mxu1 %v4444_v18  ;;  %v21480_v5 = vld [vmem:[#allocation136_spill] sm:$0xff]  ;;  %v4524_v18 = vsel %vm4416_vm4, %v4519_v62, %v4523_v32 }
 0x305   : > { %15232 = vmatprep.subr.bf16.mxu1 %v16880_v34 }
 0x308   : > { %15233 = vmatpush3.bf16.msra.mxu1 %v16880_v34  ;;  %v21490_v34 = vld [vmem:[#allocation140_spill] sm:$0xff] }
 0x309   : > { %15234 = vmatprep.subr.bf16.mxu1 %v16881_v31  ;;  %v4516_v49 = vsel %vm4416_vm4, %v21490_v34, %v4515_v48  ;;  %v21500_v48 = vld [vmem:[#allocation154_spill] sm:$0xff] }
 0x30b   : > { %15187 = vmatmul.mubr.bf16.gmra.mrb[32].mxu1 %v4452_v41 }
 0x30c   : > { %15190 = vmatprep.mubr.bf16.mxu1 %v21480_v5  ;;  %15235 = vmatpush3.bf16.msra.mxu1 %v16881_v31  ;;  %v4531_v31 = vrot.slane %v21430_v30, 1  ;;  %v21494_v30 = vrot.slane %v18142_v33, 1  ;;  %v21501_v33 = vld [vmem:[#allocation156_spill] sm:$0xff] }
 0x30d   : > { %15236 = vmatprep.subr.bf16.mxu1 %v16882_v57 }
 0x30e   : > { %v4535_v40 = vor.u32 %v4533_v15, %v4531_v31 }
 0x310   : > { %15237 = vmatpush3.bf16.msra.mxu1 %v16882_v57  ;;  %v21491_v57 = vshrl.u32 %v21470_v51, 16  ;;  %v4540_v5 = vsel %vm4416_vm4, %v4535_v40, %v4539_v44  ;;  %v21496_v51 = vld [vmem:[#allocation150_spill] sm:$0xff] }
 0x311   : > { %15238 = vmatprep.subr.bf16.mxu1 %v16883_v61 }
 0x312   : > { %v4527_v3 = vor.u32 %v21491_v57, %v4523_v32  ;;  %v21502_v32 = vld [vmem:[#allocation155_spill] sm:$0xff] }
 0x313   : > { %15191 = vmatmul.mubr.bf16.gmra.mrb[36].mxu1 %v21481_v50  ;;  %v21495_v50 = vld [vmem:[#allocation149_spill] sm:$0xff] }
 0x314   : > { %15194 = vmatprep.mubr.bf16.mxu1 %v21482_v14  ;;  %15239 = vmatpush3.bf16.msra.mxu1 %v16883_v61  ;;  %v4532_v41 = vsel %vm4416_vm4, %v4527_v3, %v4531_v31  ;;  %v21493_v61 = vshrl.u32 %v21471_v27, 16  ;;  %v21497_v14 = vld [vmem:[#allocation151_spill] sm:$0xff]  ;;  %v21504_v31 = vld [vmem:[#allocation172_spill] sm:$0xff] }
 0x315   : > { %15240 = vmatprep.subr.bf16.mxu1 %v16884_v60  ;;  %v21505_v15 = vshrl.u32 %v21504_v31, 16  ;;  %v21506_v57 = vshll.u32 %v21504_v31, 16  ;;  %v21517_v31 = vld [vmem:[#allocation165_spill] sm:$0xff] }
 0x317   : > { %v5125_v40 = vrot.slane %v21505_v15, 3  ;;  %v5128_v3 = vrot.slane %v21506_v57, 4  ;;  %v21518_v15 = vld [vmem:[#allocation166_spill] sm:$0xff]  ;;  %v21519_v57 = vld [vmem:[#allocation167_spill] sm:$0xff] }
 0x318   : > { %15241 = vmatpush3.bf16.msra.mxu1 %v16884_v60  ;;  %v4543_v60 = vor.u32 %v21493_v61, %v4539_v44  ;;  %v16888_v44 = vld [vmem:[%s20920_s4 + $0x1c8] sm:$0xff]  }
 0x319   : > { %15242 = vmatprep.subr.bf16.mxu1 %v16885_v22  ;;  %v5129_v13 = vor.u32 %v5128_v3, %v5125_v40  ;;  %v19052_v40 = vld [vmem:[%s20920_s4 + $0x200] sm:$0xff]   ;;  %v21520_v3 = vshrl.u32 %v18558_v28, 16 }
 0x31a   : > { %v4548_v63 = vsel %vm4416_vm4, %v4543_v60, %v21494_v30 }
 0x31b   : > { %15195 = vmatmul.mubr.bf16.gmra.mrb[40].mxu1 %v21483_v43  ;;  %v5054_v43 = vld [vmem:[#allocation2 + $0x18] sm:$0xf8] }
 0x31c   : > { %15198 = vmatprep.mubr.bf16.mxu1 %v21484_v20  ;;  %15243 = vmatpush3.bf16.msra.mxu1 %v16885_v22  ;;  %v21498_v22 = vld [vmem:[#allocation152_spill] sm:$0xff]  ;;  %v5100_v27 = vshll.u32 %v5054_v43, 16 }
 0x31d   : > { %15244 = vmatprep.subr.bf16.mxu1 %v16886_v23  ;;  %v4398_v20 = vld [vmem:[#allocation2 + $0xd0] sm:$0x1] }
 0x31e   : > { %v4609_v35 = vshll.u32 %v4398_v20, 16  ;;  %v5102_v52 = vrot.slane %v5100_v27, 4  ;;  %v21512_v20 = vld [vmem:[#allocation177_spill] sm:$0xff] }
 0x320   : > { %15245 = vmatpush3.bf16.msra.mxu1 %v16886_v23  ;;  %v21499_v23 = vld [vmem:[#allocation153_spill] sm:$0xff]  ;;  %v4611_v62 = vrot.slane %v4609_v35, 1 }
 0x321   : > { %15294 = vmatprep.subr.bf16.mxu1 %v16887_v56 }
 0x322   : > { %v4612_v34 = vsel %vm4416_vm4, %v21502_v32, %v4611_v62  ;;  %v16892_v62 = vld [vmem:[%s20920_s4 + $0x1e8] sm:$0xff]   ;;  %v21516_v32 = vld [vmem:[#allocation164_spill] sm:$0xff] }
 0x323   : > { %15199 = vmatmul.mubr.bf16.gmra.mrb[44].mxu1 %v21485_v24  ;;  %v5097_v24 = vshrl.u32 %v5054_v43, 16 }
 0x324   : > { %15202 = vmatprep.mubr.bf16.mxu1 %v21487_v9 }
 0x325   : > { %v5099_v9 = vrot.slane %v5097_v24, 3  ;;  %v21513_v24 = vshrl.u32 %v21512_v20, 16 }
 0x327   : > { %v5103_v46 = vor.u32 %v5102_v52, %v5099_v9  ;;  %v5152_v27 = vrot.slane %v21513_v24, 3  ;;  %v16891_v9 = vld [vmem:[%s20920_s4 + $0x1e0] sm:$0xff]   ;;  %v21528_v24 = vshrl.u32 %v18515_v19, 16 }
 0x32b   : > { %15203 = vmatmul.mubr.bf16.gmra.mrb[48].mxu1 %v4516_v49  ;;  %v21503_v49 = vld [vmem:[#allocation157_spill] sm:$0xff] }
 0x32c   : > { %15206 = vmatprep.mubr.bf16.mxu1 %v4524_v18  ;;  %v5112_v18 = vsel %vm1400_vm0, %v5103_v46, %v21503_v49  ;;  %v16893_v49 = vld [vmem:[%s20920_s4 + $0x1f0] sm:$0xff]  }
 0x333   : > { %15207 = vmatmul.mubr.bf16.gmra.mrb[52].mxu1 %v4532_v41  ;;  %v21507_v41 = vld [vmem:[#allocation173_spill] sm:$0xff] }
 0x334   : > { %15210 = vmatprep.mubr.bf16.mxu1 %v4540_v5  ;;  %v21508_v5 = vshrl.u32 %v21507_v41, 16  ;;  %v21509_v60 = vshll.u32 %v21507_v41, 16 }
 0x336   : > { %v5134_v61 = vrot.slane %v21508_v5, 3  ;;  %v5137_v30 = vrot.slane %v21509_v60, 4 }
 0x33b   : > { %15211 = vmatmul.mubr.bf16.gmra.mrb[56].mxu1 %v4548_v63  ;;  %v21510_v63 = vld [vmem:[#allocation162_spill] sm:$0xff] }
 0x33c   : > { %15214 = vmatprep.mubr.bf16.mxu1 %v21495_v50  ;;  %v21511_v50 = vld [vmem:[#allocation159_spill] sm:$0xff] }
 0x343   : > { %15215 = vmatmul.mubr.bf16.gmra.mrb[60].mxu1 %v21496_v51  ;;  %v5130_v51 = vsel %vm1400_vm0, %v21511_v50, %v5129_v13 }
 0x344   : > { %15218 = vmatprep.mubr.bf16.mxu1 %v21497_v14  ;;  %v16889_v14 = vld [vmem:[%s20920_s4 + $0x1d0] sm:$0xff]  }
 0x34b   : > { %15219 = vmatmul.mubr.bf16.gmra.mrb[64].mxu1 %v21498_v22  ;;  %v5138_v22 = vor.u32 %v5137_v30, %v5134_v61  ;;  %v21522_v61 = vld [vmem:[#allocation168_spill] sm:$0xff]  ;;  %v21523_v30 = vld [vmem:[#allocation170_spill] sm:$0xff] }
 0x34c   : > { %15222 = vmatprep.mubr.bf16.mxu1 %v21499_v23  ;;  %v16890_v23 = vld [vmem:[%s20920_s4 + $0x1d8] sm:$0xff]  }
 0x34d   : > { %v5139_v43 = vsel %vm1400_vm0, %v5129_v13, %v5138_v22  ;;  %v5215_v13 = vrot.slane %v21520_v3, 3 }
 0x353   : > { %15223 = vmatmul.mubr.bf16.gmra.mrb[68].mxu1 %v21500_v48  ;;  %v21515_v48 = vld [vmem:[#allocation163_spill] sm:$0xff] }
 0x354   : > { %15226 = vmatprep.mubr.bf16.mxu1 %v21501_v33  ;;  %v5148_v33 = vsel %vm1400_vm0, %v5138_v22, %v21515_v48  ;;  %v21526_v22 = vshll.u32 %v18513_v38, 16 }
 0x35b   : > { %15227 = vmatmul.mubr.bf16.gmra.mrb[72].mxu1 %v4612_v34 }
 0x35c   : > { %15246 = vmatprep.mubr.bf16.mxu1 %v5112_v18  ;;  %v16894_v18 = vld [vmem:[%s20920_s4 + $0x1f8] sm:$0xff]  }
 0x363   : > { %15247 = vmatmul.mubr.bf16.vlgmr.msra.gmra.mrb[28].mxu1 %v21510_v63  ;;  %v21524_v63 = vld [vmem:[#allocation169_spill] sm:$0xff] }
 0x364   : > { %15295 = vmatpush3.bf16.msra.mxu1 %v16887_v56  ;;  %15250 = vmatprep.mubr.bf16.mxu1 %v5130_v51  ;;  %v21514_v56 = vshll.u32 %v21512_v20, 16  ;;  %v21525_v51 = vshrl.u32 %v18513_v38, 16  ;;  %v21527_v20 = vld [vmem:[#allocation171_spill] sm:$0xff] }
 0x365   : > { %15296 = vmatprep.subr.bf16.mxu1 %v16888_v44 }
 0x366   : > { %v5155_v35 = vrot.slane %v21514_v56, 4  ;;  %v21529_v56 = vshll.u32 %v18515_v19, 16  ;;  %v21533_v19 = vshll.u32 %v18531_v26, 16 }
 0x368   : > { %15297 = vmatpush3.bf16.msra.mxu1 %v16888_v44  ;;  %v5156_v52 = vor.u32 %v5155_v35, %v5152_v27  ;;  %v21521_v44 = vshll.u32 %v18558_v28, 16  ;;  %v5242_v27 = vrot.slane %v21528_v24, 3  ;;  %v5245_v35 = vrot.slane %v21529_v56, 4 }
 0x369   : > { %15298 = vmatprep.subr.bf16.mxu1 %v16889_v14 }
 0x36a   : > { %v5157_v46 = vsel %vm1400_vm0, %v21515_v48, %v5156_v52  ;;  %v5166_v34 = vsel %vm1400_vm0, %v5156_v52, %v21516_v32  ;;  %v5218_v5 = vrot.slane %v21521_v44, 4  ;;  %v21531_v52 = vshll.u32 %v18529_v12, 16 }
 0x36b   : > { %15251 = vmatmul.mubr.bf16.gmra.mrb[32].mxu1 %v5139_v43 }
 0x36c   : > { %15254 = vmatprep.mubr.bf16.mxu1 %v5148_v33  ;;  %15299 = vmatpush3.bf16.msra.mxu1 %v16889_v14  ;;  %v5219_v60 = vor.u32 %v5218_v5, %v5215_v13  ;;  %v5233_v14 = vrot.slane %v21525_v51, 3  ;;  %v21530_v33 = vshrl.u32 %v18529_v12, 16  ;;  %v21535_v12 = vshll.u32 %v18543_v53, 16 }
 0x36d   : > { %15300 = vmatprep.subr.bf16.mxu1 %v16890_v23  ;;  %v21538_v51 = vshrl.u32 %v18550_v29, 16 }
 0x36e   : > { %v5220_v50 = vsel %vm1400_vm0, %v21524_v63, %v5219_v60  ;;  %v5229_v28 = vsel %vm1400_vm0, %v5219_v60, %v21527_v20  ;;  %v5272_v13 = vrot.slane %v21535_v12, 4  ;;  %v21536_v60 = vshrl.u32 %v18545_v8, 16 }
 0x370   : > { %15301 = vmatpush3.bf16.msra.mxu1 %v16890_v23  ;;  %v5236_v23 = vrot.slane %v21526_v22, 4 }
 0x371   : > { %15302 = vmatprep.subr.bf16.mxu1 %v16891_v9 }
 0x372   : > { %v5237_v43 = vor.u32 %v5236_v23, %v5233_v14  ;;  %v5287_v14 = vrot.slane %v21538_v51, 3  ;;  %v16998_v51 = vld [vmem:[#allocation2 + $0x48] sm:$0xff] }
 0x373   : > { %15255 = vmatmul.mubr.bf16.gmra.mrb[36].mxu1 %v5157_v46  ;;  %v5246_v46 = vor.u32 %v5245_v35, %v5242_v27  ;;  %v21542_v35 = vshrl.u32 %v18560_v4, 16 }
 0x374   : > { %15258 = vmatprep.mubr.bf16.mxu1 %v5166_v34  ;;  %15303 = vmatpush3.bf16.msra.mxu1 %v16891_v9  ;;  %v5238_v48 = vsel %vm1400_vm0, %v21527_v20, %v5237_v43  ;;  %v5251_v9 = vrot.slane %v21530_v33, 3 }
 0x375   : > { %15304 = vmatprep.subr.bf16.mxu1 %v16892_v62  ;;  %v5247_v34 = vsel %vm1400_vm0, %v5237_v43, %v5246_v46 }
 0x378   : > { %15305 = vmatpush3.bf16.msra.mxu1 %v16892_v62  ;;  %v5254_v62 = vrot.slane %v21531_v52, 4 }
 0x379   : > { %15306 = vmatprep.subr.bf16.mxu1 %v16893_v49 }
 0x37a   : > { %v5255_v32 = vor.u32 %v5254_v62, %v5251_v9  ;;  %v5078_v9 = vld [vmem:[#allocation2 + $0xd8] sm:$0xf] }
 0x37b   : > { %15259 = vmatmul.mubr.bf16.gmra.mrb[40].mxu1 %v21517_v31  ;;  %v5263_v31 = vrot.slane %v21533_v19, 4  ;;  %v5312_v62 = vshrl.u32 %v5078_v9, 16 }
 0x37c   : > { %15262 = vmatprep.mubr.bf16.mxu1 %v21518_v15  ;;  %15307 = vmatpush3.bf16.msra.mxu1 %v16893_v49  ;;  %v21532_v49 = vshrl.u32 %v18531_v26, 16  ;;  %v5256_v15 = vsel %vm1400_vm0, %v5246_v46, %v5255_v32  ;;  %v21537_v26 = vshll.u32 %v18545_v8, 16  ;;  %v21541_v8 = vshll.u32 %v18552_v6, 16 }
 0x37d   : > { %15308 = vmatprep.subr.bf16.mxu1 %v16894_v18  ;;  %v5315_v46 = vshll.u32 %v5078_v9, 16  ;;  %v17003_v9 = vld [vmem:[#allocation2 + $0x70] sm:$0xff] }
 0x37e   : > { %v5281_v63 = vrot.slane %v21537_v26, 4  ;;  %v5299_v27 = vrot.slane %v21541_v8, 4  ;;  %v21547_v26 = vld [vmem:[#allocation176_spill] sm:$0xff]  ;;  %v17001_v8 = vld [vmem:[#allocation2 + $0x60] sm:$0xff] }
 0x380   : > { %15309 = vmatpush3.bf16.msra.mxu1 %v16894_v18  ;;  %v5260_v18 = vrot.slane %v21532_v49, 3  ;;  %v5314_v49 = vrot.slane %v5312_v62, 3 }
 0x381   : > { %15358 = vmatprep.subr.bf16.mxu1 %v19052_v40 }
 0x382   : > { %v5264_v44 = vor.u32 %v5263_v31, %v5260_v18  ;;  %v5761_v31 = vld [vmem:[#allocation2 + $0x18] sm:$0xf0] }
 0x383   : > { %15263 = vmatmul.mubr.bf16.gmra.mrb[44].mxu1 %v21519_v57  ;;  %v21534_v57 = vshrl.u32 %v18543_v53, 16  ;;  %v21539_v53 = vshll.u32 %v18550_v29, 16  ;;  %v21543_v29 = vshll.u32 %v18560_v4, 16 }
 0x384   : > { %15266 = vmatprep.mubr.bf16.mxu1 %v21522_v61  ;;  %v5265_v61 = vsel %vm1400_vm0, %v5255_v32, %v5264_v44 }
 0x385   : > { %v5269_v3 = vrot.slane %v21534_v57, 3  ;;  %v5290_v22 = vrot.slane %v21539_v53, 4  ;;  %v5308_v33 = vrot.slane %v21543_v29, 4  ;;  %v16999_v53 = vld [vmem:[#allocation2 + $0x50] sm:$0xff]  ;;  %v17002_v29 = vld [vmem:[#allocation2 + $0x68] sm:$0xff] }
 0x387   : > { %v5273_v5 = vor.u32 %v5272_v13, %v5269_v3  ;;  %v5291_v43 = vor.u32 %v5290_v22, %v5287_v14  ;;  %v21544_v3 = vrot.slane %v21472_v0, 4  ;;  %v16896_v13 = vld [vmem:[%s20920_s4 + $0x208] sm:$0xff]   ;;  %v5839_v14 = vrot.slane %v16998_v51, 4  ;;  %v6318_v51 = vld [vmem:[#allocation2 + $0x18] sm:$0xf0] }
 0x388   : > { %v5841_v22 = vrot.slane %v16999_v53, 4 }
 0x38b   : > { %15267 = vmatmul.mubr.bf16.gmra.mrb[48].mxu1 %v21523_v30  ;;  %v5278_v30 = vrot.slane %v21536_v60, 3  ;;  %v16997_v60 = vld [vmem:[#allocation2 + $0x40] sm:$0xff] }
 0x38c   : > { %15270 = vmatprep.mubr.bf16.mxu1 %v5220_v50  ;;  %v5274_v50 = vsel %vm1400_vm0, %v5264_v44, %v5273_v5  ;;  %v21545_v44 = vld [vmem:[#allocation174_spill] sm:$0xff]  ;;  %v5837_v0 = vrot.slane %v16997_v60, 4  ;;  %v21552_v60 = vld [vmem:[#allocation180_spill] sm:$0xff] }
 0x38d   : > { %v5282_v23 = vor.u32 %v5281_v63, %v5278_v30  ;;  %v16898_v30 = vld [vmem:[%s20920_s4 + $0x218] sm:$0xff]   ;;  %v21548_v63 = vrot.slane %v21507_v41, 4 }
 0x38e   : > { %v5840_v41 = vsel %vm2037_vm1, %v5837_v0, %v5839_v14 }
 0x38f   : > { %v5283_v20 = vsel %vm1400_vm0, %v5273_v5, %v5282_v23  ;;  %v5292_v56 = vsel %vm1400_vm0, %v5282_v23, %v5291_v43  ;;  %v21546_v5 = vld [vmem:[#allocation175_spill] sm:$0xff] }
 0x390   : > { %v16900_v23 = vld [vmem:[%s20920_s4 + $0x228] sm:$0xff]  }
 0x393   : > { %15271 = vmatmul.mubr.bf16.gmra.mrb[52].mxu1 %v5229_v28  ;;  %v21540_v28 = vshrl.u32 %v18552_v6, 16  ;;  %v5317_v6 = vrot.slane %v5315_v46, 4 }
 0x394   : > { %15274 = vmatprep.mubr.bf16.mxu1 %v5238_v48  ;;  %v5305_v48 = vrot.slane %v21542_v35, 3 }
 0x395   : > { %v5296_v24 = vrot.slane %v21540_v28, 3  ;;  %v5318_v19 = vor.u32 %v5317_v6, %v5314_v49  ;;  %v17000_v28 = vld [vmem:[#allocation2 + $0x58] sm:$0xff]  ;;  %v17005_v49 = vld [vmem:[#allocation2 + $0x80] sm:$0xff] }
 0x396   : > { %v5309_v32 = vor.u32 %v5308_v33, %v5305_v48  ;;  %v5847_v33 = vrot.slane %v17002_v29, 4  ;;  %v5853_v6 = vrot.slane %v17005_v49, 4 }
 0x397   : > { %v5300_v52 = vor.u32 %v5299_v27, %v5296_v24  ;;  %v5843_v24 = vrot.slane %v17000_v28, 4  ;;  %v5845_v27 = vrot.slane %v17001_v8, 4  ;;  %v21557_v8 = vld [vmem:[#allocation185_spill] sm:$0xff] }
 0x398   : > { %v5319_v57 = vsel %vm1400_vm0, %v5309_v32, %v5318_v19 }
 0x399   : > { %v5310_v18 = vsel %vm1400_vm0, %v5300_v52, %v5309_v32  ;;  %v5844_v35 = vsel %vm2037_vm1, %v5841_v22, %v5843_v24  ;;  %v5846_v48 = vsel %vm2037_vm1, %v5843_v24, %v5845_v27  ;;  %v5848_v62 = vsel %vm2037_vm1, %v5845_v27, %v5847_v33  ;;  %v17004_v32 = vld [vmem:[#allocation2 + $0x78] sm:$0xff]  ;;  %v6320_v24 = vld [vmem:[#allocation2 + $0x28] sm:$0xff] }
 0x39a   : > { %v6381_v29 = vshll.u32 %v6320_v24, 16 }
 0x39b   : > { %15275 = vmatmul.mubr.bf16.gmra.mrb[56].mxu1 %v5247_v34  ;;  %v5301_v34 = vsel %vm1400_vm0, %v5291_v43, %v5300_v52  ;;  %v5842_v43 = vsel %vm2037_vm1, %v5839_v14, %v5841_v22  ;;  %v5849_v52 = vrot.slane %v17003_v9, 4  ;;  %v6361_v22 = vshrl.u32 %v6318_v51, 16 }
 0x39c   : > { %15278 = vmatprep.mubr.bf16.mxu1 %v5256_v15  ;;  %v5828_v15 = vrot.slane %v5761_v31, 4  ;;  %v17006_v31 = vld [vmem:[#allocation2 + $0x88] sm:$0xff] }
 0x39d   : > { %v5850_v46 = vsel %vm2037_vm1, %v5847_v33, %v5849_v52  ;;  %v6363_v27 = vrot.slane %v6361_v22, 4 }
 0x39e   : > { %v5830_v12 = vsel %vm2037_vm1, %v5828_v15, %v21544_v3  ;;  %v5855_v15 = vrot.slane %v17006_v31, 4  ;;  %v21549_v3 = vrot.slane %v18513_v38, 4  ;;  %v16905_v38 = vld [vmem:[%s20922_s6 + $0x10] sm:$0xff]   ;;  %v21560_v31 = vld [vmem:[#allocation187_spill] sm:$0xff] }
 0x3a3   : > { %15279 = vmatmul.mubr.bf16.gmra.mrb[60].mxu1 %v5265_v61  ;;  %v16897_v61 = vld [vmem:[%s20920_s4 + $0x210] sm:$0xff]  }
 0x3a4   : > { %15282 = vmatprep.mubr.bf16.mxu1 %v5274_v50  ;;  %v16899_v50 = vld [vmem:[%s20920_s4 + $0x220] sm:$0xff]  }
 0x3ab   : > { %15283 = vmatmul.mubr.bf16.gmra.mrb[64].mxu1 %v5283_v20  ;;  %v16901_v20 = vld [vmem:[%s20920_s4 + $0x230] sm:$0xff]  }
 0x3ac   : > { %15286 = vmatprep.mubr.bf16.mxu1 %v5292_v56  ;;  %v16902_v56 = vld [vmem:[%s20920_s4 + $0x238] sm:$0xff]  }
 0x3b3   : > { %15287 = vmatmul.mubr.bf16.gmra.mrb[68].mxu1 %v5301_v34  ;;  %v5851_v34 = vrot.slane %v17004_v32, 4  ;;  %v6383_v32 = vrot.slane %v6381_v29, 5 }
 0x3b4   : > { %15290 = vmatprep.mubr.bf16.mxu1 %v5310_v18 }
 0x3b5   : > { %v5852_v18 = vsel %vm2037_vm1, %v5849_v52, %v5851_v34  ;;  %v5854_v19 = vsel %vm2037_vm1, %v5851_v34, %v5853_v6  ;;  %v21558_v52 = vrot.slane %v18560_v4, 4 }
 0x3bb   : > { %15291 = vmatmul.mubr.bf16.gmra.mrb[72].mxu1 %v5319_v57  ;;  %v5856_v57 = vsel %vm2037_vm1, %v5853_v6, %v5855_v15 }
 0x3bc   : > { %15310 = vmatprep.mubr.bf16.mxu1 %v5830_v12  ;;  %v5858_v12 = vsel %vm2037_vm1, %v5855_v15, %v21549_v3  ;;  %v21561_v15 = vld [vmem:[#allocation188_spill] sm:$0xff] }
 0x3c3   : > { %15311 = vmatmul.mubr.bf16.vlgmr.msra.gmra.mrb[28].mxu1 %v21545_v44  ;;  %v16903_v44 = vld [vmem:[%s20922_s6] sm:$0xff]  }
 0x3c4   : > { %15359 = vmatpush3.bf16.msra.mxu1 %v19052_v40  ;;  %15314 = vmatprep.mubr.bf16.mxu1 %v21546_v5  ;;  %v5838_v40 = vsel %vm2037_vm1, %v21548_v63, %v5837_v0  ;;  %v16904_v5 = vld [vmem:[%s20922_s6 + $0x8] sm:$0xff]   ;;  %v16906_v0 = vld [vmem:[%s20922_s6 + $0x18] sm:$0xff]   ;;  %v21554_v63 = vld [vmem:[#allocation182_spill] sm:$0xff] }
 0x3c5   : > { %15360 = vmatprep.subr.bf16.mxu1 %v16896_v13  ;;  %15422 = vmatprep.subr.bf16.mxu0 %v16903_v44 }
 0x3c6   : > { %15423 = vmatpush3.bf16.msra.mxu0 %v16903_v44  ;;  %v19234_v44 = vld [vmem:[%s20921_s5] ss:$0 sm:$0xff] }
 0x3c7   : > { %15424 = vmatprep.subr.bf16.mxu0 %v16904_v5 }
 0x3c8   : > { %15361 = vmatpush3.bf16.msra.mxu1 %v16896_v13  ;;  %v21550_v13 = vld [vmem:[#allocation178_spill] sm:$0xff] }
 0x3c9   : > { %15362 = vmatprep.subr.bf16.mxu1 %v16897_v61 }
 0x3ca   : > { %15425 = vmatpush3.bf16.msra.mxu0 %v16904_v5 }
 0x3cb   : > { %15315 = vmatmul.mubr.bf16.gmra.mrb[32].mxu1 %v21547_v26  ;;  %15426 = vmatprep.subr.bf16.mxu0 %v16905_v38  ;;  %v16907_v26 = vld [vmem:[%s20922_s6 + $0x20] sm:$0xff]  }
 0x3cc   : > { %15318 = vmatprep.mubr.bf16.mxu1 %v5838_v40  ;;  %15363 = vmatpush3.bf16.msra.mxu1 %v16897_v61  ;;  %v21551_v61 = vld [vmem:[#allocation179_spill] sm:$0xff] }
 0x3cd   : > { %15364 = vmatprep.subr.bf16.mxu1 %v16898_v30  ;;  %v21555_v40 = vld [vmem:[#allocation183_spill] sm:$0xff] }
 0x3ce   : > { %15427 = vmatpush3.bf16.msra.mxu0 %v16905_v38 }
 0x3cf   : > { %15428 = vmatprep.subr.bf16.mxu0 %v16906_v0 }
 0x3d0   : > { %15365 = vmatpush3.bf16.msra.mxu1 %v16898_v30  ;;  %v21553_v30 = vld [vmem:[#allocation181_spill] sm:$0xff] }
 0x3d1   : > { %15366 = vmatprep.subr.bf16.mxu1 %v16899_v50 }
 0x3d2   : > { %15429 = vmatpush3.bf16.msra.mxu0 %v16906_v0 }
 0x3d3   : > { %15319 = vmatmul.mubr.bf16.gmra.mrb[36].mxu1 %v5840_v41  ;;  %15430 = vmatprep.subr.bf16.mxu0 %v16907_v26  ;;  %v21556_v41 = vld [vmem:[#allocation184_spill] sm:$0xff] }
 0x3d4   : > { %15322 = vmatprep.mubr.bf16.mxu1 %v5842_v43  ;;  %15367 = vmatpush3.bf16.msra.mxu1 %v16899_v50  ;;  %v6319_v50 = vld [vmem:[#allocation2 + $0x20] sm:$0xff]  ;;  %v5785_v43 = vld [vmem:[#allocation2 + $0xd8] sm:$0xf] }
 0x3d5   : > { %15368 = vmatprep.subr.bf16.mxu1 %v16900_v23  ;;  %v6369_v14 = vshrl.u32 %v6319_v50, 16  ;;  %v6372_v53 = vshll.u32 %v6319_v50, 16 }
 0x3d6   : > { %15431 = vmatpush3.bf16.msra.mxu0 %v16907_v26 }
 0x3d7   : > { %v6374_v28 = vrot.slane %v6372_v53, 5  ;;  %v21562_v53 = vld [vmem:[#allocation9_spill] sm:$0xff] }
 0x3d8   : > { %15369 = vmatpush3.bf16.msra.mxu1 %v16900_v23  ;;  %v6364_v23 = vshll.u32 %v6318_v51, 16 }
 0x3d9   : > { %15370 = vmatprep.subr.bf16.mxu1 %v16901_v20 }
 0x3db   : > { %15323 = vmatmul.mubr.bf16.gmra.mrb[40].mxu1 %v5844_v35  ;;  %v5875_v35 = vrot.slane %v5785_v43, 4  ;;  %v21564_v43 = vld [vmem:[#allocation7_spill] sm:$0xff] }
 0x3dc   : > { %15326 = vmatprep.mubr.bf16.mxu1 %v5846_v48  ;;  %15371 = vmatpush3.bf16.msra.mxu1 %v16901_v20  ;;  %v6371_v20 = vrot.slane %v6369_v14, 4  ;;  %v6378_v48 = vshrl.u32 %v6320_v24, 16 }
 0x3dd   : > { %15372 = vmatprep.subr.bf16.mxu1 %v16902_v56 }
 0x3de   : > { %v6375_v33 = vor.u32 %v6374_v28, %v6371_v20  ;;  %v21565_v28 = vld [vmem:[#allocation6_spill] sm:$0xff] }
 0x3e0   : > { %15373 = vmatpush3.bf16.msra.mxu1 %v16902_v56  ;;  %v6366_v56 = vrot.slane %v6364_v23, 5  ;;  %v21563_v23 = vld [vmem:[#allocation8_spill] sm:$0xff] }
 0x3e2   : > { %v6367_v9 = vor.u32 %v6366_v56, %v6363_v27 }
 0x3e3   : > { %15327 = vmatmul.mubr.bf16.gmra.mrb[44].mxu1 %v5848_v62  ;;  %v5876_v62 = vsel %vm2037_vm1, %v21558_v52, %v5875_v35 }
 0x3e4   : > { %15330 = vmatprep.mubr.bf16.mxu1 %v5850_v46  ;;  %v6380_v46 = vrot.slane %v6378_v48, 4  ;;  %v6376_v34 = vsel %vm2570_vm2, %v6367_v9, %v6375_v33 }
 0x3e6   : > { %v6384_v49 = vor.u32 %v6383_v32, %v6380_v46 }
 0x3e8   : > { %v6385_v6 = vsel %vm2570_vm2, %v6375_v33, %v6384_v49 }
 0x3eb   : > { %15331 = vmatmul.mubr.bf16.gmra.mrb[48].mxu1 %v5852_v18  ;;  %v21559_v18 = vld [vmem:[#allocation186_spill] sm:$0xff] }
 0x3ec   : > { %15334 = vmatprep.mubr.bf16.mxu1 %v5854_v19  ;;  %v6394_v19 = vsel %vm2570_vm2, %v6384_v49, %v21559_v18 }
 0x3f3   : > { %15335 = vmatmul.mubr.bf16.gmra.mrb[52].mxu1 %v5856_v57 }
 0x3f4   : > { %15338 = vmatprep.mubr.bf16.mxu1 %v5858_v12 }
 0x3fb   : > { %15339 = vmatmul.mubr.bf16.gmra.mrb[56].mxu1 %v21550_v13 }
 0x3fc   : > { %15342 = vmatprep.mubr.bf16.mxu1 %v21551_v61 }
 0x403   : > { %15343 = vmatmul.mubr.bf16.gmra.mrb[60].mxu1 %v21552_v60 }
 0x404   : > { %15346 = vmatprep.mubr.bf16.mxu1 %v21553_v30 }
 0x40b   : > { %15347 = vmatmul.mubr.bf16.gmra.mrb[64].mxu1 %v21554_v63 }
 0x40c   : > { %15350 = vmatprep.mubr.bf16.mxu1 %v21555_v40 }
 0x413   : > { %15351 = vmatmul.mubr.bf16.gmra.mrb[68].mxu1 %v21556_v41 }
 0x414   : > { %15354 = vmatprep.mubr.bf16.mxu1 %v21557_v8 }
 0x41b   : > { %15355 = vmatmul.mubr.bf16.gmra.mrb[72].mxu1 %v5876_v62 }
 0x41c   : > { %15374 = vmatprep.mubr.bf16.mxu1 %v6376_v34 }
 0x423   : > { %15375 = vmatmul.mubr.bf16.vlgmr.msra.gmra.mrb[28].mxu1 %v6385_v6 }
 0x424   : > { %15378 = vmatprep.mubr.bf16.mxu1 %v6394_v19 }
 0x42b   : > { %15379 = vmatmul.mubr.bf16.gmra.mrb[32].mxu1 %v21560_v31 }
 0x42c   : > { %15382 = vmatprep.mubr.bf16.mxu1 %v21561_v15 }
 0x433   : > { %15383 = vmatmul.mubr.bf16.gmra.mrb[36].mxu1 %v18649_v2 }
 0x434   : > { %15386 = vmatprep.mubr.bf16.mxu1 %v18652_v42  ;;  %v6342_v42 = vld [vmem:[#allocation2 + $0xd8] sm:$0x1f] }
 0x435   : > { %v6576_v4 = vshrl.u32 %v6342_v42, 16  ;;  %v6579_v2 = vshll.u32 %v6342_v42, 16  ;;  %v21566_v42 = vld [vmem:[#allocation12_spill] sm:$0xff] }
 0x43b   : > { %15387 = vmatmul.mubr.bf16.gmra.mrb[40].mxu1 %v18658_v39  ;;  %v6578_v39 = vrot.slane %v6576_v4, 4 }
 0x43c   : > { %15390 = vmatprep.mubr.bf16.mxu1 %v18661_v21  ;;  %v6581_v21 = vrot.slane %v6579_v2, 5 }
 0x443   : > { %15391 = vmatmul.mubr.bf16.gmra.mrb[44].mxu1 %v18664_v7  ;;  %v6582_v7 = vor.u32 %v6581_v21, %v6578_v39 }
 0x444   : > { %15394 = vmatprep.mubr.bf16.mxu1 %v18682_v25 }
 0x445   : > { %v6583_v25 = vsel %vm2570_vm2, %v18756_v54, %v6582_v7  ;;  %v21567_v7 = vld [vmem:[#allocation13_spill] sm:$0xff] }
 0x44b   : > { %15395 = vmatmul.mubr.bf16.gmra.mrb[48].mxu1 %v18685_v36  ;;  %v16908_v36 = vld [vmem:[%s20922_s6 + $0x28] sm:$0xff]  }
 0x44c   : > { %15398 = vmatprep.mubr.bf16.mxu1 %v18692_v16  ;;  %15432 = vmatprep.subr.bf16.mxu0 %v16908_v36  ;;  %v16909_v16 = vld [vmem:[%s20922_s6 + $0x30] sm:$0xff]  }
 0x44d   : > { %15433 = vmatpush3.bf16.msra.mxu0 %v16908_v36 }
 0x44e   : > { %15434 = vmatprep.subr.bf16.mxu0 %v16909_v16 }
 0x451   : > { %15435 = vmatpush3.bf16.msra.mxu0 %v16909_v16 }
 0x453   : > { %15399 = vmatmul.mubr.bf16.gmra.mrb[52].mxu1 %v18708_v11  ;;  %v16910_v11 = vld [vmem:[%s20922_s6 + $0x38] sm:$0xff]  }
 0x454   : > { %15402 = vmatprep.mubr.bf16.mxu1 %v18711_v59  ;;  %15436 = vmatprep.subr.bf16.mxu0 %v16910_v11  ;;  %v7272_v59 = vld [vmem:[#allocation3] sm:$0xf8] }
 0x455   : > { %15437 = vmatpush3.bf16.msra.mxu0 %v16910_v11 }
 0x45b   : > { %15403 = vmatmul.mubr.bf16.gmra.mrb[56].mxu1 %v18716_v58  ;;  %v19217_v58 = vld [vmem:[#allocation3] sm:$0xff] }
 0x45c   : > { %15406 = vmatprep.mubr.bf16.mxu1 %v18722_v1  ;;  %v7322_v1 = vshrl.u32 %v19217_v58, 16 }
 0x45e   : > { %v7324_v54 = vrot.slane %v7322_v1, 3 }
 0x463   : > { %15407 = vmatmul.mubr.bf16.gmra.mrb[60].mxu1 %v18732_v17  ;;  %v7325_v17 = vshll.u32 %v19217_v58, 16 }
 0x464   : > { %15410 = vmatprep.mubr.bf16.mxu1 %v18735_v47  ;;  %v19224_v47 = vld [vmem:[%s20922_s6 + $0x40] sm:$0xff]  }
 0x465   : > { %15486 = vmatprep.subr.bf16.mxu0 %v19224_v47 }
 0x46b   : > { %15411 = vmatmul.mubr.bf16.gmra.mrb[64].mxu1 %v18747_v10  ;;  %v7314_v10 = vshrl.u32 %v7272_v59, 16 }
 0x46c   : > { %15414 = vmatprep.mubr.bf16.mxu1 %v18754_v55  ;;  %v7317_v55 = vshll.u32 %v7272_v59, 16  ;;  %v21568_v59 = vld [vmem:[#allocation11_spill] sm:$0xff] }
 0x46e   : > { %v7319_v57 = vrot.slane %v7317_v55, 4 }
 0x473   : > { %15415 = vmatmul.mubr.bf16.gmra.mrb[68].mxu1 %v18759_v45  ;;  %v7327_v45 = vrot.slane %v7325_v17, 4  ;;  %v21569_v17 = vld [vmem:[#allocation10_spill] sm:$0xff] }
 0x474   : > { %15418 = vmatprep.mubr.bf16.mxu1 %v18766_v37  ;;  %v7316_v37 = vrot.slane %v7314_v10, 3 }
 0x475   : > { %v19227_v3 = vor.u32 %v7327_v45, %v7324_v54 }
 0x476   : > { %v7320_v12 = vor.u32 %v7319_v57, %v7316_v37 }
 0x478   : > { %v7329_v13 = vsel %vm1400_vm0, %v7320_v12, %v19227_v3  ;;  %v16912_v12 = vld [vmem:[%s20922_s6 + $0x48] sm:$0xff]  }
 0x479   : > { %15438 = vmatprep.mubr.bf16.mxu0 %v7329_v13 }
 0x47b   : > { %15419 = vmatmul.mubr.bf16.gmra.mrb[72].mxu1 %v6583_v25 }
 0x4f6   : > { %v15376_v5 = vpop.f32.mrb[28].mxu1 }
 0x4f7   : > { %v7082_v61 = vadd.f32 %v15376_v5, %v19234_v44  ;;  %v6690_v38 = vpop.f32.mrb[29].mxu1 }
 0x4f8   : > { %v7080_v60 = vadd.f32 %v19234_v44, %v6690_v38  ;;  %v15377_v0 = vpop.f32.mrb[30].mxu1 }
 0x4f9   : > { %v7130_v30 = vmax.f32 %v7082_v61, 0.0  ;;  %v7083_v26 = vadd.f32 %v15377_v0, %v19234_v44  ;;  %v6693_v63 = vpop.f32.mrb[31].mxu1 }
 0x4fa   : > { %v7128_v40 = vmax.f32 %v7080_v60, 0.0  ;;  %v7081_v50 = vadd.f32 %v19234_v44, %v6693_v63 }
 0x4fb   : > { %v7131_v51 = vmax.f32 %v7083_v26, 0.0  ;;  %v7178_v22 = vmul.f32 %v7130_v30, %v21562_v53 }
 0x4fc   : > { %v7129_v14 = vmax.f32 %v7081_v50, 0.0  ;;  %v7176_v20 = vmul.f32 %v7128_v40, %v21564_v43  ;;  %v16913_v43 = vld [vmem:[%s20922_s6 + $0x50] sm:$0xff]  }
 0x4fd   : > { %v7179_v41 = vmul.f32 %v7131_v51, %v21563_v23 }
 0x4fe   : > { %v7177_v24 = vmul.f32 %v7129_v14, %v21565_v28  ;;  %v15380_v8 = vpop.f32.mrb[32].mxu1 }
 0x4ff   : > { %v19244_v27 = vpack.c.bf16 %v7179_v41, %v7178_v22  ;;  %v7086_v56 = vadd.f32 %v15380_v8, %v19234_v44  ;;  %v6706_v35 = vpop.f32.mrb[33].mxu1 }
 0x500   : > { %v19247_v48 = vpack.c.bf16 %v7177_v24, %v7176_v20  ;;  %v7084_v29 = vadd.f32 %v19234_v44, %v6706_v35  ;;  %v15381_v33 = vpop.f32.mrb[34].mxu1  ;;  %v21570_v20 = vld [vmem:[#allocation16_spill] sm:$0xff] }
 0x501   : > { %7249 = vst [vmem:[#allocation3 + $0x18] sm:$0xff] %v19244_v27  ;;  %v7134_v9 = vmax.f32 %v7086_v56, 0.0  ;;  %v7087_v52 = vadd.f32 %v15381_v33, %v19234_v44  ;;  %v6709_v62 = vpop.f32.mrb[35].mxu1  ;;  %v7340_v46 = vshrl.u32 %v19244_v27, 16  ;;  %v7343_v32 = vshll.u32 %v19244_v27, 16  ;;  %v21571_v56 = vld [vmem:[#allocation17_spill] sm:$0xff] }
 0x502   : > { %7248 = vst [vmem:[#allocation3 + $0x10] sm:$0xff] %v19247_v48  ;;  %v7132_v34 = vmax.f32 %v7084_v29, 0.0  ;;  %v7085_v49 = vadd.f32 %v19234_v44, %v6709_v62  ;;  %v7331_v6 = vshrl.u32 %v19247_v48, 16  ;;  %v7334_v18 = vshll.u32 %v19247_v48, 16  ;;  %v21573_v62 = vld [vmem:[#allocation15_spill] sm:$0xff] }
 0x503   : > { %v7135_v19 = vmax.f32 %v7087_v52, 0.0  ;;  %v7342_v31 = vrot.slane %v7340_v46, 3  ;;  %v7345_v15 = vrot.slane %v7343_v32, 4  ;;  %v7182_v4 = vmul.f32 %v7134_v9, %v21566_v42  ;;  %v21572_v9 = vld [vmem:[#allocation14_spill] sm:$0xff] }
 0x504   : > { %v7133_v2 = vmax.f32 %v7085_v49, 0.0  ;;  %v7333_v39 = vrot.slane %v7331_v6, 3  ;;  %v7336_v21 = vrot.slane %v7334_v18, 4  ;;  %v7952_v16 = vrot.slane %v19247_v48, 4  ;;  %v16921_v48 = vld [vmem:[%s20922_s6 + $0x90] sm:$0xff]  }
 0x505   : > { %v7183_v25 = vmul.f32 %v7135_v19, %v21567_v7  ;;  %v7346_v36 = vor.u32 %v7345_v15, %v7342_v31  ;;  %v7954_v11 = vrot.slane %v19244_v27, 4  ;;  %v7180_v1 = vmul.f32 %v7132_v34, %v21568_v59  ;;  %v16914_v19 = vld [vmem:[%s20922_s6 + $0x58] sm:$0xff]  }
 0x506   : > { %v7181_v10 = vmul.f32 %v7133_v2, %v21569_v17  ;;  %v15384_v55 = vpop.f32.mrb[36].mxu1  ;;  %v7337_v54 = vor.u32 %v7336_v21, %v7333_v39 }
 0x507   : > { %v19264_v45 = vpack.c.bf16 %v7183_v25, %v7182_v4  ;;  %v7090_v37 = vadd.f32 %v15384_v55, %v19234_v44  ;;  %v6722_v57 = vpop.f32.mrb[37].mxu1  ;;  %v19273_v13 = vsel %vm2037_vm1, %v7952_v16, %v7954_v11 }
 0x508   : > { %v7226_v5 = vpack.c.bf16 %v7181_v10, %v7180_v1  ;;  %v7088_v61 = vadd.f32 %v19234_v44, %v6722_v57  ;;  %v15385_v38 = vpop.f32.mrb[38].mxu1  ;;  %v7338_v60 = vsel %vm1400_vm0, %v19227_v3, %v7337_v54  ;;  %v7347_v0 = vsel %vm1400_vm0, %v7337_v54, %v7346_v36  ;;  %v16915_v57 = vld [vmem:[%s20922_s6 + $0x60] sm:$0xff]  }
 0x509   : > { %7251 = vst [vmem:[#allocation3 + $0x28] sm:$0xff] %v19264_v45  ;;  %v7138_v30 = vmax.f32 %v7090_v37, 0.0  ;;  %v7091_v26 = vadd.f32 %v15385_v38, %v19234_v44  ;;  %v6725_v63 = vpop.f32.mrb[39].mxu1  ;;  %15439 = vmatmul.mubr.bf16.vlgmr.msra.gmra.mrb[28].mxu0 %v7338_v60  ;;  %v7358_v40 = vshrl.u32 %v19264_v45, 16  ;;  %v7361_v50 = vshll.u32 %v19264_v45, 16 }
 0x50a   : > { %7250 = vst [vmem:[#allocation3 + $0x20] sm:$0xff] %v7226_v5  ;;  %v7136_v51 = vmax.f32 %v7088_v61, 0.0  ;;  %v7089_v14 = vadd.f32 %v19234_v44, %v6725_v63  ;;  %15487 = vmatpush3.bf16.msra.mxu0 %v19224_v47  ;;  %15442 = vmatprep.mubr.bf16.mxu0 %v7347_v0  ;;  %v7349_v3 = vshrl.u32 %v7226_v5, 16  ;;  %v7352_v53 = vshll.u32 %v7226_v5, 16  ;;  %v21575_v0 = vld [vmem:[#allocation21_spill] sm:$0xff] }
 0x50b   : > { %v7139_v22 = vmax.f32 %v7091_v26, 0.0  ;;  %v7360_v23 = vrot.slane %v7358_v40, 3  ;;  %v7363_v41 = vrot.slane %v7361_v50, 4  ;;  %15488 = vmatprep.subr.bf16.mxu0 %v16912_v12  ;;  %v7186_v28 = vmul.f32 %v7138_v30, %v21570_v20  ;;  %v21576_v50 = vld [vmem:[#allocation18_spill] sm:$0xff]  ;;  %v16916_v20 = vld [vmem:[%s20922_s6 + $0x68] sm:$0xff]  }
 0x50c   : > { %v7137_v24 = vmax.f32 %v7089_v14, 0.0  ;;  %v7351_v8 = vrot.slane %v7349_v3, 3  ;;  %v7354_v27 = vrot.slane %v7352_v53, 4  ;;  %v7956_v47 = vrot.slane %v7226_v5, 4  ;;  %v21577_v14 = vld [vmem:[#allocation19_spill] sm:$0xff] }
 0x50d   : > { %v7187_v35 = vmul.f32 %v7139_v22, %v21571_v56  ;;  %v19290_v29 = vor.u32 %v7363_v41, %v7360_v23  ;;  %v7958_v33 = vrot.slane %v19264_v45, 4  ;;  %v7184_v52 = vmul.f32 %v7136_v51, %v21572_v9 }
 0x50e   : > { %v7185_v46 = vmul.f32 %v7137_v24, %v21573_v62  ;;  %v15388_v32 = vpop.f32.mrb[40].mxu1  ;;  %v7355_v34 = vor.u32 %v7354_v27, %v7351_v8  ;;  %15489 = vmatpush3.bf16.msra.mxu0 %v16912_v12  ;;  %v19302_v31 = vsel %vm2037_vm1, %v7954_v11, %v7956_v47  ;;  %v21574_v12 = vld [vmem:[#allocation20_spill] sm:$0xff] }
 0x50f   : > { %v19295_v49 = vpack.c.bf16 %v7187_v35, %v7186_v28  ;;  %v7094_v6 = vadd.f32 %v15388_v32, %v19234_v44  ;;  %v6738_v18 = vpop.f32.mrb[41].mxu1  ;;  %15490 = vmatprep.subr.bf16.mxu0 %v16913_v43  ;;  %v19305_v15 = vsel %vm2037_vm1, %v7956_v47, %v7958_v33 }
 0x510   : > { %v7228_v42 = vpack.c.bf16 %v7185_v46, %v7184_v52  ;;  %v7092_v4 = vadd.f32 %v19234_v44, %v6738_v18  ;;  %v15389_v2 = vpop.f32.mrb[42].mxu1  ;;  %v7356_v39 = vsel %vm1400_vm0, %v7346_v36, %v7355_v34  ;;  %v7365_v21 = vsel %vm1400_vm0, %v7355_v34, %v19290_v29 }
 0x511   : > { %7253 = vst [vmem:[#allocation3 + $0x38] sm:$0xff] %v19295_v49  ;;  %v7142_v7 = vmax.f32 %v7094_v6, 0.0  ;;  %v7095_v25 = vadd.f32 %v15389_v2, %v19234_v44  ;;  %v6741_v59 = vpop.f32.mrb[43].mxu1  ;;  %15443 = vmatmul.mubr.bf16.gmra.mrb[32].mxu0 %v7356_v39  ;;  %v7376_v11 = vshrl.u32 %v19295_v49, 16  ;;  %v7379_v1 = vshll.u32 %v19295_v49, 16 }
 0x512   : > { %7252 = vst [vmem:[#allocation3 + $0x30] sm:$0xff] %v7228_v42  ;;  %v7140_v17 = vmax.f32 %v7092_v4, 0.0  ;;  %v7093_v10 = vadd.f32 %v19234_v44, %v6741_v59  ;;  %15446 = vmatprep.mubr.bf16.mxu0 %v7365_v21  ;;  %v7367_v36 = vshrl.u32 %v7228_v42, 16  ;;  %v7370_v55 = vshll.u32 %v7228_v42, 16  ;;  %15491 = vmatpush3.bf16.msra.mxu0 %v16913_v43  ;;  %v21578_v4 = vld [vmem:[#allocation24_spill] sm:$0xff] }
 0x513   : > { %v7143_v54 = vmax.f32 %v7095_v25, 0.0  ;;  %v7378_v45 = vrot.slane %v7376_v11, 3  ;;  %v7381_v37 = vrot.slane %v7379_v1, 4  ;;  %15492 = vmatprep.subr.bf16.mxu0 %v16914_v19  ;;  %v7190_v5 = vmul.f32 %v7142_v7, %v21574_v12  ;;  %v21579_v25 = vld [vmem:[#allocation25_spill] sm:$0xff] }
 0x514   : > { %v7141_v61 = vmax.f32 %v7093_v10, 0.0  ;;  %v7369_v38 = vrot.slane %v7367_v36, 3  ;;  %v7372_v60 = vrot.slane %v7370_v55, 4  ;;  %v7960_v63 = vrot.slane %v7228_v42, 4  ;;  %v16917_v42 = vld [vmem:[%s20922_s6 + $0x70] sm:$0xff]   ;;  %v21580_v10 = vld [vmem:[#allocation22_spill] sm:$0xff] }
 0x515   : > { %v7191_v30 = vmul.f32 %v7143_v54, %v21575_v0  ;;  %v19321_v26 = vor.u32 %v7381_v37, %v7378_v45  ;;  %v7962_v40 = vrot.slane %v19295_v49, 4  ;;  %v7188_v51 = vmul.f32 %v7140_v17, %v21576_v50  ;;  %v21581_v55 = vld [vmem:[#allocation23_spill] sm:$0xff] }
 0x516   : > { %v7189_v3 = vmul.f32 %v7141_v61, %v21577_v14  ;;  %v15392_v53 = vpop.f32.mrb[44].mxu1  ;;  %v7373_v22 = vor.u32 %v7372_v60, %v7369_v38  ;;  %15493 = vmatpush3.bf16.msra.mxu0 %v16914_v19  ;;  %v19333_v28 = vsel %vm2037_vm1, %v7958_v33, %v7960_v63  ;;  %v16918_v61 = vld [vmem:[%s20922_s6 + $0x78] sm:$0xff]  }
 0x517   : > { %v19326_v23 = vpack.c.bf16 %v7191_v30, %v7190_v5  ;;  %v7098_v41 = vadd.f32 %v15392_v53, %v19234_v44  ;;  %v6754_v43 = vpop.f32.mrb[45].mxu1  ;;  %15494 = vmatprep.subr.bf16.mxu0 %v16915_v57  ;;  %v19336_v24 = vsel %vm2037_vm1, %v7960_v63, %v7962_v40 }
 0x518   : > { %v7230_v8 = vpack.c.bf16 %v7189_v3, %v7188_v51  ;;  %v7096_v27 = vadd.f32 %v19234_v44, %v6754_v43  ;;  %v15393_v56 = vpop.f32.mrb[46].mxu1  ;;  %v7374_v35 = vsel %vm1400_vm0, %v19290_v29, %v7373_v22  ;;  %v7383_v47 = vsel %vm1400_vm0, %v7373_v22, %v19321_v26 }
 0x519   : > { %7255 = vst [vmem:[#allocation3 + $0x48] sm:$0xff] %v19326_v23  ;;  %v7146_v9 = vmax.f32 %v7098_v41, 0.0  ;;  %v7099_v52 = vadd.f32 %v15393_v56, %v19234_v44  ;;  %v6757_v33 = vpop.f32.mrb[47].mxu1  ;;  %15447 = vmatmul.mubr.bf16.gmra.mrb[36].mxu0 %v7374_v35  ;;  %v7394_v62 = vshrl.u32 %v19326_v23, 16  ;;  %v7397_v46 = vshll.u32 %v19326_v23, 16  ;;  %v19380_v56 = vld [vmem:[%s20922_s6 + $0x80] sm:$0xff]  }
 0x51a   : > { %7254 = vst [vmem:[#allocation3 + $0x40] sm:$0xff] %v7230_v8  ;;  %v7144_v32 = vmax.f32 %v7096_v27, 0.0  ;;  %v7097_v34 = vadd.f32 %v19234_v44, %v6757_v33  ;;  %15450 = vmatprep.mubr.bf16.mxu0 %v7383_v47  ;;  %v7385_v29 = vshrl.u32 %v7230_v8, 16  ;;  %v7388_v49 = vshll.u32 %v7230_v8, 16  ;;  %15495 = vmatpush3.bf16.msra.mxu0 %v16915_v57  ;;  %v21582_v35 = vld [vmem:[#allocation28_spill] sm:$0xff] }
 0x51b   : > { %v7147_v6 = vmax.f32 %v7099_v52, 0.0  ;;  %v7396_v18 = vrot.slane %v7394_v62, 3  ;;  %v7399_v19 = vrot.slane %v7397_v46, 4  ;;  %15496 = vmatprep.subr.bf16.mxu0 %v16916_v20  ;;  %v7194_v2 = vmul.f32 %v7146_v9, %v21578_v4  ;;  %v21583_v62 = vld [vmem:[#allocation29_spill] sm:$0xff] }
 0x51c   : > { %v7145_v39 = vmax.f32 %v7097_v34, 0.0  ;;  %v7387_v21 = vrot.slane %v7385_v29, 3  ;;  %v7390_v7 = vrot.slane %v7388_v49, 4  ;;  %v7964_v1 = vrot.slane %v7230_v8, 4  ;;  %v21584_v49 = vld [vmem:[#allocation26_spill] sm:$0xff] }
 0x51d   : > { %v7195_v59 = vmul.f32 %v7147_v6, %v21579_v25  ;;  %v7400_v11 = vor.u32 %v7399_v19, %v7396_v18  ;;  %v7966_v17 = vrot.slane %v19326_v23, 4  ;;  %v7192_v36 = vmul.f32 %v7144_v32, %v21580_v10  ;;  %v21585_v18 = vld [vmem:[#allocation27_spill] sm:$0xff] }
 0x51e   : > { %v7193_v54 = vmul.f32 %v7145_v39, %v21581_v55  ;;  %v15396_v45 = vpop.f32.mrb[48].mxu1  ;;  %v7391_v37 = vor.u32 %v7390_v7, %v7387_v21  ;;  %15497 = vmatpush3.bf16.msra.mxu0 %v16916_v20  ;;  %v19363_v38 = vsel %vm2037_vm1, %v7962_v40, %v7964_v1 }
 0x51f   : > { %v19356_v57 = vpack.c.bf16 %v7195_v59, %v7194_v2  ;;  %v7102_v12 = vadd.f32 %v15396_v45, %v19234_v44  ;;  %v6770_v5 = vpop.f32.mrb[49].mxu1  ;;  %15498 = vmatprep.subr.bf16.mxu0 %v16917_v42  ;;  %v19366_v60 = vsel %vm2037_vm1, %v7964_v1, %v7966_v17 }
 0x520   : > { %v7232_v0 = vpack.c.bf16 %v7193_v54, %v7192_v36  ;;  %v7100_v30 = vadd.f32 %v19234_v44, %v6770_v5  ;;  %v15397_v63 = vpop.f32.mrb[50].mxu1  ;;  %v7392_v50 = vsel %vm1400_vm0, %v19321_v26, %v7391_v37  ;;  %v7401_v51 = vsel %vm1400_vm0, %v7391_v37, %v7400_v11 }
 0x521   : > { %7257 = vst [vmem:[#allocation3 + $0x58] sm:$0xff] %v19356_v57  ;;  %v7150_v14 = vmax.f32 %v7102_v12, 0.0  ;;  %v7103_v3 = vadd.f32 %v15397_v63, %v19234_v44  ;;  %v6773_v53 = vpop.f32.mrb[51].mxu1  ;;  %15451 = vmatmul.mubr.bf16.gmra.mrb[40].mxu0 %v7392_v50  ;;  %v7412_v40 = vshrl.u32 %v19356_v57, 16  ;;  %v7415_v22 = vshll.u32 %v19356_v57, 16  ;;  %v21586_v50 = vld [vmem:[#allocation32_spill] sm:$0xff] }
 0x522   : > { %7256 = vst [vmem:[#allocation3 + $0x50] sm:$0xff] %v7232_v0  ;;  %v7148_v23 = vmax.f32 %v7100_v30, 0.0  ;;  %v7101_v41 = vadd.f32 %v19234_v44, %v6773_v53  ;;  %15454 = vmatprep.mubr.bf16.mxu0 %v7401_v51  ;;  %v7403_v43 = vshrl.u32 %v7232_v0, 16  ;;  %v7406_v26 = vshll.u32 %v7232_v0, 16  ;;  %15499 = vmatpush3.bf16.msra.mxu0 %v16917_v42 }
 0x523   : > { %v7151_v20 = vmax.f32 %v7103_v3, 0.0  ;;  %v7414_v8 = vrot.slane %v7412_v40, 3  ;;  %v7417_v27 = vrot.slane %v7415_v22, 4  ;;  %15500 = vmatprep.subr.bf16.mxu0 %v16918_v61  ;;  %v7198_v47 = vmul.f32 %v7150_v14, %v21582_v35  ;;  %v21587_v40 = vld [vmem:[#allocation33_spill] sm:$0xff] }
 0x524   : > { %v7149_v9 = vmax.f32 %v7101_v41, 0.0  ;;  %v7405_v52 = vrot.slane %v7403_v43, 3  ;;  %v7408_v33 = vrot.slane %v7406_v26, 4  ;;  %v7968_v34 = vrot.slane %v7232_v0, 4  ;;  %v21588_v26 = vld [vmem:[#allocation30_spill] sm:$0xff] }
 0x525   : > { %v7199_v46 = vmul.f32 %v7151_v20, %v21583_v62  ;;  %v7418_v32 = vor.u32 %v7417_v27, %v7414_v8  ;;  %v7970_v29 = vrot.slane %v19356_v57, 4  ;;  %v7196_v6 = vmul.f32 %v7148_v23, %v21584_v49  ;;  %v21589_v8 = vld [vmem:[#allocation31_spill] sm:$0xff] }
 0x526   : > { %v7197_v19 = vmul.f32 %v7149_v9, %v21585_v18  ;;  %v15400_v42 = vpop.f32.mrb[52].mxu1  ;;  %v7409_v4 = vor.u32 %v7408_v33, %v7405_v52  ;;  %15501 = vmatpush3.bf16.msra.mxu0 %v16918_v61  ;;  %v19392_v7 = vsel %vm2037_vm1, %v7966_v17, %v7968_v34 }
 0x527   : > { %v19387_v2 = vpack.c.bf16 %v7199_v46, %v7198_v47  ;;  %v7106_v39 = vadd.f32 %v15400_v42, %v19234_v44  ;;  %v6786_v21 = vpop.f32.mrb[53].mxu1  ;;  %15550 = vmatprep.subr.bf16.mxu0 %v19380_v56  ;;  %v19395_v25 = vsel %vm2037_vm1, %v7968_v34, %v7970_v29 }
 0x528   : > { %v7234_v59 = vpack.c.bf16 %v7197_v19, %v7196_v6  ;;  %v7104_v1 = vadd.f32 %v19234_v44, %v6786_v21  ;;  %v15401_v10 = vpop.f32.mrb[54].mxu1  ;;  %v7410_v36 = vsel %vm1400_vm0, %v7400_v11, %v7409_v4  ;;  %v7419_v55 = vsel %vm1400_vm0, %v7409_v4, %v7418_v32 }
 0x529   : > { %7259 = vst [vmem:[#allocation3 + $0x68] sm:$0xff] %v19387_v2  ;;  %v7154_v54 = vmax.f32 %v7106_v39, 0.0  ;;  %v7107_v45 = vadd.f32 %v15401_v10, %v19234_v44  ;;  %v6789_v37 = vpop.f32.mrb[55].mxu1  ;;  %15455 = vmatmul.mubr.bf16.gmra.mrb[44].mxu0 %v7410_v36  ;;  %v7430_v17 = vshrl.u32 %v19387_v2, 16  ;;  %v7433_v57 = vshll.u32 %v19387_v2, 16 }
 0x52a   : > { %7258 = vst [vmem:[#allocation3 + $0x60] sm:$0xff] %v7234_v59  ;;  %v7152_v12 = vmax.f32 %v7104_v1, 0.0  ;;  %v7105_v5 = vadd.f32 %v19234_v44, %v6789_v37  ;;  %15458 = vmatprep.mubr.bf16.mxu0 %v7419_v55  ;;  %v7421_v61 = vshrl.u32 %v7234_v59, 16  ;;  %v7424_v11 = vshll.u32 %v7234_v59, 16 }
 0x52b   : > { %v7155_v0 = vmax.f32 %v7107_v45, 0.0  ;;  %v7432_v30 = vrot.slane %v7430_v17, 3  ;;  %v7435_v63 = vrot.slane %v7433_v57, 4  ;;  %v7202_v51 = vmul.f32 %v7154_v54, %v21586_v50  ;;  %v21590_v54 = vld [vmem:[#allocation36_spill] sm:$0xff]  ;;  %v21593_v50 = vld [vmem:[#allocation35_spill] sm:$0xff] }
 0x52c   : > { %v7153_v14 = vmax.f32 %v7105_v5, 0.0  ;;  %v7423_v3 = vrot.slane %v7421_v61, 3  ;;  %v7426_v53 = vrot.slane %v7424_v11, 4  ;;  %v7972_v41 = vrot.slane %v7234_v59, 4 }
 0x52d   : > { %v7203_v22 = vmul.f32 %v7155_v0, %v21587_v40  ;;  %v7436_v23 = vor.u32 %v7435_v63, %v7432_v30  ;;  %v7974_v43 = vrot.slane %v19387_v2, 4  ;;  %v7200_v20 = vmul.f32 %v7152_v12, %v21588_v26  ;;  %v21591_v12 = vld [vmem:[#allocation37_spill] sm:$0xff]  ;;  %v21592_v30 = vld [vmem:[#allocation34_spill] sm:$0xff] }
 0x52e   : > { %v7201_v27 = vmul.f32 %v7153_v14, %v21589_v8  ;;  %v15404_v35 = vpop.f32.mrb[56].mxu1  ;;  %v7427_v47 = vor.u32 %v7426_v53, %v7423_v3  ;;  %v19414_v62 = vsel %vm2037_vm1, %v7970_v29, %v7972_v41 }
 0x52f   : > { %v19410_v9 = vpack.c.bf16 %v7203_v22, %v7202_v51  ;;  %v7110_v52 = vadd.f32 %v15404_v35, %v19234_v44  ;;  %v6802_v33 = vpop.f32.mrb[57].mxu1  ;;  %v19417_v46 = vsel %vm2037_vm1, %v7972_v41, %v7974_v43 }
 0x530   : > { %v7236_v34 = vpack.c.bf16 %v7201_v27, %v7200_v20  ;;  %v7108_v49 = vadd.f32 %v19234_v44, %v6802_v33  ;;  %v15405_v6 = vpop.f32.mrb[58].mxu1  ;;  %v7428_v18 = vsel %vm1400_vm0, %v7418_v32, %v7427_v47  ;;  %v7437_v19 = vsel %vm1400_vm0, %v7427_v47, %v7436_v23 }
 0x531   : > { %7261 = vst [vmem:[#allocation3 + $0x78] sm:$0xff] %v19410_v9  ;;  %v7158_v42 = vmax.f32 %v7110_v52, 0.0  ;;  %v7111_v4 = vadd.f32 %v15405_v6, %v19234_v44  ;;  %v6805_v2 = vpop.f32.mrb[59].mxu1  ;;  %15459 = vmatmul.mubr.bf16.gmra.mrb[48].mxu0 %v7428_v18  ;;  %v7448_v29 = vshrl.u32 %v19410_v9, 16  ;;  %v7451_v39 = vshll.u32 %v19410_v9, 16 }
 0x532   : > { %7260 = vst [vmem:[#allocation3 + $0x70] sm:$0xff] %v7236_v34  ;;  %v7156_v21 = vmax.f32 %v7108_v49, 0.0  ;;  %v7109_v59 = vadd.f32 %v19234_v44, %v6805_v2  ;;  %15462 = vmatprep.mubr.bf16.mxu0 %v7437_v19  ;;  %v7439_v1 = vshrl.u32 %v7236_v34, 16  ;;  %v7442_v32 = vshll.u32 %v7236_v34, 16  ;;  %v21594_v2 = vld [vmem:[#allocation40_spill] sm:$0xff] }
 0x533   : > { %v7159_v10 = vmax.f32 %v7111_v4, 0.0  ;;  %v7450_v36 = vrot.slane %v7448_v29, 3  ;;  %v7453_v55 = vrot.slane %v7451_v39, 4  ;;  %v7206_v45 = vmul.f32 %v7158_v42, %v21590_v54  ;;  %v21596_v54 = vld [vmem:[#allocation38_spill] sm:$0xff] }
 0x534   : > { %v7157_v37 = vmax.f32 %v7109_v59, 0.0  ;;  %v7441_v17 = vrot.slane %v7439_v1, 3  ;;  %v7444_v57 = vrot.slane %v7442_v32, 4  ;;  %v7976_v11 = vrot.slane %v7236_v34, 4  ;;  %v21595_v1 = vld [vmem:[#allocation41_spill] sm:$0xff] }
 0x535   : > { %v7207_v5 = vmul.f32 %v7159_v10, %v21591_v12  ;;  %v7454_v61 = vor.u32 %v7453_v55, %v7450_v36  ;;  %v7978_v0 = vrot.slane %v19410_v9, 4  ;;  %v7204_v63 = vmul.f32 %v7156_v21, %v21592_v30 }
 0x536   : > { %v7205_v51 = vmul.f32 %v7157_v37, %v21593_v50  ;;  %v15408_v14 = vpop.f32.mrb[60].mxu1  ;;  %v7445_v3 = vor.u32 %v7444_v57, %v7441_v17  ;;  %v19436_v41 = vsel %vm2037_vm1, %v7974_v43, %v7976_v11  ;;  %v21597_v37 = vld [vmem:[#allocation39_spill] sm:$0xff] }
 0x537   : > { %v19432_v53 = vpack.c.bf16 %v7207_v5, %v7206_v45  ;;  %v7114_v40 = vadd.f32 %v15408_v14, %v19234_v44  ;;  %v6818_v22 = vpop.f32.mrb[61].mxu1  ;;  %v19439_v26 = vsel %vm2037_vm1, %v7976_v11, %v7978_v0 }
 0x538   : > { %v7238_v20 = vpack.c.bf16 %v7205_v51, %v7204_v63  ;;  %v7112_v8 = vadd.f32 %v19234_v44, %v6818_v22  ;;  %v15409_v27 = vpop.f32.mrb[62].mxu1  ;;  %v7446_v35 = vsel %vm1400_vm0, %v7436_v23, %v7445_v3  ;;  %v7455_v47 = vsel %vm1400_vm0, %v7445_v3, %v7454_v61 }
 0x539   : > { %7263 = vst [vmem:[#allocation3 + $0x88] sm:$0xff] %v19432_v53  ;;  %v7162_v9 = vmax.f32 %v7114_v40, 0.0  ;;  %v7115_v52 = vadd.f32 %v15409_v27, %v19234_v44  ;;  %v6821_v33 = vpop.f32.mrb[63].mxu1  ;;  %15463 = vmatmul.mubr.bf16.gmra.mrb[52].mxu0 %v7446_v35  ;;  %v7466_v43 = vshrl.u32 %v19432_v53, 16  ;;  %v7469_v34 = vshll.u32 %v19432_v53, 16 }
 0x53a   : > { %7262 = vst [vmem:[#allocation3 + $0x80] sm:$0xff] %v7238_v20  ;;  %v7160_v49 = vmax.f32 %v7112_v8, 0.0  ;;  %v7113_v6 = vadd.f32 %v19234_v44, %v6821_v33  ;;  %15466 = vmatprep.mubr.bf16.mxu0 %v7455_v47  ;;  %v7457_v18 = vshrl.u32 %v7238_v20, 16  ;;  %v7460_v23 = vshll.u32 %v7238_v20, 16 }
 0x53b   : > { %v7163_v19 = vmax.f32 %v7115_v52, 0.0  ;;  %v7468_v42 = vrot.slane %v7466_v43, 3  ;;  %v7471_v4 = vrot.slane %v7469_v34, 4  ;;  %v7210_v29 = vmul.f32 %v7162_v9, %v21594_v2  ;;  %v21598_v34 = vld [vmem:[#allocation44_spill] sm:$0xff] }
 0x53c   : > { %v7161_v39 = vmax.f32 %v7113_v6, 0.0  ;;  %v7459_v21 = vrot.slane %v7457_v18, 3  ;;  %v7462_v59 = vrot.slane %v7460_v23, 4  ;;  %v7980_v36 = vrot.slane %v7238_v20, 4 }
 0x53d   : > { %v7211_v32 = vmul.f32 %v7163_v19, %v21595_v1  ;;  %v7472_v10 = vor.u32 %v7471_v4, %v7468_v42  ;;  %v7982_v55 = vrot.slane %v19432_v53, 4  ;;  %v7208_v45 = vmul.f32 %v7160_v49, %v21596_v54  ;;  %v21599_v19 = vld [vmem:[#allocation49_spill] sm:$0xff] }
 0x53e   : > { %v7209_v17 = vmul.f32 %v7161_v39, %v21597_v37  ;;  %v15412_v57 = vpop.f32.mrb[64].mxu1  ;;  %v7463_v12 = vor.u32 %v7462_v59, %v7459_v21  ;;  %v19458_v63 = vsel %vm2037_vm1, %v7978_v0, %v7980_v36  ;;  %v21600_v39 = vld [vmem:[#allocation42_spill] sm:$0xff]  ;;  %v21601_v59 = vld [vmem:[#allocation43_spill] sm:$0xff] }
 0x53f   : > { %v19454_v5 = vpack.c.bf16 %v7211_v32, %v7210_v29  ;;  %v7118_v11 = vadd.f32 %v15412_v57, %v19234_v44  ;;  %v6834_v30 = vpop.f32.mrb[65].mxu1  ;;  %v19461_v50 = vsel %vm2037_vm1, %v7980_v36, %v7982_v55 }
 0x540   : > { %v19463_v51 = vpack.c.bf16 %v7209_v17, %v7208_v45  ;;  %v7116_v14 = vadd.f32 %v19234_v44, %v6834_v30  ;;  %v15413_v3 = vpop.f32.mrb[66].mxu1  ;;  %v7464_v53 = vsel %vm1400_vm0, %v7454_v61, %v7463_v12  ;;  %v7473_v40 = vsel %vm1400_vm0, %v7463_v12, %v7472_v10 }
 0x541   : > { %7265 = vst [vmem:[#allocation3 + $0x98] sm:$0xff] %v19454_v5  ;;  %v7166_v22 = vmax.f32 %v7118_v11, 0.0  ;;  %v7119_v20 = vadd.f32 %v15413_v3, %v19234_v44  ;;  %v6837_v8 = vpop.f32.mrb[67].mxu1  ;;  %15467 = vmatmul.mubr.bf16.gmra.mrb[56].mxu0 %v7464_v53  ;;  %v21100_v0 = vshrl.u32 %v19454_v5, 16  ;;  %v21099_v27 = vshll.u32 %v19454_v5, 16 }
 0x542   : > { %7264 = vst [vmem:[#allocation3 + $0x90] sm:$0xff] %v19463_v51  ;;  %v7164_v35 = vmax.f32 %v7116_v14, 0.0  ;;  %v7117_v47 = vadd.f32 %v19234_v44, %v6837_v8  ;;  %15470 = vmatprep.mubr.bf16.mxu0 %v7473_v40  ;;  %v21102_v61 = vshrl.u32 %v19463_v51, 16  ;;  %v21101_v9 = vshll.u32 %v19463_v51, 16 }
 0x543   : > { %v7167_v52 = vmax.f32 %v7119_v20, 0.0  ;;  %v7486_v33 = vrot.slane %v21100_v0, 3  ;;  %v7489_v43 = vrot.slane %v21099_v27, 4  ;;  %v7214_v49 = vmul.f32 %v7166_v22, %v21598_v34  ;;  %v21604_v34 = vld [vmem:[#allocation60_spill] sm:$0xff]  ;;  %v8448_v0 = vld [vmem:[#allocation3 + $0x48] sm:$0xff] }
 0x544   : > { %v7165_v6 = vmax.f32 %v7117_v47, 0.0  ;;  %v7477_v18 = vrot.slane %v21102_v61, 3  ;;  %v7480_v23 = vrot.slane %v21101_v9, 4  ;;  %v7984_v2 = vrot.slane %v19463_v51, 4  ;;  %v8447_v9 = vld [vmem:[#allocation3 + $0x40] sm:$0xff] }
 0x545   : > { %v7215_v42 = vmul.f32 %v7167_v52, %v21599_v19  ;;  %v7490_v4 = vor.u32 %v7489_v43, %v7486_v33  ;;  %v7986_v29 = vrot.slane %v19454_v5, 4  ;;  %v7212_v21 = vmul.f32 %v7164_v35, %v21600_v39  ;;  %v21605_v19 = vld [vmem:[#allocation69_spill] sm:$0xff] }
 0x546   : > { %v7213_v1 = vmul.f32 %v7165_v6, %v21601_v59  ;;  %v15416_v32 = vpop.f32.mrb[68].mxu1  ;;  %v7481_v36 = vor.u32 %v7480_v23, %v7477_v18  ;;  %v19494_v17 = vsel %vm2037_vm1, %v7982_v55, %v7984_v2  ;;  %v21606_v59 = vld [vmem:[#allocation50_spill] sm:$0xff] }
 0x547   : > { %v19490_v54 = vpack.c.bf16 %v7215_v42, %v7214_v49  ;;  %v7122_v45 = vadd.f32 %v15416_v32, %v19234_v44  ;;  %v6850_v37 = vpop.f32.mrb[69].mxu1  ;;  %v19497_v57 = vsel %vm2037_vm1, %v7984_v2, %v7986_v29  ;;  %v21607_v32 = vld [vmem:[#allocation59_spill] sm:$0xff] }
 0x548   : > { %v19499_v12 = vpack.c.bf16 %v7213_v1, %v7212_v21  ;;  %v7120_v11 = vadd.f32 %v19234_v44, %v6850_v37  ;;  %v15417_v30 = vpop.f32.mrb[70].mxu1  ;;  %v7482_v14 = vsel %vm1400_vm0, %v7472_v10, %v7481_v36  ;;  %v7491_v3 = vsel %vm1400_vm0, %v7481_v36, %v7490_v4 }
 0x549   : > { %21602 = vst [vmem:[#allocation102_spill] sm:$0xff] %v19490_v54  ;;  %7267 = vst [vmem:[#allocation3 + $0xa8] sm:$0xff] %v19490_v54  ;;  %v7170_v53 = vmax.f32 %v7122_v45, 0.0  ;;  %v7123_v40 = vadd.f32 %v15417_v30, %v19234_v44  ;;  %v6853_v22 = vpop.f32.mrb[71].mxu1  ;;  %15471 = vmatmul.mubr.bf16.gmra.mrb[60].mxu0 %v7482_v14  ;;  %v21096_v55 = vshrl.u32 %v19490_v54, 16  ;;  %v21095_v20 = vshll.u32 %v19490_v54, 16 }
 0x54a   : > { %21603 = vst [vmem:[#allocation103_spill] sm:$0xff] %v19499_v12  ;;  %7266 = vst [vmem:[#allocation3 + $0xa0] sm:$0xff] %v19499_v12  ;;  %v7168_v8 = vmax.f32 %v7120_v11, 0.0  ;;  %v7121_v35 = vadd.f32 %v19234_v44, %v6853_v22  ;;  %15474 = vmatprep.mubr.bf16.mxu0 %v7491_v3  ;;  %v21098_v10 = vshrl.u32 %v19499_v12, 16  ;;  %v21097_v47 = vshll.u32 %v19499_v12, 16 }
 0x54b   : > { %v7171_v52 = vmax.f32 %v7123_v40, 0.0  ;;  %v7504_v33 = vrot.slane %v21096_v55, 3  ;;  %v7507_v43 = vrot.slane %v21095_v20, 4  ;;  %v7218_v49 = vmul.f32 %v7170_v53, %v21604_v34 }
 0x54c   : > { %v7169_v6 = vmax.f32 %v7121_v35, 0.0  ;;  %v7495_v18 = vrot.slane %v21098_v10, 3  ;;  %v7498_v23 = vrot.slane %v21097_v47, 4  ;;  %v7988_v39 = vrot.slane %v19499_v12, 4 }
 0x54d   : > { %v7219_v42 = vmul.f32 %v7171_v52, %v21605_v19  ;;  %v7508_v2 = vor.u32 %v7507_v43, %v7504_v33  ;;  %v7990_v21 = vrot.slane %v19490_v54, 4  ;;  %v7216_v1 = vmul.f32 %v7168_v8, %v21606_v59  ;;  %v21609_v59 = vld [vmem:[#allocation80_spill] sm:$0xff] }
 0x54e   : > { %v7217_v36 = vmul.f32 %v7169_v6, %v21607_v32  ;;  %v15420_v45 = vpop.f32.mrb[72].mxu1  ;;  %v7499_v37 = vor.u32 %v7498_v23, %v7495_v18  ;;  %v19530_v3 = vsel %vm2037_vm1, %v7986_v29, %v7988_v39 }
 0x54f   : > { %v19526_v11 = vpack.c.bf16 %v7219_v42, %v7218_v49  ;;  %v7126_v30 = vadd.f32 %v15420_v45, %v19234_v44  ;;  %v6866_v14 = vpop.f32.mrb[73].mxu1  ;;  %v19533_v53 = vsel %vm2037_vm1, %v7988_v39, %v7990_v21  ;;  %v21610_v45 = vld [vmem:[#allocation89_spill] sm:$0xff] }
 0x550   : > { %v19535_v40 = vpack.c.bf16 %v7217_v36, %v7216_v1  ;;  %v7124_v22 = vadd.f32 %v19234_v44, %v6866_v14  ;;  %v15421_v8 = vpop.f32.mrb[74].mxu1  ;;  %v7500_v35 = vsel %vm1400_vm0, %v7490_v4, %v7499_v37  ;;  %v7509_v52 = vsel %vm1400_vm0, %v7499_v37, %v7508_v2 }
 0x551   : > { %7269 = vst [vmem:[#allocation3 + $0xb8] sm:$0xff] %v19526_v11  ;;  %v7174_v33 = vmax.f32 %v7126_v30, 0.0  ;;  %v7127_v43 = vadd.f32 %v15421_v8, %v19234_v44  ;;  %v6869_v34 = vpop.f32.mrb[75].mxu1  ;;  %15475 = vmatmul.mubr.bf16.gmra.mrb[64].mxu0 %v7500_v35  ;;  %v21092_v29 = vshrl.u32 %v19526_v11, 16  ;;  %v21091_v49 = vshll.u32 %v19526_v11, 16  ;;  %v21611_v8 = vld [vmem:[#allocation70_spill] sm:$0xff] }
 0x552   : > { %21608 = vst [vmem:[#allocation104_spill] sm:$0xff] %v19535_v40  ;;  %7268 = vst [vmem:[#allocation3 + $0xb0] sm:$0xff] %v19535_v40  ;;  %v7172_v6 = vmax.f32 %v7124_v22, 0.0  ;;  %v7125_v18 = vadd.f32 %v19234_v44, %v6869_v34  ;;  %15478 = vmatprep.mubr.bf16.mxu0 %v7509_v52  ;;  %v21094_v4 = vshrl.u32 %v19535_v40, 16  ;;  %v21093_v23 = vshll.u32 %v19535_v40, 16  ;;  %v21612_v52 = vld [vmem:[#allocation79_spill] sm:$0xff] }
 0x553   : > { %v7175_v19 = vmax.f32 %v7127_v43, 0.0  ;;  %v7522_v42 = vrot.slane %v21092_v29, 3  ;;  %v7525_v39 = vrot.slane %v21091_v49, 4  ;;  %v7222_v1 = vmul.f32 %v7174_v33, %v21609_v59 }
 0x554   : > { %v7173_v32 = vmax.f32 %v7125_v18, 0.0  ;;  %v7513_v36 = vrot.slane %v21094_v4, 3  ;;  %v7516_v44 = vrot.slane %v21093_v23, 4  ;;  %v7992_v14 = vrot.slane %v19535_v40, 4 }
 0x555   : > { %v7223_v37 = vmul.f32 %v7175_v19, %v21610_v45  ;;  %v7526_v30 = vor.u32 %v7525_v39, %v7522_v42  ;;  %v21103_v22 = vrot.slane %v19526_v11, 4  ;;  %v7220_v35 = vmul.f32 %v7172_v6, %v21611_v8  ;;  %v19572_v6 = vld [vmem:[#allocation3 + $0x10] sm:$0xff] }
 0x556   : > { %v7221_v43 = vmul.f32 %v7173_v32, %v21612_v52  ;;  %v7517_v34 = vor.u32 %v7516_v44, %v7513_v36  ;;  %v19563_v18 = vsel %vm2037_vm1, %v7990_v21, %v7992_v14  ;;  %v19576_v21 = vld [vmem:[#allocation3 + $0x20] sm:$0xff]  ;;  %v19578_v36 = vld [vmem:[#allocation3 + $0x28] sm:$0xff]  ;;  %v21112_v45 = vshrl.u32 %v19572_v6, 16 }
 0x557   : > { %v7247_v33 = vpack.c.bf16 %v7223_v37, %v7222_v1  ;;  %v19568_v59 = vsel %vm2037_vm1, %v7992_v14, %v21103_v22  ;;  %v19574_v1 = vld [vmem:[#allocation3 + $0x18] sm:$0xff]  ;;  %v7882_v32 = vld [vmem:[#allocation3] sm:$0xf0]  ;;  %v21107_v8 = vshrl.u32 %v19576_v21, 16  ;;  %v21106_v29 = vshll.u32 %v19576_v21, 16 }
 0x558   : > { %v7246_v19 = vpack.c.bf16 %v7221_v43, %v7220_v35  ;;  %v7518_v42 = vsel %vm1400_vm0, %v7508_v2, %v7517_v34  ;;  %v7527_v39 = vsel %vm1400_vm0, %v7517_v34, %v7526_v30  ;;  %v21109_v14 = vshrl.u32 %v19574_v1, 16  ;;  %v8446_v35 = vld [vmem:[#allocation3 + $0x38] sm:$0xff] }
 0x559   : > { %7271 = vst [vmem:[#allocation3 + $0xc8] sm:$0xff] %v7247_v33  ;;  %15479 = vmatmul.mubr.bf16.gmra.mrb[68].mxu0 %v7518_v42  ;;  %v7949_v52 = vrot.slane %v7882_v32, 4  ;;  %v21105_v43 = vshrl.u32 %v19578_v36, 16  ;;  %v8445_v42 = vld [vmem:[#allocation3 + $0x30] sm:$0xff]  ;;  %v21108_v49 = vshll.u32 %v19574_v1, 16  ;;  %v9195_v4 = vrot.slane %v21112_v45, 7 }
 0x55a   : > { %7270 = vst [vmem:[#allocation3 + $0xc0] sm:$0xff] %v7246_v19  ;;  %15482 = vmatprep.mubr.bf16.mxu0 %v7527_v39  ;;  %v7950_v19 = vrot.slane %v19217_v58, 4  ;;  %v21111_v39 = vshll.u32 %v19572_v6, 16  ;;  %v9203_v32 = vrot.slane %v21109_v14, 7  ;;  %v19598_v20 = vshrl.u32 %v8445_v42, 16  ;;  %v8451_v14 = vld [vmem:[#allocation3 + $0x60] sm:$0xff] }
 0x55b   : > { %v9219_v55 = vrot.slane %v21105_v43, 7  ;;  %v19622_v22 = vshll.u32 %v8445_v42, 16  ;;  %v19628_v43 = vshrl.u32 %v8448_v0, 16  ;;  %v19699_v45 = vshrl.u32 %v8451_v14, 16 }
 0x55c   : > { %v7951_v58 = vsel %vm2037_vm1, %v7949_v52, %v7950_v19  ;;  %v9206_v47 = vor.u32 %v9203_v32, %v21108_v49 }
 0x55d   : > { %21616 = vst [vmem:[#allocation119_spill] sm:$0xff] %v19622_v22 }
 0x561   : > { %v7296_v44 = vld [vmem:[#allocation3 + $0xc0] sm:$0xf] }
 0x562   : > { %v7529_v37 = vshrl.u32 %v7296_v44, 16  ;;  %v7532_v2 = vshll.u32 %v7296_v44, 16  ;;  %v19588_v44 = vshrl.u32 %v8446_v35, 16 }
 0x564   : > { %v7531_v34 = vrot.slane %v7529_v37, 3  ;;  %v7534_v33 = vrot.slane %v7532_v2, 4  ;;  %v9211_v37 = vrot.slane %v21107_v8, 7  ;;  %v21104_v2 = vshll.u32 %v19578_v36, 16 }
 0x565   : > { %v9235_v27 = vrot.slane %v19588_v44, 7 }
 0x566   : > { %v7535_v23 = vor.u32 %v7534_v33, %v7531_v34  ;;  %v19605_v33 = vor.u32 %v9195_v4, %v21111_v39  ;;  %v9214_v10 = vor.u32 %v9211_v37, %v21106_v29  ;;  %v9222_v52 = vor.u32 %v9219_v55, %v21104_v2 }
 0x567   : > { %v9227_v2 = vrot.slane %v19598_v20, 7  ;;  %v19631_v29 = vshrl.u32 %v8447_v9, 16 }
 0x568   : > { %v7536_v34 = vsel %vm1400_vm0, %v7526_v30, %v7535_v23  ;;  %21613 = vst [vmem:[#allocation105_spill] sm:$0xff] %v19605_v33  ;;  %v19615_v23 = vsel %vm3278_vm3, %v9195_v4, %v9206_v47  ;;  %v19617_v30 = vshll.u32 %v8446_v35, 16  ;;  %v19620_v61 = vsel %vm3278_vm3, %v9203_v32, %v9214_v10  ;;  %v16920_v10 = vld [vmem:[%s20922_s6 + $0x88] sm:$0xff]  }
 0x569   : > { %15483 = vmatmul.mubr.bf16.gmra.mrb[72].mxu0 %v7536_v34  ;;  %21614 = vst [vmem:[#allocation106_spill] sm:$0xff] %v19615_v23  ;;  %21615 = vst [vmem:[#allocation113_spill] sm:$0xff] %v19620_v61  ;;  %v19625_v34 = vsel %vm3278_vm3, %v9211_v37, %v9222_v52  ;;  %v9230_v47 = vor.u32 %v9227_v2, %v19622_v22  ;;  %v7953_v35 = vsel %vm2037_vm1, %v7950_v19, %v7952_v16  ;;  %v8449_v16 = vld [vmem:[#allocation3 + $0x50] sm:$0xff]  ;;  %v8455_v61 = vld [vmem:[#allocation3 + $0x80] sm:$0xff] }
 0x56a   : > { %15502 = vmatprep.mubr.bf16.mxu0 %v7951_v58  ;;  %21617 = vst [vmem:[#allocation107_spill] sm:$0xff] %v19625_v34  ;;  %v9238_v58 = vor.u32 %v9235_v27, %v19617_v30  ;;  %v19646_v32 = vshll.u32 %v8448_v0, 16  ;;  %v9251_v37 = vrot.slane %v19628_v43, 7  ;;  %v19651_v52 = vshll.u32 %v8447_v9, 16 }
 0x56b   : > { %v19644_v42 = vsel %vm3278_vm3, %v9219_v55, %v9230_v47  ;;  %v16922_v47 = vld [vmem:[%s20922_s6 + $0x98] sm:$0xff]   ;;  %v10367_v49 = vrot.slane %v19617_v30, 1 }
 0x56c   : > { %v19638_v4 = vsel %vm3278_vm3, %v9227_v2, %v9238_v58  ;;  %21619 = vst [vmem:[#allocation108_spill] sm:$0xff] %v19644_v42  ;;  %v8450_v2 = vld [vmem:[#allocation3 + $0x58] sm:$0xff]  ;;  %v9243_v58 = vrot.slane %v19631_v29, 7  ;;  %v9254_v0 = vor.u32 %v9251_v37, %v19646_v32 }
 0x56d   : > { %21618 = vst [vmem:[#allocation109_spill] sm:$0xff] %v19638_v4  ;;  %v19659_v19 = vshrl.u32 %v8450_v2, 16  ;;  %v19674_v8 = vshll.u32 %v8450_v2, 16  ;;  %v16923_v2 = vld [vmem:[%s20922_s6 + $0xa0] sm:$0xff]  }
 0x56e   : > { %v9246_v55 = vor.u32 %v9243_v58, %v19651_v52 }
 0x570   : > { %v19667_v9 = vsel %vm3278_vm3, %v9235_v27, %v9246_v55  ;;  %v19681_v27 = vshll.u32 %v8449_v16, 16 }
 0x571   : > { %15503 = vmatmul.mubr.bf16.vlgmr.msra.gmra.mrb[28].mxu0 %v7953_v35  ;;  %21621 = vst [vmem:[#allocation122_spill] sm:$0xff] %v19667_v9  ;;  %v21110_v35 = vrot.slane %v19622_v22, 1  ;;  %v10371_v9 = vor.u32 %v10367_v49, %v19588_v44 }
 0x572   : > { %15551 = vmatpush3.bf16.msra.mxu0 %v19380_v56  ;;  %15506 = vmatprep.mubr.bf16.mxu0 %v19273_v13  ;;  %v19662_v56 = vsel %vm3278_vm3, %v9243_v58, %v9254_v0  ;;  %v19664_v13 = vshrl.u32 %v8449_v16, 16  ;;  %v9267_v58 = vrot.slane %v19659_v19, 7  ;;  %v8452_v0 = vld [vmem:[#allocation3 + $0x68] sm:$0xff] }
 0x573   : > { %15552 = vmatprep.subr.bf16.mxu0 %v16920_v10  ;;  %21620 = vst [vmem:[#allocation120_spill] sm:$0xff] %v19662_v56  ;;  %v19694_v16 = vshrl.u32 %v8452_v0, 16 }
 0x574   : > { %v9259_v55 = vrot.slane %v19664_v13, 7 }
 0x575   : > { %v21637_v34 = vrot.slane %v19694_v16, 7 }
 0x576   : > { %15553 = vmatpush3.bf16.msra.mxu0 %v16920_v10  ;;  %v10363_v10 = vor.u32 %v21110_v35, %v19598_v20  ;;  %v9270_v35 = vor.u32 %v9267_v58, %v19674_v8 }
 0x577   : > { %15554 = vmatprep.subr.bf16.mxu0 %v16921_v48 }
 0x578   : > { %v19697_v39 = vsel %vm3278_vm3, %v9259_v55, %v9270_v35  ;;  %v10391_v35 = vrot.slane %v19681_v27, 1 }
 0x579   : > { %15507 = vmatmul.mubr.bf16.gmra.mrb[32].mxu0 %v19302_v31  ;;  %v10375_v31 = vrot.slane %v19651_v52, 1  ;;  %21623 = vst [vmem:[#allocation110_spill] sm:$0xff] %v19697_v39  ;;  %v19723_v39 = vshll.u32 %v8451_v14, 16  ;;  %v8453_v14 = vld [vmem:[#allocation3 + $0x70] sm:$0xff] }
 0x57a   : > { %15510 = vmatprep.mubr.bf16.mxu0 %v19305_v15  ;;  %15555 = vmatpush3.bf16.msra.mxu0 %v16921_v48  ;;  %v9262_v15 = vor.u32 %v9259_v55, %v19681_v27  ;;  %v19692_v48 = vsel %vm4416_vm4, %v10363_v10, %v10367_v49  ;;  %v16924_v10 = vld [vmem:[%s20922_s6 + $0xa8] sm:$0xff]   ;;  %v21113_v49 = vrot.slane %v19694_v16, 7 }
 0x57b   : > { %15556 = vmatprep.subr.bf16.mxu0 %v16922_v47  ;;  %21622 = vst [vmem:[#allocation123_spill] sm:$0xff] %v19692_v48  ;;  %v10379_v4 = vor.u32 %v10375_v31, %v19631_v29  ;;  %v10383_v48 = vrot.slane %v19646_v32, 1 }
 0x57c   : > { %v19702_v56 = vsel %vm3278_vm3, %v9251_v37, %v9262_v15  ;;  %v19715_v37 = vshll.u32 %v8452_v0, 16 }
 0x57d   : > { %21624 = vst [vmem:[#allocation112_spill] sm:$0xff] %v19702_v56  ;;  %v19719_v55 = vsel %vm4416_vm4, %v10379_v4, %v10383_v48  ;;  %v10387_v15 = vor.u32 %v10383_v48, %v19628_v43  ;;  %v8454_v56 = vld [vmem:[#allocation3 + $0x78] sm:$0xff]  ;;  %v16925_v4 = vld [vmem:[%s20922_s6 + $0xb0] sm:$0xff]  }
 0x57e   : > { %15557 = vmatpush3.bf16.msra.mxu0 %v16922_v47  ;;  %v19712_v47 = vsel %vm4416_vm4, %v10371_v9, %v10375_v31  ;;  %21626 = vst [vmem:[#allocation115_spill] sm:$0xff] %v19719_v55  ;;  %v9275_v9 = vrot.slane %v19699_v45, 7  ;;  %v10395_v31 = vor.u32 %v10391_v35, %v19664_v13  ;;  %v9286_v0 = vor.u32 %v21113_v49, %v19715_v37 }
 0x57f   : > { %15558 = vmatprep.subr.bf16.mxu0 %v16923_v2  ;;  %21625 = vst [vmem:[#allocation114_spill] sm:$0xff] %v19712_v47  ;;  %v19741_v55 = vshrl.u32 %v8454_v56, 16  ;;  %v10407_v49 = vrot.slane %v19723_v39, 1 }
 0x580   : > { %v19744_v47 = vsel %vm3278_vm3, %v9275_v9, %v9286_v0 }
 0x581   : > { %15511 = vmatmul.mubr.bf16.gmra.mrb[36].mxu0 %v19333_v28  ;;  %v10399_v28 = vrot.slane %v19674_v8, 1  ;;  %21629 = vst [vmem:[#allocation118_spill] sm:$0xff] %v19744_v47  ;;  %v10411_v0 = vor.u32 %v10407_v49, %v19699_v45  ;;  %v9299_v47 = vrot.slane %v19741_v55, 7 }
 0x582   : > { %15514 = vmatprep.mubr.bf16.mxu0 %v19336_v24  ;;  %15559 = vmatpush3.bf16.msra.mxu0 %v16923_v2  ;;  %v19735_v24 = vsel %vm4416_vm4, %v10387_v15, %v10391_v35  ;;  %v9278_v2 = vor.u32 %v9275_v9, %v19723_v39  ;;  %v10415_v35 = vrot.slane %v19715_v37, 1  ;;  %v16926_v15 = vld [vmem:[%s20922_s6 + $0xb8] sm:$0xff]   ;;  %v19760_v9 = vld [vmem:[#allocation3 + $0x28] sm:$0xff] }
 0x583   : > { %15560 = vmatprep.subr.bf16.mxu0 %v16924_v10  ;;  %21627 = vst [vmem:[#allocation116_spill] sm:$0xff] %v19735_v24  ;;  %v19739_v48 = vsel %vm4416_vm4, %v10395_v31, %v10399_v28  ;;  %v19754_v31 = vshrl.u32 %v8453_v14, 16  ;;  %v19758_v24 = vld [vmem:[#allocation3 + $0x20] sm:$0xff]  ;;  %21632 = vst [vmem:[#allocation138_spill] sm:$0xff] %v19760_v9 }
 0x584   : > { %21628 = vst [vmem:[#allocation117_spill] sm:$0xff] %v19739_v48  ;;  %v19747_v42 = vsel %vm3278_vm3, %v9267_v58, %v9278_v2  ;;  %v19756_v48 = vshll.u32 %v8453_v14, 16  ;;  %21631 = vst [vmem:[#allocation134_spill] sm:$0xff] %v19758_v24  ;;  %v10403_v58 = vor.u32 %v10399_v28, %v19659_v19  ;;  %v8456_v2 = vld [vmem:[#allocation3 + $0x88] sm:$0xff]  ;;  %v10419_v28 = vor.u32 %v10415_v35, %v19694_v16 }
 0x585   : > { %21630 = vst [vmem:[#allocation133_spill] sm:$0xff] %v19747_v42  ;;  %v19787_v14 = vshrl.u32 %v8456_v2, 16 }
 0x586   : > { %15561 = vmatpush3.bf16.msra.mxu0 %v16924_v10  ;;  %v19763_v10 = vshll.u32 %v8454_v56, 16  ;;  %v19769_v42 = vsel %vm4416_vm4, %v10403_v58, %v10407_v49  ;;  %v9291_v49 = vrot.slane %v19754_v31, 7  ;;  %v10423_v58 = vrot.slane %v19756_v48, 1 }
 0x587   : > { %15562 = vmatprep.subr.bf16.mxu0 %v16925_v4  ;;  %21633 = vst [vmem:[#allocation135_spill] sm:$0xff] %v19769_v42  ;;  %v19789_v56 = vshll.u32 %v8456_v2, 16 }
 0x588   : > { %v10431_v42 = vrot.slane %v19763_v10, 1  ;;  %v9294_v23 = vor.u32 %v9291_v49, %v19756_v48  ;;  %v19798_v40 = vsel %vm4416_vm4, %v10419_v28, %v10423_v58  ;;  %v21640_v28 = vshrl.u32 %v19758_v24, 16 }
 0x589   : > { %15515 = vmatmul.mubr.bf16.gmra.mrb[40].mxu0 %v19363_v38  ;;  %v19779_v38 = vld [vmem:[%s20922_s6 + $0xc0] sm:$0xff]   ;;  %21636 = vst [vmem:[#allocation125_spill] sm:$0xff] %v19798_v40  ;;  %v10447_v40 = vrot.slane %v19789_v56, 1 }
 0x58a   : > { %15518 = vmatprep.mubr.bf16.mxu0 %v19366_v60  ;;  %15563 = vmatpush3.bf16.msra.mxu0 %v16925_v4  ;;  %v9302_v60 = vor.u32 %v9299_v47, %v19763_v10  ;;  %v19784_v4 = vsel %vm4416_vm4, %v10411_v0, %v10415_v35  ;;  %v10427_v35 = vor.u32 %v10423_v58, %v19754_v31  ;;  %v19801_v0 = vshrl.u32 %v8455_v61, 16 }
 0x58b   : > { %15564 = vmatprep.subr.bf16.mxu0 %v16926_v15  ;;  %21634 = vst [vmem:[#allocation121_spill] sm:$0xff] %v19784_v4  ;;  %v19803_v4 = vshll.u32 %v8455_v61, 16  ;;  %v10435_v2 = vor.u32 %v10431_v42, %v19741_v55  ;;  %v19810_v54 = vsel %vm3278_vm3, %v21637_v34, %v9294_v23  ;;  %v21124_v61 = vrot.slane %v19787_v14, 7 }
 0x58c   : > { %v19795_v33 = vsel %vm3278_vm3, %v9291_v49, %v9302_v60  ;;  %21638 = vst [vmem:[#allocation126_spill] sm:$0xff] %v19810_v54  ;;  %v19813_v49 = vsel %vm4416_vm4, %v10427_v35, %v10431_v42  ;;  %v11015_v60 = vrot.slane %v21640_v28, 3  ;;  %v21643_v23 = vshll.u32 %v19760_v9, 16 }
 0x58d   : > { %21635 = vst [vmem:[#allocation124_spill] sm:$0xff] %v19795_v33  ;;  %21639 = vst [vmem:[#allocation127_spill] sm:$0xff] %v19813_v49  ;;  %v21642_v33 = vshrl.u32 %v19760_v9, 16  ;;  %v9307_v42 = vrot.slane %v19801_v0, 7  ;;  %v10439_v35 = vrot.slane %v19803_v4, 1  ;;  %v10451_v28 = vor.u32 %v10447_v40, %v19787_v14 }
 0x58e   : > { %15565 = vmatpush3.bf16.msra.mxu0 %v16926_v15  ;;  %v21641_v15 = vshll.u32 %v19758_v24, 16  ;;  %v11027_v34 = vrot.slane %v21643_v23, 4 }
 0x58f   : > { %15614 = vmatprep.subr.bf16.mxu0 %v19779_v38  ;;  %v11024_v12 = vrot.slane %v21642_v33, 3  ;;  %v9310_v49 = vor.u32 %v9307_v42, %v19803_v4  ;;  %v19837_v33 = vsel %vm4416_vm4, %v10435_v2, %v10439_v35  ;;  %v10443_v23 = vor.u32 %v10439_v35, %v19801_v0 }
 0x590   : > { %v11018_v58 = vrot.slane %v21641_v15, 4  ;;  %21645 = vst [vmem:[#allocation129_spill] sm:$0xff] %v19837_v33 }
 0x591   : > { %15519 = vmatmul.mubr.bf16.gmra.mrb[44].mxu0 %v19392_v7  ;;  %v9318_v7 = vor.u32 %v21124_v61, %v19789_v56  ;;  %v19843_v9 = vor.u32 %v11027_v34, %v11024_v12  ;;  %v19846_v24 = vsel %vm3278_vm3, %v9299_v47, %v9310_v49  ;;  %v9164_v61 = vld [vmem:[#allocation3 + $0x98] sm:$0xff]  ;;  %v19849_v54 = vsel %vm4416_vm4, %v10443_v23, %v10447_v40  ;;  %v9165_v23 = vld [vmem:[#allocation3 + $0xa0] sm:$0xff] }
 0x592   : > { %15522 = vmatprep.mubr.bf16.mxu0 %v19395_v25  ;;  %v19833_v15 = vor.u32 %v11018_v58, %v11015_v60  ;;  %21648 = vst [vmem:[#allocation131_spill] sm:$0xff] %v19849_v54  ;;  %v19851_v60 = vld [vmem:[#allocation3 + $0x90] sm:$0xff]  ;;  %v19853_v58 = vshll.u32 %v9164_v61, 16  ;;  %v19862_v12 = vshrl.u32 %v9164_v61, 16  ;;  %v8439_v54 = vld [vmem:[#allocation3] sm:$0xf0] }
 0x593   : > { %v19841_v25 = vsel %vm3278_vm3, %v9307_v42, %v9318_v7  ;;  %21647 = vst [vmem:[#allocation141_spill] sm:$0xff] %v19843_v9  ;;  %v21126_v42 = vshll.u32 %v19851_v60, 16  ;;  %v21127_v40 = vshrl.u32 %v19851_v60, 16 }
 0x594   : > { %21644 = vst [vmem:[#allocation128_spill] sm:$0xff] %v19833_v15  ;;  %21646 = vst [vmem:[#allocation130_spill] sm:$0xff] %v19841_v25  ;;  %v19858_v2 = vsel %vm1400_vm0, %v19833_v15, %v19843_v9  ;;  %v10463_v47 = vrot.slane %v19853_v58, 1  ;;  %v19895_v15 = vld [vmem:[#allocation3 + $0xb8] sm:$0xff] }
 0x595   : > { %21649 = vst [vmem:[#allocation145_spill] sm:$0xff] %v19853_v58  ;;  %21650 = vst [vmem:[#allocation132_spill] sm:$0xff] %v19858_v2  ;;  %v10455_v49 = vrot.slane %v21126_v42, 1 }
 0x596   : > { %v10467_v34 = vor.u32 %v10463_v47, %v19862_v12  ;;  %21656 = vst [vmem:[#allocation111_spill] sm:$0xff] %v19895_v15 }
 0x597   : > { %v19871_v35 = vsel %vm4416_vm4, %v10451_v28, %v10455_v49  ;;  %v10459_v7 = vor.u32 %v10455_v49, %v21127_v40  ;;  %v19885_v28 = vshrl.u32 %v9165_v23, 16 }
 0x598   : > { %21651 = vst [vmem:[#allocation158_spill] sm:$0xff] %v19871_v35 }
 0x599   : > { %15523 = vmatmul.mubr.bf16.gmra.mrb[48].mxu0 %v19414_v62  ;;  %v9166_v62 = vld [vmem:[#allocation3 + $0xa8] sm:$0xff]  ;;  %v19876_v61 = vsel %vm4416_vm4, %v10459_v7, %v10463_v47 }
 0x59a   : > { %15526 = vmatprep.mubr.bf16.mxu0 %v19417_v46  ;;  %21652 = vst [vmem:[#allocation160_spill] sm:$0xff] %v19876_v61  ;;  %v19878_v9 = vshll.u32 %v9166_v62, 16  ;;  %v19880_v46 = vshll.u32 %v9165_v23, 16  ;;  %v19887_v2 = vshrl.u32 %v9166_v62, 16  ;;  %v19900_v61 = vld [vmem:[#allocation3 + $0xb0] sm:$0xff] }
 0x59b   : > { %21658 = vst [vmem:[#allocation137_spill] sm:$0xff] %v19900_v61  ;;  %v19904_v62 = vshll.u32 %v19900_v61, 16 }
 0x59c   : > { %21653 = vst [vmem:[#allocation161_spill] sm:$0xff] %v19878_v9  ;;  %21654 = vst [vmem:[#allocation147_spill] sm:$0xff] %v19880_v46  ;;  %v10479_v42 = vrot.slane %v19878_v9, 1  ;;  %v10471_v49 = vrot.slane %v19880_v46, 1 }
 0x59d   : > { %21659 = vst [vmem:[#allocation139_spill] sm:$0xff] %v19904_v62 }
 0x59e   : > { %v19891_v47 = vsel %vm4416_vm4, %v10467_v34, %v10471_v49  ;;  %v10475_v7 = vor.u32 %v10471_v49, %v19885_v28  ;;  %v10483_v40 = vor.u32 %v10479_v42, %v19887_v2  ;;  %v21130_v34 = vshrl.u32 %v19895_v15, 16 }
 0x59f   : > { %21655 = vst [vmem:[#allocation148_spill] sm:$0xff] %v19891_v47  ;;  %v19912_v49 = vshrl.u32 %v19900_v61, 16  ;;  %v19921_v47 = vld [vmem:[#allocation3 + $0xc8] sm:$0xff]  ;;  %v19942_v61 = vld [vmem:[#allocation3] sm:$0xff] }
 0x5a0   : > { %21662 = vst [vmem:[#allocation144_spill] sm:$0xff] %v19921_v47  ;;  %21666 = vst [vmem:[#allocation150_spill] sm:$0xff] %v19942_v61 }
 0x5a1   : > { %15527 = vmatmul.mubr.bf16.gmra.mrb[52].mxu0 %v19436_v41  ;;  %v19898_v41 = vsel %vm4416_vm4, %v10475_v7, %v10479_v42  ;;  %21660 = vst [vmem:[#allocation142_spill] sm:$0xff] %v19912_v49  ;;  %v10487_v42 = vrot.slane %v19904_v62, 1 }
 0x5a2   : > { %15530 = vmatprep.mubr.bf16.mxu0 %v19439_v26  ;;  %21657 = vst [vmem:[#allocation136_spill] sm:$0xff] %v19898_v41  ;;  %v21129_v26 = vshll.u32 %v19895_v15, 16  ;;  %v21141_v15 = vshll.u32 %v19942_v61, 16 }
 0x5a3   : > { %v19918_v41 = vsel %vm4416_vm4, %v10483_v40, %v10487_v42 }
 0x5a4   : > { %v10495_v23 = vrot.slane %v21129_v26, 1  ;;  %21661 = vst [vmem:[#allocation143_spill] sm:$0xff] %v19918_v41  ;;  %v19926_v26 = vld [vmem:[#allocation3 + $0xc0] sm:$0xff] }
 0x5a5   : > { %21664 = vst [vmem:[#allocation140_spill] sm:$0xff] %v19926_v26  ;;  %v21135_v33 = vshll.u32 %v19926_v26, 16 }
 0x5a6   : > { %v10499_v7 = vor.u32 %v10495_v23, %v21130_v34  ;;  %v21136_v34 = vshrl.u32 %v19921_v47, 16 }
 0x5a9   : > { %15531 = vmatmul.mubr.bf16.gmra.mrb[56].mxu0 %v19458_v63  ;;  %v10491_v63 = vor.u32 %v10487_v42, %v19912_v49  ;;  %v21140_v42 = vshrl.u32 %v19926_v26, 16 }
 0x5aa   : > { %15534 = vmatprep.mubr.bf16.mxu0 %v19461_v50  ;;  %v21134_v50 = vshll.u32 %v19921_v47, 16 }
 0x5ab   : > { %v19924_v35 = vsel %vm4416_vm4, %v10491_v63, %v10495_v23  ;;  %v10503_v23 = vrot.slane %v21135_v33, 1  ;;  %v8482_v63 = vshrl.u32 %v8439_v54, 16 }
 0x5ac   : > { %21663 = vst [vmem:[#allocation146_spill] sm:$0xff] %v19924_v35  ;;  %v10511_v40 = vrot.slane %v21134_v50, 1  ;;  %v8485_v35 = vshll.u32 %v8439_v54, 16 }
 0x5ad   : > { %v19947_v50 = vsel %vm4416_vm4, %v10499_v7, %v10503_v23  ;;  %v8484_v54 = vrot.slane %v8482_v63, 4  ;;  %v21671_v63 = vshrl.u32 %v19574_v1, 16 }
 0x5ae   : > { %v19940_v41 = vor.u32 %v10511_v40, %v21136_v34  ;;  %21667 = vst [vmem:[#allocation151_spill] sm:$0xff] %v19947_v50  ;;  %v8487_v25 = vrot.slane %v8485_v35, 5  ;;  %v21669_v50 = vshrl.u32 %v19572_v6, 16 }
 0x5af   : > { %v8510_v35 = vrot.slane %v21671_v63, 4  ;;  %v8558_v63 = vrot.slane %v19651_v52, 5  ;;  %v11177_v52 = vrot.slane %v19912_v49, 3 }
 0x5b0   : > { %21665 = vst [vmem:[#allocation149_spill] sm:$0xff] %v19940_v41  ;;  %v8495_v41 = vrot.slane %v21141_v15, 5  ;;  %v8488_v7 = vor.u32 %v8487_v25, %v8484_v54  ;;  %v8501_v47 = vrot.slane %v21669_v50, 4  ;;  %v21673_v15 = vshrl.u32 %v19576_v21, 16 }
 0x5b1   : > { %15535 = vmatmul.mubr.bf16.gmra.mrb[60].mxu0 %v19494_v17  ;;  %v21139_v17 = vshrl.u32 %v19942_v61, 16  ;;  %v21675_v54 = vshrl.u32 %v19578_v36, 16  ;;  %v8537_v61 = vrot.slane %v19598_v20, 4  ;;  %v8564_v20 = vrot.slane %v19628_v43, 4 }
 0x5b2   : > { %15538 = vmatprep.mubr.bf16.mxu0 %v19497_v57  ;;  %v10507_v57 = vor.u32 %v10503_v23, %v21140_v42  ;;  %v21670_v23 = vshll.u32 %v19572_v6, 16  ;;  %v21676_v6 = vshll.u32 %v19578_v36, 16  ;;  %v11162_v36 = vrot.slane %v19880_v46, 4 }
 0x5b3   : > { %v8492_v34 = vrot.slane %v21139_v17, 4  ;;  %v21672_v17 = vshll.u32 %v19574_v1, 16  ;;  %v8528_v50 = vrot.slane %v21675_v54, 4  ;;  %v8549_v1 = vrot.slane %v19617_v30, 5  ;;  %v7906_v54 = vld [vmem:[#allocation3 + $0xc0] sm:$0xf] }
 0x5b4   : > { %v19952_v33 = vsel %vm4416_vm4, %v10507_v57, %v10511_v40  ;;  %v8504_v40 = vrot.slane %v21670_v23, 5  ;;  %v8531_v23 = vrot.slane %v21676_v6, 5  ;;  %v11171_v30 = vrot.slane %v19878_v9, 4 }
 0x5b5   : > { %21668 = vst [vmem:[#allocation152_spill] sm:$0xff] %v19952_v33  ;;  %v19966_v57 = vor.u32 %v8495_v41, %v8492_v34  ;;  %v8513_v42 = vrot.slane %v21672_v17, 5  ;;  %v8540_v41 = vrot.slane %v19622_v22, 5  ;;  %v8546_v34 = vrot.slane %v19588_v44, 4 }
 0x5b6   : > { %v11150_v17 = vrot.slane %v19862_v12, 3  ;;  %v11168_v44 = vrot.slane %v19887_v2, 3  ;;  %v8567_v33 = vrot.slane %v19646_v32, 5  ;;  %v11180_v22 = vrot.slane %v19904_v62, 4 }
 0x5b7   : > { %v8505_v26 = vor.u32 %v8504_v40, %v8501_v47  ;;  %v8514_v46 = vor.u32 %v8513_v42, %v8510_v35  ;;  %v8541_v32 = vor.u32 %v8540_v41, %v8537_v61  ;;  %v8576_v47 = vrot.slane %v19681_v27, 5  ;;  %v20017_v61 = vld [vmem:[#allocation3 + $0x30] sm:$0xff] }
 0x5b8   : > { %v20007_v62 = vor.u32 %v8567_v33, %v8564_v20  ;;  %v8582_v40 = vrot.slane %v19659_v19, 4  ;;  %v8497_v35 = vsel %vm2570_vm2, %v8488_v7, %v19966_v57 }
 0x5b9   : > { %15539 = vmatmul.mubr.bf16.gmra.mrb[64].mxu0 %v19530_v3  ;;  %v8519_v3 = vrot.slane %v21673_v15, 4  ;;  %v11153_v15 = vrot.slane %v19853_v58, 4  ;;  %v8532_v58 = vor.u32 %v8531_v23, %v8528_v50  ;;  %v8506_v33 = vsel %vm2570_vm2, %v19966_v57, %v8505_v26  ;;  %v20041_v23 = vld [vmem:[#allocation3 + $0x40] sm:$0xff] }
 0x5ba   : > { %15542 = vmatprep.mubr.bf16.mxu0 %v19533_v53  ;;  %v21674_v53 = vshll.u32 %v19576_v21, 16  ;;  %v8555_v21 = vrot.slane %v19631_v29, 4  ;;  %21683 = vst [vmem:[#allocation172_spill] sm:$0xff] %v20041_v23 }
 0x5bb   : > { %v19989_v6 = vor.u32 %v11153_v15, %v11150_v17  ;;  %v11172_v17 = vor.u32 %v11171_v30, %v11168_v44  ;;  %v7996_v15 = vrot.slane %v7906_v54, 4  ;;  %v20036_v50 = vsel %vm2570_vm2, %v8532_v58, %v8541_v32  ;;  %v20063_v44 = vld [vmem:[#allocation3 + $0x60] sm:$0xff]  ;;  %v20065_v30 = vld [vmem:[#allocation3 + $0x68] sm:$0xff] }
 0x5bc   : > { %v8522_v25 = vrot.slane %v21674_v53, 5  ;;  %v11159_v53 = vrot.slane %v19885_v28, 3  ;;  %21684 = vst [vmem:[#allocation173_spill] sm:$0xff] %v20065_v30 }
 0x5bd   : > { %21677 = vst [vmem:[#allocation153_spill] sm:$0xff] %v19989_v6 }
 0x5be   : > { %v11163_v29 = vor.u32 %v11162_v36, %v11159_v53  ;;  %v8523_v43 = vor.u32 %v8522_v25, %v8519_v3  ;;  %v8550_v53 = vor.u32 %v8549_v1, %v8546_v34  ;;  %v8559_v36 = vor.u32 %v8558_v63, %v8555_v21  ;;  %v20027_v3 = vld [vmem:[#allocation3 + $0x38] sm:$0xff]  ;;  %v20054_v1 = vld [vmem:[#allocation3 + $0x50] sm:$0xff] }
 0x5bf   : > { %v21682_v25 = vrot.slane %v19526_v11, 4  ;;  %v21152_v21 = vrot.slane %v20017_v61, 4 }
 0x5c0   : > { %v20000_v9 = vsel %vm1400_vm0, %v19989_v6, %v11163_v29  ;;  %v20005_v49 = vsel %vm1400_vm0, %v11163_v29, %v11172_v17  ;;  %v20025_v27 = vsel %vm2570_vm2, %v8514_v46, %v8523_v43  ;;  %v20039_v7 = vsel %vm2570_vm2, %v8541_v32, %v8550_v53 }
 0x5c1   : > { %15543 = vmatmul.mubr.bf16.gmra.mrb[68].mxu0 %v19563_v18  ;;  %21678 = vst [vmem:[#allocation154_spill] sm:$0xff] %v20000_v9  ;;  %v20002_v18 = vor.u32 %v11180_v22, %v11177_v52  ;;  %21680 = vst [vmem:[#allocation155_spill] sm:$0xff] %v20005_v49  ;;  %v8585_v22 = vrot.slane %v19674_v8, 5  ;;  %v7997_v19 = vsel %vm2037_vm1, %v21682_v25, %v7996_v15  ;;  %v11743_v29 = vrot.slane %v20027_v3, 4  ;;  %v20072_v15 = vld [vmem:[#allocation3 + $0x78] sm:$0xff]  ;;  %v20088_v25 = vld [vmem:[#allocation3 + $0x90] sm:$0xff] }
 0x5c2   : > { %15546 = vmatprep.mubr.bf16.mxu0 %v19568_v59  ;;  %v8573_v59 = vrot.slane %v19664_v13, 4  ;;  %v8515_v13 = vsel %vm2570_vm2, %v8505_v26, %v8514_v46  ;;  %v20033_v8 = vsel %vm2570_vm2, %v8523_v43, %v8532_v58  ;;  %v20043_v26 = vld [vmem:[#allocation3 + $0x48] sm:$0xff]  ;;  %v20046_v46 = vsel %vm2570_vm2, %v8550_v53, %v8559_v36  ;;  %v20056_v58 = vld [vmem:[#allocation3 + $0x58] sm:$0xff] }
 0x5c3   : > { %21679 = vst [vmem:[#allocation156_spill] sm:$0xff] %v20002_v18  ;;  %v20013_v42 = vsel %vm1400_vm0, %v11172_v17, %v20002_v18  ;;  %v20050_v41 = vsel %vm2570_vm2, %v8559_v36, %v20007_v62  ;;  %v20059_v63 = vor.u32 %v8585_v22, %v8582_v40  ;;  %v20070_v17 = vld [vmem:[#allocation3 + $0x70] sm:$0xff]  ;;  %v11745_v32 = vrot.slane %v20041_v23, 4  ;;  %v20122_v18 = vld [vmem:[#allocation3 + $0xc8] sm:$0xff] }
 0x5c4   : > { %21681 = vst [vmem:[#allocation157_spill] sm:$0xff] %v20013_v42  ;;  %v20052_v34 = vor.u32 %v8576_v47, %v8573_v59  ;;  %v11747_v53 = vrot.slane %v20043_v26, 4  ;;  %v20077_v59 = vld [vmem:[#allocation3 + $0x80] sm:$0xff]  ;;  %v20079_v47 = vld [vmem:[#allocation3 + $0x88] sm:$0xff]  ;;  %v20084_v40 = vsel %vm2037_vm1, %v21152_v21, %v11743_v29  ;;  %v11749_v22 = vrot.slane %v20054_v1, 4 }
 0x5c5   : > { %21685 = vst [vmem:[#allocation162_spill] sm:$0xff] %v20084_v40  ;;  %v11753_v43 = vrot.slane %v20063_v44, 4  ;;  %v11755_v52 = vrot.slane %v20065_v30, 4  ;;  %v11757_v54 = vrot.slane %v20070_v17, 4  ;;  %v11759_v40 = vrot.slane %v20072_v15, 4 }
 0x5c6   : > { %v20094_v36 = vsel %vm2037_vm1, %v11745_v32, %v11747_v53  ;;  %v20099_v20 = vsel %vm2037_vm1, %v11747_v53, %v11749_v22  ;;  %v11761_v53 = vrot.slane %v20077_v59, 4  ;;  %v21711_v9 = vshrl.u32 %v20056_v58, 16 }
 0x5c7   : > { %21687 = vst [vmem:[#allocation177_spill] sm:$0xff] %v20094_v36  ;;  %21688 = vst [vmem:[#allocation163_spill] sm:$0xff] %v20099_v20  ;;  %v20113_v36 = vsel %vm2037_vm1, %v11753_v43, %v11755_v52  ;;  %v11763_v20 = vrot.slane %v20079_v47, 4  ;;  %v20125_v42 = vsel %vm2037_vm1, %v11755_v52, %v11757_v54 }
 0x5c8   : > { %21691 = vst [vmem:[#allocation166_spill] sm:$0xff] %v20113_v36  ;;  %21692 = vst [vmem:[#allocation167_spill] sm:$0xff] %v20125_v42  ;;  %v21710_v42 = vshll.u32 %v20054_v1, 16  ;;  %v12342_v6 = vrot.slane %v21711_v9, 4  ;;  %v16932_v9 = vld [vmem:[%s20922_s6 + $0xe8] sm:$0xff]  }
 0x5c9   : > { %15547 = vmatmul.mubr.bf16.gmra.mrb[72].mxu0 %v7997_v19  ;;  %v20091_v19 = vsel %vm2037_vm1, %v11743_v29, %v11745_v32  ;;  %v16928_v29 = vld [vmem:[%s20922_s6 + $0xc8] sm:$0xff]   ;;  %v20137_v49 = vsel %vm2037_vm1, %v11761_v53, %v11763_v20 }
 0x5ca   : > { %15566 = vmatprep.mubr.bf16.mxu0 %v8497_v35  ;;  %v11751_v35 = vrot.slane %v20056_v58, 4  ;;  %21686 = vst [vmem:[#allocation159_spill] sm:$0xff] %v20091_v19  ;;  %v20120_v19 = vld [vmem:[#allocation3 + $0xc0] sm:$0xff]  ;;  %21695 = vst [vmem:[#allocation169_spill] sm:$0xff] %v20137_v49 }
 0x5cc   : > { %v20102_v21 = vsel %vm2037_vm1, %v11749_v22, %v11751_v35  ;;  %v20110_v32 = vsel %vm2037_vm1, %v11751_v35, %v11753_v43  ;;  %v20128_v35 = vsel %vm2037_vm1, %v11757_v54, %v11759_v40  ;;  %v20134_v22 = vsel %vm2037_vm1, %v11759_v40, %v11761_v53  ;;  %v16929_v40 = vld [vmem:[%s20922_s6 + $0xd0] sm:$0xff]  }
 0x5cd   : > { %21689 = vst [vmem:[#allocation164_spill] sm:$0xff] %v20102_v21  ;;  %21690 = vst [vmem:[#allocation165_spill] sm:$0xff] %v20110_v32  ;;  %v20118_v21 = vld [vmem:[#allocation3 + $0xb8] sm:$0xff]  ;;  %v21155_v54 = vrot.slane %v20122_v18, 4  ;;  %v21701_v32 = vshll.u32 %v20017_v61, 16 }
 0x5ce   : > { %21693 = vst [vmem:[#allocation168_spill] sm:$0xff] %v20128_v35  ;;  %21694 = vst [vmem:[#allocation170_spill] sm:$0xff] %v20134_v22 }
 0x5cf   : > { %v12300_v52 = vrot.slane %v21701_v32, 5 }
 0x5d1   : > { %15567 = vmatmul.mubr.bf16.vlgmr.msra.gmra.mrb[28].mxu0 %v8506_v33  ;;  %v21696_v33 = vrot.slane %v20088_v25, 4 }
 0x5d2   : > { %15615 = vmatpush3.bf16.msra.mxu0 %v19779_v38  ;;  %15570 = vmatprep.mubr.bf16.mxu0 %v8515_v13  ;;  %v21154_v38 = vrot.slane %v20118_v21, 4  ;;  %v11777_v13 = vrot.slane %v20120_v19, 4 }
 0x5d3   : > { %v20146_v36 = vsel %vm2037_vm1, %v11763_v20, %v21696_v33  ;;  %15616 = vmatprep.subr.bf16.mxu0 %v16928_v29 }
 0x5d4   : > { %21697 = vst [vmem:[#allocation171_spill] sm:$0xff] %v20146_v36  ;;  %v20164_v53 = vsel %vm2037_vm1, %v21154_v38, %v11777_v13  ;;  %v20169_v49 = vsel %vm2037_vm1, %v11777_v13, %v21155_v54  ;;  %v16930_v38 = vld [vmem:[%s20922_s6 + $0xd8] sm:$0xff]   ;;  %v21703_v13 = vshll.u32 %v20027_v3, 16  ;;  %v21707_v36 = vshrl.u32 %v20043_v26, 16 }
 0x5d5   : > { %21698 = vst [vmem:[#allocation174_spill] sm:$0xff] %v20164_v53  ;;  %21699 = vst [vmem:[#allocation175_spill] sm:$0xff] %v20169_v49  ;;  %v21702_v49 = vshrl.u32 %v20027_v3, 16 }
 0x5d6   : > { %15617 = vmatpush3.bf16.msra.mxu0 %v16928_v29  ;;  %v21700_v29 = vshrl.u32 %v20017_v61, 16  ;;  %v12309_v22 = vrot.slane %v21703_v13, 5  ;;  %v12324_v35 = vrot.slane %v21707_v36, 4  ;;  %v16931_v13 = vld [vmem:[%s20922_s6 + $0xe0] sm:$0xff]   ;;  %v12336_v36 = vrot.slane %v21710_v42, 5 }
 0x5d7   : > { %15618 = vmatprep.subr.bf16.mxu0 %v16929_v40  ;;  %v12306_v53 = vrot.slane %v21702_v49, 4  ;;  %v21706_v49 = vshll.u32 %v20041_v23, 16 }
 0x5d8   : > { %v12297_v54 = vrot.slane %v21700_v29, 4  ;;  %v21704_v29 = vshrl.u32 %v20041_v23, 16 }
 0x5d9   : > { %15571 = vmatmul.mubr.bf16.gmra.mrb[32].mxu0 %v20025_v27  ;;  %v12318_v27 = vrot.slane %v21706_v49, 5  ;;  %v12310_v43 = vor.u32 %v12309_v22, %v12306_v53 }
 0x5da   : > { %v12315_v20 = vrot.slane %v21704_v29, 4  ;;  %15574 = vmatprep.mubr.bf16.mxu0 %v20033_v8  ;;  %15619 = vmatpush3.bf16.msra.mxu0 %v16929_v40  ;;  %v20198_v33 = vor.u32 %v12300_v52, %v12297_v54  ;;  %v21708_v8 = vshll.u32 %v20043_v26, 16  ;;  %v21709_v52 = vshrl.u32 %v20054_v1, 16 }
 0x5db   : > { %15620 = vmatprep.subr.bf16.mxu0 %v16930_v38  ;;  %v21721_v29 = vshrl.u32 %v20070_v17, 16 }
 0x5dc   : > { %21705 = vst [vmem:[#allocation176_spill] sm:$0xff] %v20198_v33  ;;  %v12327_v40 = vrot.slane %v21708_v8, 5  ;;  %v12333_v54 = vrot.slane %v21709_v52, 4  ;;  %v12319_v49 = vor.u32 %v12318_v27, %v12315_v20  ;;  %v20219_v23 = vsel %vm2570_vm2, %v20198_v33, %v12310_v43 }
 0x5dd   : > { %21712 = vst [vmem:[#allocation178_spill] sm:$0xff] %v20219_v23  ;;  %v21714_v52 = vshll.u32 %v20056_v58, 16  ;;  %v21715_v20 = vshrl.u32 %v20063_v44, 16  ;;  %v21722_v23 = vshll.u32 %v20070_v17, 16  ;;  %v21723_v33 = vshrl.u32 %v20072_v15, 16 }
 0x5de   : > { %v12328_v22 = vor.u32 %v12327_v40, %v12324_v35  ;;  %15621 = vmatpush3.bf16.msra.mxu0 %v16930_v38  ;;  %v20222_v53 = vsel %vm2570_vm2, %v12310_v43, %v12319_v49  ;;  %v12337_v8 = vor.u32 %v12336_v36, %v12333_v54  ;;  %v21717_v35 = vshll.u32 %v20063_v44, 16 }
 0x5df   : > { %21713 = vst [vmem:[#allocation179_spill] sm:$0xff] %v20222_v53  ;;  %v12345_v32 = vrot.slane %v21714_v52, 5  ;;  %v12351_v27 = vrot.slane %v21715_v20, 4  ;;  %15622 = vmatprep.subr.bf16.mxu0 %v16931_v13  ;;  %v21718_v43 = vshrl.u32 %v20065_v30, 16  ;;  %v21719_v54 = vshll.u32 %v20065_v30, 16 }
 0x5e0   : > { %v20232_v42 = vsel %vm2570_vm2, %v12319_v49, %v12328_v22  ;;  %v12354_v38 = vrot.slane %v21717_v35, 5  ;;  %v20241_v52 = vsel %vm2570_vm2, %v12328_v22, %v12337_v8  ;;  %v12369_v53 = vrot.slane %v21721_v29, 4 }
 0x5e1   : > { %21716 = vst [vmem:[#allocation180_spill] sm:$0xff] %v20232_v42  ;;  %v12360_v40 = vrot.slane %v21718_v43, 4  ;;  %v12363_v36 = vrot.slane %v21719_v54, 5  ;;  %21720 = vst [vmem:[#allocation181_spill] sm:$0xff] %v20241_v52  ;;  %v12346_v20 = vor.u32 %v12345_v32, %v12342_v6  ;;  %v12372_v49 = vrot.slane %v21722_v23, 5  ;;  %15575 = vmatmul.mubr.bf16.gmra.mrb[36].mxu0 %v20036_v50  ;;  %v11685_v6 = vld [vmem:[#allocation3 + $0x98] sm:$0xff] }
 0x5e2   : > { %v12355_v42 = vor.u32 %v12354_v38, %v12351_v27  ;;  %v12378_v43 = vrot.slane %v21723_v33, 4  ;;  %v21724_v30 = vshll.u32 %v20072_v15, 16  ;;  %15578 = vmatprep.mubr.bf16.mxu0 %v20039_v7  ;;  %15623 = vmatpush3.bf16.msra.mxu0 %v16931_v13  ;;  %v21726_v23 = vshrl.u32 %v20077_v59, 16  ;;  %v16933_v33 = vld [vmem:[%s20922_s6 + $0xf0] sm:$0xff]  }
 0x5e3   : > { %v12364_v35 = vor.u32 %v12363_v36, %v12360_v40  ;;  %v20254_v32 = vsel %vm2570_vm2, %v12337_v8, %v12346_v20  ;;  %v12373_v29 = vor.u32 %v12372_v49, %v12369_v53  ;;  %v21727_v50 = vshll.u32 %v20077_v59, 16  ;;  %15624 = vmatprep.subr.bf16.mxu0 %v16932_v9  ;;  %v20273_v40 = vld [vmem:[#allocation3 + $0xa8] sm:$0xff] }
 0x5e4   : > { %v12381_v54 = vrot.slane %v21724_v30, 5  ;;  %21725 = vst [vmem:[#allocation182_spill] sm:$0xff] %v20254_v32  ;;  %v12387_v22 = vrot.slane %v21726_v23, 4  ;;  %v20263_v30 = vld [vmem:[#allocation3 + $0xa0] sm:$0xff]  ;;  %v20266_v7 = vsel %vm2570_vm2, %v12346_v20, %v12355_v42  ;;  %v21730_v8 = vshrl.u32 %v20079_v47, 16 }
 0x5e5   : > { %v12390_v27 = vrot.slane %v21727_v50, 5  ;;  %21728 = vst [vmem:[#allocation183_spill] sm:$0xff] %v20266_v7  ;;  %v20269_v13 = vsel %vm2570_vm2, %v12355_v42, %v12364_v35  ;;  %v20276_v36 = vsel %vm2570_vm2, %v12364_v35, %v12373_v29  ;;  %v21732_v23 = vshll.u32 %v20079_v47, 16 }
 0x5e6   : > { %21729 = vst [vmem:[#allocation184_spill] sm:$0xff] %v20269_v13  ;;  %v12382_v53 = vor.u32 %v12381_v54, %v12378_v43  ;;  %v12396_v38 = vrot.slane %v21730_v8, 4  ;;  %21731 = vst [vmem:[#allocation185_spill] sm:$0xff] %v20276_v36  ;;  %v21733_v32 = vshrl.u32 %v20088_v25, 16  ;;  %v21735_v42 = vshll.u32 %v20088_v25, 16  ;;  %15625 = vmatpush3.bf16.msra.mxu0 %v16932_v9  ;;  %v20287_v13 = vld [vmem:[#allocation3 + $0xb0] sm:$0xff] }
 0x5e7   : > { %v12391_v49 = vor.u32 %v12390_v27, %v12387_v22  ;;  %v12399_v50 = vrot.slane %v21732_v23, 5  ;;  %v12412_v54 = vshrl.u32 %v11685_v6, 16  ;;  %v12415_v8 = vshll.u32 %v11685_v6, 16  ;;  %21736 = vst [vmem:[#allocation187_spill] sm:$0xff] %v20287_v13  ;;  %15626 = vmatprep.subr.bf16.mxu0 %v16933_v33 }
 0x5e8   : > { %v12405_v20 = vrot.slane %v21733_v32, 4  ;;  %v20283_v7 = vsel %vm2570_vm2, %v12373_v29, %v12382_v53  ;;  %v12408_v43 = vrot.slane %v21735_v42, 5  ;;  %v12421_v27 = vshrl.u32 %v20263_v30, 16  ;;  %v16934_v32 = vld [vmem:[%s20922_s6 + $0xf8] sm:$0xff]  }
 0x5e9   : > { %21734 = vst [vmem:[#allocation186_spill] sm:$0xff] %v20283_v7  ;;  %v20290_v35 = vsel %vm2570_vm2, %v12382_v53, %v12391_v49  ;;  %v12400_v22 = vor.u32 %v12399_v50, %v12396_v38  ;;  %v12424_v23 = vshll.u32 %v20263_v30, 16  ;;  %v12414_v42 = vrot.slane %v12412_v54, 4  ;;  %15579 = vmatmul.mubr.bf16.gmra.mrb[40].mxu0 %v20046_v46  ;;  %v20314_v46 = vld [vmem:[%s20922_s6 + $0x100] sm:$0xff]  }
 0x5ea   : > { %21737 = vst [vmem:[#allocation188_spill] sm:$0xff] %v20290_v35  ;;  %v12409_v29 = vor.u32 %v12408_v43, %v12405_v20  ;;  %v12417_v7 = vrot.slane %v12415_v8, 5  ;;  %v12430_v9 = vshrl.u32 %v20273_v40, 16  ;;  %v12423_v53 = vrot.slane %v12421_v27, 4  ;;  %15582 = vmatprep.mubr.bf16.mxu0 %v20050_v41  ;;  %15627 = vmatpush3.bf16.msra.mxu0 %v16933_v33 }
 0x5eb   : > { %v20299_v6 = vsel %vm2570_vm2, %v12391_v49, %v12400_v22  ;;  %v12426_v35 = vrot.slane %v12424_v23, 5  ;;  %v12433_v38 = vshll.u32 %v20273_v40, 16  ;;  %v12439_v20 = vshrl.u32 %v20287_v13, 16  ;;  %15628 = vmatprep.subr.bf16.mxu0 %v16934_v32 }
 0x5ec   : > { %21738 = vst [vmem:[#allocation9_spill] sm:$0xff] %v20299_v6  ;;  %v20304_v50 = vsel %vm2570_vm2, %v12400_v22, %v12409_v29  ;;  %v12418_v36 = vor.u32 %v12417_v7, %v12414_v42  ;;  %v12432_v52 = vrot.slane %v12430_v9, 4  ;;  %v12442_v49 = vshll.u32 %v20287_v13, 16 }
 0x5ed   : > { %21739 = vst [vmem:[#allocation8_spill] sm:$0xff] %v20304_v50  ;;  %v12427_v43 = vor.u32 %v12426_v35, %v12423_v53  ;;  %v12435_v54 = vrot.slane %v12433_v38, 5  ;;  %v21740_v8 = vshrl.u32 %v20118_v21, 16  ;;  %v12441_v22 = vrot.slane %v12439_v20, 4 }
 0x5ee   : > { %v20317_v7 = vsel %vm2570_vm2, %v12409_v29, %v12418_v36  ;;  %v21742_v41 = vshll.u32 %v20118_v21, 16  ;;  %v21743_v35 = vshrl.u32 %v20120_v19, 16  ;;  %v12444_v53 = vrot.slane %v12442_v49, 5  ;;  %15629 = vmatpush3.bf16.msra.mxu0 %v16934_v32 }
 0x5ef   : > { %v12450_v27 = vrot.slane %v21740_v8, 4  ;;  %21741 = vst [vmem:[#allocation7_spill] sm:$0xff] %v20317_v7  ;;  %v20324_v42 = vsel %vm2570_vm2, %v12418_v36, %v12427_v43  ;;  %v12436_v9 = vor.u32 %v12435_v54, %v12432_v52  ;;  %v21744_v38 = vshll.u32 %v20120_v19, 16  ;;  %15678 = vmatprep.subr.bf16.mxu0 %v20314_v46 }
 0x5f0   : > { %v12453_v33 = vrot.slane %v21742_v41, 5  ;;  %v12459_v23 = vrot.slane %v21743_v35, 4  ;;  %v21745_v6 = vshrl.u32 %v20122_v18, 16  ;;  %v21746_v20 = vshll.u32 %v20122_v18, 16 }
 0x5f1   : > { %v12462_v8 = vrot.slane %v21744_v38, 5  ;;  %v20333_v41 = vsel %vm2570_vm2, %v12427_v43, %v12436_v9  ;;  %v12445_v35 = vor.u32 %v12444_v53, %v12441_v22  ;;  %v8578_v52 = vsel %vm2570_vm2, %v20007_v62, %v20052_v34 }
 0x5f2   : > { %v12454_v50 = vor.u32 %v12453_v33, %v12450_v27  ;;  %v12468_v29 = vrot.slane %v21745_v6, 4  ;;  %v12471_v7 = vrot.slane %v21746_v20, 5  ;;  %v8591_v36 = vrot.slane %v19699_v45, 4  ;;  %15583 = vmatmul.mubr.bf16.gmra.mrb[44].mxu0 %v8578_v52 }
 0x5f3   : > { %v12463_v13 = vor.u32 %v12462_v8, %v12459_v23  ;;  %v8594_v54 = vrot.slane %v19723_v39, 5  ;;  %v20342_v49 = vsel %vm2570_vm2, %v12436_v9, %v12445_v35  ;;  %v8587_v62 = vsel %vm2570_vm2, %v20052_v34, %v20059_v63 }
 0x5f4   : > { %v12472_v6 = vor.u32 %v12471_v7, %v12468_v29  ;;  %v20345_v32 = vsel %vm2570_vm2, %v12445_v35, %v12454_v50  ;;  %v8600_v45 = vrot.slane %v19694_v16, 4  ;;  %v8603_v39 = vrot.slane %v19715_v37, 5  ;;  %15586 = vmatprep.mubr.bf16.mxu0 %v8587_v62 }
 0x5f5   : > { %v20348_v43 = vsel %vm2570_vm2, %v12454_v50, %v12463_v13  ;;  %v8595_v22 = vor.u32 %v8594_v54, %v8591_v36  ;;  %v8609_v23 = vrot.slane %v19754_v31, 4  ;;  %v8612_v34 = vrot.slane %v19756_v48, 5 }
 0x5f6   : > { %v20356_v27 = vsel %vm2570_vm2, %v12463_v13, %v12472_v6  ;;  %v20360_v7 = vsel %vm2570_vm2, %v12472_v6, %v19966_v57  ;;  %v8604_v50 = vor.u32 %v8603_v39, %v8600_v45  ;;  %v8618_v37 = vrot.slane %v19741_v55, 4 }
 0x5f7   : > { %v8596_v33 = vsel %vm2570_vm2, %v20059_v63, %v8595_v22  ;;  %v8621_v13 = vrot.slane %v19763_v10, 5  ;;  %v8613_v9 = vor.u32 %v8612_v34, %v8609_v23  ;;  %v8627_v8 = vrot.slane %v19801_v0, 4 }
 0x5f8   : > { %v8605_v16 = vsel %vm2570_vm2, %v8595_v22, %v8604_v50  ;;  %v8630_v63 = vrot.slane %v19803_v4, 5  ;;  %v8636_v48 = vrot.slane %v19787_v14, 4  ;;  %v8639_v29 = vrot.slane %v19789_v56, 5 }
 0x5f9   : > { %v8622_v53 = vor.u32 %v8621_v13, %v8618_v37  ;;  %v8614_v38 = vsel %vm2570_vm2, %v8604_v50, %v8613_v9  ;;  %v21747_v35 = vshrl.u32 %v19463_v51, 16  ;;  %v21748_v36 = vshll.u32 %v19463_v51, 16  ;;  %v21751_v50 = vld [vmem:[#allocation103_spill] sm:$0xff]  ;;  %v21754_v37 = vld [vmem:[#allocation102_spill] sm:$0xff] }
 0x5fa   : > { %15587 = vmatmul.mubr.bf16.gmra.mrb[48].mxu0 %v8596_v33  ;;  %v8631_v55 = vor.u32 %v8630_v63, %v8627_v8  ;;  %v8640_v20 = vor.u32 %v8639_v29, %v8636_v48  ;;  %v21749_v54 = vshrl.u32 %v19454_v5, 16  ;;  %v21750_v62 = vshll.u32 %v19454_v5, 16 }
 0x5fb   : > { %15590 = vmatprep.mubr.bf16.mxu0 %v8605_v16  ;;  %v8623_v31 = vsel %vm2570_vm2, %v8613_v9, %v8622_v53  ;;  %v8645_v52 = vrot.slane %v21747_v35, 4  ;;  %v8648_v0 = vrot.slane %v21748_v36, 5  ;;  %v21752_v33 = vshrl.u32 %v21751_v50, 16 }
 0x5fc   : > { %v8632_v10 = vsel %vm2570_vm2, %v8622_v53, %v8631_v55  ;;  %v8641_v4 = vsel %vm2570_vm2, %v8631_v55, %v8640_v20  ;;  %v8654_v6 = vrot.slane %v21749_v54, 4  ;;  %v8657_v56 = vrot.slane %v21750_v62, 5 }
 0x5fd   : > { %v8649_v45 = vor.u32 %v8648_v0, %v8645_v52  ;;  %v8663_v23 = vrot.slane %v21752_v33, 4  ;;  %v21753_v51 = vshll.u32 %v21751_v50, 16  ;;  %v21755_v13 = vshrl.u32 %v21754_v37, 16 }
 0x5fe   : > { %v8658_v39 = vor.u32 %v8657_v56, %v8654_v6  ;;  %v21756_v5 = vshll.u32 %v21754_v37, 16  ;;  %v21760_v35 = vshrl.u32 %v19526_v11, 16  ;;  %v21761_v36 = vshll.u32 %v19526_v11, 16 }
 0x5ff   : > { %v8650_v22 = vsel %vm2570_vm2, %v8640_v20, %v8649_v45  ;;  %v8666_v34 = vrot.slane %v21753_v51, 5  ;;  %v8672_v9 = vrot.slane %v21755_v13, 4  ;;  %v16936_v13 = vld [vmem:[%s20922_s6 + $0x108] sm:$0xff]  }
 0x600   : > { %v8659_v16 = vsel %vm2570_vm2, %v8649_v45, %v8658_v39  ;;  %v8675_v53 = vrot.slane %v21756_v5, 5  ;;  %v8690_v52 = vrot.slane %v21760_v35, 4  ;;  %v8693_v0 = vrot.slane %v21761_v36, 5  ;;  %v9146_v45 = vld [vmem:[#allocation3 + $0x8] sm:$0x80]  ;;  %v21764_v5 = vld [vmem:[#allocation113_spill] sm:$0xff] }
 0x601   : > { %v21770_v35 = vld [vmem:[#allocation112_spill] sm:$0xff]  ;;  %v21771_v36 = vld [vmem:[#allocation110_spill] sm:$0xff] }
 0x602   : > { %15591 = vmatmul.mubr.bf16.gmra.mrb[52].mxu0 %v8614_v38  ;;  %v8667_v38 = vor.u32 %v8666_v34, %v8663_v23  ;;  %v8676_v8 = vor.u32 %v8675_v53, %v8672_v9  ;;  %v8694_v56 = vor.u32 %v8693_v0, %v8690_v52  ;;  %v9189_v23 = vshrl.u32 %v9146_v45, 16  ;;  %v21763_v9 = vld [vmem:[#allocation106_spill] sm:$0xff]  ;;  %v16937_v53 = vld [vmem:[%s20922_s6 + $0x110] sm:$0xff]   ;;  %v21772_v0 = vld [vmem:[#allocation133_spill] sm:$0xff] }
 0x603   : > { %15594 = vmatprep.mubr.bf16.mxu0 %v8623_v31  ;;  %v21757_v31 = vld [vmem:[#allocation104_spill] sm:$0xff]  ;;  %v16943_v52 = vld [vmem:[%s20922_s6 + $0x140] sm:$0xff]   ;;  %v21777_v45 = vshll.u32 %v19851_v60, 16 }
 0x604   : > { %v8668_v63 = vsel %vm2570_vm2, %v8658_v39, %v8667_v38  ;;  %v21758_v48 = vshrl.u32 %v21757_v31, 16  ;;  %v21759_v55 = vshll.u32 %v21757_v31, 16  ;;  %v9191_v34 = vrot.slane %v9189_v23, 7  ;;  %v16940_v31 = vld [vmem:[%s20922_s6 + $0x128] sm:$0xff]  }
 0x606   : > { %v8681_v29 = vrot.slane %v21758_v48, 4  ;;  %v8684_v20 = vrot.slane %v21759_v55, 5  ;;  %v21767_v48 = vld [vmem:[#allocation109_spill] sm:$0xff]  ;;  %v16941_v55 = vld [vmem:[%s20922_s6 + $0x130] sm:$0xff]  }
 0x608   : > { %v8685_v54 = vor.u32 %v8684_v20, %v8681_v29  ;;  %v21768_v29 = vld [vmem:[#allocation122_spill] sm:$0xff]  ;;  %v16942_v20 = vld [vmem:[%s20922_s6 + $0x138] sm:$0xff]  }
 0x60a   : > { %15595 = vmatmul.mubr.bf16.gmra.mrb[56].mxu0 %v8632_v10  ;;  %v8677_v10 = vsel %vm2570_vm2, %v8667_v38, %v8676_v8  ;;  %v8686_v39 = vsel %vm2570_vm2, %v8676_v8, %v8685_v54  ;;  %v8695_v33 = vsel %vm2570_vm2, %v8685_v54, %v8694_v56  ;;  %v16938_v38 = vld [vmem:[%s20922_s6 + $0x118] sm:$0xff]   ;;  %v21765_v8 = vld [vmem:[#allocation107_spill] sm:$0xff]  ;;  %v21774_v54 = vld [vmem:[#allocation126_spill] sm:$0xff] }
 0x60b   : > { %15598 = vmatprep.mubr.bf16.mxu0 %v8641_v4  ;;  %v8463_v4 = vld [vmem:[#allocation3 + $0xc0] sm:$0x1f] }
 0x60c   : > { %v8697_v6 = vshrl.u32 %v8463_v4, 16  ;;  %v8700_v62 = vshll.u32 %v8463_v4, 16  ;;  %v21773_v4 = vld [vmem:[#allocation118_spill] sm:$0xff] }
 0x60e   : > { %v8702_v50 = vrot.slane %v8700_v62, 5  ;;  %v21776_v62 = vshrl.u32 %v19851_v60, 16  ;;  %v9347_v60 = vrot.slane %v19887_v2, 7 }
 0x612   : > { %15599 = vmatmul.mubr.bf16.gmra.mrb[60].mxu0 %v8650_v22  ;;  %v8699_v22 = vrot.slane %v8697_v6, 4  ;;  %v21775_v6 = vld [vmem:[#allocation124_spill] sm:$0xff] }
 0x613   : > { %15602 = vmatprep.mubr.bf16.mxu0 %v8659_v16  ;;  %v21762_v16 = vld [vmem:[#allocation105_spill] sm:$0xff] }
 0x614   : > { %v8703_v51 = vor.u32 %v8702_v50, %v8699_v22  ;;  %v9199_v37 = vsel %vm3278_vm3, %v9191_v34, %v21762_v16  ;;  %v9331_v22 = vrot.slane %v19862_v12, 7  ;;  %v21778_v50 = vld [vmem:[#allocation130_spill] sm:$0xff]  ;;  %v21780_v34 = vld [vmem:[#allocation145_spill] sm:$0xff]  ;;  %v21781_v16 = vld [vmem:[#allocation147_spill] sm:$0xff] }
 0x616   : > { %v8704_v11 = vsel %vm2570_vm2, %v8694_v56, %v8703_v51  ;;  %v9323_v56 = vrot.slane %v21776_v62, 7  ;;  %v9339_v51 = vrot.slane %v19885_v28, 7 }
 0x61a   : > { %15603 = vmatmul.mubr.bf16.gmra.mrb[64].mxu0 %v8668_v63  ;;  %v21766_v63 = vld [vmem:[#allocation108_spill] sm:$0xff] }
 0x61b   : > { %15606 = vmatprep.mubr.bf16.mxu0 %v8677_v10  ;;  %v21769_v10 = vld [vmem:[#allocation120_spill] sm:$0xff] }
 0x622   : > { %15607 = vmatmul.mubr.bf16.gmra.mrb[68].mxu0 %v8686_v39  ;;  %v9326_v39 = vor.u32 %v21777_v45, %v9323_v56 }
 0x623   : > { %15610 = vmatprep.mubr.bf16.mxu0 %v8695_v33  ;;  %v21779_v33 = vrot.slane %v19787_v14, 7  ;;  %v21783_v14 = vld [vmem:[#allocation161_spill] sm:$0xff] }
 0x625   : > { %v9327_v23 = vsel %vm3278_vm3, %v21779_v33, %v9326_v39  ;;  %v17009_v39 = vld [vmem:[#allocation3 + $0x10] sm:$0xff]  ;;  %v17011_v33 = vld [vmem:[#allocation3 + $0x20] sm:$0xff] }
 0x62a   : > { %15611 = vmatmul.mubr.bf16.gmra.mrb[72].mxu0 %v8704_v11  ;;  %v9334_v11 = vor.u32 %v21780_v34, %v9331_v22  ;;  %v17012_v34 = vld [vmem:[#allocation3 + $0x28] sm:$0xff] }
 0x62b   : > { %15630 = vmatprep.mubr.bf16.mxu0 %v9199_v37  ;;  %v9342_v37 = vor.u32 %v21781_v16, %v9339_v51  ;;  %v16948_v16 = vld [vmem:[%s20922_s6 + $0x168] sm:$0xff]  }
 0x62d   : > { %v9343_v12 = vsel %vm3278_vm3, %v9331_v22, %v9342_v37  ;;  %v16944_v22 = vld [vmem:[%s20922_s6 + $0x148] sm:$0xff]   ;;  %v17014_v37 = vld [vmem:[#allocation3 + $0x38] sm:$0xff] }
 0x632   : > { %15631 = vmatmul.mubr.bf16.vlgmr.msra.gmra.mrb[28].mxu0 %v21763_v9 }
 0x633   : > { %15679 = vmatpush3.bf16.msra.mxu0 %v20314_v46  ;;  %15634 = vmatprep.mubr.bf16.mxu0 %v21764_v5  ;;  %v16939_v46 = vld [vmem:[%s20922_s6 + $0x120] sm:$0xff]   ;;  %v9350_v5 = vor.u32 %v21783_v14, %v9347_v60 }
 0x634   : > { %15680 = vmatprep.subr.bf16.mxu0 %v16936_v13  ;;  %v16951_v14 = vld [vmem:[%s20922_s6 + $0x180] sm:$0xff]  }
 0x635   : > { %v9351_v28 = vsel %vm3278_vm3, %v9339_v51, %v9350_v5  ;;  %v16946_v51 = vld [vmem:[%s20922_s6 + $0x158] sm:$0xff]  }
 0x636   : > { %v17018_v5 = vld [vmem:[#allocation3 + $0x58] sm:$0xff] }
 0x637   : > { %15681 = vmatpush3.bf16.msra.mxu0 %v16936_v13  ;;  %v21782_v13 = vld [vmem:[#allocation142_spill] sm:$0xff] }
 0x638   : > { %15682 = vmatprep.subr.bf16.mxu0 %v16937_v53  ;;  %v9355_v9 = vrot.slane %v21782_v13, 7  ;;  %v17016_v13 = vld [vmem:[#allocation3 + $0x48] sm:$0xff] }
 0x63a   : > { %15635 = vmatmul.mubr.bf16.gmra.mrb[32].mxu0 %v21765_v8  ;;  %v21785_v8 = vld [vmem:[#allocation111_spill] sm:$0xff] }
 0x63b   : > { %15638 = vmatprep.mubr.bf16.mxu0 %v21766_v63  ;;  %15683 = vmatpush3.bf16.msra.mxu0 %v16937_v53  ;;  %v21784_v53 = vld [vmem:[#allocation139_spill] sm:$0xff]  ;;  %v21786_v63 = vshrl.u32 %v21785_v8, 16 }
 0x63c   : > { %15684 = vmatprep.subr.bf16.mxu0 %v16938_v38 }
 0x63f   : > { %15685 = vmatpush3.bf16.msra.mxu0 %v16938_v38  ;;  %v9358_v38 = vor.u32 %v21784_v53, %v9355_v9  ;;  %v17019_v53 = vld [vmem:[#allocation3 + $0x60] sm:$0xff] }
 0x640   : > { %15686 = vmatprep.subr.bf16.mxu0 %v16939_v46 }
 0x642   : > { %15639 = vmatmul.mubr.bf16.gmra.mrb[36].mxu0 %v21767_v48  ;;  %v21787_v48 = vld [vmem:[#allocation140_spill] sm:$0xff] }
 0x643   : > { %15642 = vmatprep.mubr.bf16.mxu0 %v21768_v29  ;;  %15687 = vmatpush3.bf16.msra.mxu0 %v16939_v46  ;;  %v9363_v46 = vrot.slane %v21786_v63, 7  ;;  %v21788_v2 = vshrl.u32 %v21787_v48, 16  ;;  %v17022_v63 = vld [vmem:[#allocation3 + $0x78] sm:$0xff] }
 0x644   : > { %15688 = vmatprep.subr.bf16.mxu0 %v16940_v31 }
 0x645   : > { %v9371_v29 = vrot.slane %v21788_v2, 7  ;;  %v17025_v2 = vld [vmem:[#allocation3 + $0x90] sm:$0xff] }
 0x647   : > { %15689 = vmatpush3.bf16.msra.mxu0 %v16940_v31  ;;  %v9359_v31 = vsel %vm3278_vm3, %v9347_v60, %v9358_v38  ;;  %v16949_v60 = vld [vmem:[%s20922_s6 + $0x170] sm:$0xff]   ;;  %v17020_v38 = vld [vmem:[#allocation3 + $0x68] sm:$0xff] }
 0x648   : > { %15690 = vmatprep.subr.bf16.mxu0 %v16941_v55 }
 0x64a   : > { %15643 = vmatmul.mubr.bf16.gmra.mrb[40].mxu0 %v21769_v10  ;;  %v21790_v10 = vshll.u32 %v21787_v48, 16 }
 0x64b   : > { %15646 = vmatprep.mubr.bf16.mxu0 %v21770_v35  ;;  %15691 = vmatpush3.bf16.msra.mxu0 %v16941_v55  ;;  %v21789_v55 = vshll.u32 %v21785_v8, 16 }
 0x64c   : > { %15692 = vmatprep.subr.bf16.mxu0 %v16942_v20  ;;  %v9374_v35 = vor.u32 %v21790_v10, %v9371_v29  ;;  %v21794_v10 = vld [vmem:[#allocation137_spill] sm:$0xff] }
 0x64f   : > { %15693 = vmatpush3.bf16.msra.mxu0 %v16942_v20  ;;  %v9366_v20 = vor.u32 %v21789_v55, %v9363_v46  ;;  %v17027_v55 = vld [vmem:[#allocation3 + $0xa0] sm:$0xff] }
 0x650   : > { %15742 = vmatprep.subr.bf16.mxu0 %v16943_v52 }
 0x652   : > { %15647 = vmatmul.mubr.bf16.gmra.mrb[44].mxu0 %v21771_v36  ;;  %v9367_v36 = vsel %vm3278_vm3, %v9355_v9, %v9366_v20  ;;  %v17017_v9 = vld [vmem:[#allocation3 + $0x50] sm:$0xff]  ;;  %v17028_v20 = vld [vmem:[#allocation3 + $0xa8] sm:$0xff] }
 0x653   : > { %15650 = vmatprep.mubr.bf16.mxu0 %v21772_v0  ;;  %v21791_v0 = vld [vmem:[#allocation144_spill] sm:$0xff] }
 0x654   : > { %v21793_v62 = vshll.u32 %v21791_v0, 16 }
 0x65a   : > { %15651 = vmatmul.mubr.bf16.gmra.mrb[48].mxu0 %v21773_v4  ;;  %v21792_v4 = vshrl.u32 %v21791_v0, 16 }
 0x65b   : > { %15654 = vmatprep.mubr.bf16.mxu0 %v21774_v54 }
 0x65c   : > { %v9379_v54 = vrot.slane %v21792_v4, 7 }
 0x662   : > { %15655 = vmatmul.mubr.bf16.gmra.mrb[52].mxu0 %v21775_v6  ;;  %v9375_v6 = vsel %vm3278_vm3, %v9363_v46, %v9374_v35  ;;  %v17023_v46 = vld [vmem:[#allocation3 + $0x80] sm:$0xff]  ;;  %v10283_v35 = vld [vmem:[#allocation3 + $0x10] sm:$0xff] }
 0x663   : > { %15658 = vmatprep.mubr.bf16.mxu0 %v19846_v24  ;;  %v9335_v24 = vsel %vm3278_vm3, %v9323_v56, %v9334_v11  ;;  %v9382_v56 = vor.u32 %v21793_v62, %v9379_v54  ;;  %v17013_v11 = vld [vmem:[#allocation3 + $0x30] sm:$0xff]  ;;  %v10326_v54 = vshrl.u32 %v10283_v35, 16 }
 0x665   : > { %v9383_v45 = vsel %vm3278_vm3, %v9371_v29, %v9382_v56  ;;  %v17026_v29 = vld [vmem:[#allocation3 + $0x98] sm:$0xff] }
 0x66a   : > { %15659 = vmatmul.mubr.bf16.gmra.mrb[56].mxu0 %v21778_v50  ;;  %v20487_v50 = vld [vmem:[#allocation3 + $0x18] sm:$0xff] }
 0x66b   : > { %15662 = vmatprep.mubr.bf16.mxu0 %v9327_v23  ;;  %v16945_v23 = vld [vmem:[%s20922_s6 + $0x150] sm:$0xff]  }
 0x672   : > { %15663 = vmatmul.mubr.bf16.gmra.mrb[60].mxu0 %v9335_v24  ;;  %v17015_v24 = vld [vmem:[#allocation3 + $0x40] sm:$0xff] }
 0x673   : > { %15666 = vmatprep.mubr.bf16.mxu0 %v9343_v12  ;;  %v16950_v12 = vld [vmem:[%s20922_s6 + $0x178] sm:$0xff]  }
 0x67a   : > { %15667 = vmatmul.mubr.bf16.gmra.mrb[64].mxu0 %v9351_v28  ;;  %v17021_v28 = vld [vmem:[#allocation3 + $0x70] sm:$0xff] }
 0x67b   : > { %15670 = vmatprep.mubr.bf16.mxu0 %v9359_v31  ;;  %v17024_v31 = vld [vmem:[#allocation3 + $0x88] sm:$0xff] }
 0x682   : > { %15671 = vmatmul.mubr.bf16.gmra.mrb[68].mxu0 %v9367_v36  ;;  %v10328_v36 = vshll.u32 %v10283_v35, 16  ;;  %v21810_v35 = vld [vmem:[#allocation125_spill] sm:$0xff] }
 0x683   : > { %15674 = vmatprep.mubr.bf16.mxu0 %v9375_v6  ;;  %v10333_v6 = vshll.u32 %v20487_v50, 16 }
 0x684   : > { %v10330_v4 = vrot.slane %v10328_v36, 1  ;;  %v21811_v36 = vld [vmem:[#allocation127_spill] sm:$0xff] }
 0x685   : > { %v10335_v56 = vrot.slane %v10333_v6, 1  ;;  %v21814_v6 = vld [vmem:[#allocation158_spill] sm:$0xff] }
 0x686   : > { %v10331_v62 = vor.u32 %v10330_v4, %v10326_v54  ;;  %v21812_v4 = vld [vmem:[#allocation129_spill] sm:$0xff]  ;;  %v21813_v54 = vld [vmem:[#allocation131_spill] sm:$0xff] }
 0x68a   : > { %15675 = vmatmul.mubr.bf16.gmra.mrb[72].mxu0 %v9383_v45  ;;  %v10336_v45 = vsel %vm4416_vm4, %v10331_v62, %v10335_v56  ;;  %v21815_v62 = vld [vmem:[#allocation160_spill] sm:$0xff] }
 0x68b   : > { %15694 = vmatprep.mubr.bf16.mxu0 %v17009_v39  ;;  %v21795_v39 = vld [vmem:[#allocation134_spill] sm:$0xff] }
 0x692   : > { %15695 = vmatmul.mubr.bf16.vlgmr.msra.gmra.mrb[28].mxu0 %v20487_v50 }
 0x693   : > { %15743 = vmatpush3.bf16.msra.mxu0 %v16943_v52  ;;  %15698 = vmatprep.mubr.bf16.mxu0 %v17011_v33  ;;  %v16947_v52 = vld [vmem:[%s20922_s6 + $0x160] sm:$0xff]  }
 0x694   : > { %15744 = vmatprep.subr.bf16.mxu0 %v16944_v22 }
 0x697   : > { %15745 = vmatpush3.bf16.msra.mxu0 %v16944_v22  ;;  %v21796_v22 = vshll.u32 %v21795_v39, 16 }
 0x698   : > { %15746 = vmatprep.subr.bf16.mxu0 %v16945_v23 }
 0x699   : > { %v10343_v33 = vrot.slane %v21796_v22, 1  ;;  %v21819_v22 = vld [vmem:[#allocation146_spill] sm:$0xff] }
 0x69a   : > { %15699 = vmatmul.mubr.bf16.gmra.mrb[32].mxu0 %v17012_v34 }
 0x69b   : > { %15702 = vmatprep.mubr.bf16.mxu0 %v17013_v11  ;;  %15747 = vmatpush3.bf16.msra.mxu0 %v16945_v23  ;;  %v10337_v23 = vshrl.u32 %v20487_v50, 16  ;;  %v16953_v50 = vld [vmem:[%s20922_s6 + $0x190] sm:$0xff]  }
 0x69c   : > { %15748 = vmatprep.subr.bf16.mxu0 %v16946_v51 }
 0x69d   : > { %v10339_v34 = vor.u32 %v10337_v23, %v10335_v56  ;;  %v21816_v56 = vld [vmem:[#allocation148_spill] sm:$0xff] }
 0x69e   : > { %v10307_v23 = vld [vmem:[#allocation3 + $0xd0] sm:$0x1] }
 0x69f   : > { %15749 = vmatpush3.bf16.msra.mxu0 %v16946_v51 }
 0x6a0   : > { %15750 = vmatprep.subr.bf16.mxu0 %v16947_v52 }
 0x6a2   : > { %15703 = vmatmul.mubr.bf16.gmra.mrb[36].mxu0 %v17014_v37 }
 0x6a3   : > { %15706 = vmatprep.mubr.bf16.mxu0 %v17015_v24  ;;  %15751 = vmatpush3.bf16.msra.mxu0 %v16947_v52 }
 0x6a4   : > { %15752 = vmatprep.subr.bf16.mxu0 %v16948_v16 }
 0x6a7   : > { %15753 = vmatpush3.bf16.msra.mxu0 %v16948_v16  ;;  %v16952_v16 = vld [vmem:[%s20922_s6 + $0x188] sm:$0xff]  }
 0x6a8   : > { %15754 = vmatprep.subr.bf16.mxu0 %v16949_v60 }
 0x6aa   : > { %15707 = vmatmul.mubr.bf16.gmra.mrb[40].mxu0 %v17016_v13  ;;  %v21801_v13 = vld [vmem:[#allocation119_spill] sm:$0xff] }
 0x6ab   : > { %15710 = vmatprep.mubr.bf16.mxu0 %v17017_v9  ;;  %15755 = vmatpush3.bf16.msra.mxu0 %v16949_v60  ;;  %v21802_v9 = vrot.slane %v21801_v13, 1  ;;  %v21824_v13 = vshrl.u32 %v20017_v61, 16 }
 0x6ac   : > { %15756 = vmatprep.subr.bf16.mxu0 %v16950_v12 }
 0x6af   : > { %15757 = vmatpush3.bf16.msra.mxu0 %v16950_v12  ;;  %v16954_v12 = vld [vmem:[%s20922_s6 + $0x198] sm:$0xff]  }
 0x6b0   : > { %15806 = vmatprep.subr.bf16.mxu0 %v16951_v14 }
 0x6b2   : > { %15711 = vmatmul.mubr.bf16.gmra.mrb[44].mxu0 %v17018_v5 }
 0x6b3   : > { %15714 = vmatprep.mubr.bf16.mxu0 %v17019_v53  ;;  %v16955_v53 = vld [vmem:[%s20922_s6 + $0x1a0] sm:$0xff]  }
 0x6ba   : > { %15715 = vmatmul.mubr.bf16.gmra.mrb[48].mxu0 %v17020_v38  ;;  %v16956_v38 = vld [vmem:[%s20922_s6 + $0x1a8] sm:$0xff]  }
 0x6bb   : > { %15718 = vmatprep.mubr.bf16.mxu0 %v17021_v28  ;;  %v21804_v28 = vld [vmem:[#allocation114_spill] sm:$0xff] }
 0x6c2   : > { %15719 = vmatmul.mubr.bf16.gmra.mrb[52].mxu0 %v17022_v63  ;;  %v21805_v63 = vld [vmem:[#allocation115_spill] sm:$0xff] }
 0x6c3   : > { %15722 = vmatprep.mubr.bf16.mxu0 %v17023_v46  ;;  %v16957_v46 = vld [vmem:[%s20922_s6 + $0x1b0] sm:$0xff]  }
 0x6ca   : > { %15723 = vmatmul.mubr.bf16.gmra.mrb[56].mxu0 %v17024_v31  ;;  %v16958_v31 = vld [vmem:[%s20922_s6 + $0x1b8] sm:$0xff]  }
 0x6cb   : > { %15726 = vmatprep.mubr.bf16.mxu0 %v17025_v2  ;;  %v21806_v2 = vld [vmem:[#allocation116_spill] sm:$0xff] }
 0x6d2   : > { %15727 = vmatmul.mubr.bf16.gmra.mrb[60].mxu0 %v17026_v29  ;;  %v21807_v29 = vld [vmem:[#allocation117_spill] sm:$0xff] }
 0x6d3   : > { %15730 = vmatprep.mubr.bf16.mxu0 %v17027_v55  ;;  %v16959_v55 = vld [vmem:[%s20922_s6 + $0x1c0] sm:$0xff]  }
 0x6da   : > { %15731 = vmatmul.mubr.bf16.gmra.mrb[64].mxu0 %v17028_v20  ;;  %v21808_v20 = vld [vmem:[#allocation135_spill] sm:$0xff] }
 0x6db   : > { %15734 = vmatprep.mubr.bf16.mxu0 %v21794_v10  ;;  %v21809_v10 = vld [vmem:[#allocation121_spill] sm:$0xff] }
 0x6e2   : > { %15735 = vmatmul.mubr.bf16.gmra.mrb[68].mxu0 %v21785_v8  ;;  %v21797_v8 = vshrl.u32 %v21795_v39, 16  ;;  %v21818_v39 = vld [vmem:[#allocation143_spill] sm:$0xff] }
 0x6e3   : > { %15738 = vmatprep.mubr.bf16.mxu0 %v21787_v48  ;;  %v21798_v48 = vld [vmem:[#allocation138_spill] sm:$0xff] }
 0x6e4   : > { %v10347_v51 = vor.u32 %v21797_v8, %v10343_v33  ;;  %v21799_v11 = vshll.u32 %v21798_v48, 16  ;;  %v21800_v24 = vshrl.u32 %v21798_v48, 16  ;;  %v21820_v48 = vld [vmem:[#allocation151_spill] sm:$0xff] }
 0x6e6   : > { %v10351_v52 = vrot.slane %v21799_v11, 1  ;;  %v21821_v11 = vld [vmem:[#allocation152_spill] sm:$0xff] }
 0x6e8   : > { %v10352_v37 = vsel %vm4416_vm4, %v10347_v51, %v10351_v52  ;;  %v10355_v60 = vor.u32 %v21800_v24, %v10351_v52 }
 0x6ea   : > { %15739 = vmatmul.mubr.bf16.gmra.mrb[72].mxu0 %v21791_v0  ;;  %v10344_v0 = vsel %vm4416_vm4, %v10339_v34, %v10343_v33  ;;  %v10360_v5 = vsel %vm4416_vm4, %v10355_v60, %v21802_v9  ;;  %v10962_v33 = vld [vmem:[#allocation3 + $0x18] sm:$0xf8]  ;;  %v10517_v34 = vshll.u32 %v10307_v23, 16  ;;  %v21823_v60 = vld [vmem:[#allocation128_spill] sm:$0xff]  ;;  %v11033_v9 = vrot.slane %v21824_v13, 3 }
 0x6eb   : > { %15758 = vmatprep.mubr.bf16.mxu0 %v10336_v45  ;;  %v21817_v45 = vld [vmem:[#allocation136_spill] sm:$0xff]  ;;  %v11005_v8 = vshrl.u32 %v10962_v33, 16  ;;  %v11008_v51 = vshll.u32 %v10962_v33, 16 }
 0x6ed   : > { %v11007_v52 = vrot.slane %v11005_v8, 3  ;;  %v21835_v8 = vshrl.u32 %v20054_v1, 16 }
 0x6f2   : > { %15759 = vmatmul.mubr.bf16.vlgmr.msra.gmra.mrb[28].mxu0 %v10344_v0  ;;  %v10519_v0 = vrot.slane %v10517_v34, 1  ;;  %v21836_v34 = vshll.u32 %v20054_v1, 16  ;;  %v21837_v1 = vshrl.u32 %v20056_v58, 16 }
 0x6f3   : > { %15807 = vmatpush3.bf16.msra.mxu0 %v16951_v14  ;;  %15762 = vmatprep.mubr.bf16.mxu0 %v10352_v37  ;;  %v21803_v14 = vld [vmem:[#allocation123_spill] sm:$0xff] }
 0x6f4   : > { %15808 = vmatprep.subr.bf16.mxu0 %v16952_v16 }
 0x6f7   : > { %15809 = vmatpush3.bf16.msra.mxu0 %v16952_v16  ;;  %v11010_v16 = vrot.slane %v11008_v51, 4  ;;  %v11069_v51 = vrot.slane %v21835_v8, 3 }
 0x6f8   : > { %15810 = vmatprep.subr.bf16.mxu0 %v16953_v50 }
 0x6f9   : > { %v11011_v37 = vor.u32 %v11010_v16, %v11007_v52 }
 0x6fa   : > { %15763 = vmatmul.mubr.bf16.gmra.mrb[32].mxu0 %v10360_v5  ;;  %v21825_v5 = vshll.u32 %v20017_v61, 16 }
 0x6fb   : > { %15766 = vmatprep.mubr.bf16.mxu0 %v21803_v14  ;;  %15811 = vmatpush3.bf16.msra.mxu0 %v16953_v50  ;;  %v21822_v50 = vld [vmem:[#allocation149_spill] sm:$0xff] }
 0x6fc   : > { %15812 = vmatprep.subr.bf16.mxu0 %v16954_v12  ;;  %v10520_v24 = vsel %vm4416_vm4, %v21822_v50, %v10519_v0  ;;  %v11036_v14 = vrot.slane %v21825_v5, 4  ;;  %v21838_v50 = vshll.u32 %v20056_v58, 16  ;;  %v16966_v58 = vld [vmem:[%s20922_s6 + $0x1f8] sm:$0xff]  }
 0x6ff   : > { %15813 = vmatpush3.bf16.msra.mxu0 %v16954_v12  ;;  %v11020_v12 = vsel %vm1400_vm0, %v11011_v37, %v21823_v60  ;;  %v11078_v37 = vrot.slane %v21837_v1, 3 }
 0x700   : > { %15814 = vmatprep.subr.bf16.mxu0 %v16955_v53 }
 0x702   : > { %15767 = vmatmul.mubr.bf16.gmra.mrb[36].mxu0 %v21804_v28  ;;  %v21826_v28 = vshrl.u32 %v20027_v3, 16 }
 0x703   : > { %15770 = vmatprep.mubr.bf16.mxu0 %v21805_v63  ;;  %15815 = vmatpush3.bf16.msra.mxu0 %v16955_v53  ;;  %v11037_v53 = vor.u32 %v11036_v14, %v11033_v9  ;;  %v21840_v9 = vshll.u32 %v20063_v44, 16  ;;  %v16965_v14 = vld [vmem:[%s20922_s6 + $0x1f0] sm:$0xff]  }
 0x704   : > { %15816 = vmatprep.subr.bf16.mxu0 %v16956_v38  ;;  %v11042_v63 = vrot.slane %v21826_v28, 3 }
 0x705   : > { %v11090_v5 = vrot.slane %v21840_v9, 4  ;;  %v21856_v9 = vshrl.u32 %v20118_v21, 16 }
 0x707   : > { %15817 = vmatpush3.bf16.msra.mxu0 %v16956_v38  ;;  %v16960_v38 = vld [vmem:[%s20922_s6 + $0x1c8] sm:$0xff]  }
 0x708   : > { %15818 = vmatprep.subr.bf16.mxu0 %v16957_v46 }
 0x70a   : > { %15771 = vmatmul.mubr.bf16.gmra.mrb[40].mxu0 %v21806_v2  ;;  %v21828_v2 = vld [vmem:[#allocation132_spill] sm:$0xff] }
 0x70b   : > { %15774 = vmatprep.mubr.bf16.mxu0 %v21807_v29  ;;  %15819 = vmatpush3.bf16.msra.mxu0 %v16957_v46  ;;  %v21827_v46 = vshll.u32 %v20027_v3, 16  ;;  %v21829_v29 = vld [vmem:[#allocation141_spill] sm:$0xff] }
 0x70c   : > { %15820 = vmatprep.subr.bf16.mxu0 %v16958_v31 }
 0x70f   : > { %15821 = vmatpush3.bf16.msra.mxu0 %v16958_v31  ;;  %v11045_v31 = vrot.slane %v21827_v46, 4 }
 0x710   : > { %15870 = vmatprep.subr.bf16.mxu0 %v16959_v55 }
 0x711   : > { %v11046_v3 = vor.u32 %v11045_v31, %v11042_v63  ;;  %v21841_v63 = vld [vmem:[#allocation173_spill] sm:$0xff] }
 0x712   : > { %15775 = vmatmul.mubr.bf16.gmra.mrb[44].mxu0 %v21808_v20  ;;  %v11038_v20 = vsel %vm1400_vm0, %v21829_v29, %v11037_v53  ;;  %v21843_v31 = vshll.u32 %v21841_v63, 16 }
 0x713   : > { %15778 = vmatprep.mubr.bf16.mxu0 %v21809_v10  ;;  %v21830_v10 = vld [vmem:[#allocation172_spill] sm:$0xff] }
 0x71a   : > { %15779 = vmatmul.mubr.bf16.gmra.mrb[48].mxu0 %v21810_v35  ;;  %v21831_v35 = vshrl.u32 %v21830_v10, 16 }
 0x71b   : > { %15782 = vmatprep.mubr.bf16.mxu0 %v21811_v36 }
 0x71c   : > { %v11051_v36 = vrot.slane %v21831_v35, 3  ;;  %v21845_v35 = vshll.u32 %v20070_v17, 16 }
 0x722   : > { %15783 = vmatmul.mubr.bf16.gmra.mrb[52].mxu0 %v21812_v4  ;;  %v21832_v4 = vshll.u32 %v21830_v10, 16 }
 0x723   : > { %15786 = vmatprep.mubr.bf16.mxu0 %v21813_v54 }
 0x724   : > { %v11054_v54 = vrot.slane %v21832_v4, 4  ;;  %v20647_v4 = vld [vmem:[%s20922_s6 + $0x200] sm:$0xff]  }
 0x72a   : > { %15787 = vmatmul.mubr.bf16.gmra.mrb[56].mxu0 %v21814_v6  ;;  %v16961_v6 = vld [vmem:[%s20922_s6 + $0x1d0] sm:$0xff]  }
 0x72b   : > { %15790 = vmatprep.mubr.bf16.mxu0 %v21815_v62  ;;  %v11055_v62 = vor.u32 %v11054_v54, %v11051_v36  ;;  %v11108_v36 = vrot.slane %v21845_v35, 4  ;;  %v21863_v35 = vshrl.u32 %v20122_v18, 16 }
 0x72d   : > { %v11056_v23 = vsel %vm1400_vm0, %v11046_v3, %v11055_v62 }
 0x732   : > { %15791 = vmatmul.mubr.bf16.gmra.mrb[60].mxu0 %v21816_v56  ;;  %v16962_v56 = vld [vmem:[%s20922_s6 + $0x1d8] sm:$0xff]  }
 0x733   : > { %15794 = vmatprep.mubr.bf16.mxu0 %v21817_v45  ;;  %v11047_v45 = vsel %vm1400_vm0, %v11037_v53, %v11046_v3 }
 0x73a   : > { %15795 = vmatmul.mubr.bf16.gmra.mrb[64].mxu0 %v21818_v39  ;;  %v21833_v39 = vshrl.u32 %v20043_v26, 16 }
 0x73b   : > { %15798 = vmatprep.mubr.bf16.mxu0 %v21819_v22 }
 0x73c   : > { %v11060_v22 = vrot.slane %v21833_v39, 3 }
 0x742   : > { %15799 = vmatmul.mubr.bf16.gmra.mrb[68].mxu0 %v21820_v48  ;;  %v11072_v48 = vrot.slane %v21836_v34, 4 }
 0x743   : > { %15802 = vmatprep.mubr.bf16.mxu0 %v21821_v11  ;;  %v16963_v11 = vld [vmem:[%s20922_s6 + $0x1e0] sm:$0xff]  }
 0x744   : > { %v11073_v16 = vor.u32 %v11072_v48, %v11069_v51  ;;  %v21850_v48 = vshrl.u32 %v20079_v47, 16 }
 0x74a   : > { %15803 = vmatmul.mubr.bf16.gmra.mrb[72].mxu0 %v10520_v24  ;;  %v11081_v24 = vrot.slane %v21838_v50, 4 }
 0x74b   : > { %15822 = vmatprep.mubr.bf16.mxu0 %v11020_v12  ;;  %v21839_v12 = vshrl.u32 %v20063_v44, 16  ;;  %v21842_v44 = vshrl.u32 %v21841_v63, 16  ;;  %v21860_v63 = vshll.u32 %v20120_v19, 16 }
 0x74c   : > { %v11082_v53 = vor.u32 %v11081_v24, %v11078_v37 }
 0x74d   : > { %v11087_v13 = vrot.slane %v21839_v12, 3  ;;  %v11096_v46 = vrot.slane %v21842_v44, 3  ;;  %v11198_v44 = vrot.slane %v21860_v63, 4  ;;  %v21875_v63 = vld [vmem:[#allocation166_spill] sm:$0xff] }
 0x74e   : > { %v11083_v28 = vsel %vm1400_vm0, %v11073_v16, %v11082_v53 }
 0x752   : > { %15823 = vmatmul.mubr.bf16.vlgmr.msra.gmra.mrb[28].mxu0 %v21828_v2  ;;  %v11099_v2 = vrot.slane %v21843_v31, 4 }
 0x753   : > { %15871 = vmatpush3.bf16.msra.mxu0 %v16959_v55  ;;  %15826 = vmatprep.mubr.bf16.mxu0 %v11038_v20  ;;  %v21834_v55 = vshll.u32 %v20043_v26, 16  ;;  %v16964_v26 = vld [vmem:[%s20922_s6 + $0x1e8] sm:$0xff]   ;;  %v21844_v20 = vshrl.u32 %v20070_v17, 16  ;;  %v21847_v17 = vshll.u32 %v20072_v15, 16 }
 0x754   : > { %15872 = vmatprep.subr.bf16.mxu0 %v16960_v38  ;;  %v11100_v54 = vor.u32 %v11099_v2, %v11096_v46  ;;  %v21861_v46 = vld [vmem:[#allocation157_spill] sm:$0xff] }
 0x755   : > { %v11063_v33 = vrot.slane %v21834_v55, 4  ;;  %v11105_v10 = vrot.slane %v21844_v20, 3  ;;  %v21862_v20 = vld [vmem:[#allocation156_spill] sm:$0xff] }
 0x757   : > { %15873 = vmatpush3.bf16.msra.mxu0 %v16960_v38  ;;  %v11064_v52 = vor.u32 %v11063_v33, %v11060_v22  ;;  %v11091_v38 = vor.u32 %v11090_v5, %v11087_v13  ;;  %v21848_v22 = vshrl.u32 %v20077_v59, 16  ;;  %v21849_v33 = vshll.u32 %v20077_v59, 16  ;;  %v21855_v13 = vld [vmem:[#allocation154_spill] sm:$0xff] }
 0x758   : > { %15874 = vmatprep.subr.bf16.mxu0 %v16961_v6  ;;  %v21853_v59 = vshll.u32 %v20088_v25, 16  ;;  %v11186_v5 = vrot.slane %v21856_v9, 3  ;;  %v21870_v9 = vld [vmem:[#allocation159_spill] sm:$0xff] }
 0x759   : > { %v11065_v0 = vsel %vm1400_vm0, %v11055_v62, %v11064_v52  ;;  %v11074_v60 = vsel %vm1400_vm0, %v11064_v52, %v11073_v16  ;;  %v11092_v29 = vsel %vm1400_vm0, %v11082_v53, %v11091_v38  ;;  %v11101_v3 = vsel %vm1400_vm0, %v11091_v38, %v11100_v54  ;;  %v21858_v38 = vld [vmem:[#allocation155_spill] sm:$0xff] }
 0x75a   : > { %15827 = vmatmul.mubr.bf16.gmra.mrb[32].mxu0 %v11047_v45  ;;  %v21846_v62 = vshrl.u32 %v20072_v15, 16  ;;  %v11117_v45 = vrot.slane %v21847_v17, 4  ;;  %v11123_v55 = vrot.slane %v21848_v22, 3  ;;  %v21851_v15 = vshll.u32 %v20079_v47, 16  ;;  %v21854_v47 = vld [vmem:[#allocation153_spill] sm:$0xff] }
 0x75b   : > { %15830 = vmatprep.mubr.bf16.mxu0 %v11056_v23  ;;  %15875 = vmatpush3.bf16.msra.mxu0 %v16961_v6  ;;  %v11109_v6 = vor.u32 %v11108_v36, %v11105_v10  ;;  %v11126_v23 = vrot.slane %v21849_v33, 4  ;;  %v11144_v1 = vrot.slane %v21853_v59, 4  ;;  %v11204_v36 = vrot.slane %v21863_v35, 3  ;;  %v17030_v59 = vld [vmem:[#allocation3 + $0x28] sm:$0xff] }
 0x75c   : > { %15876 = vmatprep.subr.bf16.mxu0 %v16962_v56  ;;  %v11135_v52 = vrot.slane %v21851_v15, 4  ;;  %v17029_v15 = vld [vmem:[#allocation3 + $0x20] sm:$0xff]  ;;  %v11769_v35 = vrot.slane %v20263_v30, 4  ;;  %v21883_v30 = vrot.slane %v20118_v21, 4 }
 0x75d   : > { %v11110_v39 = vsel %vm1400_vm0, %v11100_v54, %v11109_v6  ;;  %v11127_v51 = vor.u32 %v11126_v23, %v11123_v55  ;;  %v21864_v54 = vshll.u32 %v20122_v18, 16 }
 0x75f   : > { %15877 = vmatpush3.bf16.msra.mxu0 %v16962_v56  ;;  %v11114_v56 = vrot.slane %v21846_v62, 3  ;;  %v21865_v62 = vld [vmem:[#allocation150_spill] sm:$0xff] }
 0x760   : > { %15878 = vmatprep.subr.bf16.mxu0 %v16963_v11  ;;  %v21867_v17 = vshll.u32 %v21865_v62, 16 }
 0x761   : > { %v11118_v8 = vor.u32 %v11117_v45, %v11114_v56 }
 0x762   : > { %15831 = vmatmul.mubr.bf16.gmra.mrb[36].mxu0 %v11065_v0  ;;  %v11216_v45 = vrot.slane %v21867_v17, 4 }
 0x763   : > { %15834 = vmatprep.mubr.bf16.mxu0 %v11074_v60  ;;  %15879 = vmatpush3.bf16.msra.mxu0 %v16963_v11  ;;  %v11119_v34 = vsel %vm1400_vm0, %v11109_v6, %v11118_v8  ;;  %v11132_v11 = vrot.slane %v21850_v48, 3  ;;  %v11128_v16 = vsel %vm1400_vm0, %v11118_v8, %v11127_v51  ;;  %v11207_v6 = vrot.slane %v21864_v54, 4 }
 0x764   : > { %15880 = vmatprep.subr.bf16.mxu0 %v16964_v26 }
 0x765   : > { %v11136_v37 = vor.u32 %v11135_v52, %v11132_v11  ;;  %v11208_v55 = vor.u32 %v11207_v6, %v11204_v36  ;;  %v11669_v11 = vld [vmem:[#allocation3 + $0x18] sm:$0xf0]  ;;  %v11737_v52 = vrot.slane %v17029_v15, 4  ;;  %v21881_v36 = vrot.slane %v20088_v25, 4 }
 0x767   : > { %15881 = vmatpush3.bf16.msra.mxu0 %v16964_v26  ;;  %v21852_v26 = vshrl.u32 %v20088_v25, 16  ;;  %v11137_v24 = vsel %vm1400_vm0, %v11127_v51, %v11136_v37 }
 0x768   : > { %15882 = vmatprep.subr.bf16.mxu0 %v16965_v14 }
 0x769   : > { %v11141_v0 = vrot.slane %v21852_v26, 3  ;;  %v11736_v26 = vrot.slane %v11669_v11, 4  ;;  %v21886_v11 = vrot.slane %v20122_v18, 4 }
 0x76a   : > { %15835 = vmatmul.mubr.bf16.gmra.mrb[40].mxu0 %v11083_v28 }
 0x76b   : > { %15838 = vmatprep.mubr.bf16.mxu0 %v11092_v29  ;;  %15883 = vmatpush3.bf16.msra.mxu0 %v16965_v14  ;;  %v11145_v50 = vor.u32 %v11144_v1, %v11141_v0  ;;  %v21857_v14 = vshll.u32 %v20118_v21, 16  ;;  %v10986_v29 = vld [vmem:[#allocation3 + $0xd8] sm:$0xf]  ;;  %v11738_v0 = vsel %vm2037_vm1, %v11736_v26, %v11737_v52  ;;  %v11739_v1 = vrot.slane %v17030_v59, 4 }
 0x76c   : > { %15884 = vmatprep.subr.bf16.mxu0 %v16966_v58  ;;  %v11223_v22 = vshll.u32 %v10986_v29, 16 }
 0x76d   : > { %v11146_v60 = vsel %vm1400_vm0, %v11136_v37, %v11145_v50  ;;  %v11155_v12 = vsel %vm1400_vm0, %v11145_v50, %v21854_v47  ;;  %v11189_v53 = vrot.slane %v21857_v14, 4  ;;  %v16968_v37 = vld [vmem:[%s20922_s6 + $0x208] sm:$0xff]   ;;  %v11740_v50 = vsel %vm2037_vm1, %v11737_v52, %v11739_v1  ;;  %v16969_v47 = vld [vmem:[%s20922_s6 + $0x210] sm:$0xff]  }
 0x76e   : > { %v11225_v8 = vrot.slane %v11223_v22, 4  ;;  %v21872_v14 = vld [vmem:[#allocation163_spill] sm:$0xff]  ;;  %v12226_v22 = vld [vmem:[#allocation3 + $0x18] sm:$0xf0] }
 0x76f   : > { %15885 = vmatpush3.bf16.msra.mxu0 %v16966_v58  ;;  %v21859_v58 = vshrl.u32 %v20120_v19, 16  ;;  %v11190_v31 = vor.u32 %v11189_v53, %v11186_v5  ;;  %v21866_v19 = vshrl.u32 %v21865_v62, 16  ;;  %v21871_v5 = vld [vmem:[#allocation177_spill] sm:$0xff]  ;;  %v16973_v53 = vld [vmem:[%s20922_s6 + $0x230] sm:$0xff]   ;;  %v21882_v62 = vld [vmem:[#allocation187_spill] sm:$0xff] }
 0x770   : > { %15934 = vmatprep.subr.bf16.mxu0 %v20647_v4 }
 0x771   : > { %v11195_v28 = vrot.slane %v21859_v58, 3  ;;  %v11191_v10 = vsel %vm1400_vm0, %v21862_v20, %v11190_v31  ;;  %v11213_v56 = vrot.slane %v21866_v19, 3  ;;  %v21873_v58 = vld [vmem:[#allocation164_spill] sm:$0xff]  ;;  %v17031_v20 = vld [vmem:[#allocation3 + $0x98] sm:$0xff]  ;;  %v11773_v19 = vrot.slane %v21882_v62, 4 }
 0x772   : > { %15839 = vmatmul.mubr.bf16.gmra.mrb[44].mxu0 %v11101_v3 }
 0x773   : > { %15842 = vmatprep.mubr.bf16.mxu0 %v11110_v39  ;;  %v11199_v2 = vor.u32 %v11198_v44, %v11195_v28  ;;  %v11220_v39 = vshrl.u32 %v10986_v29, 16  ;;  %v11217_v33 = vor.u32 %v11216_v45, %v11213_v56  ;;  %v21874_v28 = vld [vmem:[#allocation165_spill] sm:$0xff]  ;;  %v21876_v44 = vld [vmem:[#allocation167_spill] sm:$0xff]  ;;  %v11776_v25 = vsel %vm2037_vm1, %v11773_v19, %v21883_v30  ;;  %v21884_v45 = vld [vmem:[#allocation174_spill] sm:$0xff] }
 0x774   : > { %v21880_v29 = vld [vmem:[#allocation171_spill] sm:$0xff] }
 0x775   : > { %v11200_v3 = vsel %vm1400_vm0, %v11190_v31, %v11199_v2  ;;  %v11222_v23 = vrot.slane %v11220_v39, 3  ;;  %v11209_v51 = vsel %vm1400_vm0, %v11199_v2, %v11208_v55  ;;  %v21878_v31 = vld [vmem:[#allocation170_spill] sm:$0xff]  ;;  %v21879_v2 = vld [vmem:[#allocation169_spill] sm:$0xff]  ;;  %v21902_v30 = vld [vmem:[#allocation55_spill] sm:$0xff] }
 0x776   : > { %v12227_v39 = vld [vmem:[#allocation3 + $0x20] sm:$0xff] }
 0x777   : > { %v11226_v48 = vor.u32 %v11225_v8, %v11222_v23  ;;  %v12280_v23 = vshll.u32 %v12227_v39, 16  ;;  %v11693_v8 = vld [vmem:[#allocation3 + $0xd8] sm:$0xf] }
 0x778   : > { %v11783_v26 = vrot.slane %v11693_v8, 4 }
 0x779   : > { %v12282_v52 = vrot.slane %v12280_v23, 5 }
 0x77a   : > { %15843 = vmatmul.mubr.bf16.gmra.mrb[48].mxu0 %v11119_v34  ;;  %v11218_v34 = vsel %vm1400_vm0, %v11208_v55, %v11217_v33  ;;  %v17032_v55 = vld [vmem:[#allocation3] sm:$0xff] }
 0x77b   : > { %15846 = vmatprep.mubr.bf16.mxu0 %v11128_v16  ;;  %v11227_v16 = vsel %vm1400_vm0, %v11217_v33, %v11226_v48  ;;  %v11781_v33 = vrot.slane %v17032_v55, 4  ;;  %v21885_v48 = vld [vmem:[#allocation175_spill] sm:$0xff] }
 0x77d   : > { %v11782_v21 = vsel %vm2037_vm1, %v21886_v11, %v11781_v33 }
 0x782   : > { %15847 = vmatmul.mubr.bf16.gmra.mrb[52].mxu0 %v11137_v24  ;;  %v21868_v24 = vrot.slane %v20017_v61, 4  ;;  %v16971_v61 = vld [vmem:[%s20922_s6 + $0x220] sm:$0xff]  }
 0x783   : > { %15850 = vmatprep.mubr.bf16.mxu0 %v11146_v60 }
 0x784   : > { %v11742_v60 = vsel %vm2037_vm1, %v11739_v1, %v21868_v24  ;;  %v11784_v24 = vsel %vm2037_vm1, %v11781_v33, %v11783_v26 }
 0x78a   : > { %15851 = vmatmul.mubr.bf16.gmra.mrb[56].mxu0 %v11155_v12  ;;  %v16970_v12 = vld [vmem:[%s20922_s6 + $0x218] sm:$0xff]  }
 0x78b   : > { %15854 = vmatprep.mubr.bf16.mxu0 %v21855_v13  ;;  %v21869_v13 = vld [vmem:[#allocation162_spill] sm:$0xff] }
 0x792   : > { %15855 = vmatmul.mubr.bf16.gmra.mrb[60].mxu0 %v21858_v38  ;;  %v16974_v38 = vld [vmem:[%s20922_s6 + $0x238] sm:$0xff]  }
 0x793   : > { %15858 = vmatprep.mubr.bf16.mxu0 %v21861_v46  ;;  %v21877_v46 = vld [vmem:[#allocation168_spill] sm:$0xff] }
 0x79a   : > { %15859 = vmatmul.mubr.bf16.gmra.mrb[64].mxu0 %v11191_v10  ;;  %v11767_v10 = vrot.slane %v17031_v20, 4  ;;  %v21900_v20 = vld [vmem:[#allocation7_spill] sm:$0xff] }
 0x79b   : > { %15862 = vmatprep.mubr.bf16.mxu0 %v11200_v3  ;;  %v11771_v3 = vrot.slane %v20273_v40, 4  ;;  %v12277_v40 = vshrl.u32 %v12227_v39, 16 }
 0x79c   : > { %v11768_v54 = vsel %vm2037_vm1, %v21881_v36, %v11767_v10  ;;  %v11770_v6 = vsel %vm2037_vm1, %v11767_v10, %v11769_v35  ;;  %v12250_v10 = vld [vmem:[#allocation3 + $0xd8] sm:$0x1f] }
 0x79d   : > { %v11772_v56 = vsel %vm2037_vm1, %v11769_v35, %v11771_v3  ;;  %v11774_v17 = vsel %vm2037_vm1, %v11771_v3, %v11773_v19  ;;  %v12279_v15 = vrot.slane %v12277_v40, 4  ;;  %v12484_v35 = vshrl.u32 %v12250_v10, 16 }
 0x79e   : > { %v12487_v36 = vshll.u32 %v12250_v10, 16  ;;  %v21911_v10 = vld [vmem:[#allocation75_spill] sm:$0xff] }
 0x7a2   : > { %15863 = vmatmul.mubr.bf16.gmra.mrb[68].mxu0 %v11209_v51  ;;  %v12269_v51 = vshrl.u32 %v12226_v22, 16 }
 0x7a3   : > { %15866 = vmatprep.mubr.bf16.mxu0 %v11218_v34  ;;  %v12272_v34 = vshll.u32 %v12226_v22, 16  ;;  %v21904_v22 = vld [vmem:[#allocation57_spill] sm:$0xff] }
 0x7a5   : > { %v12274_v59 = vrot.slane %v12272_v34, 5 }
 0x7aa   : > { %15867 = vmatmul.mubr.bf16.gmra.mrb[72].mxu0 %v11227_v16  ;;  %v12228_v16 = vld [vmem:[#allocation3 + $0x28] sm:$0xff] }
 0x7ab   : > { %15886 = vmatprep.mubr.bf16.mxu0 %v11738_v0  ;;  %v12271_v0 = vrot.slane %v12269_v51, 4  ;;  %v12286_v1 = vshrl.u32 %v12228_v16, 16 }
 0x7b2   : > { %15887 = vmatmul.mubr.bf16.vlgmr.msra.gmra.mrb[28].mxu0 %v11740_v50  ;;  %v12283_v50 = vor.u32 %v12282_v52, %v12279_v15 }
 0x7b3   : > { %15935 = vmatpush3.bf16.msra.mxu0 %v20647_v4  ;;  %15890 = vmatprep.mubr.bf16.mxu0 %v11742_v60  ;;  %v16972_v4 = vld [vmem:[%s20922_s6 + $0x228] sm:$0xff]   ;;  %v12275_v60 = vor.u32 %v12274_v59, %v12271_v0 }
 0x7b4   : > { %15936 = vmatprep.subr.bf16.mxu0 %v16968_v37 }
 0x7b5   : > { %v12284_v18 = vsel %vm2570_vm2, %v12275_v60, %v12283_v50 }
 0x7b7   : > { %15937 = vmatpush3.bf16.msra.mxu0 %v16968_v37  ;;  %v12289_v37 = vshll.u32 %v12228_v16, 16  ;;  %v21905_v16 = vld [vmem:[#allocation61_spill] sm:$0xff] }
 0x7b8   : > { %15938 = vmatprep.subr.bf16.mxu0 %v16969_v47 }
 0x7ba   : > { %15891 = vmatmul.mubr.bf16.gmra.mrb[32].mxu0 %v21869_v13 }
 0x7bb   : > { %15894 = vmatprep.mubr.bf16.mxu0 %v21870_v9  ;;  %15939 = vmatpush3.bf16.msra.mxu0 %v16969_v47  ;;  %v12288_v47 = vrot.slane %v12286_v1, 4  ;;  %v21906_v1 = vld [vmem:[#allocation63_spill] sm:$0xff] }
 0x7bc   : > { %15940 = vmatprep.subr.bf16.mxu0 %v16970_v12 }
 0x7bf   : > { %15941 = vmatpush3.bf16.msra.mxu0 %v16970_v12  ;;  %v12291_v12 = vrot.slane %v12289_v37, 5 }
 0x7c0   : > { %15942 = vmatprep.subr.bf16.mxu0 %v16971_v61 }
 0x7c1   : > { %v12292_v13 = vor.u32 %v12291_v12, %v12288_v47  ;;  %v21908_v47 = vld [vmem:[#allocation67_spill] sm:$0xff] }
 0x7c2   : > { %15895 = vmatmul.mubr.bf16.gmra.mrb[36].mxu0 %v21871_v5  ;;  %v21888_v5 = vld [vmem:[#allocation178_spill] sm:$0xff] }
 0x7c3   : > { %15898 = vmatprep.mubr.bf16.mxu0 %v21872_v14  ;;  %15943 = vmatpush3.bf16.msra.mxu0 %v16971_v61  ;;  %v12293_v9 = vsel %vm2570_vm2, %v12283_v50, %v12292_v13  ;;  %v21887_v61 = vld [vmem:[#allocation176_spill] sm:$0xff]  ;;  %v21889_v14 = vld [vmem:[#allocation179_spill] sm:$0xff] }
 0x7c4   : > { %15944 = vmatprep.subr.bf16.mxu0 %v16972_v4 }
 0x7c7   : > { %15945 = vmatpush3.bf16.msra.mxu0 %v16972_v4  ;;  %v12302_v4 = vsel %vm2570_vm2, %v12292_v13, %v21887_v61 }
 0x7c8   : > { %15946 = vmatprep.subr.bf16.mxu0 %v16973_v53 }
 0x7ca   : > { %15899 = vmatmul.mubr.bf16.gmra.mrb[40].mxu0 %v21873_v58  ;;  %v21892_v58 = vld [vmem:[#allocation182_spill] sm:$0xff] }
 0x7cb   : > { %15902 = vmatprep.mubr.bf16.mxu0 %v21874_v28  ;;  %15947 = vmatpush3.bf16.msra.mxu0 %v16973_v53  ;;  %v21890_v53 = vld [vmem:[#allocation180_spill] sm:$0xff]  ;;  %v21893_v28 = vld [vmem:[#allocation183_spill] sm:$0xff] }
 0x7cc   : > { %15948 = vmatprep.subr.bf16.mxu0 %v16974_v38 }
 0x7cf   : > { %15949 = vmatpush3.bf16.msra.mxu0 %v16974_v38  ;;  %v21891_v38 = vld [vmem:[#allocation181_spill] sm:$0xff] }
 0x7d2   : > { %15903 = vmatmul.mubr.bf16.gmra.mrb[44].mxu0 %v21875_v63  ;;  %v21894_v63 = vld [vmem:[#allocation184_spill] sm:$0xff] }
 0x7d3   : > { %15906 = vmatprep.mubr.bf16.mxu0 %v21876_v44  ;;  %v21895_v44 = vld [vmem:[#allocation185_spill] sm:$0xff] }
 0x7da   : > { %15907 = vmatmul.mubr.bf16.gmra.mrb[48].mxu0 %v21877_v46  ;;  %v21896_v46 = vld [vmem:[#allocation186_spill] sm:$0xff] }
 0x7db   : > { %15910 = vmatprep.mubr.bf16.mxu0 %v21878_v31  ;;  %v21897_v31 = vld [vmem:[#allocation188_spill] sm:$0xff] }
 0x7e2   : > { %15911 = vmatmul.mubr.bf16.gmra.mrb[52].mxu0 %v21879_v2  ;;  %v21898_v2 = vld [vmem:[#allocation9_spill] sm:$0xff] }
 0x7e3   : > { %15914 = vmatprep.mubr.bf16.mxu0 %v21880_v29  ;;  %v21899_v29 = vld [vmem:[#allocation8_spill] sm:$0xff] }
 0x7ea   : > { %15915 = vmatmul.mubr.bf16.gmra.mrb[56].mxu0 %v11768_v54  ;;  %v12486_v54 = vrot.slane %v12484_v35, 4 }
 0x7eb   : > { %15918 = vmatprep.mubr.bf16.mxu0 %v11770_v6  ;;  %v12489_v6 = vrot.slane %v12487_v36, 5  ;;  %v21912_v36 = vld [vmem:[#allocation77_spill] sm:$0xff] }
 0x7ed   : > { %v12490_v3 = vor.u32 %v12489_v6, %v12486_v54 }
 0x7f2   : > { %15919 = vmatmul.mubr.bf16.gmra.mrb[60].mxu0 %v11772_v56 }
 0x7f3   : > { %15922 = vmatprep.mubr.bf16.mxu0 %v11774_v17 }
 0x7fa   : > { %15923 = vmatmul.mubr.bf16.gmra.mrb[64].mxu0 %v11776_v25 }
 0x7fb   : > { %15926 = vmatprep.mubr.bf16.mxu0 %v21884_v45  ;;  %v21903_v45 = vld [vmem:[#allocation53_spill] sm:$0xff] }
 0x802   : > { %15927 = vmatmul.mubr.bf16.gmra.mrb[68].mxu0 %v21885_v48 }
 0x803   : > { %15930 = vmatprep.mubr.bf16.mxu0 %v11782_v21 }
 0x80a   : > { %15931 = vmatmul.mubr.bf16.gmra.mrb[72].mxu0 %v11784_v24  ;;  %v21907_v24 = vld [vmem:[#allocation65_spill] sm:$0xff] }
 0x80b   : > { %15950 = vmatprep.mubr.bf16.mxu0 %v12284_v18 }
 0x812   : > { %15951 = vmatmul.mubr.bf16.vlgmr.msra.gmra.mrb[28].mxu0 %v12293_v9 }
 0x813   : > { %15954 = vmatprep.mubr.bf16.mxu0 %v12302_v4 }
 0x81a   : > { %15955 = vmatmul.mubr.bf16.gmra.mrb[32].mxu0 %v21888_v5 }
 0x81b   : > { %15958 = vmatprep.mubr.bf16.mxu0 %v21889_v14 }
 0x822   : > { %15959 = vmatmul.mubr.bf16.gmra.mrb[36].mxu0 %v21890_v53 }
 0x823   : > { %15962 = vmatprep.mubr.bf16.mxu0 %v21891_v38 }
 0x82a   : > { %15963 = vmatmul.mubr.bf16.gmra.mrb[40].mxu0 %v21892_v58 }
 0x82b   : > { %15966 = vmatprep.mubr.bf16.mxu0 %v21893_v28 }
 0x832   : > { %15967 = vmatmul.mubr.bf16.gmra.mrb[44].mxu0 %v21894_v63  ;;  %v21909_v63 = vld [vmem:[#allocation71_spill] sm:$0xff] }
 0x833   : > { %15970 = vmatprep.mubr.bf16.mxu0 %v21895_v44 }
 0x83a   : > { %15971 = vmatmul.mubr.bf16.gmra.mrb[48].mxu0 %v21896_v46 }
 0x83b   : > { %15974 = vmatprep.mubr.bf16.mxu0 %v21897_v31 }
 0x842   : > { %15975 = vmatmul.mubr.bf16.gmra.mrb[52].mxu0 %v21898_v2  ;;  %v21910_v2 = vld [vmem:[#allocation73_spill] sm:$0xff] }
 0x843   : > { %15978 = vmatprep.mubr.bf16.mxu0 %v21899_v29 }
 0x84a   : > { %15979 = vmatmul.mubr.bf16.gmra.mrb[56].mxu0 %v21900_v20 }
 0x84b   : > { %15982 = vmatprep.mubr.bf16.mxu0 %v20324_v42  ;;  %v12491_v42 = vsel %vm2570_vm2, %v19966_v57, %v12490_v3 }
 0x852   : > { %15983 = vmatmul.mubr.bf16.gmra.mrb[60].mxu0 %v20333_v41  ;;  %v20785_v41 = vld [vmem:[%s20923_s7] ss:$0 sm:$0xff] }
 0x853   : > { %15986 = vmatprep.mubr.bf16.mxu0 %v20342_v49 }
 0x85a   : > { %15987 = vmatmul.mubr.bf16.gmra.mrb[64].mxu0 %v20345_v32 }
 0x85b   : > { %15990 = vmatprep.mubr.bf16.mxu0 %v20348_v43 }
 0x862   : > { %15991 = vmatmul.mubr.bf16.gmra.mrb[68].mxu0 %v20356_v27  ;;  %v21901_v27 = vld [vmem:[#allocation51_spill] sm:$0xff] }
 0x863   : > { %15994 = vmatprep.mubr.bf16.mxu0 %v20360_v7 }
 0x86a   : > { %15995 = vmatmul.mubr.bf16.gmra.mrb[72].mxu0 %v12491_v42 }
 0x8e5   : > { %v15952_v49 = vpop.f32.mrb[28].mxu0 }
 0x8e6   : > { %v12990_v32 = vadd.f32 %v15952_v49, %v20785_v41  ;;  %v12598_v43 = vpop.f32.mrb[29].mxu0 }
 0x8e7   : > { %v12988_v62 = vadd.f32 %v20785_v41, %v12598_v43  ;;  %v15953_v19 = vpop.f32.mrb[30].mxu0 }
 0x8e8   : > { %v13086_v56 = vadd.f32 %v12990_v32, %v21901_v27  ;;  %v12991_v7 = vadd.f32 %v15953_v19, %v20785_v41  ;;  %v12601_v17 = vpop.f32.mrb[31].mxu0 }
 0x8e9   : > { %v13084_v57 = vadd.f32 %v12988_v62, %v21902_v30  ;;  %v12989_v25 = vadd.f32 %v20785_v41, %v12601_v17  ;;  %v21913_v17 = vld [vmem:[#allocation81_spill] sm:$0xff] }
 0x8ea   : > { %v13087_v39 = vadd.f32 %v12991_v7, %v21903_v45  ;;  %v13134_v33 = vmax.f32 %v13086_v56, 0.0  ;;  %v21914_v45 = vld [vmem:[#allocation83_spill] sm:$0xff] }
 0x8eb   : > { %v13085_v55 = vadd.f32 %v12989_v25, %v21904_v22  ;;  %v13132_v23 = vmax.f32 %v13084_v57, 0.0 }
 0x8ec   : > { %v13135_v40 = vmax.f32 %v13087_v39, 0.0 }
 0x8ed   : > { %v13133_v8 = vmax.f32 %v13085_v55, 0.0  ;;  %v15956_v51 = vpop.f32.mrb[32].mxu0  ;;  %v21915_v55 = vld [vmem:[#allocation85_spill] sm:$0xff] }
 0x8ee   : > { %v14027_v34 = vpack.c.bf16 %v13135_v40, %v13134_v33  ;;  %v12994_v48 = vadd.f32 %v15956_v51, %v20785_v41  ;;  %v12614_v11 = vpop.f32.mrb[33].mxu0  ;;  %v21916_v40 = vld [vmem:[#allocation87_spill] sm:$0xff] }
 0x8ef   : > { %v14022_v21 = vpack.c.bf16 %v13133_v8, %v13132_v23  ;;  %v12992_v15 = vadd.f32 %v20785_v41, %v12614_v11  ;;  %v15957_v52 = vpop.f32.mrb[34].mxu0 }
 0x8f0   : > { %14139 = vst [vmem:[%s20799_s19 + $0x8] sm:$0xff] %v14027_v34   ;;  %v13090_v26 = vadd.f32 %v12994_v48, %v21905_v16  ;;  %v12995_v0 = vadd.f32 %v15957_v52, %v20785_v41  ;;  %v12617_v59 = vpop.f32.mrb[35].mxu0 }
 0x8f1   : > { %14023 = vst [vmem:[%s20799_s19] sm:$0xff] %v14022_v21   ;;  %v13088_v37 = vadd.f32 %v12992_v15, %v21906_v1  ;;  %v12993_v50 = vadd.f32 %v20785_v41, %v12617_v59  ;;  %v21917_v59 = vld [vmem:[#allocation90_spill] sm:$0xff] }
 0x8f2   : > { %v13091_v60 = vadd.f32 %v12995_v0, %v21907_v24  ;;  %v13138_v18 = vmax.f32 %v13090_v26, 0.0  ;;  %v21918_v24 = vld [vmem:[#allocation92_spill] sm:$0xff] }
 0x8f3   : > { %v13089_v12 = vadd.f32 %v12993_v50, %v21908_v47  ;;  %v13136_v9 = vmax.f32 %v13088_v37, 0.0 }
 0x8f4   : > { %v13139_v13 = vmax.f32 %v13091_v60, 0.0 }
 0x8f5   : > { %v13137_v61 = vmax.f32 %v13089_v12, 0.0  ;;  %v15960_v4 = vpop.f32.mrb[36].mxu0  ;;  %v21919_v12 = vld [vmem:[#allocation94_spill] sm:$0xff] }
 0x8f6   : > { %v14037_v5 = vpack.c.bf16 %v13139_v13, %v13138_v18  ;;  %v12998_v14 = vadd.f32 %v15960_v4, %v20785_v41  ;;  %v12630_v53 = vpop.f32.mrb[37].mxu0  ;;  %v21920_v13 = vld [vmem:[#allocation96_spill] sm:$0xff] }
 0x8f7   : > { %v14032_v38 = vpack.c.bf16 %v13137_v61, %v13136_v9  ;;  %v12996_v58 = vadd.f32 %v20785_v41, %v12630_v53  ;;  %v15961_v28 = vpop.f32.mrb[38].mxu0 }
 0x8f8   : > { %14141 = vst [vmem:[%s20799_s19 + $0x18] sm:$0xff] %v14037_v5   ;;  %v13094_v44 = vadd.f32 %v12998_v14, %v21909_v63  ;;  %v12999_v46 = vadd.f32 %v15961_v28, %v20785_v41  ;;  %v12633_v31 = vpop.f32.mrb[39].mxu0 }
 0x8f9   : > { %14140 = vst [vmem:[%s20799_s19 + $0x10] sm:$0xff] %v14032_v38   ;;  %v13092_v29 = vadd.f32 %v12996_v58, %v21910_v2  ;;  %v12997_v20 = vadd.f32 %v20785_v41, %v12633_v31  ;;  %v21921_v31 = vld [vmem:[#allocation98_spill] sm:$0xff] }
 0x8fa   : > { %v13095_v35 = vadd.f32 %v12999_v46, %v21911_v10  ;;  %v13142_v6 = vmax.f32 %v13094_v44, 0.0  ;;  %v21922_v10 = vld [vmem:[#allocation99_spill] sm:$0xff] }
 0x8fb   : > { %v13093_v54 = vadd.f32 %v12997_v20, %v21912_v36  ;;  %v13140_v42 = vmax.f32 %v13092_v29, 0.0 }
 0x8fc   : > { %v13143_v3 = vmax.f32 %v13095_v35, 0.0 }
 0x8fd   : > { %v13141_v49 = vmax.f32 %v13093_v54, 0.0  ;;  %v15964_v32 = vpop.f32.mrb[40].mxu0  ;;  %v21923_v54 = vld [vmem:[#allocation100_spill] sm:$0xff] }
 0x8fe   : > { %v14047_v43 = vpack.c.bf16 %v13143_v3, %v13142_v6  ;;  %v13002_v62 = vadd.f32 %v15964_v32, %v20785_v41  ;;  %v12646_v19 = vpop.f32.mrb[41].mxu0  ;;  %v21924_v3 = vld [vmem:[#allocation101_spill] sm:$0xff] }
 0x8ff   : > { %v14042_v27 = vpack.c.bf16 %v13141_v49, %v13140_v42  ;;  %v13000_v56 = vadd.f32 %v20785_v41, %v12646_v19  ;;  %v15965_v7 = vpop.f32.mrb[42].mxu0 }
 0x900   : > { %14143 = vst [vmem:[%s20799_s19 + $0x28] sm:$0xff] %v14047_v43   ;;  %v13098_v30 = vadd.f32 %v13002_v62, %v21913_v17  ;;  %v13003_v57 = vadd.f32 %v15965_v7, %v20785_v41  ;;  %v12649_v25 = vpop.f32.mrb[43].mxu0 }
 0x901   : > { %14142 = vst [vmem:[%s20799_s19 + $0x20] sm:$0xff] %v14042_v27   ;;  %v13096_v39 = vadd.f32 %v13000_v56, %v21914_v45  ;;  %v13001_v22 = vadd.f32 %v20785_v41, %v12649_v25  ;;  %v21925_v25 = vld [vmem:[#allocation45_spill] sm:$0xff] }
 0x902   : > { %v13099_v33 = vadd.f32 %v13003_v57, %v21915_v55  ;;  %v13146_v8 = vmax.f32 %v13098_v30, 0.0  ;;  %v21926_v55 = vld [vmem:[#allocation47_spill] sm:$0xff] }
 0x903   : > { %v13097_v23 = vadd.f32 %v13001_v22, %v21916_v40  ;;  %v13144_v34 = vmax.f32 %v13096_v39, 0.0 }
 0x904   : > { %v13147_v51 = vmax.f32 %v13099_v33, 0.0 }
 0x905   : > { %v13145_v48 = vmax.f32 %v13097_v23, 0.0  ;;  %v15968_v11 = vpop.f32.mrb[44].mxu0  ;;  %v21927_v23 = vld [vmem:[#allocation46_spill] sm:$0xff] }
 0x906   : > { %v14057_v21 = vpack.c.bf16 %v13147_v51, %v13146_v8  ;;  %v13006_v15 = vadd.f32 %v15968_v11, %v20785_v41  ;;  %v12662_v52 = vpop.f32.mrb[45].mxu0  ;;  %v21928_v51 = vld [vmem:[#allocation48_spill] sm:$0xff] }
 0x907   : > { %v14052_v16 = vpack.c.bf16 %v13145_v48, %v13144_v34  ;;  %v13004_v26 = vadd.f32 %v20785_v41, %v12662_v52  ;;  %v15969_v0 = vpop.f32.mrb[46].mxu0 }
 0x908   : > { %14145 = vst [vmem:[%s20799_s19 + $0x38] sm:$0xff] %v14057_v21   ;;  %v13102_v1 = vadd.f32 %v13006_v15, %v21917_v59  ;;  %v13007_v37 = vadd.f32 %v15969_v0, %v20785_v41  ;;  %v12665_v50 = vpop.f32.mrb[47].mxu0 }
 0x909   : > { %14144 = vst [vmem:[%s20799_s19 + $0x30] sm:$0xff] %v14052_v16   ;;  %v13100_v60 = vadd.f32 %v13004_v26, %v21918_v24  ;;  %v13005_v47 = vadd.f32 %v20785_v41, %v12665_v50  ;;  %v21929_v50 = vld [vmem:[#allocation52_spill] sm:$0xff] }
 0x90a   : > { %v13103_v18 = vadd.f32 %v13007_v37, %v21919_v12  ;;  %v13150_v61 = vmax.f32 %v13102_v1, 0.0  ;;  %v21930_v12 = vld [vmem:[#allocation56_spill] sm:$0xff] }
 0x90b   : > { %v13101_v9 = vadd.f32 %v13005_v47, %v21920_v13  ;;  %v13148_v5 = vmax.f32 %v13100_v60, 0.0 }
 0x90c   : > { %v13151_v4 = vmax.f32 %v13103_v18, 0.0 }
 0x90d   : > { %v13149_v14 = vmax.f32 %v13101_v9, 0.0  ;;  %v15972_v53 = vpop.f32.mrb[48].mxu0  ;;  %v21931_v9 = vld [vmem:[#allocation54_spill] sm:$0xff] }
 0x90e   : > { %v14067_v38 = vpack.c.bf16 %v13151_v4, %v13150_v61  ;;  %v13010_v58 = vadd.f32 %v15972_v53, %v20785_v41  ;;  %v12678_v28 = vpop.f32.mrb[49].mxu0  ;;  %v21932_v4 = vld [vmem:[#allocation58_spill] sm:$0xff] }
 0x90f   : > { %v14062_v63 = vpack.c.bf16 %v13149_v14, %v13148_v5  ;;  %v13008_v44 = vadd.f32 %v20785_v41, %v12678_v28  ;;  %v15973_v46 = vpop.f32.mrb[50].mxu0 }
 0x910   : > { %14147 = vst [vmem:[%s20799_s19 + $0x48] sm:$0xff] %v14067_v38   ;;  %v13106_v2 = vadd.f32 %v13010_v58, %v21921_v31  ;;  %v13011_v29 = vadd.f32 %v15973_v46, %v20785_v41  ;;  %v12681_v20 = vpop.f32.mrb[51].mxu0 }
 0x911   : > { %14146 = vst [vmem:[%s20799_s19 + $0x40] sm:$0xff] %v14062_v63   ;;  %v13104_v35 = vadd.f32 %v13008_v44, %v21922_v10  ;;  %v13009_v36 = vadd.f32 %v20785_v41, %v12681_v20  ;;  %v21933_v20 = vld [vmem:[#allocation62_spill] sm:$0xff] }
 0x912   : > { %v13107_v6 = vadd.f32 %v13011_v29, %v21923_v54  ;;  %v13154_v49 = vmax.f32 %v13106_v2, 0.0  ;;  %v21934_v54 = vld [vmem:[#allocation64_spill] sm:$0xff] }
 0x913   : > { %v13105_v42 = vadd.f32 %v13009_v36, %v21924_v3  ;;  %v13152_v43 = vmax.f32 %v13104_v35, 0.0 }
 0x914   : > { %v13155_v32 = vmax.f32 %v13107_v6, 0.0 }
 0x915   : > { %v13153_v62 = vmax.f32 %v13105_v42, 0.0  ;;  %v15976_v19 = vpop.f32.mrb[52].mxu0  ;;  %v21935_v42 = vld [vmem:[#allocation66_spill] sm:$0xff] }
 0x916   : > { %v14077_v27 = vpack.c.bf16 %v13155_v32, %v13154_v49  ;;  %v13014_v56 = vadd.f32 %v15976_v19, %v20785_v41  ;;  %v12694_v7 = vpop.f32.mrb[53].mxu0  ;;  %v21936_v32 = vld [vmem:[#allocation68_spill] sm:$0xff] }
 0x917   : > { %v14072_v17 = vpack.c.bf16 %v13153_v62, %v13152_v43  ;;  %v13012_v30 = vadd.f32 %v20785_v41, %v12694_v7  ;;  %v15977_v57 = vpop.f32.mrb[54].mxu0 }
 0x918   : > { %14149 = vst [vmem:[%s20799_s19 + $0x58] sm:$0xff] %v14077_v27   ;;  %v13110_v45 = vadd.f32 %v13014_v56, %v21925_v25  ;;  %v13015_v39 = vadd.f32 %v15977_v57, %v20785_v41  ;;  %v12697_v22 = vpop.f32.mrb[55].mxu0 }
 0x919   : > { %14148 = vst [vmem:[%s20799_s19 + $0x50] sm:$0xff] %v14072_v17   ;;  %v13108_v33 = vadd.f32 %v13012_v30, %v21926_v55  ;;  %v13013_v40 = vadd.f32 %v20785_v41, %v12697_v22  ;;  %v21937_v22 = vld [vmem:[#allocation72_spill] sm:$0xff] }
 0x91a   : > { %v13111_v8 = vadd.f32 %v13015_v39, %v21927_v23  ;;  %v13158_v48 = vmax.f32 %v13110_v45, 0.0  ;;  %v21938_v23 = vld [vmem:[#allocation74_spill] sm:$0xff] }
 0x91b   : > { %v13109_v34 = vadd.f32 %v13013_v40, %v21928_v51  ;;  %v13156_v21 = vmax.f32 %v13108_v33, 0.0 }
 0x91c   : > { %v13159_v11 = vmax.f32 %v13111_v8, 0.0 }
 0x91d   : > { %v13157_v15 = vmax.f32 %v13109_v34, 0.0  ;;  %v15980_v52 = vpop.f32.mrb[56].mxu0  ;;  %v21939_v34 = vld [vmem:[#allocation76_spill] sm:$0xff] }
 0x91e   : > { %v14087_v16 = vpack.c.bf16 %v13159_v11, %v13158_v48  ;;  %v13018_v26 = vadd.f32 %v15980_v52, %v20785_v41  ;;  %v12710_v0 = vpop.f32.mrb[57].mxu0  ;;  %v21940_v11 = vld [vmem:[#allocation78_spill] sm:$0xff] }
 0x91f   : > { %v14082_v59 = vpack.c.bf16 %v13157_v15, %v13156_v21  ;;  %v13016_v1 = vadd.f32 %v20785_v41, %v12710_v0  ;;  %v15981_v37 = vpop.f32.mrb[58].mxu0 }
 0x920   : > { %14151 = vst [vmem:[%s20799_s19 + $0x68] sm:$0xff] %v14087_v16   ;;  %v13114_v24 = vadd.f32 %v13018_v26, %v21929_v50  ;;  %v13019_v60 = vadd.f32 %v15981_v37, %v20785_v41  ;;  %v12713_v47 = vpop.f32.mrb[59].mxu0 }
 0x921   : > { %14150 = vst [vmem:[%s20799_s19 + $0x60] sm:$0xff] %v14082_v59   ;;  %v13112_v18 = vadd.f32 %v13016_v1, %v21930_v12  ;;  %v13017_v13 = vadd.f32 %v20785_v41, %v12713_v47  ;;  %v21941_v47 = vld [vmem:[#allocation82_spill] sm:$0xff] }
 0x922   : > { %v13115_v61 = vadd.f32 %v13019_v60, %v21931_v9  ;;  %v13162_v14 = vmax.f32 %v13114_v24, 0.0  ;;  %v21942_v9 = vld [vmem:[#allocation84_spill] sm:$0xff] }
 0x923   : > { %v13113_v5 = vadd.f32 %v13017_v13, %v21932_v4  ;;  %v13160_v38 = vmax.f32 %v13112_v18, 0.0 }
 0x924   : > { %v13163_v53 = vmax.f32 %v13115_v61, 0.0 }
 0x925   : > { %v13161_v58 = vmax.f32 %v13113_v5, 0.0  ;;  %v15984_v28 = vpop.f32.mrb[60].mxu0  ;;  %v21943_v5 = vld [vmem:[#allocation86_spill] sm:$0xff] }
 0x926   : > { %v14097_v63 = vpack.c.bf16 %v13163_v53, %v13162_v14  ;;  %v13022_v44 = vadd.f32 %v15984_v28, %v20785_v41  ;;  %v12726_v46 = vpop.f32.mrb[61].mxu0  ;;  %v21944_v53 = vld [vmem:[#allocation88_spill] sm:$0xff] }
 0x927   : > { %v14092_v31 = vpack.c.bf16 %v13161_v58, %v13160_v38  ;;  %v13020_v2 = vadd.f32 %v20785_v41, %v12726_v46  ;;  %v15985_v29 = vpop.f32.mrb[62].mxu0 }
 0x928   : > { %14153 = vst [vmem:[%s20799_s19 + $0x78] sm:$0xff] %v14097_v63   ;;  %v13118_v10 = vadd.f32 %v13022_v44, %v21933_v20  ;;  %v13023_v35 = vadd.f32 %v15985_v29, %v20785_v41  ;;  %v12729_v36 = vpop.f32.mrb[63].mxu0 }
 0x929   : > { %14152 = vst [vmem:[%s20799_s19 + $0x70] sm:$0xff] %v14092_v31   ;;  %v13116_v6 = vadd.f32 %v13020_v2, %v21934_v54  ;;  %v13021_v3 = vadd.f32 %v20785_v41, %v12729_v36  ;;  %v21945_v36 = vld [vmem:[#allocation91_spill] sm:$0xff] }
 0x92a   : > { %v13119_v49 = vadd.f32 %v13023_v35, %v21935_v42  ;;  %v13166_v62 = vmax.f32 %v13118_v10, 0.0  ;;  %v21946_v42 = vld [vmem:[#allocation93_spill] sm:$0xff] }
 0x92b   : > { %v13117_v43 = vadd.f32 %v13021_v3, %v21936_v32  ;;  %v13164_v27 = vmax.f32 %v13116_v6, 0.0 }
 0x92c   : > { %v13167_v19 = vmax.f32 %v13119_v49, 0.0 }
 0x92d   : > { %v13165_v56 = vmax.f32 %v13117_v43, 0.0  ;;  %v15988_v7 = vpop.f32.mrb[64].mxu0  ;;  %v21947_v43 = vld [vmem:[#allocation95_spill] sm:$0xff] }
 0x92e   : > { %v14107_v17 = vpack.c.bf16 %v13167_v19, %v13166_v62  ;;  %v13026_v30 = vadd.f32 %v15988_v7, %v20785_v41  ;;  %v12742_v57 = vpop.f32.mrb[65].mxu0  ;;  %v21948_v19 = vld [vmem:[#allocation97_spill] sm:$0xff] }
 0x92f   : > { %v14102_v25 = vpack.c.bf16 %v13165_v56, %v13164_v27  ;;  %v13024_v45 = vadd.f32 %v20785_v41, %v12742_v57  ;;  %v15989_v39 = vpop.f32.mrb[66].mxu0 }
 0x930   : > { %14155 = vst [vmem:[%s20799_s19 + $0x88] sm:$0xff] %v14107_v17   ;;  %v13122_v55 = vadd.f32 %v13026_v30, %v21937_v22  ;;  %v13027_v33 = vadd.f32 %v15989_v39, %v20785_v41  ;;  %v12745_v40 = vpop.f32.mrb[67].mxu0 }
 0x931   : > { %14154 = vst [vmem:[%s20799_s19 + $0x80] sm:$0xff] %v14102_v25   ;;  %v13120_v8 = vadd.f32 %v13024_v45, %v21938_v23  ;;  %v13025_v51 = vadd.f32 %v20785_v41, %v12745_v40 }
 0x932   : > { %v13123_v48 = vadd.f32 %v13027_v33, %v21939_v34  ;;  %v13170_v15 = vmax.f32 %v13122_v55, 0.0 }
 0x933   : > { %v13121_v21 = vadd.f32 %v13025_v51, %v21940_v11  ;;  %v13168_v16 = vmax.f32 %v13120_v8, 0.0 }
 0x934   : > { %v13171_v52 = vmax.f32 %v13123_v48, 0.0 }
 0x935   : > { %v13169_v26 = vmax.f32 %v13121_v21, 0.0  ;;  %v15992_v0 = vpop.f32.mrb[68].mxu0 }
 0x936   : > { %v14117_v59 = vpack.c.bf16 %v13171_v52, %v13170_v15  ;;  %v13030_v1 = vadd.f32 %v15992_v0, %v20785_v41  ;;  %v12758_v37 = vpop.f32.mrb[69].mxu0 }
 0x937   : > { %v14112_v50 = vpack.c.bf16 %v13169_v26, %v13168_v16  ;;  %v13028_v24 = vadd.f32 %v20785_v41, %v12758_v37  ;;  %v15993_v60 = vpop.f32.mrb[70].mxu0 }
 0x938   : > { %14157 = vst [vmem:[%s20799_s19 + $0x98] sm:$0xff] %v14117_v59   ;;  %v13126_v12 = vadd.f32 %v13030_v1, %v21941_v47  ;;  %v13031_v18 = vadd.f32 %v15993_v60, %v20785_v41  ;;  %v12761_v13 = vpop.f32.mrb[71].mxu0 }
 0x939   : > { %14156 = vst [vmem:[%s20799_s19 + $0x90] sm:$0xff] %v14112_v50   ;;  %v13124_v61 = vadd.f32 %v13028_v24, %v21942_v9  ;;  %v13029_v4 = vadd.f32 %v20785_v41, %v12761_v13 }
 0x93a   : > { %v13127_v14 = vadd.f32 %v13031_v18, %v21943_v5  ;;  %v13174_v58 = vmax.f32 %v13126_v12, 0.0 }
 0x93b   : > { %v13125_v38 = vadd.f32 %v13029_v4, %v21944_v53  ;;  %v13172_v63 = vmax.f32 %v13124_v61, 0.0 }
 0x93c   : > { %v13175_v28 = vmax.f32 %v13127_v14, 0.0 }
 0x93d   : > { %v13173_v44 = vmax.f32 %v13125_v38, 0.0  ;;  %v15996_v46 = vpop.f32.mrb[72].mxu0 }
 0x93e   : > { %v14127_v31 = vpack.c.bf16 %v13175_v28, %v13174_v58  ;;  %v13034_v2 = vadd.f32 %v15996_v46, %v20785_v41  ;;  %v12774_v29 = vpop.f32.mrb[73].mxu0 }
 0x93f   : > { %v14122_v20 = vpack.c.bf16 %v13173_v44, %v13172_v63  ;;  %v13032_v10 = vadd.f32 %v20785_v41, %v12774_v29  ;;  %v15997_v35 = vpop.f32.mrb[74].mxu0 }
 0x940   : > { %14159 = vst [vmem:[%s20799_s19 + $0xa8] sm:$0xff] %v14127_v31   ;;  %v13130_v54 = vadd.f32 %v13034_v2, %v21945_v36  ;;  %v13035_v6 = vadd.f32 %v15997_v35, %v20785_v41  ;;  %v12777_v3 = vpop.f32.mrb[75].mxu0 }
 0x941   : > { %14158 = vst [vmem:[%s20799_s19 + $0xa0] sm:$0xff] %v14122_v20   ;;  %v13128_v49 = vadd.f32 %v13032_v10, %v21946_v42  ;;  %v13033_v32 = vadd.f32 %v20785_v41, %v12777_v3 }
 0x942   : > { %v13131_v62 = vadd.f32 %v13035_v6, %v21947_v43  ;;  %v13178_v56 = vmax.f32 %v13130_v54, 0.0 }
 0x943   : > { %v13129_v27 = vadd.f32 %v13033_v32, %v21948_v19  ;;  %v13176_v17 = vmax.f32 %v13128_v49, 0.0 }
 0x944   : > { %v13179_v7 = vmax.f32 %v13131_v62, 0.0 }
 0x945   : > { %v13177_v30 = vmax.f32 %v13129_v27, 0.0 }
 0x946   : > { %v14137_v57 = vpack.c.bf16 %v13179_v7, %v13178_v56 }
 0x947   : > { %v14132_v25 = vpack.c.bf16 %v13177_v30, %v13176_v17 }
 0x948   : > { %14161 = vst [vmem:[%s20799_s19 + $0xb8] sm:$0xff] %v14137_v57  }
 0x949   : > { %14160 = vst [vmem:[%s20799_s19 + $0xb0] sm:$0xff] %v14132_v25  }
 0x94a PF: > { %s18_s27 = sadd.s32 1, %s17039_s27  }
 0x94b   : > { %p15_p4 = scmp.ge.s32.totalorder %s18_s27, 4  }
 0x94d   :  { %17 = sbr.rel (!%p15_p4) target bundleno = 1 (0x1), region = 98 }

</bundles_post_ra>
